<compile_context>
chip_gen: v7x
topology: tpu7x:2x2x1
jax: 0.10.0
libtpu: 0.0.40
codegen_flags: <defaults>
</compile_context>

<pallas_src>
import math

import jax
import jax.numpy as jnp
from jax.experimental import pallas as pl
from jax.experimental.pallas import tpu as pltpu

# ------------------------- configuration (small) -------------------------
GRID_SIZE = 8          # embedding-table grid size (reference default 30)
NUM_COLORS = 10
D_MODEL = 32           # reference default 256, scaled down
NUM_HEADS = 4          # reference default 8, scaled down
HEAD_DIM = D_MODEL // NUM_HEADS
B, H, W = 2, 8, 8
L = H * W              # 64 (power of two -> batch id via shift)
BL = B * L             # 128
C_PAD = 128            # lane-dense output width (logits padded 10 -> 128)
LN_EPS = 1e-5
ATT_SCALE = 1.0 / math.sqrt(HEAD_DIM)
NEG_INF = -1e30


# ------------------------------ Pallas kernel ------------------------------
def arc_kernel(emb_ref, ln_g_ref, ln_b_ref, q_w_ref, q_b_ref,
               kv_wT_ref, kv_bT_ref, fold_w_ref, fold_b_ref,
               out_ref, kv_scr):
    # ---- LayerNorm over d_model (f32, lane reductions); dropout = identity ----
    x = emb_ref[...]                                            # (BL, D) f32
    mean = jnp.mean(x, axis=-1, keepdims=True)
    var = jnp.mean(jnp.square(x - mean), axis=-1, keepdims=True)
    xn = (x - mean) * jax.lax.rsqrt(var + LN_EPS)
    xn = xn * ln_g_ref[...] + ln_b_ref[...]
    xn_b = xn.astype(jnp.bfloat16)                              # bf16 matmul operand

    # ---- fused Q projection for all 3 branches (normal layout, small bf16) ----
    q_all = (jnp.dot(xn_b, q_w_ref[...], preferred_element_type=jnp.float32)
             + q_b_ref[...]).astype(jnp.bfloat16)               # (BL, 3D)

    # ---- fused K/V projection, TRANSPOSED layout, parked in VMEM scratch ----
    # rows: [b0 K(D) | b0 V(D) | b1 K | b1 V | b2 K | b2 V], head-major per D.
    kvT = jax.lax.dot_general(kv_wT_ref[...], xn_b, (((1,), (1,)), ((), ())),
                              preferred_element_type=jnp.float32)  # (6D, BL)
    kv_scr[...] = kvT + kv_bT_ref[...]                          # bias: lane broadcast

    # ---- additive block-diagonal mask: attention never mixes batch rows ----
    ri = jax.lax.broadcasted_iota(jnp.int32, (BL, BL), 0)
    ci = jax.lax.broadcasted_iota(jnp.int32, (BL, BL), 1)
    shift = int(math.log2(L))                                   # L is a power of two
    same_batch = (jax.lax.shift_right_logical(ri, shift)
                  == jax.lax.shift_right_logical(ci, shift))
    neg_mask = jnp.where(same_batch, 0.0, NEG_INF)              # (BL, BL) f32, hoisted

    # output starts at the fully folded bias (exactly zero in padded lanes);
    # per-branch contributions accumulate into the VMEM output buffer.
    out_ref[...] = jnp.broadcast_to(fold_b_ref[...], (BL, C_PAD))

    for a in range(3):                                          # geometric / color / spatial
        kbase = a * 2 * D_MODEL
        vbase = kbase + D_MODEL
        heads = []
        for h in range(NUM_HEADS):
            off = h * HEAD_DIM
            q_h = q_all[:, a * D_MODEL + off: a * D_MODEL + off + HEAD_DIM]      # (BL, hd)
            k_hT = kv_scr[pl.ds(kbase + off, HEAD_DIM), :].astype(jnp.bfloat16)  # (hd, BL)
            v_hT = kv_scr[pl.ds(vbase + off, HEAD_DIM), :].astype(jnp.bfloat16)  # (hd, BL)

            # scores (BL, BL): plain dot (K already transposed); cross-batch
            # blocks masked to -inf so the softmax denominator stays per-batch.
            s = jnp.dot(q_h, k_hT, preferred_element_type=jnp.float32) * ATT_SCALE
            s = s + neg_mask
            s = s - jnp.max(s, axis=-1, keepdims=True)
            p = jnp.exp(s)
            p = p * pl.reciprocal(jnp.sum(p, axis=-1, keepdims=True), approx=True)

            # attention output (BL, hd): A @ B^T form (rhs already transposed)
            o_h = jax.lax.dot_general(p.astype(jnp.bfloat16), v_hT,
                                      (((1,), (1,)), ((), ())),
                                      preferred_element_type=jnp.float32)
            heads.append(o_h)

        # within-tile lane concat of the 4 head outputs -> one folded matmul
        # per branch against (out_w @ head_w @ fus_w_block), lane-dense N=128.
        o_cat = jnp.concatenate(heads, axis=-1).astype(jnp.bfloat16)      # (BL, D)
        out_ref[...] = out_ref[...] + jnp.dot(o_cat, fold_w_ref[a],
                                              preferred_element_type=jnp.float32)


def _full_spec(shape):
    return pl.BlockSpec(shape, lambda i, _n=len(shape): (0,) * _n)


def run_pallas_forward(emb2d, kp):
    """emb2d: (B*L, D) f32 summed embeddings. kp: dict of packed kernel weights."""
    weights = [kp["ln_g"], kp["ln_b"], kp["q_w"], kp["q_b"],
               kp["kv_wT"], kp["kv_bT"], kp["fold_w"], kp["fold_b"]]
    in_specs = [_full_spec(emb2d.shape)] + [_full_spec(w.shape) for w in weights]

    out = pl.pallas_call(
        arc_kernel,
        out_shape=jax.ShapeDtypeStruct((BL, C_PAD), jnp.float32),
        grid=(1,),
        in_specs=in_specs,
        out_specs=_full_spec((BL, C_PAD)),
        scratch_shapes=[pltpu.VMEM((6 * D_MODEL, BL), jnp.float32)],
        compiler_params=pltpu.CompilerParams(
            dimension_semantics=("arbitrary",)),
    )(emb2d, *weights)
    return out


# ----------------------------- JAX-side glue -------------------------------
def build_embeddings(x, params):
    """Embedding lookups + positional/row/col sums (glue; gathers only)."""
    b, h, w = x.shape
    l = h * w
    x_flat = x.reshape(b, l)
    color_emb = jnp.take(params["color_emb"], x_flat, axis=0)            # (B, L, D)
    positions = jnp.arange(l)
    pos_emb = jnp.take(params["pos_emb"], positions, axis=0)[None]       # (1, L, D)
    rows = jnp.repeat(jnp.arange(h), w)                                  # repeat_interleave
    cols = jnp.tile(jnp.arange(w), h)                                    # repeat
    row_emb = jnp.take(params["row_emb"], rows, axis=0)                  # (L, D/4)
    col_emb = jnp.take(params["col_emb"], cols, axis=0)                  # (L, D/4)
    zeros = jnp.zeros((l, D_MODEL // 2), dtype=jnp.float32)
    rc = jnp.concatenate([row_emb, col_emb, zeros], axis=-1)[None]       # (1, L, D)
    emb = (color_emb + pos_emb + rc).astype(jnp.float32)                 # (B, L, D)
    return emb.reshape(b * l, D_MODEL)                                   # (B*L, D)


def init_params(key):
    """Reference-structured parameters (y = x @ W + b layout)."""
    def nrm(k, shape, scale=0.02):
        return (scale * jax.random.normal(k, shape)).astype(jnp.float32)

    keys = jax.random.split(key, 16)
    return {
        # embedding tables
        "color_emb": nrm(keys[0], (NUM_COLORS, D_MODEL)),
        "pos_emb":   nrm(keys[1], (GRID_SIZE * GRID_SIZE, D_MODEL)),
        "row_emb":   nrm(keys[2], (GRID_SIZE, D_MODEL // 4)),
        "col_emb":   nrm(keys[3], (GRID_SIZE, D_MODEL // 4)),
        # layernorm
        "ln_g": jnp.ones((D_MODEL,), jnp.float32),
        "ln_b": jnp.zeros((D_MODEL,), jnp.float32),
        # per-branch attention (geometric / color / spatial)
        "q_w": nrm(keys[4], (3, D_MODEL, D_MODEL)),
        "q_b": nrm(keys[5], (3, D_MODEL)),
        "k_w": nrm(keys[6], (3, D_MODEL, D_MODEL)),
        "k_b": nrm(keys[7], (3, D_MODEL)),
        "v_w": nrm(keys[8], (3, D_MODEL, D_MODEL)),
        "v_b": nrm(keys[9], (3, D_MODEL)),
        "out_w": nrm(keys[10], (3, D_MODEL, D_MODEL)),
        "out_b": nrm(keys[11], (3, D_MODEL)),
        # geometric / color / completion heads
        "head_w": nrm(keys[12], (3, D_MODEL, NUM_COLORS)),
        "head_b": nrm(keys[13], (3, NUM_COLORS)),
        # fusion over the concatenated 3*C predictions
        "fus_w": nrm(keys[14], (3 * NUM_COLORS, NUM_COLORS)),
        "fus_b": nrm(keys[15], (NUM_COLORS,)),
    }


def pack_kernel_params(p):
    """Host-side weight packing + algebraic fold of the post-attention chain."""
    # Q projection: normal layout, columns branch-major / head-major.
    q_w = jnp.concatenate([p["q_w"][a] for a in range(3)], axis=1)        # (D, 3D)
    q_b = jnp.concatenate([p["q_b"][a] for a in range(3)], axis=0)[None]  # (1, 3D)

    # K/V projections: transposed layout, rows = [K_a ; V_a] per branch.
    kv_rows, kv_bias = [], []
    for a in range(3):
        kv_rows += [p["k_w"][a].T, p["v_w"][a].T]
        kv_bias += [p["k_b"][a], p["v_b"][a]]
    kv_wT = jnp.concatenate(kv_rows, axis=0)                              # (6D, D)
    kv_bT = jnp.concatenate(kv_bias, axis=0)[:, None]                     # (6D, 1)

    # Fold out_w -> head_w -> fusion block into a single (D, C_PAD) per branch,
    # and all downstream biases into one (1, C_PAD) bias (zero in padded lanes).
    fold_w = jnp.zeros((3, D_MODEL, C_PAD), jnp.float32)
    fold_b = jnp.zeros((C_PAD,), jnp.float32).at[:NUM_COLORS].set(p["fus_b"])
    for a in range(3):
        fus_blk = p["fus_w"][a * NUM_COLORS:(a + 1) * NUM_COLORS]         # (C, C)
        w_fold = p["out_w"][a] @ p["head_w"][a] @ fus_blk                 # (D, C)
        b_fold = (p["out_b"][a] @ p["head_w"][a] + p["head_b"][a]) @ fus_blk
        fold_w = fold_w.at[a, :, :NUM_COLORS].set(w_fold)
        fold_b = fold_b.at[:NUM_COLORS].add(b_fold)

    return {
        "ln_g": p["ln_g"][None],                    # (1, D) f32
        "ln_b": p["ln_b"][None],                    # (1, D) f32
        "q_w": q_w.astype(jnp.bfloat16),            # (D, 3D) bf16
        "q_b": q_b,                                 # (1, 3D) f32
        "kv_wT": kv_wT.astype(jnp.bfloat16),        # (6D, D) bf16
        "kv_bT": kv_bT,                             # (6D, 1) f32
        "fold_w": fold_w.astype(jnp.bfloat16),      # (3, D, C_PAD) bf16
        "fold_b": fold_b[None],                     # (1, C_PAD) f32
    }


def enhanced_arc_transformer_forward(x, params, kparams):
    b, h, w = x.shape
    emb2d = build_embeddings(x, params)                   # (B*L, D)
    logits_pad = run_pallas_forward(emb2d, kparams)       # (B*L, 128)
    logits = logits_pad[:, :NUM_COLORS]                   # drop lane padding
    return logits.reshape(b, h, w, NUM_COLORS)


# --------------------------------- main -------------------------------------
if __name__ == "__main__":
    key = jax.random.PRNGKey(0)
    pkey, xkey = jax.random.split(key)
    params = init_params(pkey)
    kparams = pack_kernel_params(params)
    x = jax.random.randint(xkey, (B, H, W), 0, NUM_COLORS, dtype=jnp.int32)

    out = enhanced_arc_transformer_forward(x, params, kparams)
    out = jax.block_until_ready(out)
    assert out.shape == (B, H, W, NUM_COLORS)
    assert out.dtype == jnp.float32
    assert bool(jnp.all(jnp.isfinite(out)))
    print("KERNEL_OK")
</pallas_src>

<mosaic_0001>
module attributes {stable_mosaic.version = 11 : i64} {
  func.func @arc_kernel(%arg0: i32, %arg1: memref<128x32xf32, #tpu.memory_space<vmem>>, %arg2: memref<1x32xf32, #tpu.memory_space<vmem>>, %arg3: memref<1x32xf32, #tpu.memory_space<vmem>>, %arg4: memref<32x96xbf16, #tpu.memory_space<vmem>>, %arg5: memref<1x96xf32, #tpu.memory_space<vmem>>, %arg6: memref<192x32xbf16, #tpu.memory_space<vmem>>, %arg7: memref<192x1xf32, #tpu.memory_space<vmem>>, %arg8: memref<3x32x128xbf16, #tpu.memory_space<vmem>>, %arg9: memref<1x128xf32, #tpu.memory_space<vmem>>, %arg10: memref<128x128xf32, #tpu.memory_space<vmem>>, %arg11: memref<192x128xf32, #tpu.memory_space<vmem>>) attributes {dimension_semantics = [#tpu.dimension_semantics<arbitrary>], iteration_bounds = array<i64: 1>, scalar_prefetch = 0 : i64, scratch_operands = 1 : i64, tpu.core_type = #tpu.core_type<tc>, window_params = [{pipeline_mode = #tpu.pipeline_mode<synchronous>, transform_indices = @transform_0, window_bounds = array<i64: 128, 32>}, {pipeline_mode = #tpu.pipeline_mode<synchronous>, transform_indices = @transform_1, window_bounds = array<i64: 1, 32>}, {pipeline_mode = #tpu.pipeline_mode<synchronous>, transform_indices = @transform_2, window_bounds = array<i64: 1, 32>}, {pipeline_mode = #tpu.pipeline_mode<synchronous>, transform_indices = @transform_3, window_bounds = array<i64: 32, 96>}, {pipeline_mode = #tpu.pipeline_mode<synchronous>, transform_indices = @transform_4, window_bounds = array<i64: 1, 96>}, {pipeline_mode = #tpu.pipeline_mode<synchronous>, transform_indices = @transform_5, window_bounds = array<i64: 192, 32>}, {pipeline_mode = #tpu.pipeline_mode<synchronous>, transform_indices = @transform_6, window_bounds = array<i64: 192, 1>}, {pipeline_mode = #tpu.pipeline_mode<synchronous>, transform_indices = @transform_7, window_bounds = array<i64: 3, 32, 128>}, {pipeline_mode = #tpu.pipeline_mode<synchronous>, transform_indices = @transform_8, window_bounds = array<i64: 1, 128>}, {pipeline_mode = #tpu.pipeline_mode<synchronous>, transform_indices = @transform_9, window_bounds = array<i64: 128, 128>}]} {
    %c0 = arith.constant 0 : index
    %c0_0 = arith.constant 0 : index
    %0 = vector.load %arg1[%c0, %c0_0] : memref<128x32xf32, #tpu.memory_space<vmem>>, vector<128x32xf32>
    %cst = arith.constant dense<0.000000e+00> : vector<128xf32>
    %1 = vector.multi_reduction <add>, %0, %cst [1] : vector<128x32xf32> to vector<128xf32>
    %2 = vector.shape_cast %1 : vector<128xf32> to vector<128x1xf32>
    %cst_1 = arith.constant 3.200000e+01 : f32
    %3 = vector.broadcast %cst_1 : f32 to vector<128x1xf32>
    %4 = arith.divf %2, %3 : vector<128x1xf32>
    %5 = vector.broadcast %4 : vector<128x1xf32> to vector<128x32xf32>
    %6 = arith.subf %0, %5 : vector<128x32xf32>
    %7 = arith.mulf %6, %6 : vector<128x32xf32>
    %cst_2 = arith.constant dense<0.000000e+00> : vector<128xf32>
    %8 = vector.multi_reduction <add>, %7, %cst_2 [1] : vector<128x32xf32> to vector<128xf32>
    %9 = vector.shape_cast %8 : vector<128xf32> to vector<128x1xf32>
    %cst_3 = arith.constant 3.200000e+01 : f32
    %10 = vector.broadcast %cst_3 : f32 to vector<128x1xf32>
    %11 = arith.divf %9, %10 : vector<128x1xf32>
    %12 = vector.broadcast %4 : vector<128x1xf32> to vector<128x32xf32>
    %13 = arith.subf %0, %12 : vector<128x32xf32>
    %cst_4 = arith.constant 9.99999974E-6 : f32
    %14 = vector.broadcast %cst_4 : f32 to vector<128x1xf32>
    %15 = arith.addf %11, %14 : vector<128x1xf32>
    %16 = math.rsqrt %15 : vector<128x1xf32>
    %17 = vector.broadcast %16 : vector<128x1xf32> to vector<128x32xf32>
    %18 = arith.mulf %13, %17 : vector<128x32xf32>
    %c0_5 = arith.constant 0 : index
    %c0_6 = arith.constant 0 : index
    %19 = vector.load %arg2[%c0_5, %c0_6] : memref<1x32xf32, #tpu.memory_space<vmem>>, vector<1x32xf32>
    %20 = vector.broadcast %19 : vector<1x32xf32> to vector<128x32xf32>
    %21 = arith.mulf %18, %20 : vector<128x32xf32>
    %c0_7 = arith.constant 0 : index
    %c0_8 = arith.constant 0 : index
    %22 = vector.load %arg3[%c0_7, %c0_8] : memref<1x32xf32, #tpu.memory_space<vmem>>, vector<1x32xf32>
    %23 = vector.broadcast %22 : vector<1x32xf32> to vector<128x32xf32>
    %24 = arith.addf %21, %23 : vector<128x32xf32>
    %25 = arith.truncf %24 : vector<128x32xf32> to vector<128x32xbf16>
    %c0_9 = arith.constant 0 : index
    %c0_10 = arith.constant 0 : index
    %26 = vector.load %arg4[%c0_9, %c0_10] : memref<32x96xbf16, #tpu.memory_space<vmem>>, vector<32x96xbf16>
    %cst_11 = arith.constant dense<0.000000e+00> : vector<128x96xf32>
    %27 = tpu.matmul %25, %26, %cst_11 {dimension_numbers = #tpu.dot_dimension_numbers<[1], [0], [0], [1], [0, 0, 1, 1], [], []>} : vector<128x32xbf16>, vector<32x96xbf16>, vector<128x96xf32> -> vector<128x96xf32>
    %c0_12 = arith.constant 0 : index
    %c0_13 = arith.constant 0 : index
    %28 = vector.load %arg5[%c0_12, %c0_13] : memref<1x96xf32, #tpu.memory_space<vmem>>, vector<1x96xf32>
    %29 = vector.broadcast %28 : vector<1x96xf32> to vector<128x96xf32>
    %30 = arith.addf %27, %29 : vector<128x96xf32>
    %31 = arith.truncf %30 : vector<128x96xf32> to vector<128x96xbf16>
    %c0_14 = arith.constant 0 : index
    %c0_15 = arith.constant 0 : index
    %32 = vector.load %arg6[%c0_14, %c0_15] : memref<192x32xbf16, #tpu.memory_space<vmem>>, vector<192x32xbf16>
    %cst_16 = arith.constant dense<0.000000e+00> : vector<192x128xf32>
    %33 = tpu.matmul %32, %25, %cst_16 {dimension_numbers = #tpu.dot_dimension_numbers<[1], [1], [0], [0], [0, 0, 1, 0], [], []>} : vector<192x32xbf16>, vector<128x32xbf16>, vector<192x128xf32> -> vector<192x128xf32>
    %c0_17 = arith.constant 0 : index
    %c0_18 = arith.constant 0 : index
    %34 = vector.load %arg7[%c0_17, %c0_18] : memref<192x1xf32, #tpu.memory_space<vmem>>, vector<192x1xf32>
    %35 = vector.broadcast %34 : vector<192x1xf32> to vector<192x128xf32>
    %36 = arith.addf %33, %35 : vector<192x128xf32>
    %c0_19 = arith.constant 0 : index
    %c0_20 = arith.constant 0 : index
    %37 = vector.load %arg11[%c0_19, %c0_20] : memref<192x128xf32, #tpu.memory_space<vmem>>, vector<192x128xf32>
    tpu.vector_store %arg11[%c0_19, %c0_20], %36 {strides = array<i32>} : memref<192x128xf32, #tpu.memory_space<vmem>>, vector<192x128xf32>,
    %38 = tpu.iota {dimensions = array<i32: 0>} : vector<128x128xi32>
    %39 = tpu.iota {dimensions = array<i32: 1>} : vector<128x128xi32>
    %c6_i32 = arith.constant 6 : i32
    %40 = vector.broadcast %c6_i32 : i32 to vector<128x128xi32>
    %41 = arith.shrui %38, %40 : vector<128x128xi32>
    %c6_i32_21 = arith.constant 6 : i32
    %42 = vector.broadcast %c6_i32_21 : i32 to vector<128x128xi32>
    %43 = arith.shrui %39, %42 : vector<128x128xi32>
    %44 = arith.cmpi eq, %41, %43 : vector<128x128xi32>
    %cst_22 = arith.constant 0.000000e+00 : f32
    %cst_23 = arith.constant -1.000000e+30 : f32
    %45 = vector.broadcast %cst_22 : f32 to vector<128x128xf32>
    %46 = vector.broadcast %cst_23 : f32 to vector<128x128xf32>
    %47 = arith.select %44, %45, %46 : vector<128x128xi1>, vector<128x128xf32>
    %c0_24 = arith.constant 0 : index
    %c0_25 = arith.constant 0 : index
    %48 = vector.load %arg9[%c0_24, %c0_25] : memref<1x128xf32, #tpu.memory_space<vmem>>, vector<1x128xf32>
    %49 = vector.shape_cast %48 : vector<1x128xf32> to vector<1x128xf32>
    %50 = vector.broadcast %49 : vector<1x128xf32> to vector<128x128xf32>
    %c0_26 = arith.constant 0 : index
    %c0_27 = arith.constant 0 : index
    %51 = vector.load %arg10[%c0_26, %c0_27] : memref<128x128xf32, #tpu.memory_space<vmem>>, vector<128x128xf32>
    tpu.vector_store %arg10[%c0_26, %c0_27], %50 {strides = array<i32>} : memref<128x128xf32, #tpu.memory_space<vmem>>, vector<128x128xf32>,
    %52 = vector.extract_strided_slice %31 {offsets = [0, 0], sizes = [128, 8], strides = [1, 1]} : vector<128x96xbf16> to vector<128x8xbf16>
    %c0_28 = arith.constant 0 : index
    %c0_29 = arith.constant 0 : index
    %53 = vector.load %arg11[%c0_28, %c0_29] : memref<192x128xf32, #tpu.memory_space<vmem>>, vector<8x128xf32>
    %54 = arith.truncf %53 : vector<8x128xf32> to vector<8x128xbf16>
    %c32 = arith.constant 32 : index
    %c0_30 = arith.constant 0 : index
    %55 = vector.load %arg11[%c32, %c0_30] : memref<192x128xf32, #tpu.memory_space<vmem>>, vector<8x128xf32>
    %56 = arith.truncf %55 : vector<8x128xf32> to vector<8x128xbf16>
    %cst_31 = arith.constant dense<0.000000e+00> : vector<128x128xf32>
    %57 = tpu.matmul %52, %54, %cst_31 {dimension_numbers = #tpu.dot_dimension_numbers<[1], [0], [0], [1], [0, 0, 1, 1], [], []>} : vector<128x8xbf16>, vector<8x128xbf16>, vector<128x128xf32> -> vector<128x128xf32>
    %cst_32 = arith.constant 0.353553385 : f32
    %58 = vector.broadcast %cst_32 : f32 to vector<128x128xf32>
    %59 = arith.mulf %57, %58 : vector<128x128xf32>
    %60 = arith.addf %59, %47 : vector<128x128xf32>
    %cst_33 = arith.constant dense<0xFF800000> : vector<128xf32>
    %61 = vector.multi_reduction <maximumf>, %60, %cst_33 [1] : vector<128x128xf32> to vector<128xf32>
    %62 = vector.shape_cast %61 : vector<128xf32> to vector<128x1xf32>
    %63 = vector.broadcast %62 : vector<128x1xf32> to vector<128x128xf32>
    %64 = arith.subf %60, %63 : vector<128x128xf32>
    %65 = math.exp %64 : vector<128x128xf32>
    %cst_34 = arith.constant dense<0.000000e+00> : vector<128xf32>
    %66 = vector.multi_reduction <add>, %65, %cst_34 [1] : vector<128x128xf32> to vector<128xf32>
    %67 = vector.shape_cast %66 : vector<128xf32> to vector<128x1xf32>
    %68 = tpu.reciprocal %67 {approx = true} : vector<128x1xf32> -> vector<128x1xf32>
    %69 = vector.broadcast %68 : vector<128x1xf32> to vector<128x128xf32>
    %70 = arith.mulf %65, %69 : vector<128x128xf32>
    %71 = arith.truncf %70 : vector<128x128xf32> to vector<128x128xbf16>
    %cst_35 = arith.constant dense<0.000000e+00> : vector<128x8xf32>
    %72 = tpu.matmul %71, %56, %cst_35 {dimension_numbers = #tpu.dot_dimension_numbers<[1], [1], [0], [0], [0, 0, 1, 0], [], []>} : vector<128x128xbf16>, vector<8x128xbf16>, vector<128x8xf32> -> vector<128x8xf32>
    %73 = vector.extract_strided_slice %31 {offsets = [0, 8], sizes = [128, 8], strides = [1, 1]} : vector<128x96xbf16> to vector<128x8xbf16>
    %c8 = arith.constant 8 : index
    %c0_36 = arith.constant 0 : index
    %74 = vector.load %arg11[%c8, %c0_36] : memref<192x128xf32, #tpu.memory_space<vmem>>, vector<8x128xf32>
    %75 = arith.truncf %74 : vector<8x128xf32> to vector<8x128xbf16>
    %c40 = arith.constant 40 : index
    %c0_37 = arith.constant 0 : index
    %76 = vector.load %arg11[%c40, %c0_37] : memref<192x128xf32, #tpu.memory_space<vmem>>, vector<8x128xf32>
    %77 = arith.truncf %76 : vector<8x128xf32> to vector<8x128xbf16>
    %cst_38 = arith.constant dense<0.000000e+00> : vector<128x128xf32>
    %78 = tpu.matmul %73, %75, %cst_38 {dimension_numbers = #tpu.dot_dimension_numbers<[1], [0], [0], [1], [0, 0, 1, 1], [], []>} : vector<128x8xbf16>, vector<8x128xbf16>, vector<128x128xf32> -> vector<128x128xf32>
    %cst_39 = arith.constant 0.353553385 : f32
    %79 = vector.broadcast %cst_39 : f32 to vector<128x128xf32>
    %80 = arith.mulf %78, %79 : vector<128x128xf32>
    %81 = arith.addf %80, %47 : vector<128x128xf32>
    %cst_40 = arith.constant dense<0xFF800000> : vector<128xf32>
    %82 = vector.multi_reduction <maximumf>, %81, %cst_40 [1] : vector<128x128xf32> to vector<128xf32>
    %83 = vector.shape_cast %82 : vector<128xf32> to vector<128x1xf32>
    %84 = vector.broadcast %83 : vector<128x1xf32> to vector<128x128xf32>
    %85 = arith.subf %81, %84 : vector<128x128xf32>
    %86 = math.exp %85 : vector<128x128xf32>
    %cst_41 = arith.constant dense<0.000000e+00> : vector<128xf32>
    %87 = vector.multi_reduction <add>, %86, %cst_41 [1] : vector<128x128xf32> to vector<128xf32>
    %88 = vector.shape_cast %87 : vector<128xf32> to vector<128x1xf32>
    %89 = tpu.reciprocal %88 {approx = true} : vector<128x1xf32> -> vector<128x1xf32>
    %90 = vector.broadcast %89 : vector<128x1xf32> to vector<128x128xf32>
    %91 = arith.mulf %86, %90 : vector<128x128xf32>
    %92 = arith.truncf %91 : vector<128x128xf32> to vector<128x128xbf16>
    %cst_42 = arith.constant dense<0.000000e+00> : vector<128x8xf32>
    %93 = tpu.matmul %92, %77, %cst_42 {dimension_numbers = #tpu.dot_dimension_numbers<[1], [1], [0], [0], [0, 0, 1, 0], [], []>} : vector<128x128xbf16>, vector<8x128xbf16>, vector<128x8xf32> -> vector<128x8xf32>
    %94 = vector.extract_strided_slice %31 {offsets = [0, 16], sizes = [128, 8], strides = [1, 1]} : vector<128x96xbf16> to vector<128x8xbf16>
    %c16 = arith.constant 16 : index
    %c0_43 = arith.constant 0 : index
    %95 = vector.load %arg11[%c16, %c0_43] : memref<192x128xf32, #tpu.memory_space<vmem>>, vector<8x128xf32>
    %96 = arith.truncf %95 : vector<8x128xf32> to vector<8x128xbf16>
    %c48 = arith.constant 48 : index
    %c0_44 = arith.constant 0 : index
    %97 = vector.load %arg11[%c48, %c0_44] : memref<192x128xf32, #tpu.memory_space<vmem>>, vector<8x128xf32>
    %98 = arith.truncf %97 : vector<8x128xf32> to vector<8x128xbf16>
    %cst_45 = arith.constant dense<0.000000e+00> : vector<128x128xf32>
    %99 = tpu.matmul %94, %96, %cst_45 {dimension_numbers = #tpu.dot_dimension_numbers<[1], [0], [0], [1], [0, 0, 1, 1], [], []>} : vector<128x8xbf16>, vector<8x128xbf16>, vector<128x128xf32> -> vector<128x128xf32>
    %cst_46 = arith.constant 0.353553385 : f32
    %100 = vector.broadcast %cst_46 : f32 to vector<128x128xf32>
    %101 = arith.mulf %99, %100 : vector<128x128xf32>
    %102 = arith.addf %101, %47 : vector<128x128xf32>
    %cst_47 = arith.constant dense<0xFF800000> : vector<128xf32>
    %103 = vector.multi_reduction <maximumf>, %102, %cst_47 [1] : vector<128x128xf32> to vector<128xf32>
    %104 = vector.shape_cast %103 : vector<128xf32> to vector<128x1xf32>
    %105 = vector.broadcast %104 : vector<128x1xf32> to vector<128x128xf32>
    %106 = arith.subf %102, %105 : vector<128x128xf32>
    %107 = math.exp %106 : vector<128x128xf32>
    %cst_48 = arith.constant dense<0.000000e+00> : vector<128xf32>
    %108 = vector.multi_reduction <add>, %107, %cst_48 [1] : vector<128x128xf32> to vector<128xf32>
    %109 = vector.shape_cast %108 : vector<128xf32> to vector<128x1xf32>
    %110 = tpu.reciprocal %109 {approx = true} : vector<128x1xf32> -> vector<128x1xf32>
    %111 = vector.broadcast %110 : vector<128x1xf32> to vector<128x128xf32>
    %112 = arith.mulf %107, %111 : vector<128x128xf32>
    %113 = arith.truncf %112 : vector<128x128xf32> to vector<128x128xbf16>
    %cst_49 = arith.constant dense<0.000000e+00> : vector<128x8xf32>
    %114 = tpu.matmul %113, %98, %cst_49 {dimension_numbers = #tpu.dot_dimension_numbers<[1], [1], [0], [0], [0, 0, 1, 0], [], []>} : vector<128x128xbf16>, vector<8x128xbf16>, vector<128x8xf32> -> vector<128x8xf32>
    %115 = vector.extract_strided_slice %31 {offsets = [0, 24], sizes = [128, 8], strides = [1, 1]} : vector<128x96xbf16> to vector<128x8xbf16>
    %c24 = arith.constant 24 : index
    %c0_50 = arith.constant 0 : index
    %116 = vector.load %arg11[%c24, %c0_50] : memref<192x128xf32, #tpu.memory_space<vmem>>, vector<8x128xf32>
    %117 = arith.truncf %116 : vector<8x128xf32> to vector<8x128xbf16>
    %c56 = arith.constant 56 : index
    %c0_51 = arith.constant 0 : index
    %118 = vector.load %arg11[%c56, %c0_51] : memref<192x128xf32, #tpu.memory_space<vmem>>, vector<8x128xf32>
    %119 = arith.truncf %118 : vector<8x128xf32> to vector<8x128xbf16>
    %cst_52 = arith.constant dense<0.000000e+00> : vector<128x128xf32>
    %120 = tpu.matmul %115, %117, %cst_52 {dimension_numbers = #tpu.dot_dimension_numbers<[1], [0], [0], [1], [0, 0, 1, 1], [], []>} : vector<128x8xbf16>, vector<8x128xbf16>, vector<128x128xf32> -> vector<128x128xf32>
    %cst_53 = arith.constant 0.353553385 : f32
    %121 = vector.broadcast %cst_53 : f32 to vector<128x128xf32>
    %122 = arith.mulf %120, %121 : vector<128x128xf32>
    %123 = arith.addf %122, %47 : vector<128x128xf32>
    %cst_54 = arith.constant dense<0xFF800000> : vector<128xf32>
    %124 = vector.multi_reduction <maximumf>, %123, %cst_54 [1] : vector<128x128xf32> to vector<128xf32>
    %125 = vector.shape_cast %124 : vector<128xf32> to vector<128x1xf32>
    %126 = vector.broadcast %125 : vector<128x1xf32> to vector<128x128xf32>
    %127 = arith.subf %123, %126 : vector<128x128xf32>
    %128 = math.exp %127 : vector<128x128xf32>
    %cst_55 = arith.constant dense<0.000000e+00> : vector<128xf32>
    %129 = vector.multi_reduction <add>, %128, %cst_55 [1] : vector<128x128xf32> to vector<128xf32>
    %130 = vector.shape_cast %129 : vector<128xf32> to vector<128x1xf32>
    %131 = tpu.reciprocal %130 {approx = true} : vector<128x1xf32> -> vector<128x1xf32>
    %132 = vector.broadcast %131 : vector<128x1xf32> to vector<128x128xf32>
    %133 = arith.mulf %128, %132 : vector<128x128xf32>
    %134 = arith.truncf %133 : vector<128x128xf32> to vector<128x128xbf16>
    %cst_56 = arith.constant dense<0.000000e+00> : vector<128x8xf32>
    %135 = tpu.matmul %134, %119, %cst_56 {dimension_numbers = #tpu.dot_dimension_numbers<[1], [1], [0], [0], [0, 0, 1, 0], [], []>} : vector<128x128xbf16>, vector<8x128xbf16>, vector<128x8xf32> -> vector<128x8xf32>
    %136 = tpu.concatenate %72, %93, %114, %135 in 1 : vector<128x8xf32>, vector<128x8xf32>, vector<128x8xf32>, vector<128x8xf32> -> vector<128x32xf32>
    %137 = arith.truncf %136 : vector<128x32xf32> to vector<128x32xbf16>
    %c0_57 = arith.constant 0 : index
    %c0_58 = arith.constant 0 : index
    %138 = vector.load %arg10[%c0_57, %c0_58] : memref<128x128xf32, #tpu.memory_space<vmem>>, vector<128x128xf32>
    %c0_59 = arith.constant 0 : index
    %c0_60 = arith.constant 0 : index
    %c0_61 = arith.constant 0 : index
    %139 = vector.load %arg8[%c0_59, %c0_60, %c0_61] : memref<3x32x128xbf16, #tpu.memory_space<vmem>>, vector<1x32x128xbf16>
    %140 = vector.shape_cast %139 : vector<1x32x128xbf16> to vector<32x128xbf16>
    %cst_62 = arith.constant dense<0.000000e+00> : vector<128x128xf32>
    %141 = tpu.matmul %137, %140, %cst_62 {dimension_numbers = #tpu.dot_dimension_numbers<[1], [0], [0], [1], [0, 0, 1, 1], [], []>} : vector<128x32xbf16>, vector<32x128xbf16>, vector<128x128xf32> -> vector<128x128xf32>
    %142 = arith.addf %138, %141 : vector<128x128xf32>
    %c0_63 = arith.constant 0 : index
    %c0_64 = arith.constant 0 : index
    %143 = vector.load %arg10[%c0_63, %c0_64] : memref<128x128xf32, #tpu.memory_space<vmem>>, vector<128x128xf32>
    tpu.vector_store %arg10[%c0_63, %c0_64], %142 {strides = array<i32>} : memref<128x128xf32, #tpu.memory_space<vmem>>, vector<128x128xf32>,
    %144 = vector.extract_strided_slice %31 {offsets = [0, 32], sizes = [128, 8], strides = [1, 1]} : vector<128x96xbf16> to vector<128x8xbf16>
    %c64 = arith.constant 64 : index
    %c0_65 = arith.constant 0 : index
    %145 = vector.load %arg11[%c64, %c0_65] : memref<192x128xf32, #tpu.memory_space<vmem>>, vector<8x128xf32>
    %146 = arith.truncf %145 : vector<8x128xf32> to vector<8x128xbf16>
    %c96 = arith.constant 96 : index
    %c0_66 = arith.constant 0 : index
    %147 = vector.load %arg11[%c96, %c0_66] : memref<192x128xf32, #tpu.memory_space<vmem>>, vector<8x128xf32>
    %148 = arith.truncf %147 : vector<8x128xf32> to vector<8x128xbf16>
    %cst_67 = arith.constant dense<0.000000e+00> : vector<128x128xf32>
    %149 = tpu.matmul %144, %146, %cst_67 {dimension_numbers = #tpu.dot_dimension_numbers<[1], [0], [0], [1], [0, 0, 1, 1], [], []>} : vector<128x8xbf16>, vector<8x128xbf16>, vector<128x128xf32> -> vector<128x128xf32>
    %cst_68 = arith.constant 0.353553385 : f32
    %150 = vector.broadcast %cst_68 : f32 to vector<128x128xf32>
    %151 = arith.mulf %149, %150 : vector<128x128xf32>
    %152 = arith.addf %151, %47 : vector<128x128xf32>
    %cst_69 = arith.constant dense<0xFF800000> : vector<128xf32>
    %153 = vector.multi_reduction <maximumf>, %152, %cst_69 [1] : vector<128x128xf32> to vector<128xf32>
    %154 = vector.shape_cast %153 : vector<128xf32> to vector<128x1xf32>
    %155 = vector.broadcast %154 : vector<128x1xf32> to vector<128x128xf32>
    %156 = arith.subf %152, %155 : vector<128x128xf32>
    %157 = math.exp %156 : vector<128x128xf32>
    %cst_70 = arith.constant dense<0.000000e+00> : vector<128xf32>
    %158 = vector.multi_reduction <add>, %157, %cst_70 [1] : vector<128x128xf32> to vector<128xf32>
    %159 = vector.shape_cast %158 : vector<128xf32> to vector<128x1xf32>
    %160 = tpu.reciprocal %159 {approx = true} : vector<128x1xf32> -> vector<128x1xf32>
    %161 = vector.broadcast %160 : vector<128x1xf32> to vector<128x128xf32>
    %162 = arith.mulf %157, %161 : vector<128x128xf32>
    %163 = arith.truncf %162 : vector<128x128xf32> to vector<128x128xbf16>
    %cst_71 = arith.constant dense<0.000000e+00> : vector<128x8xf32>
    %164 = tpu.matmul %163, %148, %cst_71 {dimension_numbers = #tpu.dot_dimension_numbers<[1], [1], [0], [0], [0, 0, 1, 0], [], []>} : vector<128x128xbf16>, vector<8x128xbf16>, vector<128x8xf32> -> vector<128x8xf32>
    %165 = vector.extract_strided_slice %31 {offsets = [0, 40], sizes = [128, 8], strides = [1, 1]} : vector<128x96xbf16> to vector<128x8xbf16>
    %c72 = arith.constant 72 : index
    %c0_72 = arith.constant 0 : index
    %166 = vector.load %arg11[%c72, %c0_72] : memref<192x128xf32, #tpu.memory_space<vmem>>, vector<8x128xf32>
    %167 = arith.truncf %166 : vector<8x128xf32> to vector<8x128xbf16>
    %c104 = arith.constant 104 : index
    %c0_73 = arith.constant 0 : index
    %168 = vector.load %arg11[%c104, %c0_73] : memref<192x128xf32, #tpu.memory_space<vmem>>, vector<8x128xf32>
    %169 = arith.truncf %168 : vector<8x128xf32> to vector<8x128xbf16>
    %cst_74 = arith.constant dense<0.000000e+00> : vector<128x128xf32>
    %170 = tpu.matmul %165, %167, %cst_74 {dimension_numbers = #tpu.dot_dimension_numbers<[1], [0], [0], [1], [0, 0, 1, 1], [], []>} : vector<128x8xbf16>, vector<8x128xbf16>, vector<128x128xf32> -> vector<128x128xf32>
    %cst_75 = arith.constant 0.353553385 : f32
    %171 = vector.broadcast %cst_75 : f32 to vector<128x128xf32>
    %172 = arith.mulf %170, %171 : vector<128x128xf32>
    %173 = arith.addf %172, %47 : vector<128x128xf32>
    %cst_76 = arith.constant dense<0xFF800000> : vector<128xf32>
    %174 = vector.multi_reduction <maximumf>, %173, %cst_76 [1] : vector<128x128xf32> to vector<128xf32>
    %175 = vector.shape_cast %174 : vector<128xf32> to vector<128x1xf32>
    %176 = vector.broadcast %175 : vector<128x1xf32> to vector<128x128xf32>
    %177 = arith.subf %173, %176 : vector<128x128xf32>
    %178 = math.exp %177 : vector<128x128xf32>
    %cst_77 = arith.constant dense<0.000000e+00> : vector<128xf32>
    %179 = vector.multi_reduction <add>, %178, %cst_77 [1] : vector<128x128xf32> to vector<128xf32>
    %180 = vector.shape_cast %179 : vector<128xf32> to vector<128x1xf32>
    %181 = tpu.reciprocal %180 {approx = true} : vector<128x1xf32> -> vector<128x1xf32>
    %182 = vector.broadcast %181 : vector<128x1xf32> to vector<128x128xf32>
    %183 = arith.mulf %178, %182 : vector<128x128xf32>
    %184 = arith.truncf %183 : vector<128x128xf32> to vector<128x128xbf16>
    %cst_78 = arith.constant dense<0.000000e+00> : vector<128x8xf32>
    %185 = tpu.matmul %184, %169, %cst_78 {dimension_numbers = #tpu.dot_dimension_numbers<[1], [1], [0], [0], [0, 0, 1, 0], [], []>} : vector<128x128xbf16>, vector<8x128xbf16>, vector<128x8xf32> -> vector<128x8xf32>
    %186 = vector.extract_strided_slice %31 {offsets = [0, 48], sizes = [128, 8], strides = [1, 1]} : vector<128x96xbf16> to vector<128x8xbf16>
    %c80 = arith.constant 80 : index
    %c0_79 = arith.constant 0 : index
    %187 = vector.load %arg11[%c80, %c0_79] : memref<192x128xf32, #tpu.memory_space<vmem>>, vector<8x128xf32>
    %188 = arith.truncf %187 : vector<8x128xf32> to vector<8x128xbf16>
    %c112 = arith.constant 112 : index
    %c0_80 = arith.constant 0 : index
    %189 = vector.load %arg11[%c112, %c0_80] : memref<192x128xf32, #tpu.memory_space<vmem>>, vector<8x128xf32>
    %190 = arith.truncf %189 : vector<8x128xf32> to vector<8x128xbf16>
    %cst_81 = arith.constant dense<0.000000e+00> : vector<128x128xf32>
    %191 = tpu.matmul %186, %188, %cst_81 {dimension_numbers = #tpu.dot_dimension_numbers<[1], [0], [0], [1], [0, 0, 1, 1], [], []>} : vector<128x8xbf16>, vector<8x128xbf16>, vector<128x128xf32> -> vector<128x128xf32>
    %cst_82 = arith.constant 0.353553385 : f32
    %192 = vector.broadcast %cst_82 : f32 to vector<128x128xf32>
    %193 = arith.mulf %191, %192 : vector<128x128xf32>
    %194 = arith.addf %193, %47 : vector<128x128xf32>
    %cst_83 = arith.constant dense<0xFF800000> : vector<128xf32>
    %195 = vector.multi_reduction <maximumf>, %194, %cst_83 [1] : vector<128x128xf32> to vector<128xf32>
    %196 = vector.shape_cast %195 : vector<128xf32> to vector<128x1xf32>
    %197 = vector.broadcast %196 : vector<128x1xf32> to vector<128x128xf32>
    %198 = arith.subf %194, %197 : vector<128x128xf32>
    %199 = math.exp %198 : vector<128x128xf32>
    %cst_84 = arith.constant dense<0.000000e+00> : vector<128xf32>
    %200 = vector.multi_reduction <add>, %199, %cst_84 [1] : vector<128x128xf32> to vector<128xf32>
    %201 = vector.shape_cast %200 : vector<128xf32> to vector<128x1xf32>
    %202 = tpu.reciprocal %201 {approx = true} : vector<128x1xf32> -> vector<128x1xf32>
    %203 = vector.broadcast %202 : vector<128x1xf32> to vector<128x128xf32>
    %204 = arith.mulf %199, %203 : vector<128x128xf32>
    %205 = arith.truncf %204 : vector<128x128xf32> to vector<128x128xbf16>
    %cst_85 = arith.constant dense<0.000000e+00> : vector<128x8xf32>
    %206 = tpu.matmul %205, %190, %cst_85 {dimension_numbers = #tpu.dot_dimension_numbers<[1], [1], [0], [0], [0, 0, 1, 0], [], []>} : vector<128x128xbf16>, vector<8x128xbf16>, vector<128x8xf32> -> vector<128x8xf32>
    %207 = vector.extract_strided_slice %31 {offsets = [0, 56], sizes = [128, 8], strides = [1, 1]} : vector<128x96xbf16> to vector<128x8xbf16>
    %c88 = arith.constant 88 : index
    %c0_86 = arith.constant 0 : index
    %208 = vector.load %arg11[%c88, %c0_86] : memref<192x128xf32, #tpu.memory_space<vmem>>, vector<8x128xf32>
    %209 = arith.truncf %208 : vector<8x128xf32> to vector<8x128xbf16>
    %c120 = arith.constant 120 : index
    %c0_87 = arith.constant 0 : index
    %210 = vector.load %arg11[%c120, %c0_87] : memref<192x128xf32, #tpu.memory_space<vmem>>, vector<8x128xf32>
    %211 = arith.truncf %210 : vector<8x128xf32> to vector<8x128xbf16>
    %cst_88 = arith.constant dense<0.000000e+00> : vector<128x128xf32>
    %212 = tpu.matmul %207, %209, %cst_88 {dimension_numbers = #tpu.dot_dimension_numbers<[1], [0], [0], [1], [0, 0, 1, 1], [], []>} : vector<128x8xbf16>, vector<8x128xbf16>, vector<128x128xf32> -> vector<128x128xf32>
    %cst_89 = arith.constant 0.353553385 : f32
    %213 = vector.broadcast %cst_89 : f32 to vector<128x128xf32>
    %214 = arith.mulf %212, %213 : vector<128x128xf32>
    %215 = arith.addf %214, %47 : vector<128x128xf32>
    %cst_90 = arith.constant dense<0xFF800000> : vector<128xf32>
    %216 = vector.multi_reduction <maximumf>, %215, %cst_90 [1] : vector<128x128xf32> to vector<128xf32>
    %217 = vector.shape_cast %216 : vector<128xf32> to vector<128x1xf32>
    %218 = vector.broadcast %217 : vector<128x1xf32> to vector<128x128xf32>
    %219 = arith.subf %215, %218 : vector<128x128xf32>
    %220 = math.exp %219 : vector<128x128xf32>
    %cst_91 = arith.constant dense<0.000000e+00> : vector<128xf32>
    %221 = vector.multi_reduction <add>, %220, %cst_91 [1] : vector<128x128xf32> to vector<128xf32>
    %222 = vector.shape_cast %221 : vector<128xf32> to vector<128x1xf32>
    %223 = tpu.reciprocal %222 {approx = true} : vector<128x1xf32> -> vector<128x1xf32>
    %224 = vector.broadcast %223 : vector<128x1xf32> to vector<128x128xf32>
    %225 = arith.mulf %220, %224 : vector<128x128xf32>
    %226 = arith.truncf %225 : vector<128x128xf32> to vector<128x128xbf16>
    %cst_92 = arith.constant dense<0.000000e+00> : vector<128x8xf32>
    %227 = tpu.matmul %226, %211, %cst_92 {dimension_numbers = #tpu.dot_dimension_numbers<[1], [1], [0], [0], [0, 0, 1, 0], [], []>} : vector<128x128xbf16>, vector<8x128xbf16>, vector<128x8xf32> -> vector<128x8xf32>
    %228 = tpu.concatenate %164, %185, %206, %227 in 1 : vector<128x8xf32>, vector<128x8xf32>, vector<128x8xf32>, vector<128x8xf32> -> vector<128x32xf32>
    %229 = arith.truncf %228 : vector<128x32xf32> to vector<128x32xbf16>
    %c0_93 = arith.constant 0 : index
    %c0_94 = arith.constant 0 : index
    %230 = vector.load %arg10[%c0_93, %c0_94] : memref<128x128xf32, #tpu.memory_space<vmem>>, vector<128x128xf32>
    %c1 = arith.constant 1 : index
    %c0_95 = arith.constant 0 : index
    %c0_96 = arith.constant 0 : index
    %231 = vector.load %arg8[%c1, %c0_95, %c0_96] : memref<3x32x128xbf16, #tpu.memory_space<vmem>>, vector<1x32x128xbf16>
    %232 = vector.shape_cast %231 : vector<1x32x128xbf16> to vector<32x128xbf16>
    %cst_97 = arith.constant dense<0.000000e+00> : vector<128x128xf32>
    %233 = tpu.matmul %229, %232, %cst_97 {dimension_numbers = #tpu.dot_dimension_numbers<[1], [0], [0], [1], [0, 0, 1, 1], [], []>} : vector<128x32xbf16>, vector<32x128xbf16>, vector<128x128xf32> -> vector<128x128xf32>
    %234 = arith.addf %230, %233 : vector<128x128xf32>
    %c0_98 = arith.constant 0 : index
    %c0_99 = arith.constant 0 : index
    %235 = vector.load %arg10[%c0_98, %c0_99] : memref<128x128xf32, #tpu.memory_space<vmem>>, vector<128x128xf32>
    tpu.vector_store %arg10[%c0_98, %c0_99], %234 {strides = array<i32>} : memref<128x128xf32, #tpu.memory_space<vmem>>, vector<128x128xf32>,
    %236 = vector.extract_strided_slice %31 {offsets = [0, 64], sizes = [128, 8], strides = [1, 1]} : vector<128x96xbf16> to vector<128x8xbf16>
    %c128 = arith.constant 128 : index
    %c0_100 = arith.constant 0 : index
    %237 = vector.load %arg11[%c128, %c0_100] : memref<192x128xf32, #tpu.memory_space<vmem>>, vector<8x128xf32>
    %238 = arith.truncf %237 : vector<8x128xf32> to vector<8x128xbf16>
    %c160 = arith.constant 160 : index
    %c0_101 = arith.constant 0 : index
    %239 = vector.load %arg11[%c160, %c0_101] : memref<192x128xf32, #tpu.memory_space<vmem>>, vector<8x128xf32>
    %240 = arith.truncf %239 : vector<8x128xf32> to vector<8x128xbf16>
    %cst_102 = arith.constant dense<0.000000e+00> : vector<128x128xf32>
    %241 = tpu.matmul %236, %238, %cst_102 {dimension_numbers = #tpu.dot_dimension_numbers<[1], [0], [0], [1], [0, 0, 1, 1], [], []>} : vector<128x8xbf16>, vector<8x128xbf16>, vector<128x128xf32> -> vector<128x128xf32>
    %cst_103 = arith.constant 0.353553385 : f32
    %242 = vector.broadcast %cst_103 : f32 to vector<128x128xf32>
    %243 = arith.mulf %241, %242 : vector<128x128xf32>
    %244 = arith.addf %243, %47 : vector<128x128xf32>
    %cst_104 = arith.constant dense<0xFF800000> : vector<128xf32>
    %245 = vector.multi_reduction <maximumf>, %244, %cst_104 [1] : vector<128x128xf32> to vector<128xf32>
    %246 = vector.shape_cast %245 : vector<128xf32> to vector<128x1xf32>
    %247 = vector.broadcast %246 : vector<128x1xf32> to vector<128x128xf32>
    %248 = arith.subf %244, %247 : vector<128x128xf32>
    %249 = math.exp %248 : vector<128x128xf32>
    %cst_105 = arith.constant dense<0.000000e+00> : vector<128xf32>
    %250 = vector.multi_reduction <add>, %249, %cst_105 [1] : vector<128x128xf32> to vector<128xf32>
    %251 = vector.shape_cast %250 : vector<128xf32> to vector<128x1xf32>
    %252 = tpu.reciprocal %251 {approx = true} : vector<128x1xf32> -> vector<128x1xf32>
    %253 = vector.broadcast %252 : vector<128x1xf32> to vector<128x128xf32>
    %254 = arith.mulf %249, %253 : vector<128x128xf32>
    %255 = arith.truncf %254 : vector<128x128xf32> to vector<128x128xbf16>
    %cst_106 = arith.constant dense<0.000000e+00> : vector<128x8xf32>
    %256 = tpu.matmul %255, %240, %cst_106 {dimension_numbers = #tpu.dot_dimension_numbers<[1], [1], [0], [0], [0, 0, 1, 0], [], []>} : vector<128x128xbf16>, vector<8x128xbf16>, vector<128x8xf32> -> vector<128x8xf32>
    %257 = vector.extract_strided_slice %31 {offsets = [0, 72], sizes = [128, 8], strides = [1, 1]} : vector<128x96xbf16> to vector<128x8xbf16>
    %c136 = arith.constant 136 : index
    %c0_107 = arith.constant 0 : index
    %258 = vector.load %arg11[%c136, %c0_107] : memref<192x128xf32, #tpu.memory_space<vmem>>, vector<8x128xf32>
    %259 = arith.truncf %258 : vector<8x128xf32> to vector<8x128xbf16>
    %c168 = arith.constant 168 : index
    %c0_108 = arith.constant 0 : index
    %260 = vector.load %arg11[%c168, %c0_108] : memref<192x128xf32, #tpu.memory_space<vmem>>, vector<8x128xf32>
    %261 = arith.truncf %260 : vector<8x128xf32> to vector<8x128xbf16>
    %cst_109 = arith.constant dense<0.000000e+00> : vector<128x128xf32>
    %262 = tpu.matmul %257, %259, %cst_109 {dimension_numbers = #tpu.dot_dimension_numbers<[1], [0], [0], [1], [0, 0, 1, 1], [], []>} : vector<128x8xbf16>, vector<8x128xbf16>, vector<128x128xf32> -> vector<128x128xf32>
    %cst_110 = arith.constant 0.353553385 : f32
    %263 = vector.broadcast %cst_110 : f32 to vector<128x128xf32>
    %264 = arith.mulf %262, %263 : vector<128x128xf32>
    %265 = arith.addf %264, %47 : vector<128x128xf32>
    %cst_111 = arith.constant dense<0xFF800000> : vector<128xf32>
    %266 = vector.multi_reduction <maximumf>, %265, %cst_111 [1] : vector<128x128xf32> to vector<128xf32>
    %267 = vector.shape_cast %266 : vector<128xf32> to vector<128x1xf32>
    %268 = vector.broadcast %267 : vector<128x1xf32> to vector<128x128xf32>
    %269 = arith.subf %265, %268 : vector<128x128xf32>
    %270 = math.exp %269 : vector<128x128xf32>
    %cst_112 = arith.constant dense<0.000000e+00> : vector<128xf32>
    %271 = vector.multi_reduction <add>, %270, %cst_112 [1] : vector<128x128xf32> to vector<128xf32>
    %272 = vector.shape_cast %271 : vector<128xf32> to vector<128x1xf32>
    %273 = tpu.reciprocal %272 {approx = true} : vector<128x1xf32> -> vector<128x1xf32>
    %274 = vector.broadcast %273 : vector<128x1xf32> to vector<128x128xf32>
    %275 = arith.mulf %270, %274 : vector<128x128xf32>
    %276 = arith.truncf %275 : vector<128x128xf32> to vector<128x128xbf16>
    %cst_113 = arith.constant dense<0.000000e+00> : vector<128x8xf32>
    %277 = tpu.matmul %276, %261, %cst_113 {dimension_numbers = #tpu.dot_dimension_numbers<[1], [1], [0], [0], [0, 0, 1, 0], [], []>} : vector<128x128xbf16>, vector<8x128xbf16>, vector<128x8xf32> -> vector<128x8xf32>
    %278 = vector.extract_strided_slice %31 {offsets = [0, 80], sizes = [128, 8], strides = [1, 1]} : vector<128x96xbf16> to vector<128x8xbf16>
    %c144 = arith.constant 144 : index
    %c0_114 = arith.constant 0 : index
    %279 = vector.load %arg11[%c144, %c0_114] : memref<192x128xf32, #tpu.memory_space<vmem>>, vector<8x128xf32>
    %280 = arith.truncf %279 : vector<8x128xf32> to vector<8x128xbf16>
    %c176 = arith.constant 176 : index
    %c0_115 = arith.constant 0 : index
    %281 = vector.load %arg11[%c176, %c0_115] : memref<192x128xf32, #tpu.memory_space<vmem>>, vector<8x128xf32>
    %282 = arith.truncf %281 : vector<8x128xf32> to vector<8x128xbf16>
    %cst_116 = arith.constant dense<0.000000e+00> : vector<128x128xf32>
    %283 = tpu.matmul %278, %280, %cst_116 {dimension_numbers = #tpu.dot_dimension_numbers<[1], [0], [0], [1], [0, 0, 1, 1], [], []>} : vector<128x8xbf16>, vector<8x128xbf16>, vector<128x128xf32> -> vector<128x128xf32>
    %cst_117 = arith.constant 0.353553385 : f32
    %284 = vector.broadcast %cst_117 : f32 to vector<128x128xf32>
    %285 = arith.mulf %283, %284 : vector<128x128xf32>
    %286 = arith.addf %285, %47 : vector<128x128xf32>
    %cst_118 = arith.constant dense<0xFF800000> : vector<128xf32>
    %287 = vector.multi_reduction <maximumf>, %286, %cst_118 [1] : vector<128x128xf32> to vector<128xf32>
    %288 = vector.shape_cast %287 : vector<128xf32> to vector<128x1xf32>
    %289 = vector.broadcast %288 : vector<128x1xf32> to vector<128x128xf32>
    %290 = arith.subf %286, %289 : vector<128x128xf32>
    %291 = math.exp %290 : vector<128x128xf32>
    %cst_119 = arith.constant dense<0.000000e+00> : vector<128xf32>
    %292 = vector.multi_reduction <add>, %291, %cst_119 [1] : vector<128x128xf32> to vector<128xf32>
    %293 = vector.shape_cast %292 : vector<128xf32> to vector<128x1xf32>
    %294 = tpu.reciprocal %293 {approx = true} : vector<128x1xf32> -> vector<128x1xf32>
    %295 = vector.broadcast %294 : vector<128x1xf32> to vector<128x128xf32>
    %296 = arith.mulf %291, %295 : vector<128x128xf32>
    %297 = arith.truncf %296 : vector<128x128xf32> to vector<128x128xbf16>
    %cst_120 = arith.constant dense<0.000000e+00> : vector<128x8xf32>
    %298 = tpu.matmul %297, %282, %cst_120 {dimension_numbers = #tpu.dot_dimension_numbers<[1], [1], [0], [0], [0, 0, 1, 0], [], []>} : vector<128x128xbf16>, vector<8x128xbf16>, vector<128x8xf32> -> vector<128x8xf32>
    %299 = vector.extract_strided_slice %31 {offsets = [0, 88], sizes = [128, 8], strides = [1, 1]} : vector<128x96xbf16> to vector<128x8xbf16>
    %c152 = arith.constant 152 : index
    %c0_121 = arith.constant 0 : index
    %300 = vector.load %arg11[%c152, %c0_121] : memref<192x128xf32, #tpu.memory_space<vmem>>, vector<8x128xf32>
    %301 = arith.truncf %300 : vector<8x128xf32> to vector<8x128xbf16>
    %c184 = arith.constant 184 : index
    %c0_122 = arith.constant 0 : index
    %302 = vector.load %arg11[%c184, %c0_122] : memref<192x128xf32, #tpu.memory_space<vmem>>, vector<8x128xf32>
    %303 = arith.truncf %302 : vector<8x128xf32> to vector<8x128xbf16>
    %cst_123 = arith.constant dense<0.000000e+00> : vector<128x128xf32>
    %304 = tpu.matmul %299, %301, %cst_123 {dimension_numbers = #tpu.dot_dimension_numbers<[1], [0], [0], [1], [0, 0, 1, 1], [], []>} : vector<128x8xbf16>, vector<8x128xbf16>, vector<128x128xf32> -> vector<128x128xf32>
    %cst_124 = arith.constant 0.353553385 : f32
    %305 = vector.broadcast %cst_124 : f32 to vector<128x128xf32>
    %306 = arith.mulf %304, %305 : vector<128x128xf32>
    %307 = arith.addf %306, %47 : vector<128x128xf32>
    %cst_125 = arith.constant dense<0xFF800000> : vector<128xf32>
    %308 = vector.multi_reduction <maximumf>, %307, %cst_125 [1] : vector<128x128xf32> to vector<128xf32>
    %309 = vector.shape_cast %308 : vector<128xf32> to vector<128x1xf32>
    %310 = vector.broadcast %309 : vector<128x1xf32> to vector<128x128xf32>
    %311 = arith.subf %307, %310 : vector<128x128xf32>
    %312 = math.exp %311 : vector<128x128xf32>
    %cst_126 = arith.constant dense<0.000000e+00> : vector<128xf32>
    %313 = vector.multi_reduction <add>, %312, %cst_126 [1] : vector<128x128xf32> to vector<128xf32>
    %314 = vector.shape_cast %313 : vector<128xf32> to vector<128x1xf32>
    %315 = tpu.reciprocal %314 {approx = true} : vector<128x1xf32> -> vector<128x1xf32>
    %316 = vector.broadcast %315 : vector<128x1xf32> to vector<128x128xf32>
    %317 = arith.mulf %312, %316 : vector<128x128xf32>
    %318 = arith.truncf %317 : vector<128x128xf32> to vector<128x128xbf16>
    %cst_127 = arith.constant dense<0.000000e+00> : vector<128x8xf32>
    %319 = tpu.matmul %318, %303, %cst_127 {dimension_numbers = #tpu.dot_dimension_numbers<[1], [1], [0], [0], [0, 0, 1, 0], [], []>} : vector<128x128xbf16>, vector<8x128xbf16>, vector<128x8xf32> -> vector<128x8xf32>
    %320 = tpu.concatenate %256, %277, %298, %319 in 1 : vector<128x8xf32>, vector<128x8xf32>, vector<128x8xf32>, vector<128x8xf32> -> vector<128x32xf32>
    %321 = arith.truncf %320 : vector<128x32xf32> to vector<128x32xbf16>
    %c0_128 = arith.constant 0 : index
    %c0_129 = arith.constant 0 : index
    %322 = vector.load %arg10[%c0_128, %c0_129] : memref<128x128xf32, #tpu.memory_space<vmem>>, vector<128x128xf32>
    %c2 = arith.constant 2 : index
    %c0_130 = arith.constant 0 : index
    %c0_131 = arith.constant 0 : index
    %323 = vector.load %arg8[%c2, %c0_130, %c0_131] : memref<3x32x128xbf16, #tpu.memory_space<vmem>>, vector<1x32x128xbf16>
    %324 = vector.shape_cast %323 : vector<1x32x128xbf16> to vector<32x128xbf16>
    %cst_132 = arith.constant dense<0.000000e+00> : vector<128x128xf32>
    %325 = tpu.matmul %321, %324, %cst_132 {dimension_numbers = #tpu.dot_dimension_numbers<[1], [0], [0], [1], [0, 0, 1, 1], [], []>} : vector<128x32xbf16>, vector<32x128xbf16>, vector<128x128xf32> -> vector<128x128xf32>
    %326 = arith.addf %322, %325 : vector<128x128xf32>
    %c0_133 = arith.constant 0 : index
    %c0_134 = arith.constant 0 : index
    %327 = vector.load %arg10[%c0_133, %c0_134] : memref<128x128xf32, #tpu.memory_space<vmem>>, vector<128x128xf32>
    tpu.vector_store %arg10[%c0_133, %c0_134], %326 {strides = array<i32>} : memref<128x128xf32, #tpu.memory_space<vmem>>, vector<128x128xf32>,
    return
  }
  func.func @transform_0(%arg0: i32) -> (i32, i32) {
    %c0_i32 = arith.constant 0 : i32
    %c0_i32_0 = arith.constant 0 : i32
    %c0_i32_1 = arith.constant 0 : i32
    return %c0_i32, %c0_i32_0 : i32, i32
  }
  func.func @transform_1(%arg0: i32) -> (i32, i32) {
    %c0_i32 = arith.constant 0 : i32
    %c0_i32_0 = arith.constant 0 : i32
    %c0_i32_1 = arith.constant 0 : i32
    return %c0_i32, %c0_i32_0 : i32, i32
  }
  func.func @transform_2(%arg0: i32) -> (i32, i32) {
    %c0_i32 = arith.constant 0 : i32
    %c0_i32_0 = arith.constant 0 : i32
    %c0_i32_1 = arith.constant 0 : i32
    return %c0_i32, %c0_i32_0 : i32, i32
  }
  func.func @transform_3(%arg0: i32) -> (i32, i32) {
    %c0_i32 = arith.constant 0 : i32
    %c0_i32_0 = arith.constant 0 : i32
    %c0_i32_1 = arith.constant 0 : i32
    return %c0_i32, %c0_i32_0 : i32, i32
  }
  func.func @transform_4(%arg0: i32) -> (i32, i32) {
    %c0_i32 = arith.constant 0 : i32
    %c0_i32_0 = arith.constant 0 : i32
    %c0_i32_1 = arith.constant 0 : i32
    return %c0_i32, %c0_i32_0 : i32, i32
  }
  func.func @transform_5(%arg0: i32) -> (i32, i32) {
    %c0_i32 = arith.constant 0 : i32
    %c0_i32_0 = arith.constant 0 : i32
    %c0_i32_1 = arith.constant 0 : i32
    return %c0_i32, %c0_i32_0 : i32, i32
  }
  func.func @transform_6(%arg0: i32) -> (i32, i32) {
    %c0_i32 = arith.constant 0 : i32
    %c0_i32_0 = arith.constant 0 : i32
    %c0_i32_1 = arith.constant 0 : i32
    return %c0_i32, %c0_i32_0 : i32, i32
  }
  func.func @transform_7(%arg0: i32) -> (i32, i32, i32) {
    %c0_i32 = arith.constant 0 : i32
    %c0_i32_0 = arith.constant 0 : i32
    %c0_i32_1 = arith.constant 0 : i32
    %c0_i32_2 = arith.constant 0 : i32
    return %c0_i32, %c0_i32_0, %c0_i32_1 : i32, i32, i32
  }
  func.func @transform_8(%arg0: i32) -> (i32, i32) {
    %c0_i32 = arith.constant 0 : i32
    %c0_i32_0 = arith.constant 0 : i32
    %c0_i32_1 = arith.constant 0 : i32
    return %c0_i32, %c0_i32_0 : i32, i32
  }
  func.func @transform_9(%arg0: i32) -> (i32, i32) {
    %c0_i32 = arith.constant 0 : i32
    %c0_i32_0 = arith.constant 0 : i32
    %c0_i32_1 = arith.constant 0 : i32
    return %c0_i32, %c0_i32_0 : i32, i32
  }
}

</mosaic_0001>

<bundles_post_ra>
// kernel: tpu_custom_call.1
= control target key start
LH: loop header
LB: loop body
LE: loop exit
PB: predicated region body
PF: predicated region fallthrough
CT: control target
= control target key end

     0   :  { %vm50_vm0 = vcmask 261120   ;;  %s13181_s0 = inlined_call_operand.vmem [shape: f32[128,32], index: 0, kind: input, shape index: {}]   ;;  %s13182_s1 = inlined_call_operand.vmem [shape: f32[1,32], index: 1, kind: input, shape index: {}]   ;;  %s13183_s2 = inlined_call_operand.vmem [shape: f32[1,32], index: 2, kind: input, shape index: {}]   ;;  %s13184_s3 = inlined_call_operand.vmem [shape: bf16[32,96], index: 3, kind: input, shape index: {}]   ;;  %s13185_s4 = inlined_call_operand.vmem [shape: f32[1,96], index: 4, kind: input, shape index: {}]   ;;  %s13186_s5 = inlined_call_operand.vmem [shape: bf16[192,32], index: 5, kind: input, shape index: {}]   ;;  %s13187_s6 = inlined_call_operand.vmem [shape: f32[192,1], index: 6, kind: input, shape index: {}]   ;;  %s13188_s7 = inlined_call_operand.vmem [shape: bf16[3,32,128], index: 7, kind: input, shape index: {}]   ;;  %s13189_s8 = inlined_call_operand.vmem [shape: f32[1,128], index: 8, kind: input, shape index: {}]   ;;  %s13190_s9 = inlined_call_operand.hbm [shape: f32[128,128], index: 9, kind: output, shape index: {}]  }
   0x1   :  { %v34_v0 = vld [vmem:[%s13181_s0] sm:$0xff]  ;;  %v36_v1 = vld [vmem:[%s13181_s0 + $0x10] sm:$0xff]  ;;  %v35_v2 = vld [vmem:[%s13181_s0 + $0x8] sm:$0xff] }
   0x2   :  { %v51_v3 = vsel %vm50_vm0, %v34_v0, 0.0  ;;  %v57_v4 = vsel %vm50_vm0, %v36_v1, 0.0  ;;  %v37_v5 = vld [vmem:[%s13181_s0 + $0x18] sm:$0xff]  ;;  %v9798_v6 = vld [vmem:[%s13181_s0 + $0x20] sm:$0xff]  ;;  %v9803_v7 = vld [vmem:[%s13181_s0 + $0x28] sm:$0xff]  ;;  %v54_v10 = vsel %vm50_vm0, %v35_v2, 0.0 }
   0x3   :  { %52 = vadd.xlane.f32.xlu0 %v51_v3  ;;  %58 = vadd.xlane.f32.xlu1 %v57_v4  ;;  %v9808_v8 = vld [vmem:[%s13181_s0 + $0x30] sm:$0xff]  ;;  %v9813_v9 = vld [vmem:[%s13181_s0 + $0x38] sm:$0xff]  ;;  %v60_v11 = vsel %vm50_vm0, %v37_v5, 0.0  ;;  %v9820_v12 = vld [vmem:[%s13181_s0 + $0x40] sm:$0xff]  ;;  %v63_v14 = vsel %vm50_vm0, %v9798_v6, 0.0  ;;  %v66_v15 = vsel %vm50_vm0, %v9803_v7, 0.0 }
   0x4   :  { %v9825_v13 = vld [vmem:[%s13181_s0 + $0x48] sm:$0xff]  ;;  %v69_v16 = vsel %vm50_vm0, %v9808_v8, 0.0  ;;  %v72_v17 = vsel %vm50_vm0, %v9813_v9, 0.0  ;;  %v75_v18 = vsel %vm50_vm0, %v9820_v12, 0.0  ;;  %v9842_v20 = vld [vmem:[%s13181_s0 + $0x50] sm:$0xff]  ;;  %v9847_v21 = vld [vmem:[%s13181_s0 + $0x58] sm:$0xff] }
   0x5   :  { %v78_v19 = vsel %vm50_vm0, %v9825_v13, 0.0  ;;  %v81_v22 = vsel %vm50_vm0, %v9842_v20, 0.0  ;;  %v84_v23 = vsel %vm50_vm0, %v9847_v21, 0.0 }
   0x7   :  { %55 = vadd.xlane.f32.xlu0 %v54_v10  ;;  %61 = vadd.xlane.f32.xlu1 %v60_v11 }
   0xb   :  { %64 = vadd.xlane.f32.xlu0 %v63_v14  ;;  %67 = vadd.xlane.f32.xlu1 %v66_v15 }
   0xf   :  { %70 = vadd.xlane.f32.xlu0 %v69_v16  ;;  %73 = vadd.xlane.f32.xlu1 %v72_v17 }
  0x13   :  { %76 = vadd.xlane.f32.xlu0 %v75_v18  ;;  %79 = vadd.xlane.f32.xlu1 %v78_v19 }
  0x14   :  { %14 = vsyncpa [#allocation4], 0  ;;  %v9856_v24 = vld [vmem:[%s13181_s0 + $0x60] sm:$0xff]  ;;  %v9861_v25 = vld [vmem:[%s13181_s0 + $0x68] sm:$0xff]  ;;  %vm978_vm1 = vcmask 64512   ;;  %vm1003_vm2 = vcmask 1043456  }
  0x15   :  { %v87_v26 = vsel %vm50_vm0, %v9856_v24, 0.0  ;;  %v90_v27 = vsel %vm50_vm0, %v9861_v25, 0.0  ;;  %v9870_v28 = vld [vmem:[%s13181_s0 + $0x70] sm:$0xff]  ;;  %v9875_v29 = vld [vmem:[%s13181_s0 + $0x78] sm:$0xff]  ;;  %s9715_s18 = smov 120   ;;  %s9716_s19 = smov 112  }
  0x16   :  { %v93_v30 = vsel %vm50_vm0, %v9870_v28, 0.0  ;;  %v96_v31 = vsel %vm50_vm0, %v9875_v29, 0.0  ;;  %s9717_s23 = smov 104   ;;  %s9718_s0 = smov 96  }
  0x17   :  { %82 = vadd.xlane.f32.xlu0 %v81_v22  ;;  %85 = vadd.xlane.f32.xlu1 %v84_v23  ;;  %s9719_s24 = smov 88   ;;  %s9722_s28 = smov 8  }
  0x18   :  { %s9723_s15 = smov 16   ;;  %s9724_s16 = smov 24  }
  0x19   :  { %s9725_s21 = smov 64   ;;  %s9726_s27 = smov 56  }
  0x1a   :  { %s9727_s29 = smov 48  }
  0x1b   :  { %88 = vadd.xlane.f32.xlu0 %v87_v26  ;;  %91 = vadd.xlane.f32.xlu1 %v90_v27 }
  0x1f   :  { %94 = vadd.xlane.f32.xlu0 %v93_v30  ;;  %97 = vadd.xlane.f32.xlu1 %v96_v31 }
  0x90   :  { %v53_v32 = vpop.xlane.xlu0 %52  ;;  %v59_v33 = vpop.xlane.xlu1 %58 }
  0x91   :  { %v100_v34 = vmul.f32 0.03125, %v53_v32  ;;  %v102_v35 = vmul.f32 0.03125, %v59_v33 }
  0x93   :  { %v9881_v36 = vsub.f32 %v34_v0, %v100_v34  ;;  %v9883_v37 = vsub.f32 %v36_v1, %v102_v35 }
  0x94   :  { %v56_v38 = vpop.xlane.xlu0 %55  ;;  %v62_v39 = vpop.xlane.xlu1 %61 }
  0x95   :  { %v101_v40 = vmul.f32 0.03125, %v56_v38  ;;  %v103_v41 = vmul.f32 0.03125, %v62_v39  ;;  %v132_v42 = vmul.f32 %v9881_v36, %v9881_v36  ;;  %v134_v43 = vmul.f32 %v9883_v37, %v9883_v37 }
  0x97   :  { %v9889_v44 = vsub.f32 %v35_v2, %v101_v40  ;;  %v9891_v45 = vsub.f32 %v37_v5, %v103_v41  ;;  %v148_v46 = vsel %vm50_vm0, %v132_v42, 0.0  ;;  %v154_v49 = vsel %vm50_vm0, %v134_v43, 0.0 }
  0x98   :  { %149 = vadd.xlane.f32.xlu0 %v148_v46  ;;  %v65_v47 = vpop.xlane.xlu0 %64  ;;  %v68_v48 = vpop.xlane.xlu1 %67 }
  0x99   :  { %v104_v50 = vmul.f32 0.03125, %v65_v47  ;;  %v105_v51 = vmul.f32 0.03125, %v68_v48  ;;  %v133_v52 = vmul.f32 %v9889_v44, %v9889_v44  ;;  %v135_v53 = vmul.f32 %v9891_v45, %v9891_v45 }
  0x9b   :  { %v9900_v54 = vsub.f32 %v9798_v6, %v104_v50  ;;  %v9903_v55 = vsub.f32 %v9803_v7, %v105_v51  ;;  %v151_v56 = vsel %vm50_vm0, %v133_v52, 0.0  ;;  %v157_v59 = vsel %vm50_vm0, %v135_v53, 0.0  ;;  %v8870_v53 = vld [vmem:[%s13184_s3 + $0x8] sm:$0xff]  }
  0x9c   :  { %155 = vadd.xlane.f32.xlu0 %v154_v49  ;;  %152 = vadd.xlane.f32.xlu1 %v151_v56  ;;  %v71_v57 = vpop.xlane.xlu0 %70  ;;  %v74_v58 = vpop.xlane.xlu1 %73  ;;  %v490_v56 = vld [vmem:[%s13187_s6] sm:$0xff] }
  0x9d   :  { %v106_v60 = vmul.f32 0.03125, %v71_v57  ;;  %v107_v61 = vmul.f32 0.03125, %v74_v58  ;;  %v136_v62 = vmul.f32 %v9900_v54, %v9900_v54  ;;  %v137_v63 = vmul.f32 %v9903_v55, %v9903_v55 }
  0x9e   :  { %v9713_v57 = vmov 0  }
  0x9f   :  { %v9912_v0 = vsub.f32 %v9808_v8, %v106_v60  ;;  %v9915_v1 = vsub.f32 %v9813_v9, %v107_v61  ;;  %v160_v2 = vsel %vm50_vm0, %v136_v62, 0.0  ;;  %v163_v5 = vsel %vm50_vm0, %v137_v63, 0.0  ;;  %8507 = vset.pattern.permute.xlu0 %v9713_v57  ;;  %8508 = vset.pattern.permute.xlu1 %v9713_v57 }
  0xa0   :  { %158 = vadd.xlane.f32.xlu1 %v157_v59  ;;  %161 = vadd.xlane.f32.xlu0 %v160_v2  ;;  %v77_v3 = vpop.xlane.xlu0 %76  ;;  %v80_v4 = vpop.xlane.xlu1 %79 }
  0xa1   :  { %v108_v6 = vmul.f32 0.03125, %v77_v3  ;;  %v109_v7 = vmul.f32 0.03125, %v80_v4  ;;  %v138_v10 = vmul.f32 %v9912_v0, %v9912_v0  ;;  %v139_v8 = vmul.f32 %v9915_v1, %v9915_v1 }
  0xa3   :  { %v9924_v11 = vsub.f32 %v9820_v12, %v108_v6  ;;  %v9927_v9 = vsub.f32 %v9825_v13, %v109_v7  ;;  %v166_v14 = vsel %vm50_vm0, %v138_v10, 0.0  ;;  %v169_v17 = vsel %vm50_vm0, %v139_v8, 0.0 }
  0xa4   :  { %164 = vadd.xlane.f32.xlu1 %v163_v5  ;;  %167 = vadd.xlane.f32.xlu0 %v166_v14  ;;  %v83_v15 = vpop.xlane.xlu0 %82  ;;  %v86_v16 = vpop.xlane.xlu1 %85 }
  0xa5   :  { %v110_v18 = vmul.f32 0.03125, %v83_v15  ;;  %v111_v19 = vmul.f32 0.03125, %v86_v16  ;;  %v140_v22 = vmul.f32 %v9924_v11, %v9924_v11  ;;  %v141_v12 = vmul.f32 %v9927_v9, %v9927_v9 }
  0xa7   :  { %v9936_v23 = vsub.f32 %v9842_v20, %v110_v18  ;;  %v9939_v13 = vsub.f32 %v9847_v21, %v111_v19  ;;  %v172_v26 = vsel %vm50_vm0, %v140_v22, 0.0  ;;  %v175_v31 = vsel %vm50_vm0, %v141_v12, 0.0 }
  0xa8   :  { %170 = vadd.xlane.f32.xlu1 %v169_v17  ;;  %173 = vadd.xlane.f32.xlu0 %v172_v26  ;;  %v89_v27 = vpop.xlane.xlu0 %88  ;;  %v92_v30 = vpop.xlane.xlu1 %91 }
  0xa9   :  { %v112_v32 = vmul.f32 0.03125, %v89_v27  ;;  %v113_v33 = vmul.f32 0.03125, %v92_v30  ;;  %v142_v34 = vmul.f32 %v9936_v23, %v9936_v23  ;;  %v143_v20 = vmul.f32 %v9939_v13, %v9939_v13 }
  0xab   :  { %v9948_v35 = vsub.f32 %v9856_v24, %v112_v32  ;;  %v9951_v21 = vsub.f32 %v9861_v25, %v113_v33  ;;  %v178_v38 = vsel %vm50_vm0, %v142_v34, 0.0  ;;  %v181_v41 = vsel %vm50_vm0, %v143_v20, 0.0  ;;  %v9986_v33 = vld [vmem:[%s13182_s1] ss:$0 sm:$0xff] }
  0xac   :  { %176 = vadd.xlane.f32.xlu1 %v175_v31  ;;  %179 = vadd.xlane.f32.xlu0 %v178_v38  ;;  %v95_v39 = vpop.xlane.xlu0 %94  ;;  %v98_v40 = vpop.xlane.xlu1 %97 }
  0xad   :  { %v114_v42 = vmul.f32 0.03125, %v95_v39  ;;  %v115_v43 = vmul.f32 0.03125, %v98_v40  ;;  %v144_v46 = vmul.f32 %v9948_v35, %v9948_v35  ;;  %v145_v24 = vmul.f32 %v9951_v21, %v9951_v21 }
  0xaf   :  { %v9960_v47 = vsub.f32 %v9870_v28, %v114_v42  ;;  %v9963_v25 = vsub.f32 %v9875_v29, %v115_v43  ;;  %v184_v48 = vsel %vm50_vm0, %v144_v46, 0.0  ;;  %v187_v49 = vsel %vm50_vm0, %v145_v24, 0.0  ;;  %v8869_v29 = vld [vmem:[%s13184_s3] sm:$0xff]   ;;  %s9720_s3 = smov 80  }
  0xb0   :  { %182 = vadd.xlane.f32.xlu1 %v181_v41  ;;  %185 = vadd.xlane.f32.xlu0 %v184_v48  ;;  %v9993_v24 = vld [vmem:[%s13183_s2] ss:$0 sm:$0xff]  ;;  %s9721_s2 = smov 72  }
  0xb1   :  { %v146_v50 = vmul.f32 %v9960_v47, %v9960_v47  ;;  %v147_v51 = vmul.f32 %v9963_v25, %v9963_v25  ;;  %7835 = vmatprep.subr.bf16.mxu1 %v8869_v29 }
  0xb2   :  { %7836 = vmatpush3.bf16.msra.mxu1 %v8869_v29 }
  0xb3   :  { %v190_v52 = vsel %vm50_vm0, %v146_v50, 0.0  ;;  %v193_v28 = vsel %vm50_vm0, %v147_v51, 0.0  ;;  %7837 = vmatprep.subr.bf16.mxu1 %v8870_v53 }
  0xb4   :  { %188 = vadd.xlane.f32.xlu1 %v187_v49  ;;  %191 = vadd.xlane.f32.xlu0 %v190_v52 }
  0xb6   :  { %7838 = vmatpush3.bf16.msra.mxu1 %v8870_v53 }
  0xb8   :  { %194 = vadd.xlane.f32.xlu1 %v193_v28 }
  0xca   :  { %516 = vperm.xlu0 %8507, %v490_v56  }
 0x125   :  { %v150_v58 = vpop.xlane.xlu0 %149 }
 0x126   :  { %v196_v59 = vmul.f32 0.03125, %v150_v58 }
 0x128   :  { %v212_v60 = vadd.f32 1e-05, %v196_v59 }
 0x129   :  { %v153_v61 = vpop.xlane.xlu1 %152  ;;  %v156_v62 = vpop.xlane.xlu0 %155 }
 0x12a   :  { %8889 = vrsqrt.f32 %v212_v60  ;;  %v197_v63 = vmul.f32 0.03125, %v153_v61  ;;  %v198_v2 = vmul.f32 0.03125, %v156_v62 }
 0x12c   :  { %v213_v3 = vadd.f32 1e-05, %v197_v63  ;;  %v214_v4 = vadd.f32 1e-05, %v198_v2 }
 0x12d   :  { %v159_v5 = vpop.xlane.xlu1 %158  ;;  %v162_v6 = vpop.xlane.xlu0 %161 }
 0x12e   :  { %8891 = vrsqrt.f32 %v213_v3  ;;  %v199_v7 = vmul.f32 0.03125, %v159_v5  ;;  %v200_v10 = vmul.f32 0.03125, %v162_v6 }
 0x12f   :  { %8893 = vrsqrt.f32 %v214_v4 }
 0x130   :  { %v215_v8 = vadd.f32 1e-05, %v199_v7  ;;  %v216_v14 = vadd.f32 1e-05, %v200_v10 }
 0x131   :  { %v165_v15 = vpop.xlane.xlu1 %164  ;;  %v168_v16 = vpop.xlane.xlu0 %167 }
 0x132   :  { %8895 = vrsqrt.f32 %v215_v8  ;;  %v201_v17 = vmul.f32 0.03125, %v165_v15  ;;  %v202_v18 = vmul.f32 0.03125, %v168_v16 }
 0x133   :  { %8897 = vrsqrt.f32 %v216_v14 }
 0x134   :  { %v8890_v19 = vpop.eup %8889  ;;  %v217_v22 = vadd.f32 1e-05, %v201_v17  ;;  %v218_v12 = vadd.f32 1e-05, %v202_v18 }
 0x135   :  { %v171_v26 = vpop.xlane.xlu1 %170  ;;  %v174_v27 = vpop.xlane.xlu0 %173  ;;  %v244_v30 = vmul.f32 %v8890_v19, %v9881_v36 }
 0x136   :  { %8899 = vrsqrt.f32 %v217_v22  ;;  %v203_v31 = vmul.f32 0.03125, %v171_v26  ;;  %v204_v32 = vmul.f32 0.03125, %v174_v27 }
 0x137   :  { %8901 = vrsqrt.f32 %v218_v12  ;;  %v267_v43 = vmul.f32 %v9986_v33, %v244_v30 }
 0x138   :  { %v8892_v34 = vpop.eup %8891  ;;  %v219_v20 = vadd.f32 1e-05, %v203_v31  ;;  %v220_v38 = vadd.f32 1e-05, %v204_v32 }
 0x139   :  { %v8894_v39 = vpop.eup %8893  ;;  %v177_v40 = vpop.xlane.xlu1 %176  ;;  %v245_v42 = vmul.f32 %v8892_v34, %v9889_v44  ;;  %v290_v56 = vadd.f32 %v9993_v24, %v267_v43 }
 0x13a   :  { %v180_v41 = vpop.xlane.xlu0 %179  ;;  %8903 = vrsqrt.f32 %v219_v20  ;;  %v205_v36 = vmul.f32 0.03125, %v177_v40  ;;  %v246_v48 = vmul.f32 %v8894_v39, %v9883_v37 }
 0x13b   :  { %v206_v46 = vmul.f32 0.03125, %v180_v41  ;;  %8905 = vrsqrt.f32 %v220_v38  ;;  %v268_v49 = vmul.f32 %v9986_v33, %v245_v42 }
 0x13c   :  { %v8896_v50 = vpop.eup %8895  ;;  %v221_v51 = vadd.f32 1e-05, %v205_v36  ;;  %v269_v44 = vmul.f32 %v9986_v33, %v246_v48 }
 0x13d   :  { %v222_v52 = vadd.f32 1e-05, %v206_v46  ;;  %v8898_v28 = vpop.eup %8897  ;;  %v183_v29 = vpop.xlane.xlu1 %182  ;;  %v291_v57 = vadd.f32 %v9993_v24, %v268_v49  ;;  %v247_v58 = vmul.f32 %v8896_v50, %v9891_v45 }
 0x13e   :  { %v186_v53 = vpop.xlane.xlu0 %185  ;;  %8907 = vrsqrt.f32 %v221_v51  ;;  %v207_v59 = vmul.f32 0.03125, %v183_v29  ;;  %v248_v62 = vmul.f32 %v8898_v28, %v9900_v54  ;;  %v292_v4 = vadd.f32 %v9993_v24, %v269_v44 }
 0x13f   :  { %v208_v37 = vmul.f32 0.03125, %v186_v53  ;;  %8909 = vrsqrt.f32 %v222_v52  ;;  %v306_v60 = vpack.c.bf16 %v291_v57, %v290_v56  ;;  %v270_v61 = vmul.f32 %v9986_v33, %v247_v58 }
 0x140   :  { %v8900_v63 = vpop.eup %8899  ;;  %v223_v2 = vadd.f32 1e-05, %v207_v59  ;;  %v271_v8 = vmul.f32 %v9986_v33, %v248_v62 }
 0x141   :  { %v224_v3 = vadd.f32 1e-05, %v208_v37  ;;  %v8902_v5 = vpop.eup %8901  ;;  %v189_v6 = vpop.xlane.xlu1 %188  ;;  %7839 = vmatprep.mubr.msk.bf16.mxu1 %vm50_vm0, %v306_v60  ;;  %8469 = vmatprep.subr.msk.bf16.mxu1 %vm50_vm0, %v306_v60  ;;  %v293_v7 = vadd.f32 %v9993_v24, %v270_v61  ;;  %v249_v10 = vmul.f32 %v8900_v63, %v9903_v55  ;;  %v338_v12 = vsel %vm50_vm0, %v306_v60, 0 }
 0x142   :  { %v192_v45 = vpop.xlane.xlu0 %191  ;;  %8911 = vrsqrt.f32 %v223_v2  ;;  %v209_v54 = vmul.f32 0.03125, %v189_v6  ;;  %v250_v15 = vmul.f32 %v8902_v5, %v9912_v0  ;;  %v294_v55 = vadd.f32 %v9993_v24, %v271_v8 }
 0x143   :  { %v210_v14 = vmul.f32 0.03125, %v192_v45  ;;  %8913 = vrsqrt.f32 %v224_v3  ;;  %v307_v16 = vpack.c.bf16 %v293_v7, %v292_v4  ;;  %v272_v17 = vmul.f32 %v9986_v33, %v249_v10  ;;  %v8871_v7 = vld [vmem:[%s13186_s5] sm:$0xff]  }
 0x144   :  { %v8904_v18 = vpop.eup %8903  ;;  %v225_v19 = vadd.f32 1e-05, %v209_v54  ;;  %v273_v0 = vmul.f32 %v9986_v33, %v250_v15  ;;  %v7389_v15 = vld [vmem:[%s13185_s4] ss:$0 sm:$0xff]  ;;  %s9728_s4 = smov 40  }
 0x145   :  { %v226_v22 = vadd.f32 1e-05, %v210_v14  ;;  %v8906_v26 = vpop.eup %8905  ;;  %v195_v27 = vpop.xlane.xlu1 %194  ;;  %7840 = vmatmul.mubr.msk.bf16.vlgmr.msra.gmra.mrb[0].mxu1 %vm50_vm0, %v307_v16  ;;  %v295_v30 = vadd.f32 %v9993_v24, %v272_v17  ;;  %v251_v31 = vmul.f32 %v8904_v18, %v9915_v1  ;;  %v341_v50 = vsel %vm50_vm0, %v307_v16, 0  ;;  %v8872_v14 = vld [vmem:[%s13186_s5 + $0x8] sm:$0xff]  }
 0x146   :  { %8915 = vrsqrt.f32 %v225_v19  ;;  %v211_v32 = vmul.f32 0.03125, %v195_v27  ;;  %7856 = vmatpush3.bf16.xpose.msra.mxu1 %v338_v12  ;;  %v252_v34 = vmul.f32 %v8906_v26, %v9924_v11  ;;  %v296_v1 = vadd.f32 %v9993_v24, %v273_v0 }
 0x147   :  { %8917 = vrsqrt.f32 %v226_v22  ;;  %8470 = vmatprep.subr.msk.bf16.mxu1 %vm50_vm0, %v307_v16  ;;  %v308_v20 = vpack.c.bf16 %v295_v30, %v294_v55  ;;  %v274_v38 = vmul.f32 %v9986_v33, %v251_v31 }
 0x148   :  { %v8908_v39 = vpop.eup %8907  ;;  %v227_v40 = vadd.f32 1e-05, %v211_v32  ;;  %v275_v36 = vmul.f32 %v9986_v33, %v252_v34 }
 0x149   :  { %v8910_v41 = vpop.eup %8909  ;;  %7843 = vmatprep.mubr.msk.bf16.mxu1 %vm50_vm0, %v308_v20  ;;  %v297_v42 = vadd.f32 %v9993_v24, %v274_v38  ;;  %v253_v43 = vmul.f32 %v8908_v39, %v9927_v9  ;;  %v344_v63 = vsel %vm50_vm0, %v308_v20, 0 }
 0x14a   :  { %8919 = vrsqrt.f32 %v227_v40  ;;  %v254_v11 = vmul.f32 %v8910_v41, %v9936_v23  ;;  %v298_v52 = vadd.f32 %v9993_v24, %v275_v36 }
 0x14b   :  { %v309_v46 = vpack.c.bf16 %v297_v42, %v296_v1  ;;  %v276_v48 = vmul.f32 %v9986_v33, %v253_v43 }
 0x14c   :  { %v8912_v49 = vpop.eup %8911  ;;  %v277_v28 = vmul.f32 %v9986_v33, %v254_v11 }
 0x14d   :  { %v8914_v51 = vpop.eup %8913  ;;  %7844 = vmatmul.mubr.msk.bf16.gmra.mrb[4].mxu1 %vm50_vm0, %v309_v46  ;;  %v299_v44 = vadd.f32 %v9993_v24, %v276_v48  ;;  %v255_v9 = vmul.f32 %v8912_v49, %v9939_v13 }
 0x14e   :  { %7858 = vmatpush3.bf16.xpose.msra.mxu1 %v341_v50  ;;  %v256_v23 = vmul.f32 %v8914_v51, %v9948_v35  ;;  %v300_v58 = vadd.f32 %v9993_v24, %v277_v28 }
 0x14f   :  { %8471 = vmatprep.subr.msk.bf16.mxu1 %vm50_vm0, %v308_v20  ;;  %v310_v29 = vpack.c.bf16 %v299_v44, %v298_v52  ;;  %v278_v53 = vmul.f32 %v9986_v33, %v255_v9 }
 0x150   :  { %v8916_v56 = vpop.eup %8915  ;;  %v279_v37 = vmul.f32 %v9986_v33, %v256_v23 }
 0x151   :  { %v8918_v57 = vpop.eup %8917  ;;  %7847 = vmatprep.mubr.msk.bf16.mxu1 %vm50_vm0, %v310_v29  ;;  %v301_v59 = vadd.f32 %v9993_v24, %v278_v53  ;;  %v257_v13 = vmul.f32 %v8916_v56, %v9951_v21 }
 0x152   :  { %v258_v60 = vmul.f32 %v8918_v57, %v9960_v47  ;;  %v302_v2 = vadd.f32 %v9993_v24, %v279_v37 }
 0x153   :  { %v311_v35 = vpack.c.bf16 %v301_v59, %v300_v58  ;;  %v280_v61 = vmul.f32 %v9986_v33, %v257_v13  ;;  %v517_v13 = vpop.permute.xlu0 %516 }
 0x154   :  { %v8920_v62 = vpop.eup %8919  ;;  %v281_v21 = vmul.f32 %v9986_v33, %v258_v60 }
 0x155   :  { %7848 = vmatmul.mubr.msk.bf16.gmra.mrb[8].mxu1 %vm50_vm0, %v311_v35  ;;  %v303_v3 = vadd.f32 %v9993_v24, %v280_v61  ;;  %v259_v4 = vmul.f32 %v8920_v62, %v9963_v25  ;;  %v347_v25 = vsel %vm50_vm0, %v309_v46, 0 }
 0x156   :  { %7860 = vmatpush3.bf16.xpose.msra.mxu1 %v344_v63  ;;  %v304_v6 = vadd.f32 %v9993_v24, %v281_v21  ;;  %v883_v21 = vlaneseq }
 0x157   :  { %8472 = vmatprep.subr.msk.bf16.mxu1 %vm50_vm0, %v309_v46  ;;  %v312_v47 = vpack.c.bf16 %v303_v3, %v302_v2  ;;  %v282_v5 = vmul.f32 %v9986_v33, %v259_v4  ;;  %v350_v33 = vsel %vm50_vm0, %v310_v29, 0  ;;  %v8873_v3 = vld [vmem:[%s13186_s5 + $0x10] sm:$0xff]   ;;  %v8874_v4 = vld [vmem:[%s13186_s5 + $0x18] sm:$0xff]  }
 0x159   :  { %7851 = vmatprep.mubr.msk.bf16.mxu1 %vm50_vm0, %v312_v47  ;;  %v305_v45 = vadd.f32 %v9993_v24, %v282_v5  ;;  %v353_v24 = vsel %vm50_vm0, %v311_v35, 0  ;;  %v356_v8 = vsel %vm50_vm0, %v312_v47, 0 }
 0x15b   :  { %v313_v10 = vpack.c.bf16 %v305_v45, %v304_v6  ;;  %v901_v6 = vand.u32 127, %v883_v21 }
 0x15d   :  { %7852 = vmatmul.mubr.msk.bf16.gmra.mrb[12].mxu1 %vm50_vm0, %v313_v10  ;;  %v359_v54 = vsel %vm50_vm0, %v313_v10, 0 }
 0x15e   :  { %7862 = vmatpush3.bf16.xpose.msra.mxu1 %v347_v25  ;;  %7871 = vmatprep.mubr.msk.bf16.mxu1 %vm50_vm0, %v8871_v7  ;;  %v10126_v7 = vshrl.u32 %v901_v6, 6 }
 0x15f   :  { %8473 = vmatprep.subr.msk.bf16.mxu1 %vm50_vm0, %v310_v29 }
 0x166   :  { %7864 = vmatpush3.bf16.xpose.msra.mxu1 %v350_v33 }
 0x167   :  { %8474 = vmatprep.subr.msk.bf16.mxu1 %vm50_vm0, %v311_v35 }
 0x16e   :  { %7866 = vmatpush3.bf16.xpose.msra.mxu1 %v353_v24  ;;  %v9714_v24 = vmov -1e+30  }
 0x16f   :  { %8475 = vmatprep.subr.msk.bf16.mxu1 %vm50_vm0, %v312_v47  ;;  %v10123_v47 = vshrl.u32 %v883_v21, 7 }
 0x171   :  { %v886_v5 = vadd.s32 16, %v10123_v47  ;;  %v887_v25 = vadd.s32 24, %v10123_v47 }
 0x173   :  { %v904_v45 = vshrl.u32 %v886_v5, 6  ;;  %v894_v5 = vadd.s32 80, %v10123_v47 }
 0x175   :  { %vm921_vm3 = vcmp.eq.s32.totalorder %v904_v45, %v10126_v7 }
 0x176   :  { %7868 = vmatpush3.bf16.xpose.msra.mxu1 %v356_v8  ;;  %v10132_v8 = vsel %vm921_vm3, 0.0, %v9714_v24 }
 0x177   :  { %8476 = vmatprep.subr.msk.bf16.mxu1 %vm50_vm0, %v313_v10  ;;  %v902_v10 = vshrl.u32 %v10123_v47, 6  ;;  %13337 = vst [vmem:[#allocation14_spill] sm:$0xff] %v10132_v8 }
 0x179   :  { %vm919_vm4 = vcmp.eq.s32.totalorder %v902_v10, %v10126_v7 }
 0x17e   :  { %7870 = vmatpush3.bf16.xpose.msra.mxu1 %v359_v54 }
 0x185   :  { %7872 = vmatmul.mubr.msk.bf16.vlgmr.msra.gmra.mrb[16].mxu1 %vm50_vm0, %v8872_v14 }
 0x186   :  { %7875 = vmatprep.mubr.msk.bf16.mxu1 %vm50_vm0, %v8873_v3 }
 0x18d   :  { %7876 = vmatmul.mubr.msk.bf16.gmra.mrb[20].mxu1 %vm50_vm0, %v8874_v4 }
 0x218   :  { %v7841_v16 = vpop.f32.mrb[0].mxu1 }
 0x219   :  { %v404_v17 = vadd.f32 %v7841_v16, %v7389_v15  ;;  %v395_v18 = vpop.f32.mrb[1].mxu1  ;;  %v885_v16 = vadd.s32 8, %v10123_v47 }
 0x21a   :  { %v7842_v19 = vpop.f32.mrb[2].mxu1  ;;  %v396_v26 = vadd.f32 %v7389_v15, %v395_v18 }
 0x21b   :  { %v407_v22 = vadd.f32 %v7842_v19, %v7389_v15  ;;  %v398_v12 = vpop.f32.mrb[3].mxu1 }
 0x21c   :  { %v399_v27 = vadd.f32 %v7389_v15, %v398_v12  ;;  %v10140_v12 = vsel %vm919_vm4, 0.0, %v9714_v24 }
 0x21d   :  { %v10075_v55 = vpack.c.bf16 %v407_v22, %v404_v17  ;;  %13338 = vst [vmem:[#allocation15_spill] sm:$0xff] %v10140_v12 }
 0x21e   :  { %v10077_v30 = vpack.c.bf16 %v399_v27, %v396_v26  ;;  %v903_v26 = vshrl.u32 %v885_v16, 6  ;;  %v890_v27 = vadd.s32 48, %v10123_v47 }
 0x21f   :  { %13329 = vst [vmem:[#allocation6_spill] sm:$0xff] %v10075_v55 }
 0x220   :  { %13330 = vst [vmem:[#allocation7_spill] sm:$0xff] %v10077_v30  ;;  %v7845_v31 = vpop.f32.mrb[4].mxu1  ;;  %7897 = vmatprep.mubr.msk.bf16.mxu0 %vm978_vm1, %v10077_v30  ;;  %vm920_vm6 = vcmp.eq.s32.totalorder %v903_v26, %v10126_v7 }
 0x221   :  { %v420_v0 = vadd.f32 %v7845_v31, %v7389_v15  ;;  %v411_v32 = vpop.f32.mrb[5].mxu1 }
 0x222   :  { %v412_v34 = vadd.f32 %v7389_v15, %v411_v32  ;;  %v7846_v20 = vpop.f32.mrb[6].mxu1  ;;  %v895_v32 = vadd.s32 88, %v10123_v47 }
 0x223   :  { %v423_v38 = vadd.f32 %v7846_v20, %v7389_v15  ;;  %v414_v39 = vpop.f32.mrb[7].mxu1 }
 0x224   :  { %v415_v40 = vadd.f32 %v7389_v15, %v414_v39  ;;  %v908_v39 = vshrl.u32 %v890_v27, 6  ;;  %v893_v27 = vadd.s32 72, %v10123_v47 }
 0x225   :  { %v10081_v41 = vpack.c.bf16 %v423_v38, %v420_v0 }
 0x226   :  { %v10083_v1 = vpack.c.bf16 %v415_v40, %v412_v34  ;;  %v888_v40 = vadd.s32 32, %v10123_v47  ;;  %vm925_vm7 = vcmp.eq.s32.totalorder %v908_v39, %v10126_v7  ;;  %v898_v39 = vadd.s32 112, %v10123_v47 }
 0x227   :  { %13331 = vst [vmem:[#allocation8_spill] sm:$0xff] %v10081_v41 }
 0x228   :  { %13332 = vst [vmem:[#allocation9_spill] sm:$0xff] %v10083_v1  ;;  %v7849_v42 = vpop.f32.mrb[8].mxu1 }
 0x229   :  { %v436_v43 = vadd.f32 %v7849_v42, %v7389_v15  ;;  %v427_v36 = vpop.f32.mrb[9].mxu1 }
 0x22a   :  { %v428_v11 = vadd.f32 %v7389_v15, %v427_v36  ;;  %v7850_v46 = vpop.f32.mrb[10].mxu1 }
 0x22b   :  { %v439_v48 = vadd.f32 %v7850_v46, %v7389_v15  ;;  %v430_v49 = vpop.f32.mrb[11].mxu1  ;;  %v913_v46 = vshrl.u32 %v895_v32, 6 }
 0x22c   :  { %v431_v50 = vadd.f32 %v7389_v15, %v430_v49  ;;  %v906_v49 = vshrl.u32 %v888_v40, 6 }
 0x22d   :  { %v10085_v51 = vpack.c.bf16 %v439_v48, %v436_v43  ;;  %v10159_v48 = vsel %vm920_vm6, 0.0, %v9714_v24  ;;  %vm930_vm8 = vcmp.eq.s32.totalorder %v913_v46, %v10126_v7  ;;  %v896_v46 = vadd.s32 96, %v10123_v47 }
 0x22e   :  { %v10087_v52 = vpack.c.bf16 %v431_v50, %v428_v11  ;;  %13340 = vst [vmem:[#allocation17_spill] sm:$0xff] %v10159_v48  ;;  %v891_v50 = vadd.s32 56, %v10123_v47  ;;  %vm923_vm9 = vcmp.eq.s32.totalorder %v906_v49, %v10126_v7  ;;  %vm2876_vm6 = vcmask 130048  }
 0x22f   :  { %13333 = vst [vmem:[#allocation10_spill] sm:$0xff] %v10085_v51  ;;  %v10181_v3 = vsel %vm923_vm9, 0.0, %v9714_v24 }
 0x230   :  { %13334 = vst [vmem:[#allocation11_spill] sm:$0xff] %v10087_v52  ;;  %v7853_v44 = vpop.f32.mrb[12].mxu1  ;;  %13343 = vst [vmem:[#allocation20_spill] sm:$0xff] %v10181_v3 }
 0x231   :  { %v452_v9 = vadd.f32 %v7853_v44, %v7389_v15  ;;  %v443_v28 = vpop.f32.mrb[13].mxu1 }
 0x232   :  { %v444_v23 = vadd.f32 %v7389_v15, %v443_v28  ;;  %v7854_v29 = vpop.f32.mrb[14].mxu1 }
 0x233   :  { %v455_v53 = vadd.f32 %v7854_v29, %v7389_v15  ;;  %v446_v56 = vpop.f32.mrb[15].mxu1 }
 0x234   :  { %v447_v57 = vadd.f32 %v7389_v15, %v446_v56  ;;  %v905_v15 = vshrl.u32 %v887_v25, 6  ;;  %v889_v56 = vadd.s32 40, %v10123_v47 }
 0x235   :  { %v10089_v58 = vpack.c.bf16 %v455_v53, %v452_v9  ;;  %v909_v53 = vshrl.u32 %v891_v50, 6 }
 0x236   :  { %v10091_v59 = vpack.c.bf16 %v447_v57, %v444_v23  ;;  %vm922_vm5 = vcmp.eq.s32.totalorder %v905_v15, %v10126_v7  ;;  %v10169_v23 = vsel %vm925_vm7, 0.0, %v9714_v24  ;;  %v907_v21 = vshrl.u32 %v889_v56, 6 }
 0x237   :  { %13335 = vst [vmem:[#allocation12_spill] sm:$0xff] %v10089_v58  ;;  %v10150_v20 = vsel %vm922_vm5, 0.0, %v9714_v24  ;;  %13341 = vst [vmem:[#allocation18_spill] sm:$0xff] %v10169_v23  ;;  %vm926_vm10 = vcmp.eq.s32.totalorder %v909_v53, %v10126_v7  ;;  %vm2893_vm7 = vcmask 195584  }
 0x238   :  { %13336 = vst [vmem:[#allocation13_spill] sm:$0xff] %v10091_v59  ;;  %13339 = vst [vmem:[#allocation16_spill] sm:$0xff] %v10150_v20  ;;  %v10194_v25 = vsel %vm926_vm10, 0.0, %v9714_v24  ;;  %vm924_vm11 = vcmp.eq.s32.totalorder %v907_v21, %v10126_v7 }
 0x239   :  { %13344 = vst [vmem:[#allocation21_spill] sm:$0xff] %v10194_v25 }
 0x258   :  { %v10093_v37 = vpop.f32.mrb[16].mxu1 }
 0x259   :  { %v764_v60 = vpop.f32.mrb[17].mxu1 }
 0x25a   :  { %v765_v35 = vadd.f32 %v764_v60, %v517_v13  ;;  %v10095_v61 = vpop.f32.mrb[18].mxu1  ;;  %v10175_v13 = vsel %vm930_vm8, 0.0, %v9714_v24 }
 0x25b   :  { %v10097_v62 = vpop.f32.mrb[19].mxu1  ;;  %13342 = vst [vmem:[#allocation19_spill] sm:$0xff] %v10175_v13 }
 0x25c   :  { %v975_v63 = vpack.c.bf16 %v765_v35, %v765_v35 }
 0x25e   :  { %8477 = vmatprep.subr.msk.bf16.mxu0 %vm1003_vm2, %v975_v63  ;;  %v1005_v2 = vsel %vm1003_vm2, %v975_v63, 0 }
 0x25f   :  { %7896 = vmatpush3.bf16.msra.mxu0 %v1005_v2 }
 0x262   :  { %7898 = vmatmul.mubr.msk.bf16.vlgmr.msra.gmra.mrb[0].mxu0 %vm978_vm1, %v10075_v55 }
 0x263   :  { %7901 = vmatprep.mubr.msk.bf16.mxu0 %vm978_vm1, %v10083_v1 }
 0x26a   :  { %7902 = vmatmul.mubr.msk.bf16.gmra.mrb[4].mxu0 %vm978_vm1, %v10081_v41 }
 0x26b   :  { %7905 = vmatprep.mubr.msk.bf16.mxu0 %vm978_vm1, %v10087_v52 }
 0x272   :  { %7906 = vmatmul.mubr.msk.bf16.gmra.mrb[8].mxu0 %vm978_vm1, %v10085_v51 }
 0x273   :  { %7909 = vmatprep.mubr.msk.bf16.mxu0 %vm978_vm1, %v10091_v59 }
 0x27a   :  { %7910 = vmatmul.mubr.msk.bf16.gmra.mrb[12].mxu0 %vm978_vm1, %v10089_v58 }
 0x335   :  { %v7899_v33 = vpop.f32.mrb[0].mxu0 }
 0x336   :  { %v1106_v54 = vmul.f32 0.35355338, %v7899_v33  ;;  %v1041_v14 = vpop.f32.mrb[1].mxu0 }
 0x337   :  { %v7900_v17 = vpop.f32.mrb[2].mxu0  ;;  %v1104_v18 = vmul.f32 0.35355338, %v1041_v14  ;;  %v892_v14 = vadd.s32 64, %v10123_v47 }
 0x338   :  { %v1044_v19 = vpop.f32.mrb[3].mxu0  ;;  %v10137_v22 = vadd.f32 %v1106_v54, %v10132_v8  ;;  %v1107_v31 = vmul.f32 0.35355338, %v7900_v17  ;;  %v912_v54 = vshrl.u32 %v894_v5, 6 }
 0x339   :  { %v10146_v0 = vadd.f32 %v1104_v18, %v10140_v12  ;;  %v1105_v43 = vmul.f32 0.35355338, %v1044_v19  ;;  %v10203_v19 = vsel %vm924_vm11, 0.0, %v9714_v24  ;;  %v910_v26 = vshrl.u32 %v892_v14, 6 }
 0x33a   :  { %1140 = vmax.xlane.f32.xlu1 %v10137_v22  ;;  %v10156_v11 = vadd.f32 %v1107_v31, %v10150_v20  ;;  %13345 = vst [vmem:[#allocation22_spill] sm:$0xff] %v10203_v19  ;;  %vm929_vm12 = vcmp.eq.s32.totalorder %v912_v54, %v10126_v7 }
 0x33b   :  { %v10165_v9 = vadd.f32 %v1105_v43, %v10159_v48  ;;  %vm927_vm13 = vcmp.eq.s32.totalorder %v910_v26, %v10126_v7 }
 0x33c   :  { %v10221_v43 = vsel %vm927_vm13, 0.0, %v9714_v24 }
 0x33d   :  { %v7903_v34 = vpop.f32.mrb[4].mxu0  ;;  %13347 = vst [vmem:[#allocation24_spill] sm:$0xff] %v10221_v43 }
 0x33e   :  { %1136 = vmax.xlane.f32.xlu1 %v10146_v0  ;;  %v1057_v38 = vpop.f32.mrb[5].mxu0  ;;  %v1110_v44 = vmul.f32 0.35355338, %v7903_v34  ;;  %v10212_v34 = vsel %vm929_vm12, 0.0, %v9714_v24 }
 0x33f   :  { %v7904_v42 = vpop.f32.mrb[6].mxu0  ;;  %v1108_v60 = vmul.f32 0.35355338, %v1057_v38  ;;  %13346 = vst [vmem:[#allocation23_spill] sm:$0xff] %v10212_v34  ;;  %v911_v38 = vshrl.u32 %v893_v27, 6 }
 0x340   :  { %v1060_v36 = vpop.f32.mrb[7].mxu0  ;;  %v10178_v2 = vadd.f32 %v1110_v44, %v10169_v23  ;;  %v1111_v6 = vmul.f32 0.35355338, %v7904_v42 }
 0x341   :  { %v10191_v45 = vadd.f32 %v1108_v60, %v10181_v3  ;;  %v1109_v16 = vmul.f32 0.35355338, %v1060_v36  ;;  %vm928_vm14 = vcmp.eq.s32.totalorder %v911_v38, %v10126_v7  ;;  %v916_v36 = vshrl.u32 %v898_v39, 6 }
 0x342   :  { %1142 = vmax.xlane.f32.xlu1 %v10156_v11  ;;  %v10200_v18 = vadd.f32 %v1111_v6, %v10194_v25  ;;  %v10230_v44 = vsel %vm928_vm14, 0.0, %v9714_v24 }
 0x343   :  { %v10209_v32 = vadd.f32 %v1109_v16, %v10203_v19  ;;  %13348 = vst [vmem:[#allocation25_spill] sm:$0xff] %v10230_v44  ;;  %vm933_vm15 = vcmp.eq.s32.totalorder %v916_v36, %v10126_v7 }
 0x345   :  { %v7907_v28 = vpop.f32.mrb[8].mxu0 }
 0x346   :  { %1138 = vmax.xlane.f32.xlu1 %v10165_v9  ;;  %v1073_v29 = vpop.f32.mrb[9].mxu0  ;;  %v1114_v31 = vmul.f32 0.35355338, %v7907_v28  ;;  %v914_v28 = vshrl.u32 %v896_v46, 6 }
 0x347   :  { %v7908_v57 = vpop.f32.mrb[10].mxu0  ;;  %v1112_v40 = vmul.f32 0.35355338, %v1073_v29  ;;  %v899_v29 = vadd.s32 120, %v10123_v47 }
 0x348   :  { %v1115_v35 = vmul.f32 0.35355338, %v7908_v57  ;;  %v1076_v63 = vpop.f32.mrb[11].mxu0  ;;  %v10218_v42 = vadd.f32 %v1114_v31, %v10212_v34  ;;  %v10239_v57 = vsel %vm933_vm15, 0.0, %v9714_v24  ;;  %vm931_vm3 = vcmp.eq.s32.totalorder %v914_v28, %v10126_v7 }
 0x349   :  { %v1113_v49 = vmul.f32 0.35355338, %v1076_v63  ;;  %v10227_v50 = vadd.f32 %v1112_v40, %v10221_v43  ;;  %13349 = vst [vmem:[#allocation26_spill] sm:$0xff] %v10239_v57  ;;  %v917_v60 = vshrl.u32 %v899_v29, 6  ;;  %v10248_v5 = vsel %vm931_vm3, 0.0, %v9714_v24 }
 0x34a   :  { %1148 = vmax.xlane.f32.xlu1 %v10178_v2  ;;  %v10185_v4 = vadd.f32 %v1115_v35, %v10175_v13  ;;  %v897_v35 = vadd.s32 104, %v10123_v47  ;;  %13350 = vst [vmem:[#allocation27_spill] sm:$0xff] %v10248_v5 }
 0x34b   :  { %v10236_v56 = vadd.f32 %v1113_v49, %v10230_v44  ;;  %vm934_vm4 = vcmp.eq.s32.totalorder %v917_v60, %v10126_v7 }
 0x34c   :  { %1158 = vmax.xlane.f32.xlu0 %v10185_v4  ;;  %v915_v6 = vshrl.u32 %v897_v35, 6  ;;  %v10256_v14 = vsel %vm934_vm4, 0.0, %v9714_v24 }
 0x34d   :  { %v7911_v10 = vpop.f32.mrb[12].mxu0  ;;  %13351 = vst [vmem:[#allocation28_spill] sm:$0xff] %v10256_v14 }
 0x34e   :  { %1144 = vmax.xlane.f32.xlu1 %v10191_v45  ;;  %v1089_v33 = vpop.f32.mrb[13].mxu0  ;;  %v1118_v53 = vmul.f32 0.35355338, %v7911_v10  ;;  %vm932_vm5 = vcmp.eq.s32.totalorder %v915_v6, %v10126_v7 }
 0x34f   :  { %v7912_v15 = vpop.f32.mrb[14].mxu0  ;;  %v1116_v63 = vmul.f32 0.35355338, %v1089_v33  ;;  %v10264_v16 = vsel %vm932_vm5, 0.0, %v9714_v24 }
 0x350   :  { %v1092_v17 = vpop.f32.mrb[15].mxu0  ;;  %v10245_v21 = vadd.f32 %v1118_v53, %v10239_v57  ;;  %v1119_v10 = vmul.f32 0.35355338, %v7912_v15  ;;  %13352 = vst [vmem:[#allocation29_spill] sm:$0xff] %v10264_v16 }
 0x351   :  { %v10253_v54 = vadd.f32 %v1116_v63, %v10248_v5  ;;  %v1117_v47 = vmul.f32 0.35355338, %v1092_v17 }
 0x352   :  { %1150 = vmax.xlane.f32.xlu1 %v10200_v18  ;;  %v10261_v33 = vadd.f32 %v1119_v10, %v10256_v14 }
 0x353   :  { %v10268_v15 = vadd.f32 %v1117_v47, %v10264_v16 }
 0x356   :  { %1146 = vmax.xlane.f32.xlu1 %v10209_v32 }
 0x35a   :  { %1156 = vmax.xlane.f32.xlu1 %v10218_v42 }
 0x35e   :  { %1152 = vmax.xlane.f32.xlu1 %v10227_v50 }
 0x362   :  { %1154 = vmax.xlane.f32.xlu1 %v10236_v56 }
 0x366   :  { %1164 = vmax.xlane.f32.xlu1 %v10245_v21 }
 0x36a   :  { %1160 = vmax.xlane.f32.xlu1 %v10253_v54 }
 0x36e   :  { %1166 = vmax.xlane.f32.xlu1 %v10261_v33 }
 0x372   :  { %1162 = vmax.xlane.f32.xlu1 %v10268_v15 }
 0x3c7   :  { %v1141_v26 = vpop.xlane.xlu1 %1140 }
 0x3c8   :  { %v1170_v27 = vsub.f32 %v10137_v22, %v1141_v26 }
 0x3ca   :  { %v1188_v31 = vmul.f32 1.442695, %v1170_v27 }
 0x3cb   :  { %v1137_v38 = vpop.xlane.xlu1 %1136 }
 0x3cc   :  { %8921 = vpow2.f32 %v1188_v31  ;;  %v1168_v7 = vsub.f32 %v10146_v0, %v1137_v38 }
 0x3ce   :  { %v1184_v17 = vmul.f32 1.442695, %v1168_v7 }
 0x3cf   :  { %v1143_v39 = vpop.xlane.xlu1 %1142 }
 0x3d0   :  { %8923 = vpow2.f32 %v1184_v17  ;;  %v1171_v24 = vsub.f32 %v10156_v11, %v1143_v39 }
 0x3d2   :  { %v1190_v40 = vmul.f32 1.442695, %v1171_v24 }
 0x3d3   :  { %v1139_v36 = vpop.xlane.xlu1 %1138 }
 0x3d4   :  { %8925 = vpow2.f32 %v1190_v40  ;;  %v1169_v46 = vsub.f32 %v10165_v9, %v1139_v36 }
 0x3d6   :  { %v10275_v49 = vpop.eup %8921  ;;  %v1186_v28 = vmul.f32 1.442695, %v1169_v46 }
 0x3d7   :  { %v1149_v29 = vpop.xlane.xlu1 %1148  ;;  %1220 = vadd.xlane.f32.xlu1 %v10275_v49 }
 0x3d8   :  { %8927 = vpow2.f32 %v1186_v28  ;;  %v1174_v22 = vsub.f32 %v10178_v2, %v1149_v29 }
 0x3d9   :  { %v1159_v7 = vpop.xlane.xlu0 %1158 }
 0x3da   :  { %v10279_v0 = vpop.eup %8923  ;;  %v1196_v53 = vmul.f32 1.442695, %v1174_v22  ;;  %v1179_v24 = vsub.f32 %v10185_v4, %v1159_v7 }
 0x3db   :  { %v1145_v60 = vpop.xlane.xlu1 %1144  ;;  %1216 = vadd.xlane.f32.xlu1 %v10279_v0 }
 0x3dc   :  { %8929 = vpow2.f32 %v1196_v53  ;;  %v1172_v11 = vsub.f32 %v10191_v45, %v1145_v60  ;;  %v1206_v28 = vmul.f32 1.442695, %v1179_v24  ;;  %v10313_v53 = vpop.f32.mrb[20].mxu1 }
 0x3de   :  { %v10283_v35 = vpop.eup %8925  ;;  %v1192_v9 = vmul.f32 1.442695, %v1172_v11  ;;  %v780_v11 = vpop.f32.mrb[21].mxu1 }
 0x3df   :  { %v1151_v63 = vpop.xlane.xlu1 %1150  ;;  %1222 = vadd.xlane.f32.xlu1 %v10283_v35 }
 0x3e0   :  { %8931 = vpow2.f32 %v1192_v9  ;;  %v1175_v6 = vsub.f32 %v10200_v18, %v1151_v63 }
 0x3e2   :  { %v10287_v10 = vpop.eup %8927  ;;  %v1198_v2 = vmul.f32 1.442695, %v1175_v6 }
 0x3e3   :  { %v1147_v47 = vpop.xlane.xlu1 %1146  ;;  %1218 = vadd.xlane.f32.xlu1 %v10287_v10 }
 0x3e4   :  { %8933 = vpow2.f32 %v1198_v2  ;;  %v1173_v26 = vsub.f32 %v10209_v32, %v1147_v47  ;;  %v491_v47 = vld [vmem:[%s13187_s6 + $0x8] sm:$0xff] }
 0x3e6   :  { %v10291_v27 = vpop.eup %8929  ;;  %v1194_v45 = vmul.f32 1.442695, %v1173_v26  ;;  %v10328_v26 = vpop.f32.mrb[22].mxu1 }
 0x3e7   :  { %v1157_v31 = vpop.xlane.xlu1 %1156  ;;  %1228 = vadd.xlane.f32.xlu0 %v10291_v27  ;;  %13353 = vst [vmem:[#allocation30_spill] sm:$0xff] %v10328_v26 }
 0x3e8   :  { %8935 = vpow2.f32 %v1194_v45  ;;  %v1178_v38 = vsub.f32 %v10218_v42, %v1157_v31  ;;  %v10330_v45 = vpop.f32.mrb[23].mxu1 }
 0x3ea   :  { %v10295_v18 = vpop.eup %8931  ;;  %v1204_v17 = vmul.f32 1.442695, %v1178_v38 }
 0x3eb   :  { %v1153_v39 = vpop.xlane.xlu1 %1152  ;;  %1224 = vadd.xlane.f32.xlu0 %v10295_v18 }
 0x3ec   :  { %8937 = vpow2.f32 %v1204_v17  ;;  %v1176_v32 = vsub.f32 %v10227_v50, %v1153_v39 }
 0x3ee   :  { %v10300_v40 = vpop.eup %8933  ;;  %v1200_v36 = vmul.f32 1.442695, %v1176_v32 }
 0x3ef   :  { %v1155_v46 = vpop.xlane.xlu1 %1154  ;;  %1230 = vadd.xlane.f32.xlu1 %v10300_v40 }
 0x3f0   :  { %8939 = vpow2.f32 %v1200_v36  ;;  %v1177_v42 = vsub.f32 %v10236_v56, %v1155_v46  ;;  %v494_v56 = vld [vmem:[%s13187_s6 + $0x20] sm:$0xff] }
 0x3f1   :  { %8941 = vpow2.f32 %v1206_v28 }
 0x3f2   :  { %v10304_v29 = vpop.eup %8935  ;;  %v1202_v22 = vmul.f32 1.442695, %v1177_v42 }
 0x3f3   :  { %1226 = vadd.xlane.f32.xlu1 %v10304_v29  ;;  %v1165_v63 = vpop.xlane.xlu1 %1164 }
 0x3f4   :  { %8943 = vpow2.f32 %v1202_v22  ;;  %v1182_v6 = vsub.f32 %v10245_v21, %v1165_v63 }
 0x3f6   :  { %v10307_v4 = vpop.eup %8937  ;;  %v1212_v2 = vmul.f32 1.442695, %v1182_v6 }
 0x3f7   :  { %1236 = vadd.xlane.f32.xlu1 %v10307_v4  ;;  %v1161_v31 = vpop.xlane.xlu1 %1160 }
 0x3f8   :  { %8945 = vpow2.f32 %v1212_v2  ;;  %v1180_v17 = vsub.f32 %v10253_v54, %v1161_v31 }
 0x3fa   :  { %v10310_v50 = vpop.eup %8939  ;;  %v1208_v21 = vmul.f32 1.442695, %v1180_v17 }
 0x3fb   :  { %1232 = vadd.xlane.f32.xlu1 %v10310_v50  ;;  %v10315_v60 = vpop.eup %8941  ;;  %v1167_v7 = vpop.xlane.xlu1 %1166 }
 0x3fc   :  { %v1183_v39 = vsub.f32 %v10261_v33, %v1167_v7  ;;  %8947 = vpow2.f32 %v1208_v21 }
 0x3fe   :  { %v10321_v9 = vpop.eup %8943  ;;  %v1214_v32 = vmul.f32 1.442695, %v1183_v39 }
 0x3ff   :  { %1238 = vadd.xlane.f32.xlu1 %v10315_v60  ;;  %v1163_v24 = vpop.xlane.xlu1 %1162 }
 0x400   :  { %v1181_v36 = vsub.f32 %v10268_v15, %v1163_v24  ;;  %8949 = vpow2.f32 %v1214_v32 }
 0x401   :  { %536 = vperm.xlu0 %8507, %v494_v56  }
 0x402   :  { %v10332_v38 = vpop.eup %8945  ;;  %v1210_v46 = vmul.f32 1.442695, %v1181_v36 }
 0x403   :  { %1234 = vadd.xlane.f32.xlu1 %v10321_v9 }
 0x404   :  { %8951 = vpow2.f32 %v1210_v46 }
 0x406   :  { %v10338_v28 = vpop.eup %8947 }
 0x40a   :  { %v10341_v42 = vpop.eup %8949 }
 0x40e   :  { %v10344_v54 = vpop.eup %8951 }
 0x414   :  { %521 = vperm.xlu1 %8508, %v491_v47  }
 0x420   :  { %1244 = vadd.xlane.f32.xlu0 %v10332_v38 }
 0x438   :  { %1240 = vadd.xlane.f32.xlu1 %v10338_v28 }
 0x43c   :  { %1246 = vadd.xlane.f32.xlu1 %v10341_v42 }
 0x440   :  { %1242 = vadd.xlane.f32.xlu1 %v10344_v54 }
 0x451   :  { %1397 = vrot.lane.b32.xlu1 %v10077_v30, %s9715_s18 }
 0x455   :  { %1399 = vrot.lane.b32.xlu1 %v10075_v55, %s9715_s18 }
 0x464   :  { %v1221_v33 = vpop.xlane.xlu1 %1220 }
 0x468   :  { %v1217_v15 = vpop.xlane.xlu1 %1216 }
 0x469   :  { %8953 = vrcp.f32 %v1217_v15 }
 0x46c   :  { %v1223_v22 = vpop.xlane.xlu1 %1222 }
 0x470   :  { %v1219_v56 = vpop.xlane.xlu1 %1218 }
 0x471   :  { %8955 = vrcp.f32 %v1219_v56 }
 0x472   :  { %8957 = vrcp.f32 %v1223_v22 }
 0x473   :  { %v8954_v6 = vpop.eup %8953  ;;  %8959 = vrcp.f32 %v1221_v33 }
 0x474   :  { %v1229_v63 = vpop.xlane.xlu0 %1228  ;;  %v1264_v7 = vmul.f32 %v8954_v6, %v10279_v0 }
 0x478   :  { %v1225_v47 = vpop.xlane.xlu0 %1224 }
 0x479   :  { %8961 = vrcp.f32 %v1225_v47 }
 0x47b   :  { %v8956_v2 = vpop.eup %8955 }
 0x47c   :  { %v1231_v31 = vpop.xlane.xlu1 %1230  ;;  %v1265_v17 = vmul.f32 %v8956_v2, %v10287_v10  ;;  %v8958_v46 = vpop.eup %8957 }
 0x47d   :  { %v8960_v33 = vpop.eup %8959  ;;  %v1267_v22 = vmul.f32 %v8958_v46, %v10283_v35 }
 0x47e   :  { %v1280_v21 = vpack.c.bf16 %v1265_v17, %v1264_v7  ;;  %v1266_v10 = vmul.f32 %v8960_v33, %v10275_v49 }
 0x480   :  { %v537_v39 = vpop.permute.xlu0 %536  ;;  %7915 = vmatprep.mubr.bf16.mxu0 %v1280_v21  ;;  %v1227_v24 = vpop.xlane.xlu1 %1226  ;;  %v1281_v2 = vpack.c.bf16 %v1267_v22, %v1266_v10 }
 0x481   :  { %v781_v32 = vadd.f32 %v780_v11, %v537_v39  ;;  %8963 = vrcp.f32 %v1227_v24 }
 0x482   :  { %8965 = vrcp.f32 %v1231_v31 }
 0x483   :  { %v977_v36 = vpack.c.bf16 %v781_v32, %v781_v32  ;;  %8967 = vrcp.f32 %v1229_v63  ;;  %v8962_v56 = vpop.eup %8961 }
 0x484   :  { %v1237_v15 = vpop.xlane.xlu1 %1236  ;;  %v1268_v11 = vmul.f32 %v8962_v56, %v10295_v18 }
 0x485   :  { %7913 = vmatprep.subr.bf16.mxu0 %v977_v36 }
 0x486   :  { %7914 = vmatpush3.bf16.xpose.msra.mxu0 %v977_v36 }
 0x488   :  { %v1233_v0 = vpop.xlane.xlu1 %1232 }
 0x48b   :  { %v8964_v6 = vpop.eup %8963 }
 0x48c   :  { %v8966_v47 = vpop.eup %8965  ;;  %v1239_v7 = vpop.xlane.xlu1 %1238  ;;  %v1269_v31 = vmul.f32 %v8964_v6, %v10304_v29 }
 0x48d   :  { %7916 = vmatmul.mubr.bf16.vlgmr.msra.gmra.mrb[16].mxu0 %v1281_v2  ;;  %v8968_v63 = vpop.eup %8967  ;;  %8969 = vrcp.f32 %v1239_v7  ;;  %v1271_v21 = vmul.f32 %v8966_v47, %v10300_v40 }
 0x48e   :  { %v1282_v17 = vpack.c.bf16 %v1269_v31, %v1268_v11  ;;  %8971 = vrcp.f32 %v1233_v0  ;;  %v1270_v49 = vmul.f32 %v8968_v63, %v10291_v27 }
 0x48f   :  { %8973 = vrcp.f32 %v1237_v15 }
 0x490   :  { %7919 = vmatprep.mubr.bf16.mxu0 %v1282_v17  ;;  %v1235_v35 = vpop.xlane.xlu1 %1234  ;;  %v1283_v39 = vpack.c.bf16 %v1271_v21, %v1270_v49 }
 0x491   :  { %8975 = vrcp.f32 %v1235_v35 }
 0x494   :  { %v522_v24 = vpop.permute.xlu1 %521 }
 0x495   :  { %v768_v32 = vadd.f32 %v10097_v62, %v522_v24  ;;  %7920 = vmatmul.mubr.bf16.gmra.mrb[20].mxu0 %v1283_v39 }
 0x497   :  { %v1386_v18 = vpack.c.bf16 %v768_v32, %v768_v32  ;;  %v8970_v29 = vpop.eup %8969 }
 0x498   :  { %v8972_v36 = vpop.eup %8971  ;;  %v1275_v15 = vmul.f32 %v8970_v29, %v10315_v60 }
 0x499   :  { %8478 = vmatprep.subr.msk.bf16.mxu0 %vm1003_vm2, %v1386_v18  ;;  %v1438_v46 = vsel %vm1003_vm2, %v1386_v18, 0  ;;  %v8974_v33 = vpop.eup %8973  ;;  %v1272_v22 = vmul.f32 %v8972_v36, %v10310_v50 }
 0x49a   :  { %7932 = vmatpush3.bf16.msra.mxu0 %v1438_v46  ;;  %v1274_v0 = vmul.f32 %v8974_v33, %v10307_v4 }
 0x49b   :  { %v8976_v40 = vpop.eup %8975 }
 0x49c   :  { %v1273_v27 = vmul.f32 %v8976_v40, %v10321_v9  ;;  %v1285_v56 = vpack.c.bf16 %v1275_v15, %v1274_v0 }
 0x49e   :  { %v1284_v62 = vpack.c.bf16 %v1273_v27, %v1272_v22 }
 0x4a0   :  { %7923 = vmatprep.mubr.bf16.mxu0 %v1284_v62 }
 0x4a1   :  { %7924 = vmatmul.mubr.bf16.gmra.mrb[24].mxu0 %v1285_v56 }
 0x4ad   :  { %v1245_v2 = vpop.xlane.xlu0 %1244 }
 0x4c5   :  { %v1241_v10 = vpop.xlane.xlu1 %1240 }
 0x4c9   :  { %v1247_v6 = vpop.xlane.xlu1 %1246 }
 0x4ca   :  { %8977 = vrcp.f32 %v1247_v6 }
 0x4cb   :  { %8979 = vrcp.f32 %v1241_v10 }
 0x4cc   :  { %8981 = vrcp.f32 %v1245_v2 }
 0x4cd   :  { %v1243_v47 = vpop.xlane.xlu1 %1242 }
 0x4ce   :  { %8983 = vrcp.f32 %v1243_v47 }
 0x4d1   :  { %v1398_v35 = vpop.permute.xlu1 %1397 }
 0x4d4   :  { %v8978_v7 = vpop.eup %8977 }
 0x4d5   :  { %v8980_v60 = vpop.eup %8979  ;;  %v1279_v9 = vmul.f32 %v8978_v7, %v10341_v42  ;;  %v1400_v49 = vpop.permute.xlu1 %1399 }
 0x4d6   :  { %v8982_v11 = vpop.eup %8981  ;;  %v1276_v4 = vmul.f32 %v8980_v60, %v10338_v28 }
 0x4d7   :  { %v1278_v63 = vmul.f32 %v8982_v11, %v10332_v38 }
 0x4d8   :  { %v8984_v50 = vpop.eup %8983 }
 0x4d9   :  { %v1277_v31 = vmul.f32 %v8984_v50, %v10344_v54  ;;  %v1287_v21 = vpack.c.bf16 %v1279_v9, %v1278_v63 }
 0x4db   :  { %v1286_v17 = vpack.c.bf16 %v1277_v31, %v1276_v4  ;;  %v495_v4 = vld [vmem:[%s13187_s6 + $0x28] sm:$0xff]  ;;  %v493_v31 = vld [vmem:[%s13187_s6 + $0x18] sm:$0xff] }
 0x4dd   :  { %7927 = vmatprep.mubr.bf16.mxu0 %v1286_v17 }
 0x4de   :  { %7928 = vmatmul.mubr.bf16.gmra.mrb[28].mxu0 %v1287_v21 }
 0x4df   :  { %7933 = vmatprep.mubr.msk.bf16.mxu0 %vm978_vm1, %v1398_v35 }
 0x4e6   :  { %7934 = vmatmul.mubr.msk.bf16.vlgmr.msra.gmra.mrb[32].mxu0 %vm978_vm1, %v1400_v49 }
 0x560   :  { %v10372_v39 = vpop.f32.mrb[16].mxu0 }
 0x561   :  { %13354 = vst [vmem:[#allocation31_spill] sm:$0xff] %v10372_v39  ;;  %v10374_v24 = vpop.f32.mrb[17].mxu0 }
 0x562   :  { %13355 = vst [vmem:[#allocation32_spill] sm:$0xff] %v10374_v24  ;;  %v10376_v42 = vpop.f32.mrb[18].mxu0 }
 0x563   :  { %13356 = vst [vmem:[#allocation33_spill] sm:$0xff] %v10376_v42  ;;  %v10378_v28 = vpop.f32.mrb[19].mxu0 }
 0x564   :  { %13357 = vst [vmem:[#allocation34_spill] sm:$0xff] %v10378_v28 }
 0x568   :  { %v10380_v54 = vpop.f32.mrb[20].mxu0 }
 0x569   :  { %13358 = vst [vmem:[#allocation35_spill] sm:$0xff] %v10380_v54  ;;  %v10382_v38 = vpop.f32.mrb[21].mxu0 }
 0x56a   :  { %13359 = vst [vmem:[#allocation36_spill] sm:$0xff] %v10382_v38  ;;  %v10384_v32 = vpop.f32.mrb[22].mxu0 }
 0x56b   :  { %13360 = vst [vmem:[#allocation37_spill] sm:$0xff] %v10384_v32  ;;  %v10386_v18 = vpop.f32.mrb[23].mxu0 }
 0x56c   :  { %13361 = vst [vmem:[#allocation38_spill] sm:$0xff] %v10386_v18 }
 0x574   :  { %v10388_v29 = vpop.f32.mrb[24].mxu0 }
 0x575   :  { %13362 = vst [vmem:[#allocation39_spill] sm:$0xff] %v10388_v29  ;;  %v10390_v36 = vpop.f32.mrb[25].mxu0 }
 0x576   :  { %13363 = vst [vmem:[#allocation40_spill] sm:$0xff] %v10390_v36  ;;  %v10392_v46 = vpop.f32.mrb[26].mxu0 }
 0x577   :  { %13364 = vst [vmem:[#allocation41_spill] sm:$0xff] %v10392_v46  ;;  %v10394_v33 = vpop.f32.mrb[27].mxu0 }
 0x578   :  { %13365 = vst [vmem:[#allocation42_spill] sm:$0xff] %v10394_v33 }
 0x5b1   :  { %v10396_v40 = vpop.f32.mrb[28].mxu0 }
 0x5b2   :  { %13366 = vst [vmem:[#allocation43_spill] sm:$0xff] %v10396_v40  ;;  %v10398_v15 = vpop.f32.mrb[29].mxu0 }
 0x5b3   :  { %13367 = vst [vmem:[#allocation44_spill] sm:$0xff] %v10398_v15  ;;  %v10400_v22 = vpop.f32.mrb[30].mxu0 }
 0x5b4   :  { %13368 = vst [vmem:[#allocation45_spill] sm:$0xff] %v10400_v22  ;;  %v10402_v27 = vpop.f32.mrb[31].mxu0 }
 0x5b5   :  { %13369 = vst [vmem:[#allocation46_spill] sm:$0xff] %v10402_v27 }
 0x5b9   :  { %v7935_v0 = vpop.f32.mrb[32].mxu0 }
 0x5ba   :  { %v1474_v62 = vpop.f32.mrb[33].mxu0  ;;  %v1539_v2 = vmul.f32 0.35355338, %v7935_v0 }
 0x5bb   :  { %v1537_v56 = vmul.f32 0.35355338, %v1474_v62  ;;  %v7936_v10 = vpop.f32.mrb[34].mxu0 }
 0x5bc   :  { %v1477_v6 = vpop.f32.mrb[35].mxu0  ;;  %v1540_v11 = vmul.f32 0.35355338, %v7936_v10  ;;  %v1555_v50 = vadd.f32 %v1539_v2, %v10132_v8 }
 0x5bd   :  { %v1538_v47 = vmul.f32 0.35355338, %v1477_v6  ;;  %v1553_v7 = vadd.f32 %v1537_v56, %v10140_v12 }
 0x5be   :  { %v1556_v9 = vadd.f32 %v1540_v11, %v10150_v20 }
 0x5bf   :  { %1569 = vmax.xlane.f32.xlu0 %v1553_v7  ;;  %v1554_v60 = vadd.f32 %v1538_v47, %v10159_v48 }
 0x5c1   :  { %1571 = vmax.xlane.f32.xlu1 %v1554_v60 }
 0x5c3   :  { %1573 = vmax.xlane.f32.xlu0 %v1555_v50 }
 0x5c7   :  { %1575 = vmax.xlane.f32.xlu0 %v1556_v9 }
 0x5d2   :  { %1403 = vrot.lane.b32.xlu1 %v10081_v41, %s9715_s18 }
 0x5d6   :  { %1407 = vrot.lane.b32.xlu1 %v10085_v51, %s9715_s18 }
 0x5da   :  { %1411 = vrot.lane.b32.xlu1 %v10089_v58, %s9715_s18 }
 0x5dd   :  { %1401 = vrot.lane.b32.xlu0 %v10083_v1, %s9715_s18 }
 0x5de   :  { %1822 = vrot.lane.b32.xlu1 %v10077_v30, %s9716_s19 }
 0x5e1   :  { %541 = vperm.xlu0 %8507, %v495_v4  }
 0x5e2   :  { %1826 = vrot.lane.b32.xlu1 %v10083_v1, %s9716_s19 }
 0x5e5   :  { %1405 = vrot.lane.b32.xlu0 %v10087_v52, %s9715_s18 }
 0x5e6   :  { %1830 = vrot.lane.b32.xlu1 %v10087_v52, %s9716_s19 }
 0x5e9   :  { %1409 = vrot.lane.b32.xlu0 %v10091_v59, %s9715_s18 }
 0x5ea   :  { %531 = vperm.xlu1 %8508, %v493_v31  }
 0x5ee   :  { %1836 = vrot.lane.b32.xlu1 %v10089_v58, %s9716_s19 }
 0x5f2   :  { %2249 = vrot.lane.b32.xlu1 %v10075_v55, %s9717_s23 }
 0x5f6   :  { %2253 = vrot.lane.b32.xlu1 %v10081_v41, %s9717_s23 }
 0x5fa   :  { %2257 = vrot.lane.b32.xlu1 %v10085_v51, %s9717_s23 }
 0x5fe   :  { %2261 = vrot.lane.b32.xlu1 %v10089_v58, %s9717_s23 }
 0x64c   :  { %v1570_v63 = vpop.xlane.xlu0 %1569 }
 0x64d   :  { %v1601_v21 = vsub.f32 %v1553_v7, %v1570_v63 }
 0x64e   :  { %v1572_v49 = vpop.xlane.xlu1 %1571 }
 0x64f   :  { %v1617_v56 = vmul.f32 1.442695, %v1601_v21  ;;  %v1602_v2 = vsub.f32 %v1554_v60, %v1572_v49 }
 0x650   :  { %v1574_v17 = vpop.xlane.xlu0 %1573 }
 0x651   :  { %v1603_v35 = vsub.f32 %v1555_v50, %v1574_v17  ;;  %v1619_v4 = vmul.f32 1.442695, %v1602_v2 }
 0x652   :  { %v1404_v47 = vpop.permute.xlu1 %1403 }
 0x653   :  { %v1621_v0 = vmul.f32 1.442695, %v1603_v35 }
 0x654   :  { %v1576_v62 = vpop.xlane.xlu0 %1575 }
 0x655   :  { %8985 = vpow2.f32 %v1621_v0  ;;  %v1604_v10 = vsub.f32 %v1556_v9, %v1576_v62  ;;  %v492_v0 = vld [vmem:[%s13187_s6 + $0x10] sm:$0xff] }
 0x656   :  { %8987 = vpow2.f32 %v1617_v56  ;;  %v1408_v21 = vpop.permute.xlu1 %1407 }
 0x657   :  { %v1623_v11 = vmul.f32 1.442695, %v1604_v10 }
 0x658   :  { %v1402_v6 = vpop.permute.xlu0 %1401 }
 0x659   :  { %7937 = vmatprep.mubr.msk.bf16.mxu0 %vm978_vm1, %v1402_v6  ;;  %8989 = vpow2.f32 %v1623_v11 }
 0x65a   :  { %7938 = vmatmul.mubr.msk.bf16.gmra.mrb[36].mxu0 %vm978_vm1, %v1404_v47  ;;  %8991 = vpow2.f32 %v1619_v4 }
 0x65f   :  { %v8986_v31 = vpop.eup %8985 }
 0x660   :  { %1653 = vadd.xlane.f32.xlu0 %v8986_v31  ;;  %v542_v7 = vpop.permute.xlu0 %541  ;;  %v8988_v63 = vpop.eup %8987 }
 0x661   :  { %v784_v50 = vadd.f32 %v10330_v45, %v542_v7  ;;  %v1412_v45 = vpop.permute.xlu1 %1411 }
 0x663   :  { %v1388_v17 = vpack.c.bf16 %v784_v50, %v784_v50  ;;  %v8990_v60 = vpop.eup %8989 }
 0x664   :  { %1649 = vadd.xlane.f32.xlu0 %v8988_v63  ;;  %v1406_v9 = vpop.permute.xlu0 %1405  ;;  %v8992_v49 = vpop.eup %8991 }
 0x665   :  { %7941 = vmatprep.mubr.msk.bf16.mxu0 %vm978_vm1, %v1406_v9  ;;  %7949 = vmatprep.subr.bf16.mxu0 %v1388_v17  ;;  %v1823_v56 = vpop.permute.xlu1 %1822 }
 0x666   :  { %8387 = vmatprep.subr.bf16.mxu1 %v1388_v17  ;;  %7942 = vmatmul.mubr.msk.bf16.gmra.mrb[40].mxu0 %vm978_vm1, %v1408_v21 }
 0x667   :  { %7950 = vmatpush3.bf16.xpose.msra.mxu0 %v1388_v17  ;;  %8388 = vmatpush3.bf16.xpose.msra.mxu1 %v1388_v17 }
 0x668   :  { %1655 = vadd.xlane.f32.xlu0 %v8990_v60  ;;  %v1410_v35 = vpop.permute.xlu0 %1409 }
 0x669   :  { %7945 = vmatprep.mubr.msk.bf16.mxu0 %vm978_vm1, %v1410_v35  ;;  %v1827_v2 = vpop.permute.xlu1 %1826 }
 0x66c   :  { %1651 = vadd.xlane.f32.xlu0 %v8992_v49 }
 0x66d   :  { %v1831_v11 = vpop.permute.xlu1 %1830 }
 0x66e   :  { %7946 = vmatmul.mubr.msk.bf16.gmra.mrb[44].mxu0 %vm978_vm1, %v1412_v45 }
 0x671   :  { %v532_v21 = vpop.permute.xlu1 %531 }
 0x672   :  { %v776_v15 = vadd.f32 %v10095_v61, %v532_v21 }
 0x682   :  { %526 = vperm.xlu0 %8507, %v492_v0  }
 0x686   :  { %1824 = vrot.lane.b32.xlu0 %v10075_v55, %s9716_s19 }
 0x68a   :  { %1828 = vrot.lane.b32.xlu0 %v10081_v41, %s9716_s19 }
 0x68e   :  { %1832 = vrot.lane.b32.xlu0 %v10085_v51, %s9716_s19 }
 0x692   :  { %1834 = vrot.lane.b32.xlu0 %v10091_v59, %s9716_s19 }
 0x696   :  { %2247 = vrot.lane.b32.xlu0 %v10077_v30, %s9717_s23 }
 0x69a   :  { %2251 = vrot.lane.b32.xlu0 %v10083_v1, %s9717_s23 }
 0x69e   :  { %2255 = vrot.lane.b32.xlu0 %v10087_v52, %s9717_s23 }
 0x6a2   :  { %2259 = vrot.lane.b32.xlu0 %v10091_v59, %s9717_s23 }
 0x6ed   :  { %v1654_v62 = vpop.xlane.xlu0 %1653 }
 0x6f1   :  { %v1650_v10 = vpop.xlane.xlu0 %1649 }
 0x6f5   :  { %v1656_v6 = vpop.xlane.xlu0 %1655 }
 0x6f6   :  { %8993 = vrcp.f32 %v1656_v6 }
 0x6f7   :  { %8995 = vrcp.f32 %v1650_v10 }
 0x6f8   :  { %8997 = vrcp.f32 %v1654_v62 }
 0x6f9   :  { %v1652_v47 = vpop.xlane.xlu0 %1651 }
 0x6fa   :  { %8999 = vrcp.f32 %v1652_v47  ;;  %v2244_v47 = vpack.c.bf16 %v776_v15, %v776_v15 }
 0x6fc   :  { %v2288_v61 = vsel %vm1003_vm2, %v2244_v47, 0 }
 0x700   :  { %v8994_v4 = vpop.eup %8993 }
 0x701   :  { %v527_v7 = vpop.permute.xlu0 %526  ;;  %v8996_v50 = vpop.eup %8995  ;;  %v1700_v45 = vmul.f32 %v8994_v4, %v8990_v60 }
 0x702   :  { %v773_v17 = vadd.f32 %v10093_v37, %v527_v7  ;;  %v8998_v9 = vpop.eup %8997  ;;  %v1697_v40 = vmul.f32 %v8996_v50, %v8988_v63 }
 0x703   :  { %v1699_v6 = vmul.f32 %v8998_v9, %v8986_v31 }
 0x704   :  { %v9000_v35 = vpop.eup %8999  ;;  %v1819_v0 = vpack.c.bf16 %v773_v17, %v773_v17 }
 0x705   :  { %v1698_v22 = vmul.f32 %v9000_v35, %v8992_v49  ;;  %v1714_v10 = vpack.c.bf16 %v1700_v45, %v1699_v6  ;;  %v1825_v37 = vpop.permute.xlu0 %1824 }
 0x706   :  { %8479 = vmatprep.subr.msk.bf16.mxu0 %vm1003_vm2, %v1819_v0  ;;  %v1863_v27 = vsel %vm1003_vm2, %v1819_v0, 0 }
 0x707   :  { %v1713_v62 = vpack.c.bf16 %v1698_v22, %v1697_v40 }
 0x709   :  { %7951 = vmatprep.mubr.bf16.mxu0 %v1713_v62  ;;  %v1829_v40 = vpop.permute.xlu0 %1828 }
 0x70a   :  { %7952 = vmatmul.mubr.bf16.vlgmr.msra.gmra.mrb[48].mxu0 %v1714_v10 }
 0x70b   :  { %7968 = vmatpush3.bf16.msra.mxu0 %v1863_v27  ;;  %7969 = vmatprep.mubr.msk.bf16.mxu0 %vm978_vm1, %v1823_v56  ;;  %v1837_v27 = vpop.permute.xlu1 %1836 }
 0x70c   :  { %8480 = vmatprep.subr.msk.bf16.mxu0 %vm1003_vm2, %v2244_v47 }
 0x70d   :  { %v1833_v15 = vpop.permute.xlu0 %1832 }
 0x70f   :  { %v2250_v4 = vpop.permute.xlu1 %2249 }
 0x711   :  { %v1835_v22 = vpop.permute.xlu0 %1834 }
 0x712   :  { %7970 = vmatmul.mubr.msk.bf16.vlgmr.msra.gmra.mrb[52].mxu0 %vm978_vm1, %v1825_v37 }
 0x713   :  { %8004 = vmatpush3.bf16.msra.mxu0 %v2288_v61  ;;  %7973 = vmatprep.mubr.msk.bf16.mxu0 %vm978_vm1, %v1827_v2  ;;  %v2254_v45 = vpop.permute.xlu1 %2253 }
 0x715   :  { %v2248_v31 = vpop.permute.xlu0 %2247 }
 0x719   :  { %v2252_v17 = vpop.permute.xlu0 %2251 }
 0x71a   :  { %7974 = vmatmul.mubr.msk.bf16.gmra.mrb[56].mxu0 %vm978_vm1, %v1829_v40 }
 0x71b   :  { %7977 = vmatprep.mubr.msk.bf16.mxu0 %vm978_vm1, %v1831_v11 }
 0x71d   :  { %v2256_v62 = vpop.permute.xlu0 %2255 }
 0x722   :  { %7978 = vmatmul.mubr.msk.bf16.gmra.mrb[60].mxu0 %vm978_vm1, %v1833_v15 }
 0x723   :  { %7981 = vmatprep.mubr.msk.bf16.mxu0 %vm978_vm1, %v1835_v22 }
 0x72a   :  { %7982 = vmatmul.mubr.msk.bf16.gmra.mrb[64].mxu0 %vm978_vm1, %v1837_v27 }
 0x72b   :  { %8005 = vmatprep.mubr.msk.bf16.mxu0 %vm978_vm1, %v2248_v31 }
 0x72d   :  { %v7939_v63 = vpop.f32.mrb[36].mxu0 }
 0x72e   :  { %v1490_v60 = vpop.f32.mrb[37].mxu0  ;;  %v1543_v7 = vmul.f32 0.35355338, %v7939_v63  ;;  %v2258_v63 = vpop.permute.xlu1 %2257 }
 0x72f   :  { %v1541_v49 = vmul.f32 0.35355338, %v1490_v60  ;;  %v7940_v56 = vpop.f32.mrb[38].mxu0 }
 0x730   :  { %v1493_v2 = vpop.f32.mrb[39].mxu0  ;;  %v1544_v21 = vmul.f32 0.35355338, %v7940_v56  ;;  %v1559_v35 = vadd.f32 %v1543_v7, %v10169_v23  ;;  %v2260_v56 = vpop.permute.xlu0 %2259 }
 0x731   :  { %v1542_v11 = vmul.f32 0.35355338, %v1493_v2  ;;  %v10484_v50 = vadd.f32 %v1541_v49, %v10181_v3 }
 0x732   :  { %8006 = vmatmul.mubr.msk.bf16.vlgmr.msra.gmra.mrb[68].mxu0 %vm978_vm1, %v2250_v4  ;;  %v1560_v6 = vadd.f32 %v1544_v21, %v10194_v25 }
 0x733   :  { %v10488_v9 = vadd.f32 %v1542_v11, %v10203_v19  ;;  %1577 = vmax.xlane.f32.xlu0 %v10484_v50  ;;  %8009 = vmatprep.mubr.msk.bf16.mxu0 %vm978_vm1, %v2252_v17 }
 0x735   :  { %1579 = vmax.xlane.f32.xlu1 %v10488_v9 }
 0x737   :  { %1581 = vmax.xlane.f32.xlu0 %v1559_v35 }
 0x739   :  { %v7943_v0 = vpop.f32.mrb[40].mxu0 }
 0x73a   :  { %v1506_v10 = vpop.f32.mrb[41].mxu0  ;;  %8010 = vmatmul.mubr.msk.bf16.gmra.mrb[72].mxu0 %vm978_vm1, %v2254_v45  ;;  %v1547_v40 = vmul.f32 0.35355338, %v7943_v0 }
 0x73b   :  { %v1545_v47 = vmul.f32 0.35355338, %v1506_v10  ;;  %1583 = vmax.xlane.f32.xlu0 %v1560_v6  ;;  %v7944_v37 = vpop.f32.mrb[42].mxu0  ;;  %8013 = vmatprep.mubr.msk.bf16.mxu0 %vm978_vm1, %v2256_v62 }
 0x73c   :  { %v1509_v61 = vpop.f32.mrb[43].mxu0  ;;  %v1548_v27 = vmul.f32 0.35355338, %v7944_v37  ;;  %v1563_v60 = vadd.f32 %v1547_v40, %v10212_v34  ;;  %v8875_v40 = vld [vmem:[%s13186_s5 + $0x20] sm:$0xff]  }
 0x73d   :  { %v10498_v15 = vadd.f32 %v1545_v47, %v10221_v43  ;;  %v1546_v22 = vmul.f32 0.35355338, %v1509_v61  ;;  %v2262_v47 = vpop.permute.xlu1 %2261  ;;  %7879 = vmatprep.mubr.msk.bf16.mxu1 %vm50_vm0, %v8875_v40 }
 0x73e   :  { %v1564_v11 = vadd.f32 %v1548_v27, %v10175_v13  ;;  %v8877_v27 = vld [vmem:[%s13186_s5 + $0x30] sm:$0xff]  }
 0x73f   :  { %1585 = vmax.xlane.f32.xlu1 %v10498_v15  ;;  %v10502_v31 = vadd.f32 %v1546_v22, %v10230_v44  ;;  %v8876_v22 = vld [vmem:[%s13186_s5 + $0x28] sm:$0xff]  }
 0x740   :  { %7880 = vmatmul.mubr.msk.bf16.gmra.mrb[24].mxu1 %vm50_vm0, %v8876_v22 }
 0x741   :  { %1587 = vmax.xlane.f32.xlu0 %v10502_v31  ;;  %v7947_v49 = vpop.f32.mrb[44].mxu0  ;;  %7883 = vmatprep.mubr.msk.bf16.mxu1 %vm50_vm0, %v8877_v27 }
 0x742   :  { %v1522_v2 = vpop.f32.mrb[45].mxu0  ;;  %8014 = vmatmul.mubr.msk.bf16.gmra.mrb[76].mxu0 %vm978_vm1, %v2258_v63  ;;  %v1551_v21 = vmul.f32 0.35355338, %v7947_v49 }
 0x743   :  { %v1549_v4 = vmul.f32 0.35355338, %v1522_v2  ;;  %1589 = vmax.xlane.f32.xlu1 %v1563_v60  ;;  %v7948_v7 = vpop.f32.mrb[46].mxu0  ;;  %8017 = vmatprep.mubr.msk.bf16.mxu0 %vm978_vm1, %v2260_v56 }
 0x744   :  { %v1525_v17 = vpop.f32.mrb[47].mxu0  ;;  %v1552_v62 = vmul.f32 0.35355338, %v7948_v7  ;;  %v1567_v37 = vadd.f32 %v1551_v21, %v10239_v57 }
 0x745   :  { %v10510_v45 = vadd.f32 %v1549_v4, %v10248_v5  ;;  %v1550_v0 = vmul.f32 0.35355338, %v1525_v17  ;;  %1591 = vmax.xlane.f32.xlu0 %v1564_v11 }
 0x746   :  { %v1568_v61 = vadd.f32 %v1552_v62, %v10256_v14 }
 0x747   :  { %1593 = vmax.xlane.f32.xlu1 %v10510_v45  ;;  %v10514_v10 = vadd.f32 %v1550_v0, %v10264_v16 }
 0x749   :  { %1595 = vmax.xlane.f32.xlu0 %v10514_v10 }
 0x74a   :  { %8018 = vmatmul.mubr.msk.bf16.gmra.mrb[80].mxu0 %vm978_vm1, %v2262_v47 }
 0x74b   :  { %1597 = vmax.xlane.f32.xlu1 %v1567_v37 }
 0x74d   :  { %1599 = vmax.xlane.f32.xlu0 %v1568_v61 }
 0x7c0   :  { %v1578_v63 = vpop.xlane.xlu0 %1577 }
 0x7c1   :  { %v1605_v49 = vsub.f32 %v10484_v50, %v1578_v63 }
 0x7c2   :  { %v1580_v4 = vpop.xlane.xlu1 %1579 }
 0x7c3   :  { %v1625_v17 = vmul.f32 1.442695, %v1605_v49  ;;  %v1606_v0 = vsub.f32 %v10488_v9, %v1580_v4 }
 0x7c4   :  { %v1582_v56 = vpop.xlane.xlu0 %1581 }
 0x7c5   :  { %v1607_v2 = vsub.f32 %v1559_v35, %v1582_v56  ;;  %v1627_v36 = vmul.f32 1.442695, %v1606_v0 }
 0x7c7   :  { %v1629_v7 = vmul.f32 1.442695, %v1607_v2 }
 0x7c8   :  { %v1584_v21 = vpop.xlane.xlu0 %1583 }
 0x7c9   :  { %9001 = vpow2.f32 %v1629_v7  ;;  %v1608_v62 = vsub.f32 %v1560_v6, %v1584_v21 }
 0x7ca   :  { %9003 = vpow2.f32 %v1625_v17 }
 0x7cb   :  { %v1631_v47 = vmul.f32 1.442695, %v1608_v62 }
 0x7cc   :  { %v1586_v40 = vpop.xlane.xlu1 %1585 }
 0x7cd   :  { %9005 = vpow2.f32 %v1631_v47  ;;  %v1609_v50 = vsub.f32 %v10498_v15, %v1586_v40 }
 0x7ce   :  { %v1588_v22 = vpop.xlane.xlu0 %1587  ;;  %9007 = vpow2.f32 %v1627_v36 }
 0x7cf   :  { %v1610_v49 = vsub.f32 %v10502_v31, %v1588_v22  ;;  %v1633_v2 = vmul.f32 1.442695, %v1609_v50 }
 0x7d0   :  { %v1590_v33 = vpop.xlane.xlu1 %1589 }
 0x7d1   :  { %v1611_v27 = vsub.f32 %v1563_v60, %v1590_v33  ;;  %v1635_v15 = vmul.f32 1.442695, %v1610_v49 }
 0x7d2   :  { %v1592_v35 = vpop.xlane.xlu0 %1591 }
 0x7d3   :  { %v10535_v63 = vpop.eup %9001  ;;  %v1637_v56 = vmul.f32 1.442695, %v1611_v27  ;;  %v1612_v9 = vsub.f32 %v1564_v11, %v1592_v35 }
 0x7d4   :  { %1661 = vadd.xlane.f32.xlu1 %v10535_v63  ;;  %v1594_v6 = vpop.xlane.xlu1 %1593  ;;  %v10539_v7 = vpop.eup %9003 }
 0x7d5   :  { %9009 = vpow2.f32 %v1637_v56  ;;  %v1639_v4 = vmul.f32 1.442695, %v1612_v9  ;;  %v1613_v31 = vsub.f32 %v10510_v45, %v1594_v6  ;;  %v8878_v9 = vld [vmem:[%s13186_s5 + $0x38] sm:$0xff]  }
 0x7d6   :  { %v1596_v17 = vpop.xlane.xlu0 %1595  ;;  %7884 = vmatmul.mubr.msk.bf16.gmra.mrb[28].mxu1 %vm50_vm0, %v8878_v9 }
 0x7d7   :  { %v10541_v36 = vpop.eup %9005  ;;  %9011 = vpow2.f32 %v1639_v4  ;;  %v1614_v0 = vsub.f32 %v10514_v10, %v1596_v17  ;;  %v1641_v40 = vmul.f32 1.442695, %v1613_v31 }
 0x7d8   :  { %1657 = vadd.xlane.f32.xlu1 %v10539_v7  ;;  %1663 = vadd.xlane.f32.xlu0 %v10541_v36  ;;  %v1598_v33 = vpop.xlane.xlu1 %1597  ;;  %9013 = vpow2.f32 %v1633_v2  ;;  %v10546_v21 = vpop.eup %9007 }
 0x7d9   :  { %v1615_v60 = vsub.f32 %v1567_v37, %v1598_v33  ;;  %9015 = vpow2.f32 %v1635_v15  ;;  %v1643_v45 = vmul.f32 1.442695, %v1614_v0  ;;  %v8880_v0 = vld [vmem:[%s13186_s5 + $0x48] sm:$0xff]  }
 0x7da   :  { %v1600_v11 = vpop.xlane.xlu0 %1599 }
 0x7db   :  { %v1645_v62 = vmul.f32 1.442695, %v1615_v60  ;;  %v1616_v47 = vsub.f32 %v1568_v61, %v1600_v11  ;;  %v8879_v60 = vld [vmem:[%s13186_s5 + $0x40] sm:$0xff]  }
 0x7dc   :  { %1659 = vadd.xlane.f32.xlu0 %v10546_v21  ;;  %7887 = vmatprep.mubr.msk.bf16.mxu1 %vm50_vm0, %v8879_v60 }
 0x7dd   :  { %9017 = vpow2.f32 %v1645_v62  ;;  %v1647_v22 = vmul.f32 1.442695, %v1616_v47  ;;  %v10550_v50 = vpop.f32.mrb[48].mxu0 }
 0x7de   :  { %13370 = vst [vmem:[#allocation47_spill] sm:$0xff] %v10550_v50  ;;  %v10552_v27 = vpop.f32.mrb[49].mxu0  ;;  %7888 = vmatmul.mubr.msk.bf16.gmra.mrb[32].mxu1 %vm50_vm0, %v8880_v0  ;;  %v8882_v0 = vld [vmem:[%s13186_s5 + $0x58] sm:$0xff]  }
 0x7df   :  { %13371 = vst [vmem:[#allocation48_spill] sm:$0xff] %v10552_v27  ;;  %v10554_v35 = vpop.eup %9009  ;;  %9019 = vpow2.f32 %v1647_v22  ;;  %v10556_v37 = vpop.f32.mrb[50].mxu0 }
 0x7e0   :  { %13372 = vst [vmem:[#allocation49_spill] sm:$0xff] %v10556_v37  ;;  %v10560_v49 = vpop.f32.mrb[51].mxu0  ;;  %1669 = vadd.xlane.f32.xlu1 %v10554_v35  ;;  %9021 = vpow2.f32 %v1641_v40 }
 0x7e1   :  { %13373 = vst [vmem:[#allocation50_spill] sm:$0xff] %v10560_v49  ;;  %v10563_v61 = vpop.eup %9011  ;;  %9023 = vpow2.f32 %v1643_v45 }
 0x7e2   :  { %1671 = vadd.xlane.f32.xlu0 %v10563_v61  ;;  %v10571_v6 = vpop.eup %9013 }
 0x7e3   :  { %v10575_v2 = vpop.eup %9015 }
 0x7e4   :  { %1665 = vadd.xlane.f32.xlu1 %v10571_v6 }
 0x7e5   :  { %v7971_v4 = vpop.f32.mrb[52].mxu0 }
 0x7e6   :  { %v1899_v17 = vpop.f32.mrb[53].mxu0  ;;  %1667 = vadd.xlane.f32.xlu0 %v10575_v2  ;;  %v1964_v62 = vmul.f32 0.35355338, %v7971_v4 }
 0x7e7   :  { %v10578_v15 = vpop.eup %9017  ;;  %v7972_v33 = vpop.f32.mrb[54].mxu0  ;;  %v1962_v10 = vmul.f32 0.35355338, %v1899_v17 }
 0x7e8   :  { %v1902_v31 = vpop.f32.mrb[55].mxu0  ;;  %1677 = vadd.xlane.f32.xlu1 %v10578_v15  ;;  %v1965_v40 = vmul.f32 0.35355338, %v7972_v33  ;;  %v10598_v9 = vadd.f32 %v1964_v62, %v10132_v8  ;;  %v8881_v33 = vld [vmem:[%s13186_s5 + $0x50] sm:$0xff]  }
 0x7e9   :  { %v10584_v11 = vpop.eup %9019  ;;  %v1963_v29 = vmul.f32 0.35355338, %v1902_v31  ;;  %v10612_v17 = vadd.f32 %v1962_v10, %v10140_v12  ;;  %7891 = vmatprep.mubr.msk.bf16.mxu1 %vm50_vm0, %v8881_v33 }
 0x7ea   :  { %1679 = vadd.xlane.f32.xlu0 %v10584_v11  ;;  %v10591_v47 = vpop.eup %9021  ;;  %v10602_v60 = vadd.f32 %v1965_v40, %v10150_v20  ;;  %7892 = vmatmul.mubr.msk.bf16.gmra.mrb[36].mxu1 %vm50_vm0, %v8882_v0 }
 0x7eb   :  { %v10595_v22 = vpop.eup %9023  ;;  %v10618_v31 = vadd.f32 %v1963_v29, %v10159_v48 }
 0x7ec   :  { %1673 = vadd.xlane.f32.xlu1 %v10591_v47 }
 0x7ed   :  { %v7975_v45 = vpop.f32.mrb[56].mxu0 }
 0x7ee   :  { %v1915_v56 = vpop.f32.mrb[57].mxu0  ;;  %1675 = vadd.xlane.f32.xlu0 %v10595_v22  ;;  %v1968_v62 = vmul.f32 0.35355338, %v7975_v45 }
 0x7ef   :  { %v7976_v4 = vpop.f32.mrb[58].mxu0  ;;  %v1966_v32 = vmul.f32 0.35355338, %v1915_v56 }
 0x7f0   :  { %v1918_v46 = vpop.f32.mrb[59].mxu0  ;;  %1998 = vmax.xlane.f32.xlu1 %v10598_v9  ;;  %v1969_v40 = vmul.f32 0.35355338, %v7976_v4  ;;  %v10622_v38 = vadd.f32 %v1968_v62, %v10169_v23 }
 0x7f1   :  { %v1967_v33 = vmul.f32 0.35355338, %v1918_v46  ;;  %v10630_v29 = vadd.f32 %v1966_v32, %v10181_v3 }
 0x7f2   :  { %2000 = vmax.xlane.f32.xlu0 %v10602_v60  ;;  %v10626_v18 = vadd.f32 %v1969_v40, %v10194_v25 }
 0x7f3   :  { %v10634_v62 = vadd.f32 %v1967_v33, %v10203_v19 }
 0x7f4   :  { %1994 = vmax.xlane.f32.xlu1 %v10612_v17 }
 0x7f5   :  { %v7979_v54 = vpop.f32.mrb[60].mxu0 }
 0x7f6   :  { %v1931_v10 = vpop.f32.mrb[61].mxu0  ;;  %1996 = vmax.xlane.f32.xlu0 %v10618_v31  ;;  %v1972_v4 = vmul.f32 0.35355338, %v7979_v54 }
 0x7f7   :  { %v7980_v45 = vpop.f32.mrb[62].mxu0  ;;  %v1970_v46 = vmul.f32 0.35355338, %v1931_v10 }
 0x7f8   :  { %v1934_v0 = vpop.f32.mrb[63].mxu0  ;;  %2006 = vmax.xlane.f32.xlu1 %v10622_v38  ;;  %v1973_v56 = vmul.f32 0.35355338, %v7980_v45  ;;  %v10638_v40 = vadd.f32 %v1972_v4, %v10212_v34 }
 0x7f9   :  { %v1971_v54 = vmul.f32 0.35355338, %v1934_v0  ;;  %v10646_v45 = vadd.f32 %v1970_v46, %v10221_v43 }
 0x7fa   :  { %2008 = vmax.xlane.f32.xlu0 %v10626_v18  ;;  %v10642_v32 = vadd.f32 %v1973_v56, %v10175_v13 }
 0x7fb   :  { %v10650_v4 = vadd.f32 %v1971_v54, %v10230_v44 }
 0x7fc   :  { %2002 = vmax.xlane.f32.xlu1 %v10630_v29 }
 0x7fd   :  { %v7983_v39 = vpop.f32.mrb[64].mxu0 }
 0x7fe   :  { %v1947_v42 = vpop.f32.mrb[65].mxu0  ;;  %2004 = vmax.xlane.f32.xlu0 %v10634_v62  ;;  %v1976_v33 = vmul.f32 0.35355338, %v7983_v39 }
 0x7ff   :  { %v7984_v24 = vpop.f32.mrb[66].mxu0  ;;  %v1974_v0 = vmul.f32 0.35355338, %v1947_v42 }
 0x800   :  { %v1950_v28 = vpop.f32.mrb[67].mxu0  ;;  %2014 = vmax.xlane.f32.xlu1 %v10638_v40  ;;  %v1977_v10 = vmul.f32 0.35355338, %v7984_v24  ;;  %v10654_v56 = vadd.f32 %v1976_v33, %v10239_v57 }
 0x801   :  { %v1975_v39 = vmul.f32 0.35355338, %v1950_v28  ;;  %v10662_v24 = vadd.f32 %v1974_v0, %v10248_v5 }
 0x802   :  { %2016 = vmax.xlane.f32.xlu0 %v10642_v32  ;;  %v10658_v46 = vadd.f32 %v1977_v10, %v10256_v14 }
 0x803   :  { %v10666_v33 = vadd.f32 %v1975_v39, %v10264_v16 }
 0x804   :  { %2010 = vmax.xlane.f32.xlu1 %v10646_v45 }
 0x805   :  { %v8007_v50 = vpop.f32.mrb[68].mxu0 }
 0x806   :  { %v2324_v37 = vpop.f32.mrb[69].mxu0  ;;  %2012 = vmax.xlane.f32.xlu0 %v10650_v4  ;;  %v2389_v54 = vmul.f32 0.35355338, %v8007_v50 }
 0x807   :  { %v8008_v26 = vpop.f32.mrb[70].mxu0  ;;  %v2387_v28 = vmul.f32 0.35355338, %v2324_v37 }
 0x808   :  { %v2327_v27 = vpop.f32.mrb[71].mxu0  ;;  %2022 = vmax.xlane.f32.xlu1 %v10654_v56  ;;  %v2390_v42 = vmul.f32 0.35355338, %v8008_v26  ;;  %v10670_v10 = vadd.f32 %v2389_v54, %v10132_v8 }
 0x809   :  { %v2388_v50 = vmul.f32 0.35355338, %v2327_v27  ;;  %v10678_v26 = vadd.f32 %v2387_v28, %v10140_v12 }
 0x80a   :  { %2024 = vmax.xlane.f32.xlu0 %v10658_v46  ;;  %v10674_v0 = vadd.f32 %v2390_v42, %v10150_v20 }
 0x80b   :  { %v10682_v54 = vadd.f32 %v2388_v50, %v10159_v48 }
 0x80c   :  { %2018 = vmax.xlane.f32.xlu1 %v10662_v24 }
 0x80d   :  { %v8011_v49 = vpop.f32.mrb[72].mxu0 }
 0x80e   :  { %v2340_v52 = vpop.f32.mrb[73].mxu0  ;;  %2020 = vmax.xlane.f32.xlu0 %v10666_v33  ;;  %v2393_v39 = vmul.f32 0.35355338, %v8011_v49 }
 0x80f   :  { %v8012_v59 = vpop.f32.mrb[74].mxu0  ;;  %v2391_v27 = vmul.f32 0.35355338, %v2340_v52 }
 0x810   :  { %v2343_v51 = vpop.f32.mrb[75].mxu0  ;;  %2423 = vmax.xlane.f32.xlu1 %v10670_v10  ;;  %v2394_v37 = vmul.f32 0.35355338, %v8012_v59  ;;  %v10686_v42 = vadd.f32 %v2393_v39, %v10169_v23 }
 0x811   :  { %v2392_v49 = vmul.f32 0.35355338, %v2343_v51  ;;  %v10694_v59 = vadd.f32 %v2391_v27, %v10181_v3 }
 0x812   :  { %2425 = vmax.xlane.f32.xlu0 %v10674_v0  ;;  %v10690_v28 = vadd.f32 %v2394_v37, %v10194_v25 }
 0x813   :  { %v10698_v39 = vadd.f32 %v2392_v49, %v10203_v19 }
 0x814   :  { %2419 = vmax.xlane.f32.xlu1 %v10678_v26 }
 0x815   :  { %v8015_v8 = vpop.f32.mrb[76].mxu0 }
 0x816   :  { %v2356_v20 = vpop.f32.mrb[77].mxu0  ;;  %2421 = vmax.xlane.f32.xlu0 %v10682_v54  ;;  %v2397_v50 = vmul.f32 0.35355338, %v8015_v8 }
 0x817   :  { %v8016_v1 = vpop.f32.mrb[78].mxu0  ;;  %v2395_v51 = vmul.f32 0.35355338, %v2356_v20 }
 0x818   :  { %v2359_v12 = vpop.f32.mrb[79].mxu0  ;;  %2431 = vmax.xlane.f32.xlu1 %v10686_v42  ;;  %v2398_v52 = vmul.f32 0.35355338, %v8016_v1  ;;  %v10702_v37 = vadd.f32 %v2397_v50, %v10212_v34 }
 0x819   :  { %v2396_v8 = vmul.f32 0.35355338, %v2359_v12  ;;  %v10710_v1 = vadd.f32 %v2395_v51, %v10221_v43 }
 0x81a   :  { %2433 = vmax.xlane.f32.xlu0 %v10690_v28  ;;  %v10706_v27 = vadd.f32 %v2398_v52, %v10175_v13 }
 0x81b   :  { %v10714_v50 = vadd.f32 %v2396_v8, %v10230_v44 }
 0x81c   :  { %2427 = vmax.xlane.f32.xlu1 %v10694_v59 }
 0x81d   :  { %v8019_v23 = vpop.f32.mrb[80].mxu0 }
 0x81e   :  { %v2372_v25 = vpop.f32.mrb[81].mxu0  ;;  %2429 = vmax.xlane.f32.xlu0 %v10698_v39  ;;  %v2401_v49 = vmul.f32 0.35355338, %v8019_v23 }
 0x81f   :  { %v8020_v48 = vpop.f32.mrb[82].mxu0  ;;  %v2399_v52 = vmul.f32 0.35355338, %v2372_v25  ;;  %v496_v25 = vld [vmem:[%s13187_s6 + $0x30] sm:$0xff] }
 0x820   :  { %v2375_v3 = vpop.f32.mrb[83].mxu0  ;;  %2439 = vmax.xlane.f32.xlu1 %v10702_v37  ;;  %v2402_v20 = vmul.f32 0.35355338, %v8020_v48  ;;  %v10718_v34 = vadd.f32 %v2401_v49, %v10239_v57 }
 0x821   :  { %v2400_v51 = vmul.f32 0.35355338, %v2375_v3  ;;  %v10726_v23 = vadd.f32 %v2399_v52, %v10248_v5 }
 0x822   :  { %2441 = vmax.xlane.f32.xlu0 %v10706_v27  ;;  %v10722_v12 = vadd.f32 %v2402_v20, %v10256_v14 }
 0x823   :  { %v10730_v48 = vadd.f32 %v2400_v51, %v10264_v16 }
 0x824   :  { %2435 = vmax.xlane.f32.xlu1 %v10710_v1 }
 0x826   :  { %2437 = vmax.xlane.f32.xlu0 %v10714_v50 }
 0x828   :  { %2447 = vmax.xlane.f32.xlu1 %v10718_v34 }
 0x82a   :  { %2449 = vmax.xlane.f32.xlu0 %v10722_v12 }
 0x82c   :  { %2443 = vmax.xlane.f32.xlu1 %v10726_v23 }
 0x82e   :  { %2445 = vmax.xlane.f32.xlu0 %v10730_v48 }
 0x83d   :  { %546 = vperm.xlu1 %8508, %v496_v25  }
 0x861   :  { %v1662_v3 = vpop.xlane.xlu1 %1661 }
 0x865   :  { %v1664_v8 = vpop.xlane.xlu0 %1663  ;;  %v1658_v49 = vpop.xlane.xlu1 %1657 }
 0x866   :  { %9025 = vrcp.f32 %v1664_v8 }
 0x867   :  { %9027 = vrcp.f32 %v1658_v49 }
 0x868   :  { %9029 = vrcp.f32 %v1662_v3 }
 0x869   :  { %v1660_v20 = vpop.xlane.xlu0 %1659 }
 0x86a   :  { %9031 = vrcp.f32 %v1660_v20 }
 0x86d   :  { %v1670_v52 = vpop.xlane.xlu1 %1669 }
 0x86f   :  { %v1672_v51 = vpop.xlane.xlu0 %1671 }
 0x870   :  { %v9026_v16 = vpop.eup %9025  ;;  %9033 = vrcp.f32 %v1672_v51 }
 0x871   :  { %v1666_v14 = vpop.xlane.xlu1 %1665  ;;  %v9028_v5 = vpop.eup %9027  ;;  %v1704_v25 = vmul.f32 %v9026_v16, %v10541_v36 }
 0x872   :  { %9035 = vrcp.f32 %v1666_v14  ;;  %v9030_v57 = vpop.eup %9029  ;;  %v1701_v8 = vmul.f32 %v9028_v5, %v10539_v7 }
 0x873   :  { %9037 = vrcp.f32 %v1670_v52  ;;  %v1668_v44 = vpop.xlane.xlu0 %1667  ;;  %v1703_v49 = vmul.f32 %v9030_v57, %v10535_v63 }
 0x874   :  { %v9032_v13 = vpop.eup %9031  ;;  %9039 = vrcp.f32 %v1668_v44 }
 0x875   :  { %v1678_v43 = vpop.xlane.xlu1 %1677  ;;  %v1702_v3 = vmul.f32 %v9032_v13, %v10546_v21  ;;  %v1716_v51 = vpack.c.bf16 %v1704_v25, %v1703_v49 }
 0x877   :  { %v1680_v20 = vpop.xlane.xlu0 %1679  ;;  %v1715_v19 = vpack.c.bf16 %v1702_v3, %v1701_v8 }
 0x878   :  { %9041 = vrcp.f32 %v1680_v20 }
 0x879   :  { %7955 = vmatprep.mubr.bf16.mxu1 %v1715_v19  ;;  %v1674_v14 = vpop.xlane.xlu1 %1673 }
 0x87a   :  { %9043 = vrcp.f32 %v1674_v14  ;;  %7956 = vmatmul.mubr.bf16.vlgmr.msra.gmra.mrb[40].mxu1 %v1716_v51  ;;  %v9034_v52 = vpop.eup %9033 }
 0x87b   :  { %9045 = vrcp.f32 %v1678_v43  ;;  %v1676_v41 = vpop.xlane.xlu0 %1675  ;;  %v1708_v57 = vmul.f32 %v9034_v52, %v10563_v61 }
 0x87c   :  { %v9036_v16 = vpop.eup %9035  ;;  %9047 = vrcp.f32 %v1676_v41 }
 0x87d   :  { %v9038_v44 = vpop.eup %9037  ;;  %v1999_v36 = vpop.xlane.xlu1 %1998  ;;  %v1705_v7 = vmul.f32 %v9036_v16, %v10571_v6 }
 0x87e   :  { %v9040_v5 = vpop.eup %9039  ;;  %v2028_v13 = vsub.f32 %v10598_v9, %v1999_v36  ;;  %v1707_v43 = vmul.f32 %v9038_v44, %v10554_v35 }
 0x87f   :  { %v2001_v63 = vpop.xlane.xlu0 %2000  ;;  %v1706_v19 = vmul.f32 %v9040_v5, %v10575_v2 }
 0x880   :  { %v2046_v21 = vmul.f32 1.442695, %v2028_v13  ;;  %v2029_v25 = vsub.f32 %v10602_v60, %v2001_v63  ;;  %v1718_v20 = vpack.c.bf16 %v1708_v57, %v1707_v43 }
 0x881   :  { %v1995_v8 = vpop.xlane.xlu1 %1994  ;;  %v1717_v3 = vpack.c.bf16 %v1706_v19, %v1705_v7 }
 0x882   :  { %9049 = vpow2.f32 %v2046_v21  ;;  %v2048_v41 = vmul.f32 1.442695, %v2029_v25  ;;  %v2026_v49 = vsub.f32 %v10612_v17, %v1995_v8  ;;  %v9042_v9 = vpop.eup %9041 }
 0x883   :  { %v1997_v51 = vpop.xlane.xlu0 %1996  ;;  %7959 = vmatprep.mubr.bf16.mxu1 %v1717_v3  ;;  %v1712_v44 = vmul.f32 %v9042_v9, %v10584_v11 }
 0x884   :  { %v9044_v61 = vpop.eup %9043  ;;  %9051 = vpow2.f32 %v2048_v41  ;;  %v2042_v6 = vmul.f32 1.442695, %v2026_v49  ;;  %v2027_v2 = vsub.f32 %v10618_v31, %v1997_v51  ;;  %7960 = vmatmul.mubr.bf16.gmra.mrb[44].mxu1 %v1718_v20 }
 0x885   :  { %v9046_v14 = vpop.eup %9045  ;;  %v2007_v60 = vpop.xlane.xlu1 %2006  ;;  %v1709_v36 = vmul.f32 %v9044_v61, %v10591_v47 }
 0x886   :  { %v9048_v52 = vpop.eup %9047  ;;  %9053 = vpow2.f32 %v2042_v6  ;;  %v2044_v35 = vmul.f32 1.442695, %v2027_v2  ;;  %v2032_v16 = vsub.f32 %v10622_v38, %v2007_v60  ;;  %v1711_v31 = vmul.f32 %v9046_v14, %v10578_v15 }
 0x887   :  { %v2009_v17 = vpop.xlane.xlu0 %2008  ;;  %v1710_v5 = vmul.f32 %v9048_v52, %v10595_v22 }
 0x888   :  { %9055 = vpow2.f32 %v2044_v35  ;;  %v2054_v13 = vmul.f32 1.442695, %v2032_v16  ;;  %v2033_v57 = vsub.f32 %v10626_v18, %v2009_v17  ;;  %v1720_v38 = vpack.c.bf16 %v1712_v44, %v1711_v31 }
 0x889   :  { %v2003_v63 = vpop.xlane.xlu1 %2002  ;;  %v1719_v7 = vpack.c.bf16 %v1710_v5, %v1709_v36 }
 0x88a   :  { %9057 = vpow2.f32 %v2054_v13  ;;  %v2056_v19 = vmul.f32 1.442695, %v2033_v57  ;;  %v2030_v21 = vsub.f32 %v10630_v29, %v2003_v63 }
 0x88b   :  { %v2005_v25 = vpop.xlane.xlu0 %2004  ;;  %7963 = vmatprep.mubr.bf16.mxu1 %v1719_v7 }
 0x88c   :  { %v10756_v11 = vpop.eup %9049  ;;  %9059 = vpow2.f32 %v2056_v19  ;;  %v2050_v47 = vmul.f32 1.442695, %v2030_v21  ;;  %v2031_v22 = vsub.f32 %v10634_v62, %v2005_v25  ;;  %7964 = vmatmul.mubr.bf16.gmra.mrb[48].mxu1 %v1720_v38 }
 0x88d   :  { %2078 = vadd.xlane.f32.xlu1 %v10756_v11  ;;  %v2015_v18 = vpop.xlane.xlu1 %2014 }
 0x88e   :  { %v10760_v15 = vpop.eup %9051  ;;  %9061 = vpow2.f32 %v2050_v47  ;;  %v2052_v43 = vmul.f32 1.442695, %v2031_v22  ;;  %v2036_v8 = vsub.f32 %v10638_v40, %v2015_v18 }
 0x88f   :  { %2080 = vadd.xlane.f32.xlu0 %v10760_v15  ;;  %v2017_v29 = vpop.xlane.xlu0 %2016 }
 0x890   :  { %v10764_v3 = vpop.eup %9053  ;;  %9063 = vpow2.f32 %v2052_v43  ;;  %v2062_v41 = vmul.f32 1.442695, %v2036_v8  ;;  %v2037_v40 = vsub.f32 %v10642_v32, %v2017_v29 }
 0x891   :  { %2074 = vadd.xlane.f32.xlu1 %v10764_v3  ;;  %v2011_v62 = vpop.xlane.xlu1 %2010 }
 0x892   :  { %v10767_v49 = vpop.eup %9055  ;;  %v2034_v20 = vsub.f32 %v10646_v45, %v2011_v62  ;;  %9065 = vpow2.f32 %v2062_v41  ;;  %v2064_v60 = vmul.f32 1.442695, %v2037_v40 }
 0x893   :  { %2076 = vadd.xlane.f32.xlu0 %v10767_v49  ;;  %v2013_v61 = vpop.xlane.xlu0 %2012 }
 0x894   :  { %v10771_v9 = vpop.eup %9057  ;;  %v2058_v51 = vmul.f32 1.442695, %v2034_v20  ;;  %v2035_v45 = vsub.f32 %v10650_v4, %v2013_v61 }
 0x895   :  { %2086 = vadd.xlane.f32.xlu1 %v10771_v9  ;;  %v2023_v6 = vpop.xlane.xlu1 %2022 }
 0x896   :  { %v10775_v2 = vpop.eup %9059  ;;  %9067 = vpow2.f32 %v2058_v51  ;;  %v2060_v44 = vmul.f32 1.442695, %v2035_v45  ;;  %v2040_v17 = vsub.f32 %v10654_v56, %v2023_v6 }
 0x897   :  { %2088 = vadd.xlane.f32.xlu0 %v10775_v2  ;;  %v2025_v16 = vpop.xlane.xlu0 %2024  ;;  %9069 = vpow2.f32 %v2064_v60 }
 0x898   :  { %v10778_v14 = vpop.eup %9061  ;;  %v2070_v4 = vmul.f32 1.442695, %v2040_v17  ;;  %v2041_v57 = vsub.f32 %v10658_v46, %v2025_v16 }
 0x899   :  { %2082 = vadd.xlane.f32.xlu1 %v10778_v14  ;;  %v2019_v52 = vpop.xlane.xlu1 %2018 }
 0x89a   :  { %v10782_v35 = vpop.eup %9063  ;;  %v2038_v32 = vsub.f32 %v10662_v24, %v2019_v52  ;;  %v2072_v7 = vmul.f32 1.442695, %v2041_v57 }
 0x89b   :  { %2084 = vadd.xlane.f32.xlu0 %v10782_v35  ;;  %v2021_v31 = vpop.xlane.xlu0 %2020 }
 0x89c   :  { %v2066_v36 = vmul.f32 1.442695, %v2038_v32  ;;  %v10787_v13 = vpop.eup %9065  ;;  %v2039_v56 = vsub.f32 %v10666_v33, %v2021_v31 }
 0x89d   :  { %v2424_v5 = vpop.xlane.xlu1 %2423 }
 0x89e   :  { %9071 = vpow2.f32 %v2066_v36  ;;  %v2068_v46 = vmul.f32 1.442695, %v2039_v56  ;;  %v2453_v47 = vsub.f32 %v10670_v10, %v2424_v5 }
 0x89f   :  { %2094 = vadd.xlane.f32.xlu0 %v10787_v13  ;;  %9073 = vpow2.f32 %v2060_v44  ;;  %v2426_v33 = vpop.xlane.xlu0 %2425 }
 0x8a0   :  { %v10791_v63 = vpop.eup %9067  ;;  %9075 = vpow2.f32 %v2070_v4  ;;  %v2454_v10 = vsub.f32 %v10674_v0, %v2426_v33  ;;  %v10832_v4 = vpop.f32.mrb[24].mxu1 }
 0x8a1   :  { %v2420_v24 = vpop.xlane.xlu1 %2419  ;;  %v10795_v21 = vpop.eup %9069  ;;  %9077 = vpow2.f32 %v2072_v7 }
 0x8a2   :  { %v2451_v8 = vsub.f32 %v10678_v26, %v2420_v24  ;;  %v2473_v6 = vmul.f32 1.442695, %v2454_v10  ;;  %v10837_v24 = vpop.f32.mrb[25].mxu1 }
 0x8a3   :  { %2090 = vadd.xlane.f32.xlu0 %v10791_v63  ;;  %v2422_v20 = vpop.xlane.xlu0 %2421 }
 0x8a4   :  { %v2467_v62 = vmul.f32 1.442695, %v2451_v8  ;;  %v2452_v26 = vsub.f32 %v10682_v54, %v2422_v20 }
 0x8a5   :  { %v2432_v19 = vpop.xlane.xlu1 %2431 }
 0x8a6   :  { %v2457_v38 = vsub.f32 %v10686_v42, %v2432_v19  ;;  %v2471_v42 = vmul.f32 1.442695, %v2453_v47  ;;  %v2469_v52 = vmul.f32 1.442695, %v2452_v26 }
 0x8a7   :  { %2096 = vadd.xlane.f32.xlu0 %v10795_v21  ;;  %v2434_v0 = vpop.xlane.xlu0 %2433 }
 0x8a8   :  { %v10799_v25 = vpop.eup %9071  ;;  %v2479_v22 = vmul.f32 1.442695, %v2457_v38  ;;  %v2458_v54 = vsub.f32 %v10690_v28, %v2434_v0 }
 0x8a9   :  { %2098 = vadd.xlane.f32.xlu1 %v10799_v25  ;;  %v2428_v18 = vpop.xlane.xlu1 %2427  ;;  %v10803_v43 = vpop.eup %9073 }
 0x8aa   :  { %9079 = vpow2.f32 %v2479_v22  ;;  %v10807_v41 = vpop.eup %9075  ;;  %v2455_v32 = vsub.f32 %v10694_v59, %v2428_v18  ;;  %v10840_v59 = vpop.f32.mrb[26].mxu1  ;;  %v2481_v7 = vmul.f32 1.442695, %v2458_v54 }
 0x8ab   :  { %2092 = vadd.xlane.f32.xlu0 %v10803_v43  ;;  %9081 = vpow2.f32 %v2068_v46  ;;  %v10813_v51 = vpop.eup %9077  ;;  %v2430_v36 = vpop.xlane.xlu0 %2429 }
 0x8ac   :  { %9083 = vpow2.f32 %v2471_v42  ;;  %v2475_v17 = vmul.f32 1.442695, %v2455_v32  ;;  %v2456_v56 = vsub.f32 %v10698_v39, %v2430_v36  ;;  %v10843_v19 = vpop.f32.mrb[27].mxu1 }
 0x8ad   :  { %v2440_v29 = vpop.xlane.xlu1 %2439  ;;  %9085 = vpow2.f32 %v2467_v62  ;;  %v10845_v38 = vpop.f32.mrb[28].mxu1 }
 0x8ae   :  { %9087 = vpow2.f32 %v2473_v6  ;;  %13374 = vst [vmem:[#allocation51_spill] sm:$0xff] %v10845_v38  ;;  %v10849_v47 = vpop.f32.mrb[29].mxu1  ;;  %v2477_v39 = vmul.f32 1.442695, %v2456_v56  ;;  %v2461_v18 = vsub.f32 %v10702_v37, %v2440_v29 }
 0x8af   :  { %2102 = vadd.xlane.f32.xlu0 %v10807_v41  ;;  %9089 = vpow2.f32 %v2469_v52  ;;  %v10855_v22 = vpop.f32.mrb[30].mxu1  ;;  %v2442_v62 = vpop.xlane.xlu0 %2441 }
 0x8b0   :  { %9091 = vpow2.f32 %v2475_v17  ;;  %13375 = vst [vmem:[#allocation52_spill] sm:$0xff] %v10855_v22  ;;  %v10858_v33 = vpop.f32.mrb[31].mxu1  ;;  %v2487_v20 = vmul.f32 1.442695, %v2461_v18  ;;  %v2462_v32 = vsub.f32 %v10706_v27, %v2442_v62  ;;  %v13422_v22 = vld [vmem:[#allocation27_spill] sm:$0xff] }
 0x8b1   :  { %v10811_v40 = vpop.xlane.xlu1 %2435  ;;  %9093 = vpow2.f32 %v2481_v7  ;;  %v10860_v42 = vpop.f32.mrb[32].mxu1 }
 0x8b2   :  { %13376 = vst [vmem:[#allocation53_spill] sm:$0xff] %v10860_v42  ;;  %v10864_v10 = vpop.f32.mrb[33].mxu1  ;;  %9095 = vpow2.f32 %v2477_v39  ;;  %v2459_v6 = vsub.f32 %v10710_v1, %v10811_v40 }
 0x8b3   :  { %2104 = vadd.xlane.f32.xlu0 %v10813_v51  ;;  %13377 = vst [vmem:[#allocation54_spill] sm:$0xff] %v10864_v10  ;;  %v10869_v26 = vpop.f32.mrb[34].mxu1  ;;  %9097 = vpow2.f32 %v2487_v20  ;;  %v2438_v36 = vpop.xlane.xlu0 %2437 }
 0x8b4   :  { %v10816_v61 = vpop.eup %9079  ;;  %13378 = vst [vmem:[#allocation55_spill] sm:$0xff] %v10869_v26  ;;  %v10871_v37 = vpop.f32.mrb[35].mxu1  ;;  %v2483_v54 = vmul.f32 1.442695, %v2459_v6 }
 0x8b5   :  { %2511 = vadd.xlane.f32.xlu1 %v10816_v61  ;;  %v10820_v60 = vpop.xlane.xlu1 %2447  ;;  %v10822_v45 = vpop.eup %9081  ;;  %13379 = vst [vmem:[#allocation56_spill] sm:$0xff] %v10871_v37  ;;  %v13418_v37 = vld [vmem:[#allocation25_spill] sm:$0xff] }
 0x8b6   :  { %v10828_v44 = vpop.eup %9083  ;;  %9099 = vpow2.f32 %v2483_v54 }
 0x8b7   :  { %2100 = vadd.xlane.f32.xlu0 %v10822_v45  ;;  %v10834_v57 = vpop.eup %9085  ;;  %v2450_v56 = vpop.xlane.xlu0 %2449 }
 0x8b8   :  { %v10847_v46 = vpop.eup %9087 }
 0x8b9   :  { %v10826_v16 = vpop.xlane.xlu1 %2443  ;;  %v10862_v8 = vpop.eup %9089 }
 0x8ba   :  { %v10873_v29 = vpop.eup %9091  ;;  %v2463_v39 = vsub.f32 %v10726_v23, %v10826_v16 }
 0x8bb   :  { %2503 = vadd.xlane.f32.xlu0 %v10828_v44  ;;  %v10885_v40 = vpop.eup %9093  ;;  %v2446_v62 = vpop.xlane.xlu0 %2445 }
 0x8bc   :  { %v10889_v7 = vpop.eup %9095  ;;  %v2491_v6 = vmul.f32 1.442695, %v2463_v39  ;;  %v13387_v39 = vld [vmem:[#allocation13_spill] sm:$0xff] }
 0x8bd   :  { %v547_v5 = vpop.permute.xlu1 %546  ;;  %v10875_v0 = vpop.f32.mrb[36].mxu1 }
 0x8be   :  { %v789_v31 = vadd.f32 %v10313_v53, %v547_v5  ;;  %v497_v53 = vld [vmem:[%s13187_s6 + $0x38] sm:$0xff]  ;;  %13380 = vst [vmem:[#allocation57_spill] sm:$0xff] %v10875_v0  ;;  %v10878_v52 = vpop.f32.mrb[37].mxu1  ;;  %v2489_v5 = vmul.f32 1.442695, %v2462_v32 }
 0x8bf   :  { %2499 = vadd.xlane.f32.xlu0 %v10834_v57  ;;  %13381 = vst [vmem:[#allocation58_spill] sm:$0xff] %v10878_v52  ;;  %v10881_v17 = vpop.f32.mrb[38].mxu1 }
 0x8c0   :  { %v1821_v28 = vpack.c.bf16 %v789_v31, %v789_v31  ;;  %13382 = vst [vmem:[#allocation59_spill] sm:$0xff] %v10881_v17  ;;  %v10883_v1 = vpop.f32.mrb[39].mxu1  ;;  %v2460_v31 = vsub.f32 %v10714_v50, %v2438_v36  ;;  %9101 = vpow2.f32 %v2489_v5  ;;  %v2466_v50 = vsub.f32 %v10722_v12, %v2450_v56  ;;  %v499_v5 = vld [vmem:[%s13187_s6 + $0x48] sm:$0xff]  ;;  %v13384_v56 = vld [vmem:[#allocation8_spill] sm:$0xff] }
 0x8c1   :  { %13383 = vst [vmem:[#allocation60_spill] sm:$0xff] %v10883_v1 }
 0x8c2   :  { %7985 = vmatprep.subr.bf16.mxu1 %v1821_v28  ;;  %v2485_v27 = vmul.f32 1.442695, %v2460_v31  ;;  %v2497_v32 = vmul.f32 1.442695, %v2466_v50  ;;  %v498_v31 = vld [vmem:[%s13187_s6 + $0x40] sm:$0xff] }
 0x8c3   :  { %2505 = vadd.xlane.f32.xlu0 %v10847_v46  ;;  %7986 = vmatpush3.bf16.xpose.msra.mxu1 %v1821_v28  ;;  %v2465_v28 = vsub.f32 %v10718_v34, %v10820_v60  ;;  %v2464_v34 = vsub.f32 %v10730_v48, %v2446_v62 }
 0x8c4   :  { %9103 = vpow2.f32 %v2485_v27  ;;  %v13385_v27 = vld [vmem:[#allocation9_spill] sm:$0xff] }
 0x8c5   :  { %v2495_v18 = vmul.f32 1.442695, %v2465_v28  ;;  %v2493_v23 = vmul.f32 1.442695, %v2464_v34  ;;  %v13386_v28 = vld [vmem:[#allocation10_spill] sm:$0xff]  ;;  %v501_v34 = vld [vmem:[%s13187_s6 + $0x58] sm:$0xff] }
 0x8c6   :  { %551 = vperm.xlu1 %8508, %v497_v53   ;;  %v10894_v53 = vpop.eup %9097 }
 0x8c7   :  { %2501 = vadd.xlane.f32.xlu0 %v10862_v8  ;;  %v10900_v20 = vpop.eup %9099  ;;  %9105 = vpow2.f32 %v2495_v18  ;;  %v13388_v18 = vld [vmem:[#allocation11_spill] sm:$0xff] }
 0x8c8   :  { %9107 = vpow2.f32 %v2491_v6 }
 0x8c9   :  { %9109 = vpow2.f32 %v2497_v32 }
 0x8ca   :  { %v10904_v60 = vpop.eup %9101  ;;  %9111 = vpow2.f32 %v2493_v23 }
 0x8cb   :  { %2507 = vadd.xlane.f32.xlu0 %v10873_v29 }
 0x8ce   :  { %v10907_v16 = vpop.eup %9103 }
 0x8cf   :  { %2513 = vadd.xlane.f32.xlu0 %v10885_v40 }
 0x8d1   :  { %v10910_v12 = vpop.eup %9105 }
 0x8d2   :  { %v10913_v54 = vpop.eup %9107 }
 0x8d3   :  { %2509 = vadd.xlane.f32.xlu0 %v10889_v7  ;;  %v10915_v36 = vpop.eup %9109 }
 0x8d4   :  { %v10919_v48 = vpop.eup %9111 }
 0x8d7   :  { %2519 = vadd.xlane.f32.xlu0 %v10894_v53 }
 0x8db   :  { %2515 = vadd.xlane.f32.xlu0 %v10900_v20 }
 0x8df   :  { %2521 = vadd.xlane.f32.xlu0 %v10904_v60 }
 0x8e3   :  { %2517 = vadd.xlane.f32.xlu0 %v10907_v16 }
 0x8e7   :  { %2527 = vadd.xlane.f32.xlu0 %v10910_v12 }
 0x8ea   :  { %2523 = vadd.xlane.f32.xlu1 %v10913_v54 }
 0x8eb   :  { %2529 = vadd.xlane.f32.xlu0 %v10915_v36 }
 0x8ef   :  { %2525 = vadd.xlane.f32.xlu0 %v10919_v48 }
 0x8fb   :  { %3109 = vrot.lane.b32.xlu1 %v10075_v55, %s9718_s0 }
 0x8ff   :  { %561 = vperm.xlu1 %8508, %v499_v5  }
 0x903   :  { %3121 = vrot.lane.b32.xlu1 %v10089_v58, %s9718_s0 }
 0x905   :  { %556 = vperm.xlu0 %8507, %v498_v31  }
 0x907   :  { %3534 = vrot.lane.b32.xlu1 %v10075_v55, %s9719_s24 }
 0x909   :  { %3107 = vrot.lane.b32.xlu0 %v10077_v30, %s9718_s0 }
 0x90b   :  { %3538 = vrot.lane.b32.xlu1 %v13384_v56, %s9719_s24 }
 0x90d   :  { %3111 = vrot.lane.b32.xlu0 %v13385_v27, %s9718_s0 }
 0x90f   :  { %3542 = vrot.lane.b32.xlu1 %v13386_v28, %s9719_s24 }
 0x911   :  { %3113 = vrot.lane.b32.xlu0 %v13384_v56, %s9718_s0 }
 0x913   :  { %3544 = vrot.lane.b32.xlu1 %v13387_v39, %s9719_s24 }
 0x915   :  { %3115 = vrot.lane.b32.xlu0 %v13388_v18, %s9718_s0 }
 0x917   :  { %3957 = vrot.lane.b32.xlu1 %v10077_v30, %s9720_s3 }
 0x919   :  { %3117 = vrot.lane.b32.xlu0 %v13386_v28, %s9718_s0 }
 0x91a   :  { %v2079_v50 = vpop.xlane.xlu1 %2078 }
 0x91b   :  { %3961 = vrot.lane.b32.xlu1 %v13385_v27, %s9720_s3 }
 0x91c   :  { %v2081_v62 = vpop.xlane.xlu0 %2080 }
 0x91d   :  { %3119 = vrot.lane.b32.xlu0 %v13387_v39, %s9718_s0  ;;  %9113 = vrcp.f32 %v2081_v62 }
 0x91e   :  { %v2075_v6 = vpop.xlane.xlu1 %2074 }
 0x91f   :  { %9115 = vrcp.f32 %v2075_v6  ;;  %3965 = vrot.lane.b32.xlu1 %v13388_v18, %s9720_s3 }
 0x920   :  { %9117 = vrcp.f32 %v2079_v50  ;;  %v2077_v32 = vpop.xlane.xlu0 %2076 }
 0x921   :  { %9119 = vrcp.f32 %v2077_v32  ;;  %3532 = vrot.lane.b32.xlu0 %v10077_v30, %s9719_s24 }
 0x922   :  { %v2087_v23 = vpop.xlane.xlu1 %2086 }
 0x923   :  { %571 = vperm.xlu1 %8508, %v501_v34   ;;  %v500_v34 = vld [vmem:[%s13187_s6 + $0x50] sm:$0xff] }
 0x924   :  { %v2089_v5 = vpop.xlane.xlu0 %2088 }
 0x925   :  { %3536 = vrot.lane.b32.xlu0 %v13385_v27, %s9719_s24  ;;  %9121 = vrcp.f32 %v2089_v5 }
 0x926   :  { %v2083_v31 = vpop.xlane.xlu1 %2082 }
 0x927   :  { %9123 = vrcp.f32 %v2083_v31  ;;  %3971 = vrot.lane.b32.xlu1 %v10089_v58, %s9720_s3  ;;  %v9114_v50 = vpop.eup %9113 }
 0x928   :  { %9125 = vrcp.f32 %v2087_v23  ;;  %v2085_v62 = vpop.xlane.xlu0 %2084  ;;  %v2125_v5 = vmul.f32 %v9114_v50, %v10760_v15 }
 0x929   :  { %v9116_v6 = vpop.eup %9115  ;;  %9127 = vrcp.f32 %v2085_v62  ;;  %3540 = vrot.lane.b32.xlu0 %v13388_v18, %s9719_s24 }
 0x92a   :  { %v9118_v32 = vpop.eup %9117  ;;  %v2122_v23 = vmul.f32 %v9116_v6, %v10764_v3 }
 0x92b   :  { %v9120_v17 = vpop.eup %9119  ;;  %4384 = vrot.lane.b32.xlu1 %v10075_v55, %s9721_s2  ;;  %v2124_v0 = vmul.f32 %v9118_v32, %v10756_v11 }
 0x92c   :  { %v2095_v31 = vpop.xlane.xlu0 %2094  ;;  %v2123_v62 = vmul.f32 %v9120_v17, %v10767_v49 }
 0x92d   :  { %566 = vperm.xlu0 %8507, %v500_v34   ;;  %v2139_v52 = vpack.c.bf16 %v2125_v5, %v2124_v0 }
 0x92e   :  { %v2138_v1 = vpack.c.bf16 %v2123_v62, %v2122_v23 }
 0x92f   :  { %4388 = vrot.lane.b32.xlu1 %v13384_v56, %s9721_s2  ;;  %v9122_v26 = vpop.eup %9121 }
 0x930   :  { %v2091_v42 = vpop.xlane.xlu0 %2090  ;;  %7987 = vmatprep.mubr.bf16.mxu1 %v2138_v1  ;;  %v2129_v11 = vmul.f32 %v9122_v26, %v10775_v2  ;;  %v13389_v2 = vld [vmem:[#allocation50_spill] sm:$0xff] }
 0x931   :  { %v9124_v15 = vpop.eup %9123  ;;  %3546 = vrot.lane.b32.xlu0 %v10089_v58, %s9719_s24  ;;  %7988 = vmatmul.mubr.bf16.vlgmr.msra.gmra.mrb[52].mxu1 %v2139_v52 }
 0x932   :  { %v9126_v50 = vpop.eup %9125  ;;  %v2126_v17 = vmul.f32 %v9124_v15, %v10778_v14  ;;  %v13390_v14 = vld [vmem:[#allocation48_spill] sm:$0xff] }
 0x933   :  { %v9128_v3 = vpop.eup %9127  ;;  %4392 = vrot.lane.b32.xlu1 %v13386_v28, %s9721_s2  ;;  %v2128_v1 = vmul.f32 %v9126_v50, %v10771_v9  ;;  %v13391_v9 = vpack.i.bf16 %v13389_v2, %v13390_v14 }
 0x934   :  { %v2097_v49 = vpop.xlane.xlu0 %2096  ;;  %v2127_v0 = vmul.f32 %v9128_v3, %v10782_v35 }
 0x935   :  { %3959 = vrot.lane.b32.xlu0 %v10075_v55, %s9720_s3  ;;  %9129 = vrcp.f32 %v2097_v49  ;;  %v2141_v52 = vpack.c.bf16 %v2129_v11, %v2128_v1  ;;  %v13392_v1 = vld [vmem:[#allocation30_spill] sm:$0xff] }
 0x936   :  { %v2140_v6 = vpack.c.bf16 %v2127_v0, %v2126_v17  ;;  %9131 = vrcp.f32 %v2091_v42  ;;  %v2099_v42 = vpop.xlane.xlu1 %2098 }
 0x937   :  { %4396 = vrot.lane.b32.xlu1 %v10089_v58, %s9721_s2  ;;  %9133 = vrcp.f32 %v2095_v31 }
 0x938   :  { %v2093_v32 = vpop.xlane.xlu0 %2092  ;;  %7991 = vmatprep.mubr.bf16.mxu1 %v2140_v6 }
 0x939   :  { %9135 = vrcp.f32 %v2093_v32  ;;  %3963 = vrot.lane.b32.xlu0 %v13384_v56, %s9720_s3  ;;  %7992 = vmatmul.mubr.bf16.gmra.mrb[56].mxu1 %v2141_v52 }
 0x93b   :  { %8510 = vrot.lane.b32.xlu1 %v13391_v9, %s9722_s28 }
 0x93c   :  { %v2103_v35 = vpop.xlane.xlu0 %2102 }
 0x93d   :  { %3967 = vrot.lane.b32.xlu0 %v13386_v28, %s9720_s3 }
 0x93f   :  { %v9130_v26 = vpop.eup %9129 }
 0x940   :  { %v2105_v34 = vpop.xlane.xlu0 %2104  ;;  %v9132_v5 = vpop.eup %9131  ;;  %v2133_v15 = vmul.f32 %v9130_v26, %v10795_v21 }
 0x941   :  { %3969 = vrot.lane.b32.xlu0 %v13387_v39, %s9720_s3  ;;  %v9134_v31 = vpop.eup %9133  ;;  %9137 = vrcp.f32 %v2105_v34  ;;  %v2130_v3 = vmul.f32 %v9132_v5, %v10791_v63 }
 0x942   :  { %v10994_v23 = vpop.xlane.xlu1 %2511  ;;  %9139 = vrcp.f32 %v2099_v42  ;;  %v2132_v49 = vmul.f32 %v9134_v31, %v10787_v13 }
 0x943   :  { %v9136_v62 = vpop.eup %9135  ;;  %9141 = vrcp.f32 %v2103_v35 }
 0x944   :  { %v2101_v50 = vpop.xlane.xlu0 %2100  ;;  %v2131_v11 = vmul.f32 %v9136_v62, %v10803_v43  ;;  %v2143_v52 = vpack.c.bf16 %v2133_v15, %v2132_v49 }
 0x945   :  { %9143 = vrcp.f32 %v2101_v50  ;;  %4382 = vrot.lane.b32.xlu0 %v10077_v30, %s9721_s2 }
 0x946   :  { %v552_v17 = vpop.permute.xlu1 %551  ;;  %v2142_v0 = vpack.c.bf16 %v2131_v11, %v2130_v3 }
 0x947   :  { %v792_v6 = vadd.f32 %v13392_v1, %v552_v17  ;;  %v13394_v17 = vld [vmem:[#allocation47_spill] sm:$0xff] }
 0x948   :  { %v2504_v32 = vpop.xlane.xlu0 %2503  ;;  %7995 = vmatprep.mubr.bf16.mxu1 %v2142_v0 }
 0x949   :  { %v2246_v21 = vpack.c.bf16 %v792_v6, %v792_v6  ;;  %4386 = vrot.lane.b32.xlu0 %v13385_v27, %s9721_s2  ;;  %7996 = vmatmul.mubr.bf16.gmra.mrb[60].mxu1 %v2143_v52 }
 0x94b   :  { %8021 = vmatprep.subr.bf16.mxu1 %v2246_v21  ;;  %v9138_v63 = vpop.eup %9137 }
 0x94c   :  { %v2500_v43 = vpop.xlane.xlu0 %2499  ;;  %8022 = vmatpush3.bf16.xpose.msra.mxu1 %v2246_v21  ;;  %v9140_v2 = vpop.eup %9139  ;;  %v2137_v26 = vmul.f32 %v9138_v63, %v10813_v51 }
 0x94d   :  { %v7957_v14 = vpop.f32.mrb[40].mxu1  ;;  %4390 = vrot.lane.b32.xlu0 %v13388_v18, %s9721_s2  ;;  %v9142_v13 = vpop.eup %9141  ;;  %v2134_v62 = vmul.f32 %v9140_v2, %v10799_v25  ;;  %9145 = vrcp.f32 %v2500_v43  ;;  %v13393_v25 = vld [vmem:[#allocation49_spill] sm:$0xff]  ;;  %v13424_v18 = vld [vmem:[#allocation28_spill] sm:$0xff] }
 0x94e   :  { %v1771_v9 = vpop.f32.mrb[41].mxu1  ;;  %v2136_v3 = vmul.f32 %v9142_v13, %v10807_v41  ;;  %v502_v13 = vld [vmem:[%s13187_s6 + $0x60] sm:$0xff] }
 0x94f   :  { %v9144_v35 = vpop.eup %9143  ;;  %v7958_v42 = vpop.f32.mrb[42].mxu1 }
 0x950   :  { %v8524_v34 = vpack.i.bf16 %v7958_v42, %v7957_v14  ;;  %v1774_v5 = vpop.f32.mrb[43].mxu1  ;;  %v2506_v31 = vpop.xlane.xlu0 %2505  ;;  %v2135_v15 = vmul.f32 %v9144_v35, %v10822_v45  ;;  %v2145_v49 = vpack.c.bf16 %v2137_v26, %v2136_v3  ;;  %v13395_v45 = vpack.i.bf16 %v13393_v25, %v13394_v17 }
 0x951   :  { %v8519_v50 = vpack.i.bf16 %v1774_v5, %v1771_v9  ;;  %4394 = vrot.lane.b32.xlu0 %v13387_v39, %s9721_s2  ;;  %9147 = vrcp.f32 %v2506_v31  ;;  %v8883_v9 = vld [vmem:[%s13188_s7] sm:$0xff]  }
 0x952   :  { %v2144_v11 = vpack.c.bf16 %v2135_v15, %v2134_v62  ;;  %9149 = vrcp.f32 %v2504_v32  ;;  %8039 = vmatprep.subr.bf16.mxu0 %v8883_v9 }
 0x953   :  { %8520 = vrot.lane.b32.xlu1 %v8519_v50, %s9722_s28  ;;  %8040 = vmatpush3.bf16.msra.mxu0 %v8883_v9 }
 0x954   :  { %v2502_v51 = vpop.xlane.xlu0 %2501  ;;  %7999 = vmatprep.mubr.bf16.mxu1 %v2144_v11 }
 0x955   :  { %9151 = vrcp.f32 %v2502_v51  ;;  %8515 = vrot.lane.b32.xlu0 %v13395_v45, %s9722_s28  ;;  %8000 = vmatmul.mubr.bf16.gmra.mrb[64].mxu1 %v2145_v49 }
 0x957   :  { %v7961_v0 = vpop.f32.mrb[44].mxu1  ;;  %v9146_v43 = vpop.eup %9145 }
 0x958   :  { %v1787_v1 = vpop.f32.mrb[45].mxu1  ;;  %v2508_v6 = vpop.xlane.xlu0 %2507  ;;  %v2547_v31 = vmul.f32 %v9146_v43, %v10834_v57 }
 0x959   :  { %v7962_v41 = vpop.f32.mrb[46].mxu1  ;;  %8525 = vrot.lane.b32.xlu0 %v8524_v34, %s9722_s28 }
 0x95a   :  { %v8534_v52 = vpack.i.bf16 %v7962_v41, %v7961_v0  ;;  %v1790_v21 = vpop.f32.mrb[47].mxu1 }
 0x95b   :  { %v8529_v63 = vpack.i.bf16 %v1790_v21, %v1787_v1  ;;  %v9148_v2 = vpop.eup %9147 }
 0x95c   :  { %v2514_v32 = vpop.xlane.xlu0 %2513  ;;  %v9150_v14 = vpop.eup %9149  ;;  %v2550_v26 = vmul.f32 %v9148_v2, %v10847_v46  ;;  %v8884_v46 = vld [vmem:[%s13188_s7 + $0x8] sm:$0xff]  }
 0x95d   :  { %8535 = vrot.lane.b32.xlu0 %v8534_v52, %s9722_s28  ;;  %8530 = vrot.lane.b32.xlu1 %v8529_v63, %s9722_s28  ;;  %9153 = vrcp.f32 %v2514_v32  ;;  %v2549_v50 = vmul.f32 %v9150_v14, %v10828_v44  ;;  %v503_v44 = vld [vmem:[%s13187_s6 + $0x68] sm:$0xff] }
 0x95e   :  { %9155 = vrcp.f32 %v2508_v6  ;;  %8041 = vmatprep.subr.bf16.mxu0 %v8884_v46 }
 0x95f   :  { %v9152_v35 = vpop.eup %9151  ;;  %v7965_v42 = vpop.f32.mrb[48].mxu1  ;;  %9157 = vrcp.f32 %v10994_v23  ;;  %v2564_v57 = vpack.c.bf16 %v2550_v26, %v2549_v50  ;;  %8042 = vmatpush3.bf16.msra.mxu0 %v8884_v46 }
 0x960   :  { %v1803_v34 = vpop.f32.mrb[49].mxu1  ;;  %v2510_v5 = vpop.xlane.xlu0 %2509  ;;  %v2548_v62 = vmul.f32 %v9152_v35, %v10862_v8 }
 0x961   :  { %9159 = vrcp.f32 %v2510_v5  ;;  %v7966_v15 = vpop.f32.mrb[50].mxu1  ;;  %576 = vperm.xlu0 %8507, %v502_v13  }
 0x962   :  { %v8544_v3 = vpack.i.bf16 %v7966_v15, %v7965_v42  ;;  %v1806_v11 = vpop.f32.mrb[51].mxu1  ;;  %v2563_v49 = vpack.c.bf16 %v2548_v62, %v2547_v31 }
 0x963   :  { %v8539_v23 = vpack.i.bf16 %v1806_v11, %v1803_v34 }
 0x964   :  { %v2520_v51 = vpop.xlane.xlu0 %2519  ;;  %8023 = vmatprep.mubr.bf16.mxu1 %v2563_v49 }
 0x965   :  { %8545 = vrot.lane.b32.xlu0 %v8544_v3, %s9722_s28  ;;  %8540 = vrot.lane.b32.xlu1 %v8539_v23, %s9722_s28 }
 0x966   :  { %8024 = vmatmul.mubr.bf16.vlgmr.msra.gmra.mrb[68].mxu1 %v2564_v57 }
 0x967   :  { %v9154_v8 = vpop.eup %9153 }
 0x968   :  { %v2516_v25 = vpop.xlane.xlu0 %2515  ;;  %v9156_v17 = vpop.eup %9155  ;;  %v2554_v1 = vmul.f32 %v9154_v8, %v10885_v40 }
 0x969   :  { %581 = vperm.xlu0 %8507, %v503_v44   ;;  %v9158_v45 = vpop.eup %9157  ;;  %v2551_v41 = vmul.f32 %v9156_v17, %v10873_v29 }
 0x96a   :  { %v2553_v21 = vmul.f32 %v9158_v45, %v10816_v61 }
 0x96b   :  { %v9160_v0 = vpop.eup %9159 }
 0x96c   :  { %v2522_v6 = vpop.xlane.xlu0 %2521  ;;  %v2552_v52 = vmul.f32 %v9160_v0, %v10889_v7  ;;  %v2566_v43 = vpack.c.bf16 %v2554_v1, %v2553_v21 }
 0x96d   :  { %9161 = vrcp.f32 %v2522_v6 }
 0x96e   :  { %v2565_v63 = vpack.c.bf16 %v2552_v52, %v2551_v41  ;;  %9163 = vrcp.f32 %v2516_v25 }
 0x96f   :  { %9165 = vrcp.f32 %v2520_v51 }
 0x970   :  { %v2518_v32 = vpop.xlane.xlu0 %2517  ;;  %8027 = vmatprep.mubr.bf16.mxu1 %v2565_v63 }
 0x971   :  { %9167 = vrcp.f32 %v2518_v32  ;;  %8028 = vmatmul.mubr.bf16.gmra.mrb[72].mxu1 %v2566_v43 }
 0x974   :  { %v2528_v2 = vpop.xlane.xlu0 %2527 }
 0x977   :  { %v2524_v14 = vpop.xlane.xlu1 %2523  ;;  %v9162_v13 = vpop.eup %9161 }
 0x978   :  { %v2530_v40 = vpop.xlane.xlu0 %2529  ;;  %v9164_v9 = vpop.eup %9163  ;;  %v2558_v61 = vmul.f32 %v9162_v13, %v10904_v60 }
 0x979   :  { %v9166_v35 = vpop.eup %9165  ;;  %9169 = vrcp.f32 %v2530_v40  ;;  %v2555_v26 = vmul.f32 %v9164_v9, %v10900_v20 }
 0x97a   :  { %9171 = vrcp.f32 %v2524_v14  ;;  %v2557_v5 = vmul.f32 %v9166_v35, %v10894_v53 }
 0x97b   :  { %v9168_v29 = vpop.eup %9167  ;;  %v3110_v7 = vpop.permute.xlu1 %3109  ;;  %9173 = vrcp.f32 %v2528_v2 }
 0x97c   :  { %v2526_v42 = vpop.xlane.xlu0 %2525  ;;  %v2556_v34 = vmul.f32 %v9168_v29, %v10907_v16  ;;  %v2568_v15 = vpack.c.bf16 %v2558_v61, %v2557_v5 }
 0x97d   :  { %9175 = vrcp.f32 %v2526_v42 }
 0x97e   :  { %v2567_v31 = vpack.c.bf16 %v2556_v34, %v2555_v26 }
 0x97f   :  { %v562_v62 = vpop.permute.xlu1 %561 }
 0x980   :  { %8031 = vmatprep.mubr.bf16.mxu1 %v2567_v31  ;;  %v800_v60 = vadd.f32 %v10843_v19, %v562_v62 }
 0x981   :  { %8032 = vmatmul.mubr.bf16.gmra.mrb[76].mxu1 %v2568_v15 }
 0x982   :  { %v3529_v25 = vpack.c.bf16 %v800_v60, %v800_v60 }
 0x983   :  { %v3122_v50 = vpop.permute.xlu1 %3121  ;;  %v9170_v3 = vpop.eup %9169 }
 0x984   :  { %v557_v11 = vpop.permute.xlu0 %556  ;;  %v9172_v49 = vpop.eup %9171  ;;  %v2562_v57 = vmul.f32 %v9170_v3, %v10915_v36  ;;  %v3573_v6 = vsel %vm1003_vm2, %v3529_v25, 0 }
 0x985   :  { %v797_v46 = vadd.f32 %v10837_v24, %v557_v11  ;;  %v9174_v23 = vpop.eup %9173  ;;  %v2559_v44 = vmul.f32 %v9172_v49, %v10913_v54 }
 0x986   :  { %v2561_v19 = vmul.f32 %v9174_v23, %v10910_v12 }
 0x987   :  { %v9176_v20 = vpop.eup %9175  ;;  %v3104_v51 = vpack.c.bf16 %v797_v46, %v797_v46  ;;  %v3535_v16 = vpop.permute.xlu1 %3534 }
 0x988   :  { %v3108_v53 = vpop.permute.xlu0 %3107  ;;  %v2560_v8 = vmul.f32 %v9176_v20, %v10919_v48  ;;  %v2570_v0 = vpack.c.bf16 %v2562_v57, %v2561_v19 }
 0x989   :  { %8481 = vmatprep.subr.msk.bf16.mxu1 %vm1003_vm2, %v3104_v51  ;;  %v3148_v17 = vsel %vm1003_vm2, %v3104_v51, 0 }
 0x98a   :  { %8060 = vmatpush3.bf16.msra.mxu1 %v3148_v17  ;;  %v2569_v24 = vpack.c.bf16 %v2560_v8, %v2559_v44 }
 0x98b   :  { %8482 = vmatprep.subr.msk.bf16.mxu1 %vm1003_vm2, %v3529_v25  ;;  %v3539_v45 = vpop.permute.xlu1 %3538 }
 0x98c   :  { %v3112_v1 = vpop.permute.xlu0 %3111  ;;  %8035 = vmatprep.mubr.bf16.mxu1 %v2569_v24 }
 0x98d   :  { %8036 = vmatmul.mubr.bf16.gmra.mrb[80].mxu1 %v2570_v0 }
 0x98e   :  { %8061 = vmatprep.mubr.msk.bf16.mxu1 %vm978_vm1, %v3108_v53 }
 0x98f   :  { %v3543_v54 = vpop.permute.xlu1 %3542 }
 0x990   :  { %v3114_v36 = vpop.permute.xlu0 %3113 }
 0x993   :  { %v3545_v41 = vpop.permute.xlu1 %3544 }
 0x994   :  { %v3116_v48 = vpop.permute.xlu0 %3115 }
 0x995   :  { %8062 = vmatmul.mubr.msk.bf16.vlgmr.msra.gmra.mrb[84].mxu1 %vm978_vm1, %v3110_v7 }
 0x996   :  { %8096 = vmatpush3.bf16.msra.mxu1 %v3573_v6  ;;  %8065 = vmatprep.mubr.msk.bf16.mxu1 %vm978_vm1, %v3112_v1 }
 0x997   :  { %v3958_v52 = vpop.permute.xlu1 %3957 }
 0x998   :  { %v3118_v12 = vpop.permute.xlu0 %3117 }
 0x99b   :  { %v3962_v43 = vpop.permute.xlu1 %3961 }
 0x99c   :  { %v3120_v21 = vpop.permute.xlu0 %3119 }
 0x99d   :  { %8066 = vmatmul.mubr.msk.bf16.gmra.mrb[88].mxu1 %vm978_vm1, %v3114_v36 }
 0x99e   :  { %8069 = vmatprep.mubr.msk.bf16.mxu1 %vm978_vm1, %v3116_v48 }
 0x99f   :  { %v3966_v2 = vpop.permute.xlu1 %3965 }
 0x9a0   :  { %v3533_v63 = vpop.permute.xlu0 %3532 }
 0x9a3   :  { %v572_v9 = vpop.permute.xlu1 %571 }
 0x9a4   :  { %v3537_v32 = vpop.permute.xlu0 %3536  ;;  %v808_v7 = vadd.f32 %v10840_v59, %v572_v9 }
 0x9a5   :  { %8070 = vmatmul.mubr.msk.bf16.gmra.mrb[92].mxu1 %vm978_vm1, %v3118_v12 }
 0x9a6   :  { %8073 = vmatprep.mubr.msk.bf16.mxu1 %vm978_vm1, %v3120_v21  ;;  %v4379_v42 = vpack.c.bf16 %v808_v7, %v808_v7 }
 0x9a7   :  { %v3972_v20 = vpop.permute.xlu1 %3971 }
 0x9a8   :  { %v3541_v14 = vpop.permute.xlu0 %3540  ;;  %v4423_v3 = vsel %vm1003_vm2, %v4379_v42, 0 }
 0x9ab   :  { %v4385_v51 = vpop.permute.xlu1 %4384 }
 0x9ac   :  { %v567_v13 = vpop.permute.xlu0 %566 }
 0x9ad   :  { %v805_v40 = vadd.f32 %v10832_v4, %v567_v13  ;;  %8074 = vmatmul.mubr.msk.bf16.gmra.mrb[96].mxu1 %vm978_vm1, %v3122_v50 }
 0x9ae   :  { %8097 = vmatprep.mubr.msk.bf16.mxu1 %vm978_vm1, %v3533_v63 }
 0x9af   :  { %v3954_v35 = vpack.c.bf16 %v805_v40, %v805_v40 }
 0x9b0   :  { %v3547_v29 = vpop.permute.xlu0 %3546 }
 0x9b1   :  { %8483 = vmatprep.subr.msk.bf16.mxu1 %vm1003_vm2, %v3954_v35  ;;  %v3998_v26 = vsel %vm1003_vm2, %v3954_v35, 0 }
 0x9b4   :  { %v3960_v61 = vpop.permute.xlu0 %3959 }
 0x9b5   :  { %8098 = vmatmul.mubr.msk.bf16.vlgmr.msra.gmra.mrb[100].mxu1 %vm978_vm1, %v3535_v16  ;;  %v4389_v16 = vpop.permute.xlu1 %4388 }
 0x9b6   :  { %8132 = vmatpush3.bf16.msra.mxu1 %v3998_v26  ;;  %8101 = vmatprep.mubr.msk.bf16.mxu1 %vm978_vm1, %v3537_v32 }
 0x9b7   :  { %8484 = vmatprep.subr.msk.bf16.mxu1 %vm1003_vm2, %v4379_v42 }
 0x9b8   :  { %v3964_v4 = vpop.permute.xlu0 %3963 }
 0x9bc   :  { %v3968_v34 = vpop.permute.xlu0 %3967 }
 0x9bd   :  { %8102 = vmatmul.mubr.msk.bf16.gmra.mrb[104].mxu1 %vm978_vm1, %v3539_v45 }
 0x9be   :  { %8105 = vmatprep.mubr.msk.bf16.mxu1 %vm978_vm1, %v3541_v14 }
 0x9c0   :  { %v3970_v59 = vpop.permute.xlu0 %3969 }
 0x9c4   :  { %v4383_v5 = vpop.permute.xlu0 %4382 }
 0x9c5   :  { %8106 = vmatmul.mubr.msk.bf16.gmra.mrb[108].mxu1 %vm978_vm1, %v3543_v54 }
 0x9c6   :  { %8109 = vmatprep.mubr.msk.bf16.mxu1 %vm978_vm1, %v3545_v41 }
 0x9c8   :  { %v4387_v31 = vpop.permute.xlu0 %4386 }
 0x9cc   :  { %v4391_v62 = vpop.permute.xlu0 %4390 }
 0x9cd   :  { %8110 = vmatmul.mubr.msk.bf16.gmra.mrb[112].mxu1 %vm978_vm1, %v3547_v29 }
 0x9ce   :  { %8133 = vmatprep.mubr.msk.bf16.mxu1 %vm978_vm1, %v3958_v52 }
 0x9d0   :  { %v4395_v15 = vpop.permute.xlu0 %4394 }
 0x9d4   :  { %v11080_v50 = vpop.permute.xlu0 %8515 }
 0x9d5   :  { %8134 = vmatmul.mubr.msk.bf16.vlgmr.msra.gmra.mrb[116].mxu1 %vm978_vm1, %v3960_v61 }
 0x9d6   :  { %8168 = vmatpush3.bf16.msra.mxu1 %v4423_v3  ;;  %8137 = vmatprep.mubr.msk.bf16.mxu1 %vm978_vm1, %v3962_v43 }
 0x9d8   :  { %v11085_v11 = vpop.permute.xlu0 %8525 }
 0x9dc   :  { %v11087_v49 = vpop.permute.xlu0 %8535 }
 0x9dd   :  { %8138 = vmatmul.mubr.msk.bf16.gmra.mrb[120].mxu1 %vm978_vm1, %v3964_v4 }
 0x9de   :  { %8141 = vmatprep.mubr.msk.bf16.mxu1 %vm978_vm1, %v3966_v2 }
 0x9e0   :  { %v577_v60 = vpop.permute.xlu0 %576 }
 0x9e1   :  { %v813_v46 = vadd.f32 %v10849_v47, %v577_v60  ;;  %v4393_v47 = vpop.permute.xlu1 %4392 }
 0x9e3   :  { %v11092_v23 = vpack.c.bf16 %v813_v46, %v813_v46 }
 0x9e5   :  { %8077 = vmatprep.subr.bf16.mxu0 %v11092_v23  ;;  %8142 = vmatmul.mubr.msk.bf16.gmra.mrb[124].mxu1 %vm978_vm1, %v3968_v34  ;;  %v4397_v19 = vpop.permute.xlu1 %4396 }
 0x9e6   :  { %8145 = vmatprep.mubr.msk.bf16.mxu1 %vm978_vm1, %v3970_v59 }
 0x9ed   :  { %8146 = vmatmul.mubr.msk.bf16.gmra.mrb[128].mxu1 %vm978_vm1, %v3972_v20 }
 0x9ee   :  { %8169 = vmatprep.mubr.msk.bf16.mxu1 %vm978_vm1, %v4383_v5 }
 0x9f5   :  { %8170 = vmatmul.mubr.msk.bf16.vlgmr.msra.gmra.mrb[132].mxu1 %vm978_vm1, %v4385_v51 }
 0x9f6   :  { %8173 = vmatprep.mubr.msk.bf16.mxu1 %vm978_vm1, %v4387_v31 }
 0x9fd   :  { %8174 = vmatmul.mubr.msk.bf16.gmra.mrb[136].mxu1 %vm978_vm1, %v4389_v16 }
 0x9fe   :  { %8177 = vmatprep.mubr.msk.bf16.mxu1 %vm978_vm1, %v4391_v62 }
 0xa04   :  { %v7989_v57 = vpop.f32.mrb[52].mxu1 }
 0xa05   :  { %v2180_v53 = vpop.f32.mrb[53].mxu1  ;;  %8178 = vmatmul.mubr.msk.bf16.gmra.mrb[140].mxu1 %vm978_vm1, %v4393_v47 }
 0xa06   :  { %v7990_v44 = vpop.f32.mrb[54].mxu1  ;;  %8181 = vmatprep.mubr.msk.bf16.mxu1 %vm978_vm1, %v4395_v15 }
 0xa07   :  { %v8549_v8 = vpack.i.bf16 %v7990_v44, %v7989_v57  ;;  %v2183_v25 = vpop.f32.mrb[55].mxu1 }
 0xa08   :  { %v8554_v17 = vpack.i.bf16 %v2183_v25, %v2180_v53 }
 0xa09   :  { %8550 = vrot.lane.b32.xlu0 %v8549_v8, %s9723_s15 }
 0xa0a   :  { %8555 = vrot.lane.b32.xlu1 %v8554_v17, %s9723_s15 }
 0xa0c   :  { %v7993_v24 = vpop.f32.mrb[56].mxu1 }
 0xa0d   :  { %v2196_v45 = vpop.f32.mrb[57].mxu1  ;;  %8182 = vmatmul.mubr.msk.bf16.gmra.mrb[144].mxu1 %vm978_vm1, %v4397_v19 }
 0xa0e   :  { %v7994_v0 = vpop.f32.mrb[58].mxu1 }
 0xa0f   :  { %v8559_v1 = vpack.i.bf16 %v7994_v0, %v7993_v24  ;;  %v2199_v54 = vpop.f32.mrb[59].mxu1 }
 0xa10   :  { %v8564_v36 = vpack.i.bf16 %v2199_v54, %v2196_v45 }
 0xa11   :  { %8560 = vrot.lane.b32.xlu0 %v8559_v1, %s9723_s15 }
 0xa12   :  { %8565 = vrot.lane.b32.xlu1 %v8564_v36, %s9723_s15 }
 0xa1c   :  { %v7997_v48 = vpop.f32.mrb[60].mxu1 }
 0xa1d   :  { %v2212_v6 = vpop.f32.mrb[61].mxu1 }
 0xa1e   :  { %v7998_v41 = vpop.f32.mrb[62].mxu1 }
 0xa1f   :  { %v8569_v12 = vpack.i.bf16 %v7998_v41, %v7997_v48  ;;  %v2215_v52 = vpop.f32.mrb[63].mxu1 }
 0xa20   :  { %v8574_v21 = vpack.i.bf16 %v2215_v52, %v2212_v6 }
 0xa21   :  { %8570 = vrot.lane.b32.xlu0 %v8569_v12, %s9723_s15 }
 0xa22   :  { %8575 = vrot.lane.b32.xlu1 %v8574_v21, %s9723_s15  ;;  %v13396_v21 = vld [vmem:[#allocation14_spill] sm:$0xff] }
 0xa28   :  { %v8001_v63 = vpop.f32.mrb[64].mxu1 }
 0xa29   :  { %v2228_v43 = vpop.f32.mrb[65].mxu1 }
 0xa2a   :  { %v8002_v32 = vpop.f32.mrb[66].mxu1 }
 0xa2b   :  { %v8579_v2 = vpack.i.bf16 %v8002_v32, %v8001_v63  ;;  %v2231_v14 = vpop.f32.mrb[67].mxu1 }
 0xa2c   :  { %v8584_v13 = vpack.i.bf16 %v2231_v14, %v2228_v43  ;;  %v13398_v14 = vld [vmem:[#allocation15_spill] sm:$0xff] }
 0xa2d   :  { %8580 = vrot.lane.b32.xlu1 %v8579_v2, %s9723_s15 }
 0xa31   :  { %8585 = vrot.lane.b32.xlu1 %v8584_v13, %s9723_s15 }
 0xa39   :  { %v8025_v40 = vpop.f32.mrb[68].mxu1 }
 0xa3a   :  { %v2605_v9 = vpop.f32.mrb[69].mxu1 }
 0xa3b   :  { %v8026_v35 = vpop.f32.mrb[70].mxu1 }
 0xa3c   :  { %v8589_v29 = vpack.i.bf16 %v8026_v35, %v8025_v40  ;;  %v2608_v7 = vpop.f32.mrb[71].mxu1 }
 0xa3d   :  { %v8594_v61 = vpack.i.bf16 %v2608_v7, %v2605_v9  ;;  %v13400_v9 = vld [vmem:[#allocation17_spill] sm:$0xff] }
 0xa3e   :  { %8590 = vrot.lane.b32.xlu0 %v8589_v29, %s9724_s16 }
 0xa3f   :  { %8595 = vrot.lane.b32.xlu1 %v8594_v61, %s9724_s16 }
 0xa44   :  { %v8029_v42 = vpop.f32.mrb[72].mxu1 }
 0xa45   :  { %v2621_v26 = vpop.f32.mrb[73].mxu1 }
 0xa46   :  { %v8030_v4 = vpop.f32.mrb[74].mxu1 }
 0xa47   :  { %v8599_v34 = vpack.i.bf16 %v8030_v4, %v8029_v42  ;;  %v2624_v59 = vpop.f32.mrb[75].mxu1  ;;  %v13402_v4 = vld [vmem:[#allocation16_spill] sm:$0xff] }
 0xa48   :  { %v8604_v5 = vpack.i.bf16 %v2624_v59, %v2621_v26  ;;  %v11134_v26 = vpop.permute.xlu1 %8510  ;;  %v13404_v59 = vld [vmem:[#allocation18_spill] sm:$0xff] }
 0xa49   :  { %8600 = vrot.lane.b32.xlu0 %v8599_v34, %s9724_s16 }
 0xa4a   :  { %8605 = vrot.lane.b32.xlu1 %v8604_v5, %s9724_s16 }
 0xa54   :  { %v8033_v31 = vpop.f32.mrb[76].mxu1 }
 0xa55   :  { %v2637_v62 = vpop.f32.mrb[77].mxu1 }
 0xa56   :  { %v8034_v15 = vpop.f32.mrb[78].mxu1 }
 0xa57   :  { %v8609_v3 = vpack.i.bf16 %v8034_v15, %v8033_v31  ;;  %v2640_v60 = vpop.f32.mrb[79].mxu1 }
 0xa58   :  { %v8614_v46 = vpack.i.bf16 %v2640_v60, %v2637_v62  ;;  %v13406_v60 = vld [vmem:[#allocation20_spill] sm:$0xff] }
 0xa59   :  { %8610 = vrot.lane.b32.xlu1 %v8609_v3, %s9724_s16  ;;  %v11144_v3 = vpop.permute.xlu1 %8520 }
 0xa5d   :  { %8615 = vrot.lane.b32.xlu1 %v8614_v46, %s9724_s16 }
 0xa60   :  { %v8037_v20 = vpop.f32.mrb[80].mxu1 }
 0xa61   :  { %v2653_v51 = vpop.f32.mrb[81].mxu1 }
 0xa62   :  { %v8038_v16 = vpop.f32.mrb[82].mxu1 }
 0xa63   :  { %v8619_v47 = vpack.i.bf16 %v8038_v16, %v8037_v20  ;;  %v2656_v57 = vpop.f32.mrb[83].mxu1  ;;  %v13408_v20 = vld [vmem:[#allocation21_spill] sm:$0xff] }
 0xa64   :  { %v8624_v53 = vpack.i.bf16 %v2656_v57, %v2653_v51 }
 0xa65   :  { %8620 = vrot.lane.b32.xlu1 %v8619_v47, %s9724_s16 }
 0xa66   :  { %8625 = vrot.lane.b32.xlu0 %v8624_v53, %s9724_s16 }
 0xa68   :  { %v8063_v44 = vpop.f32.mrb[84].mxu1 }
 0xa69   :  { %v3184_v8 = vpop.f32.mrb[85].mxu1  ;;  %v3249_v6 = vmul.f32 0.35355338, %v8063_v44 }
 0xa6a   :  { %v8064_v25 = vpop.f32.mrb[86].mxu1  ;;  %v3247_v43 = vmul.f32 0.35355338, %v3184_v8  ;;  %v11158_v8 = vpop.permute.xlu1 %8530 }
 0xa6b   :  { %v3187_v17 = vpop.f32.mrb[87].mxu1  ;;  %v11123_v63 = vadd.f32 %v3249_v6, %v13396_v21  ;;  %v3250_v40 = vmul.f32 0.35355338, %v8064_v25  ;;  %v13410_v25 = vld [vmem:[#allocation22_spill] sm:$0xff] }
 0xa6c   :  { %v3248_v32 = vmul.f32 0.35355338, %v3187_v17  ;;  %v11127_v13 = vadd.f32 %v3247_v43, %v13398_v14  ;;  %v13414_v43 = vld [vmem:[#allocation24_spill] sm:$0xff] }
 0xa6d   :  { %13397 = vst [vmem:[#allocation50_spill] sm:$0xff] %v11123_v63  ;;  %v11137_v34 = vadd.f32 %v3250_v40, %v13402_v4  ;;  %v13416_v40 = vld [vmem:[#allocation19_spill] sm:$0xff] }
 0xa6e   :  { %13399 = vst [vmem:[#allocation48_spill] sm:$0xff] %v11127_v13  ;;  %v11130_v35 = vadd.f32 %v3248_v32, %v13400_v9  ;;  %v11170_v6 = vpop.permute.xlu1 %8540 }
 0xa6f   :  { %13403 = vst [vmem:[#allocation49_spill] sm:$0xff] %v11137_v34 }
 0xa70   :  { %v8067_v19 = vpop.f32.mrb[88].mxu1  ;;  %13401 = vst [vmem:[#allocation30_spill] sm:$0xff] %v11130_v35 }
 0xa71   :  { %v3200_v24 = vpop.f32.mrb[89].mxu1  ;;  %v3253_v29 = vmul.f32 0.35355338, %v8067_v19  ;;  %v13412_v19 = vld [vmem:[#allocation23_spill] sm:$0xff] }
 0xa72   :  { %v8068_v45 = vpop.f32.mrb[90].mxu1  ;;  %v3251_v31 = vmul.f32 0.35355338, %v3200_v24 }
 0xa73   :  { %v3203_v0 = vpop.f32.mrb[91].mxu1  ;;  %v11140_v5 = vadd.f32 %v3253_v29, %v13404_v59  ;;  %v3254_v62 = vmul.f32 0.35355338, %v8068_v45 }
 0xa74   :  { %v11147_v46 = vadd.f32 %v3251_v31, %v13406_v60  ;;  %v3252_v16 = vmul.f32 0.35355338, %v3203_v0 }
 0xa75   :  { %13405 = vst [vmem:[#allocation47_spill] sm:$0xff] %v11140_v5  ;;  %v11150_v51 = vadd.f32 %v3254_v62, %v13408_v20 }
 0xa76   :  { %13407 = vst [vmem:[#allocation61_spill] sm:$0xff] %v11147_v46  ;;  %v11161_v17 = vadd.f32 %v3252_v16, %v13410_v25 }
 0xa77   :  { %13409 = vst [vmem:[#allocation62_spill] sm:$0xff] %v11150_v51 }
 0xa78   :  { %v8071_v1 = vpop.f32.mrb[92].mxu1  ;;  %13411 = vst [vmem:[#allocation63_spill] sm:$0xff] %v11161_v17 }
 0xa79   :  { %v3216_v54 = vpop.f32.mrb[93].mxu1  ;;  %v3257_v47 = vmul.f32 0.35355338, %v8071_v1 }
 0xa7a   :  { %v8072_v36 = vpop.f32.mrb[94].mxu1  ;;  %v3255_v45 = vmul.f32 0.35355338, %v3216_v54 }
 0xa7b   :  { %v3219_v48 = vpop.f32.mrb[95].mxu1  ;;  %v11164_v24 = vadd.f32 %v3257_v47, %v13412_v19  ;;  %v3258_v0 = vmul.f32 0.35355338, %v8072_v36  ;;  %v11184_v36 = vpop.permute.xlu0 %8545 }
 0xa7c   :  { %v11173_v32 = vadd.f32 %v3255_v45, %v13414_v43  ;;  %v3256_v31 = vmul.f32 0.35355338, %v3219_v48  ;;  %v11191_v58 = vpop.permute.xlu1 %8555 }
 0xa7d   :  { %13413 = vst [vmem:[#allocation64_spill] sm:$0xff] %v11164_v24  ;;  %v11176_v29 = vadd.f32 %v3258_v0, %v13416_v40  ;;  %v13420_v0 = vld [vmem:[#allocation26_spill] sm:$0xff] }
 0xa7e   :  { %13415 = vst [vmem:[#allocation65_spill] sm:$0xff] %v11173_v32  ;;  %v11189_v45 = vadd.f32 %v3256_v31, %v13418_v37 }
 0xa7f   :  { %13417 = vst [vmem:[#allocation66_spill] sm:$0xff] %v11176_v29 }
 0xa80   :  { %v8075_v41 = vpop.f32.mrb[96].mxu1  ;;  %13419 = vst [vmem:[#allocation67_spill] sm:$0xff] %v11189_v45 }
 0xa81   :  { %v3232_v12 = vpop.f32.mrb[97].mxu1  ;;  %v3261_v62 = vmul.f32 0.35355338, %v8075_v41 }
 0xa82   :  { %v8076_v52 = vpop.f32.mrb[98].mxu1  ;;  %v3259_v41 = vmul.f32 0.35355338, %v3232_v12 }
 0xa83   :  { %v3235_v2 = vpop.f32.mrb[99].mxu1  ;;  %v11194_v48 = vadd.f32 %v3261_v62, %v13420_v0  ;;  %v3262_v39 = vmul.f32 0.35355338, %v8076_v52  ;;  %v582_v62 = vpop.permute.xlu0 %581 }
 0xa84   :  { %v11201_v38 = vadd.f32 %v3259_v41, %v13422_v22  ;;  %v3260_v31 = vmul.f32 0.35355338, %v3235_v2  ;;  %v11206_v55 = vpop.permute.xlu1 %8565  ;;  %v13426_v41 = vld [vmem:[#allocation29_spill] sm:$0xff] }
 0xa85   :  { %3283 = vmax.xlane.f32.xlu0 %v11123_v63  ;;  %13421 = vst [vmem:[#allocation68_spill] sm:$0xff] %v11194_v48  ;;  %v11204_v27 = vadd.f32 %v3262_v39, %v13424_v18  ;;  %v13437_v63 = vld [vmem:[#allocation33_spill] sm:$0xff] }
 0xa86   :  { %13423 = vst [vmem:[#allocation69_spill] sm:$0xff] %v11201_v38  ;;  %v11217_v56 = vadd.f32 %v3260_v31, %v13426_v41 }
 0xa87   :  { %13425 = vst [vmem:[#allocation70_spill] sm:$0xff] %v11204_v27 }
 0xa88   :  { %v8099_v7 = vpop.f32.mrb[100].mxu1  ;;  %13427 = vst [vmem:[#allocation71_spill] sm:$0xff] %v11217_v56 }
 0xa89   :  { %3279 = vmax.xlane.f32.xlu0 %v11127_v13  ;;  %3281 = vmax.xlane.f32.xlu1 %v11130_v35  ;;  %v3609_v61 = vpop.f32.mrb[101].mxu1  ;;  %v3674_v28 = vmul.f32 0.35355338, %v8099_v7 }
 0xa8a   :  { %v8100_v42 = vpop.f32.mrb[102].mxu1  ;;  %v3672_v2 = vmul.f32 0.35355338, %v3609_v61 }
 0xa8b   :  { %v3612_v15 = vpop.f32.mrb[103].mxu1  ;;  %v11220_v39 = vadd.f32 %v3674_v28, %v13396_v21 }
 0xa8d   :  { %3285 = vmax.xlane.f32.xlu0 %v11137_v34  ;;  %3291 = vmax.xlane.f32.xlu1 %v11140_v5  ;;  %13428 = vst [vmem:[#allocation72_spill] sm:$0xff] %v11220_v39  ;;  %v8557_v34 = vunpack.i.l.bf16 %v11191_v58 }
 0xa90   :  { %v8103_v57 = vpop.f32.mrb[104].mxu1 }
 0xa91   :  { %3287 = vmax.xlane.f32.xlu1 %v11147_v46  ;;  %3293 = vmax.xlane.f32.xlu0 %v11150_v51  ;;  %v11154_v53 = vpop.f32.mrb[105].mxu1  ;;  %v3678_v28 = vmul.f32 0.35355338, %v8103_v57  ;;  %v8517_v46 = vunpack.i.l.bf16 %v11080_v50 }
 0xa92   :  { %v11156_v44 = vpop.f32.mrb[106].mxu1 }
 0xa93   :  { %v11166_v1 = vpop.f32.mrb[107].mxu1 }
 0xa94   :  { %v11222_v7 = vpop.permute.xlu1 %8575  ;;  %v3677_v13 = vmul.f32 0.35355338, %v11166_v1 }
 0xa95   :  { %3289 = vmax.xlane.f32.xlu0 %v11161_v17  ;;  %3299 = vmax.xlane.f32.xlu1 %v11164_v24  ;;  %v11253_v24 = vadd.f32 %v3678_v28, %v13404_v59  ;;  %v13436_v28 = vld [vmem:[#allocation32_spill] sm:$0xff] }
 0xa97   :  { %13433 = vst [vmem:[#allocation77_spill] sm:$0xff] %v11253_v24 }
 0xa98   :  { %v11178_v16 = vpop.f32.mrb[108].mxu1 }
 0xa99   :  { %3295 = vmax.xlane.f32.xlu1 %v11173_v32  ;;  %3301 = vmax.xlane.f32.xlu0 %v11176_v29  ;;  %v11182_v54 = vpop.f32.mrb[109].mxu1  ;;  %v8551_v32 = vpop.permute.xlu0 %8550 }
 0xa9a   :  { %v11186_v47 = vpop.f32.mrb[110].mxu1  ;;  %v8553_v51 = vunpack.i.h.bf16 %v8551_v32  ;;  %v8552_v5 = vunpack.i.l.bf16 %v8551_v32 }
 0xa9b   :  { %v11196_v10 = vpop.f32.mrb[111].mxu1 }
 0xa9d   :  { %3297 = vmax.xlane.f32.xlu0 %v11189_v45  ;;  %3307 = vmax.xlane.f32.xlu1 %v11194_v48  ;;  %v3675_v48 = vmul.f32 0.35355338, %v8100_v42  ;;  %v11236_v61 = vpop.permute.xlu0 %8560 }
 0xa9f   :  { %v11232_v31 = vadd.f32 %v3675_v48, %v13402_v4  ;;  %v11234_v29 = vpop.permute.xlu1 %8580  ;;  %v8518_v48 = vunpack.i.h.bf16 %v11080_v50  ;;  %v8558_v50 = vunpack.i.h.bf16 %v11191_v58 }
 0xaa0   :  { %v11208_v30 = vpop.f32.mrb[112].mxu1  ;;  %13431 = vst [vmem:[#allocation75_spill] sm:$0xff] %v11234_v29 }
 0xaa1   :  { %3303 = vmax.xlane.f32.xlu1 %v11201_v38  ;;  %3309 = vmax.xlane.f32.xlu0 %v11204_v27  ;;  %v11212_v12 = vpop.f32.mrb[113].mxu1  ;;  %v11229_v27 = vadd.f32 %v3672_v2, %v13398_v14  ;;  %13430 = vst [vmem:[#allocation74_spill] sm:$0xff] %v11232_v31  ;;  %v3673_v38 = vmul.f32 0.35355338, %v3612_v15  ;;  %v8513_v2 = vunpack.i.h.bf16 %v11134_v26  ;;  %v2863_v32 = vsel %vm978_vm1, %v13437_v63, %v8518_v48 }
 0xaa2   :  { %v11214_v52 = vpop.f32.mrb[114].mxu1  ;;  %v2880_v58 = vsel %vm2876_vm6, %v2863_v32, %v8553_v51  ;;  %v11296_v51 = vadd.f32 %v3677_v13, %v13410_v25 }
 0xaa3   :  { %v11224_v45 = vpop.f32.mrb[115].mxu1  ;;  %13429 = vst [vmem:[#allocation73_spill] sm:$0xff] %v11229_v27  ;;  %v11250_v57 = vadd.f32 %v3673_v38, %v13400_v9  ;;  %v11263_v38 = vpop.permute.xlu1 %8585 }
 0xaa4   :  { %13434 = vst [vmem:[#allocation78_spill] sm:$0xff] %v11263_v38  ;;  %v13439_v38 = vld [vmem:[#allocation31_spill] sm:$0xff] }
 0xaa5   :  { %3305 = vmax.xlane.f32.xlu0 %v11217_v56  ;;  %3708 = vmax.xlane.f32.xlu1 %v11220_v39  ;;  %v8512_v39 = vunpack.i.l.bf16 %v11134_v26  ;;  %13432 = vst [vmem:[#allocation76_spill] sm:$0xff] %v11250_v57  ;;  %v11260_v26 = vpop.permute.xlu0 %8570 }
 0xaa7   :  { %v2860_v35 = vsel %vm978_vm1, %v13436_v28, %v8512_v39  ;;  %v816_v39 = vadd.f32 %v10858_v33, %v582_v62 }
 0xaa8   :  { %v11238_v42 = vpop.f32.mrb[116].mxu1 }
 0xaa9   :  { %3704 = vmax.xlane.f32.xlu1 %v11229_v27  ;;  %3710 = vmax.xlane.f32.xlu0 %v11232_v31  ;;  %v11242_v56 = vpop.f32.mrb[117].mxu1  ;;  %v3676_v27 = vmul.f32 0.35355338, %v11154_v53  ;;  %v3679_v31 = vmul.f32 0.35355338, %v11156_v44  ;;  %v13435_v53 = vld [vmem:[#allocation34_spill] sm:$0xff] }
 0xaaa   :  { %v11247_v15 = vpop.f32.mrb[118].mxu1  ;;  %v2861_v44 = vsel %vm978_vm1, %v13435_v53, %v8513_v2  ;;  %v2862_v2 = vsel %vm978_vm1, %v13439_v38, %v8517_v46 }
 0xaab   :  { %v11257_v17 = vpop.f32.mrb[119].mxu1  ;;  %v11276_v29 = vadd.f32 %v3676_v27, %v13406_v60  ;;  %v2879_v63 = vsel %vm2876_vm6, %v2862_v2, %v8552_v5  ;;  %v2877_v27 = vsel %vm2876_vm6, %v2860_v35, %v8557_v34  ;;  %v2878_v33 = vsel %vm2876_vm6, %v2861_v44, %v8558_v50 }
 0xaac   :  { %v3680_v34 = vmul.f32 0.35355338, %v11182_v54  ;;  %v3683_v44 = vmul.f32 0.35355338, %v11186_v47  ;;  %v8523_v54 = vunpack.i.h.bf16 %v11144_v3  ;;  %v8563_v47 = vunpack.i.h.bf16 %v11236_v61 }
 0xaad   :  { %3706 = vmax.xlane.f32.xlu0 %v11250_v57  ;;  %3716 = vmax.xlane.f32.xlu1 %v11253_v24  ;;  %13438 = vst [vmem:[#allocation34_spill] sm:$0xff] %v11276_v29  ;;  %v11279_v57 = vadd.f32 %v3679_v31, %v13408_v20  ;;  %v3682_v24 = vmul.f32 0.35355338, %v11178_v16 }
 0xaaf   :  { %v11301_v35 = vadd.f32 %v3682_v24, %v13412_v19 }
 0xab0   :  { %v8591_v1 = vpop.permute.xlu0 %8590  ;;  %v11286_v53 = vpop.f32.mrb[120].mxu1 }
 0xab1   :  { %v8593_v48 = vunpack.i.h.bf16 %v8591_v1  ;;  %v8592_v31 = vunpack.i.l.bf16 %v8591_v1  ;;  %v8596_v28 = vpop.permute.xlu1 %8595  ;;  %3712 = vmax.xlane.f32.xlu1 %v11276_v29  ;;  %3718 = vmax.xlane.f32.xlu0 %v11279_v57  ;;  %v11292_v46 = vpop.f32.mrb[121].mxu1 }
 0xab2   :  { %v8598_v16 = vunpack.i.h.bf16 %v8596_v28  ;;  %v8597_v62 = vunpack.i.l.bf16 %v8596_v28  ;;  %v11298_v38 = vpop.f32.mrb[122].mxu1  ;;  %v11323_v28 = vpack.c.bf16 %v816_v39, %v816_v39  ;;  %v13441_v39 = vld [vmem:[#allocation38_spill] sm:$0xff] }
 0xab3   :  { %v2897_v5 = vsel %vm2893_vm7, %v2880_v58, %v8593_v48  ;;  %v2896_v32 = vsel %vm2893_vm7, %v2879_v63, %v8592_v31  ;;  %v11306_v2 = vpop.f32.mrb[123].mxu1  ;;  %v8522_v58 = vunpack.i.l.bf16 %v11144_v3  ;;  %v8528_v63 = vunpack.i.h.bf16 %v11085_v11 }
 0xab4   :  { %v2911_v50 = vpack.c.bf16 %v2897_v5, %v2896_v32  ;;  %v2894_v13 = vsel %vm2893_vm7, %v2877_v27, %v8597_v62  ;;  %v2895_v1 = vsel %vm2893_vm7, %v2878_v33, %v8598_v16  ;;  %v8527_v48 = vunpack.i.l.bf16 %v11085_v11  ;;  %13440 = vst [vmem:[#allocation32_spill] sm:$0xff] %v11323_v28  ;;  %v13442_v5 = vld [vmem:[#allocation37_spill] sm:$0xff] }
 0xab5   :  { %3714 = vmax.xlane.f32.xlu0 %v11296_v51  ;;  %3724 = vmax.xlane.f32.xlu1 %v11301_v35  ;;  %v2910_v24 = vpack.c.bf16 %v2895_v1, %v2894_v13  ;;  %v11319_v31 = vadd.f32 %v3680_v34, %v13414_v43  ;;  %v3686_v27 = vmul.f32 0.35355338, %v11208_v30  ;;  %v11326_v33 = vadd.f32 %v3683_v44, %v13416_v40  ;;  %v13444_v13 = vld [vmem:[#allocation35_spill] sm:$0xff] }
 0xab6   :  { %v3681_v3 = vmul.f32 0.35355338, %v11196_v10  ;;  %v8562_v11 = vunpack.i.l.bf16 %v11236_v61  ;;  %v8567_v62 = vunpack.i.l.bf16 %v11206_v55  ;;  %v2865_v34 = vsel %vm978_vm1, %v13441_v39, %v8523_v54 }
 0xab7   :  { %8043 = vmatprep.mubr.msk.bf16.mxu0 %vm50_vm0, %v2910_v24  ;;  %v2867_v10 = vsel %vm978_vm1, %v13442_v5, %v8528_v63  ;;  %v8568_v32 = vunpack.i.h.bf16 %v11206_v55  ;;  %v3684_v44 = vmul.f32 0.35355338, %v11212_v12  ;;  %v2866_v1 = vsel %vm978_vm1, %v13444_v13, %v8527_v48 }
 0xab8   :  { %8044 = vmatmul.mubr.msk.bf16.vlgmr.msra.gmra.mrb[84].mxu0 %vm50_vm0, %v2911_v50  ;;  %v11330_v16 = vpop.f32.mrb[124].mxu1  ;;  %v2884_v24 = vsel %vm2876_vm6, %v2867_v10, %v8563_v47  ;;  %v11354_v54 = vadd.f32 %v3686_v27, %v13420_v0  ;;  %v11359_v12 = vadd.f32 %v3681_v3, %v13418_v37  ;;  %v3687_v39 = vmul.f32 0.35355338, %v11214_v52 }
 0xab9   :  { %8078 = vmatpush3.bf16.xpose.msra.mxu0 %v11092_v23  ;;  %3720 = vmax.xlane.f32.xlu1 %v11319_v31  ;;  %v11336_v30 = vpop.f32.mrb[125].mxu1  ;;  %v13443_v23 = vld [vmem:[#allocation36_spill] sm:$0xff]  ;;  %v2882_v27 = vsel %vm2876_vm6, %v2865_v34, %v8568_v32  ;;  %v11367_v10 = vadd.f32 %v3684_v44, %v13422_v22  ;;  %v4099_v13 = vmul.f32 0.35355338, %v11238_v42  ;;  %v3685_v34 = vmul.f32 0.35355338, %v11224_v45 }
 0xaba   :  { %8113 = vmatprep.subr.bf16.mxu0 %v11323_v28  ;;  %3726 = vmax.xlane.f32.xlu0 %v11326_v33  ;;  %v11346_v61 = vpop.f32.mrb[126].mxu1  ;;  %v2864_v50 = vsel %vm978_vm1, %v13443_v23, %v8522_v58  ;;  %v2883_v58 = vsel %vm2876_vm6, %v2866_v1, %v8562_v11 }
 0xabb   :  { %v8601_v55 = vpop.permute.xlu0 %8600  ;;  %v11356_v63 = vpop.f32.mrb[127].mxu1  ;;  %v2881_v48 = vsel %vm2876_vm6, %v2864_v50, %v8567_v62  ;;  %v11376_v50 = vadd.f32 %v3687_v39, %v13424_v18  ;;  %v11389_v1 = vadd.f32 %v4099_v13, %v13396_v21  ;;  %v4100_v39 = vmul.f32 0.35355338, %v11247_v15 }
 0xabc   :  { %v8603_v5 = vunpack.i.h.bf16 %v8601_v55  ;;  %v8602_v28 = vunpack.i.l.bf16 %v8601_v55  ;;  %v8606_v29 = vpop.permute.xlu1 %8605  ;;  %v11396_v55 = vadd.f32 %v3685_v34, %v13426_v41  ;;  %v8573_v15 = vunpack.i.h.bf16 %v11260_v26 }
 0xabd   :  { %v8608_v23 = vunpack.i.h.bf16 %v8606_v29  ;;  %v8607_v47 = vunpack.i.l.bf16 %v8606_v29  ;;  %3732 = vmax.xlane.f32.xlu1 %v11354_v54  ;;  %13445 = vst [vmem:[#allocation33_spill] sm:$0xff] %v11389_v1  ;;  %v8532_v13 = vunpack.i.l.bf16 %v11158_v8  ;;  %v4101_v34 = vmul.f32 0.35355338, %v11292_v46  ;;  %v13452_v46 = vld [vmem:[#allocation42_spill] sm:$0xff] }
 0xabe   :  { %v2901_v3 = vsel %vm2893_vm7, %v2884_v24, %v8603_v5  ;;  %v2900_v52 = vsel %vm2893_vm7, %v2883_v58, %v8602_v28  ;;  %3722 = vmax.xlane.f32.xlu0 %v11359_v12  ;;  %v4097_v24 = vmul.f32 0.35355338, %v11242_v56  ;;  %v8538_v5 = vunpack.i.h.bf16 %v11087_v49 }
 0xabf   :  { %v2898_v11 = vsel %vm2893_vm7, %v2881_v48, %v8607_v47  ;;  %v2899_v62 = vsel %vm2893_vm7, %v2882_v27, %v8608_v23  ;;  %v2913_v29 = vpack.c.bf16 %v2901_v3, %v2900_v52  ;;  %v8537_v58 = vunpack.i.l.bf16 %v11087_v49 }
 0xac0   :  { %v11379_v32 = vpop.f32.mrb[128].mxu1  ;;  %v2912_v44 = vpack.c.bf16 %v2899_v62, %v2898_v11  ;;  %v11404_v48 = vadd.f32 %v4097_v24, %v13398_v14  ;;  %v4103_v56 = vmul.f32 0.35355338, %v11286_v53  ;;  %v11408_v23 = vadd.f32 %v4100_v39, %v13402_v4  ;;  %v13448_v11 = vld [vmem:[#allocation41_spill] sm:$0xff]  ;;  %v13449_v62 = vld [vmem:[#allocation39_spill] sm:$0xff] }
 0xac1   :  { %3728 = vmax.xlane.f32.xlu1 %v11367_v10  ;;  %v11382_v28 = vpop.f32.mrb[129].mxu1  ;;  %v4098_v47 = vmul.f32 0.35355338, %v11257_v17  ;;  %v8572_v3 = vunpack.i.l.bf16 %v11260_v26  ;;  %v8533_v49 = vunpack.i.h.bf16 %v11158_v8  ;;  %v2871_v17 = vsel %vm978_vm1, %v13448_v11, %v8538_v5 }
 0xac2   :  { %3734 = vmax.xlane.f32.xlu0 %v11376_v50  ;;  %8047 = vmatprep.mubr.msk.bf16.mxu0 %vm50_vm0, %v2912_v44  ;;  %v11386_v42 = vpop.f32.mrb[130].mxu1  ;;  %13446 = vst [vmem:[#allocation31_spill] sm:$0xff] %v11404_v48  ;;  %13447 = vst [vmem:[#allocation38_spill] sm:$0xff] %v11408_v23  ;;  %v11428_v26 = vadd.f32 %v4103_v56, %v13404_v59  ;;  %v4104_v39 = vmul.f32 0.35355338, %v11298_v38  ;;  %v2888_v5 = vsel %vm2876_vm6, %v2871_v17, %v8573_v15  ;;  %v13453_v38 = vld [vmem:[#allocation40_spill] sm:$0xff] }
 0xac3   :  { %8048 = vmatmul.mubr.msk.bf16.gmra.mrb[88].mxu0 %vm50_vm0, %v2913_v29  ;;  %v11393_v45 = vpop.f32.mrb[131].mxu1  ;;  %v2870_v29 = vsel %vm978_vm1, %v13449_v62, %v8537_v58  ;;  %v11434_v8 = vadd.f32 %v4098_v47, %v13400_v9  ;;  %v8578_v58 = vunpack.i.h.bf16 %v11222_v7  ;;  %v8577_v56 = vunpack.i.l.bf16 %v11222_v7 }
 0xac4   :  { %13450 = vst [vmem:[#allocation37_spill] sm:$0xff] %v11428_v26  ;;  %v2887_v11 = vsel %vm2876_vm6, %v2870_v29, %v8572_v3  ;;  %v2869_v62 = vsel %vm978_vm1, %v13452_v46, %v8533_v49  ;;  %v2868_v15 = vsel %vm978_vm1, %v13453_v38, %v8532_v13  ;;  %v11450_v3 = vadd.f32 %v4101_v34, %v13406_v60 }
 0xac5   :  { %4133 = vmax.xlane.f32.xlu1 %v11389_v1  ;;  %13451 = vst [vmem:[#allocation36_spill] sm:$0xff] %v11434_v8  ;;  %v4107_v17 = vmul.f32 0.35355338, %v11330_v16  ;;  %v4102_v49 = vmul.f32 0.35355338, %v11306_v2  ;;  %v2885_v13 = vsel %vm2876_vm6, %v2868_v15, %v8577_v56  ;;  %v2886_v34 = vsel %vm2876_vm6, %v2869_v62, %v8578_v58 }
 0xac6   :  { %3730 = vmax.xlane.f32.xlu0 %v11396_v55  ;;  %13454 = vst [vmem:[#allocation35_spill] sm:$0xff] %v11450_v3  ;;  %v8547_v56 = vunpack.i.l.bf16 %v11184_v36  ;;  %v4105_v62 = vmul.f32 0.35355338, %v11336_v30  ;;  %v13459_v30 = vld [vmem:[#allocation44_spill] sm:$0xff] }
 0xac7   :  { %v11474_v58 = vadd.f32 %v4107_v17, %v13412_v19  ;;  %v11480_v15 = vadd.f32 %v4102_v49, %v13410_v25 }
 0xac8   :  { %v11411_v27 = vpop.f32.mrb[132].mxu1 }
 0xac9   :  { %4129 = vmax.xlane.f32.xlu1 %v11404_v48  ;;  %v11416_v52 = vpop.f32.mrb[133].mxu1  ;;  %13455 = vst [vmem:[#allocation41_spill] sm:$0xff] %v11474_v58  ;;  %13456 = vst [vmem:[#allocation39_spill] sm:$0xff] %v11480_v15 }
 0xaca   :  { %4135 = vmax.xlane.f32.xlu0 %v11408_v23  ;;  %v11421_v53 = vpop.f32.mrb[134].mxu1 }
 0xacb   :  { %v11431_v44 = vpop.f32.mrb[135].mxu1  ;;  %v8611_v24 = vpop.permute.xlu1 %8610 }
 0xacc   :  { %v8613_v23 = vunpack.i.h.bf16 %v8611_v24  ;;  %v8612_v48 = vunpack.i.l.bf16 %v8611_v24  ;;  %v11454_v24 = vadd.f32 %v4104_v39, %v13408_v20  ;;  %v8548_v39 = vunpack.i.h.bf16 %v11184_v36  ;;  %v13458_v36 = vld [vmem:[#allocation46_spill] sm:$0xff] }
 0xacd   :  { %4141 = vmax.xlane.f32.xlu1 %v11428_v26  ;;  %v11500_v26 = vadd.f32 %v4105_v62, %v13414_v43 }
 0xace   :  { %v2905_v47 = vsel %vm2893_vm7, %v2888_v5, %v8613_v23  ;;  %v2904_v1 = vsel %vm2893_vm7, %v2887_v11, %v8612_v48  ;;  %4131 = vmax.xlane.f32.xlu0 %v11434_v8  ;;  %v8543_v11 = vunpack.i.h.bf16 %v11170_v6 }
 0xacf   :  { %v8616_v7 = vpop.permute.xlu1 %8615  ;;  %v2915_v29 = vpack.c.bf16 %v2905_v47, %v2904_v1  ;;  %v8542_v1 = vunpack.i.l.bf16 %v11170_v6 }
 0xad0   :  { %v8618_v23 = vunpack.i.h.bf16 %v8616_v7  ;;  %v8617_v5 = vunpack.i.l.bf16 %v8616_v7  ;;  %v11457_v48 = vpop.f32.mrb[136].mxu1  ;;  %v4108_v7 = vmul.f32 0.35355338, %v11346_v61  ;;  %v2873_v17 = vsel %vm978_vm1, %v13458_v36, %v8543_v11  ;;  %v13461_v61 = vld [vmem:[#allocation45_spill] sm:$0xff] }
 0xad1   :  { %4137 = vmax.xlane.f32.xlu1 %v11450_v3  ;;  %v11463_v16 = vpop.f32.mrb[137].mxu1  ;;  %v13462_v3 = vld [vmem:[#allocation43_spill] sm:$0xff]  ;;  %v4111_v11 = vmul.f32 0.35355338, %v11379_v32 }
 0xad2   :  { %v2902_v2 = vsel %vm2893_vm7, %v2885_v13, %v8617_v5  ;;  %v2903_v46 = vsel %vm2893_vm7, %v2886_v34, %v8618_v23  ;;  %4143 = vmax.xlane.f32.xlu0 %v11454_v24  ;;  %v11470_v47 = vpop.f32.mrb[138].mxu1  ;;  %v13457_v23 = vld [vmem:[#allocation75_spill] sm:$0xff]  ;;  %v2872_v34 = vsel %vm978_vm1, %v13459_v30, %v8542_v1  ;;  %v11504_v36 = vadd.f32 %v4108_v7, %v13416_v40 }
 0xad3   :  { %v11477_v38 = vpop.f32.mrb[139].mxu1  ;;  %v2914_v6 = vpack.c.bf16 %v2903_v46, %v2902_v2  ;;  %v8583_v5 = vunpack.i.h.bf16 %v13457_v23  ;;  %v8582_v13 = vunpack.i.l.bf16 %v13457_v23  ;;  %v13460_v2 = vld [vmem:[#allocation78_spill] sm:$0xff]  ;;  %v2875_v23 = vsel %vm978_vm1, %v13461_v61, %v8548_v39 }
 0xad4   :  { %v8588_v46 = vunpack.i.h.bf16 %v13460_v2  ;;  %v8587_v49 = vunpack.i.l.bf16 %v13460_v2  ;;  %v4106_v30 = vmul.f32 0.35355338, %v11356_v63 }
 0xad5   :  { %4149 = vmax.xlane.f32.xlu1 %v11474_v58  ;;  %8051 = vmatprep.mubr.msk.bf16.mxu0 %vm50_vm0, %v2914_v6  ;;  %v2874_v6 = vsel %vm978_vm1, %v13462_v3, %v8547_v56  ;;  %v2892_v39 = vsel %vm2876_vm6, %v2875_v23, %v8583_v5  ;;  %v11520_v5 = vadd.f32 %v4111_v11, %v13420_v0 }
 0xad6   :  { %4139 = vmax.xlane.f32.xlu0 %v11480_v15  ;;  %8052 = vmatmul.mubr.msk.bf16.gmra.mrb[92].mxu0 %vm50_vm0, %v2915_v29  ;;  %v2891_v3 = vsel %vm2876_vm6, %v2874_v6, %v8582_v13  ;;  %v2889_v7 = vsel %vm2876_vm6, %v2872_v34, %v8587_v49  ;;  %v2890_v61 = vsel %vm2876_vm6, %v2873_v17, %v8588_v46  ;;  %v4110_v13 = vmul.f32 0.35355338, %v11393_v45 }
 0xad7   :  { %v8621_v1 = vpop.permute.xlu1 %8620  ;;  %v11526_v34 = vadd.f32 %v4106_v30, %v13418_v37  ;;  %v4524_v49 = vmul.f32 0.35355338, %v11411_v27 }
 0xad8   :  { %v8623_v2 = vunpack.i.h.bf16 %v8621_v1  ;;  %v8622_v15 = vunpack.i.l.bf16 %v8621_v1  ;;  %v8626_v29 = vpop.permute.xlu0 %8625  ;;  %v11507_v8 = vpop.f32.mrb[140].mxu1  ;;  %v11533_v45 = vadd.f32 %v4110_v13, %v13426_v41 }
 0xad9   :  { %v8628_v56 = vunpack.i.h.bf16 %v8626_v29  ;;  %v8627_v62 = vunpack.i.l.bf16 %v8626_v29  ;;  %4145 = vmax.xlane.f32.xlu1 %v11500_v26  ;;  %v11512_v32 = vpop.f32.mrb[141].mxu1 }
 0xada   :  { %v2908_v63 = vsel %vm2893_vm7, %v2891_v3, %v8622_v15  ;;  %v2909_v1 = vsel %vm2893_vm7, %v2892_v39, %v8623_v2  ;;  %4151 = vmax.xlane.f32.xlu0 %v11504_v36  ;;  %v8180_v58 = vpop.f32.mrb[142].mxu1  ;;  %v4109_v15 = vmul.f32 0.35355338, %v11382_v28  ;;  %v4112_v28 = vmul.f32 0.35355338, %v11386_v42 }
 0xadb   :  { %v2906_v23 = vsel %vm2893_vm7, %v2889_v7, %v8627_v62  ;;  %v2907_v6 = vsel %vm2893_vm7, %v2890_v61, %v8628_v56  ;;  %v4494_v29 = vpop.f32.mrb[143].mxu1  ;;  %v2917_v46 = vpack.c.bf16 %v2909_v1, %v2908_v63  ;;  %v11544_v3 = vadd.f32 %v4524_v49, %v13396_v21 }
 0xadc   :  { %v2916_v17 = vpack.c.bf16 %v2907_v6, %v2906_v23  ;;  %v11538_v11 = vadd.f32 %v4109_v15, %v13422_v22  ;;  %v4523_v56 = vmul.f32 0.35355338, %v11431_v44  ;;  %v11548_v62 = vadd.f32 %v4112_v28, %v13424_v18 }
 0xadd   :  { %4157 = vmax.xlane.f32.xlu1 %v11520_v5  ;;  %v4522_v7 = vmul.f32 0.35355338, %v11416_v52  ;;  %v4528_v61 = vmul.f32 0.35355338, %v11457_v48  ;;  %v4525_v44 = vmul.f32 0.35355338, %v11421_v53 }
 0xade   :  { %4147 = vmax.xlane.f32.xlu0 %v11526_v34  ;;  %8055 = vmatprep.mubr.msk.bf16.mxu0 %vm50_vm0, %v2916_v17  ;;  %v11554_v42 = vadd.f32 %v4523_v56, %v13400_v9  ;;  %v4531_v1 = vmul.f32 0.35355338, %v4494_v29  ;;  %v4526_v23 = vmul.f32 0.35355338, %v11463_v16  ;;  %v4529_v15 = vmul.f32 0.35355338, %v11470_v47 }
 0xadf   :  { %8056 = vmatmul.mubr.msk.bf16.gmra.mrb[96].mxu0 %vm50_vm0, %v2917_v46  ;;  %v11558_v63 = vadd.f32 %v4522_v7, %v13398_v14  ;;  %v11564_v52 = vadd.f32 %v4528_v61, %v13404_v59  ;;  %v11567_v13 = vadd.f32 %v4525_v44, %v13402_v4  ;;  %v4527_v17 = vmul.f32 0.35355338, %v11477_v38  ;;  %v13481_v4 = vld [vmem:[#allocation72_spill] sm:$0xff] }
 0xae0   :  { %v8183_v30 = vpop.f32.mrb[144].mxu1  ;;  %v11573_v48 = vadd.f32 %v4531_v1, %v13418_v37  ;;  %v11576_v6 = vadd.f32 %v4526_v23, %v13406_v60  ;;  %v11585_v16 = vadd.f32 %v4529_v15, %v13408_v20  ;;  %v4532_v47 = vmul.f32 0.35355338, %v11507_v8  ;;  %v13463_v1 = vld [vmem:[#allocation50_spill] sm:$0xff]  ;;  %v13469_v37 = vld [vmem:[#allocation61_spill] sm:$0xff] }
 0xae1   :  { %4155 = vmax.xlane.f32.xlu1 %v11533_v45  ;;  %v4507_v2 = vpop.f32.mrb[145].mxu1  ;;  %v11591_v46 = vadd.f32 %v4527_v17, %v13410_v25  ;;  %v4530_v28 = vmul.f32 0.35355338, %v11512_v32  ;;  %v4536_v7 = vmul.f32 0.35355338, %v8183_v30 }
 0xae2   :  { %4153 = vmax.xlane.f32.xlu0 %v11538_v11  ;;  %v8184_v39 = vpop.f32.mrb[146].mxu1  ;;  %v11596_v49 = vadd.f32 %v4532_v47, %v13412_v19  ;;  %v4534_v61 = vmul.f32 0.35355338, %v4507_v2  ;;  %v13464_v2 = vld [vmem:[#allocation48_spill] sm:$0xff] }
 0xae3   :  { %v4510_v27 = vpop.f32.mrb[147].mxu1  ;;  %v4537_v53 = vmul.f32 0.35355338, %v8184_v39  ;;  %v11601_v38 = vadd.f32 %v4530_v28, %v13414_v43  ;;  %v4533_v39 = vmul.f32 0.35355338, %v8180_v58  ;;  %v11609_v8 = vadd.f32 %v4536_v7, %v13420_v0  ;;  %v13467_v0 = vld [vmem:[#allocation47_spill] sm:$0xff] }
 0xae4   :  { %v11613_v32 = vadd.f32 %v4534_v61, %v13422_v22  ;;  %v4535_v44 = vmul.f32 0.35355338, %v4510_v27  ;;  %v13465_v27 = vld [vmem:[#allocation30_spill] sm:$0xff] }
 0xae5   :  { %4558 = vmax.xlane.f32.xlu1 %v11544_v3  ;;  %v11582_v29 = vadd.f32 %v4537_v53, %v13424_v18  ;;  %v11605_v56 = vadd.f32 %v4533_v39, %v13416_v40  ;;  %v13466_v18 = vld [vmem:[#allocation49_spill] sm:$0xff] }
 0xae6   :  { %4159 = vmax.xlane.f32.xlu0 %v11548_v62  ;;  %v11617_v58 = vadd.f32 %v4535_v44, %v13426_v41 }
 0xae9   :  { %4556 = vmax.xlane.f32.xlu1 %v11554_v42 }
 0xaea   :  { %4554 = vmax.xlane.f32.xlu0 %v11558_v63 }
 0xaed   :  { %4566 = vmax.xlane.f32.xlu1 %v11564_v52 }
 0xaee   :  { %4560 = vmax.xlane.f32.xlu0 %v11567_v13 }
 0xaf1   :  { %4572 = vmax.xlane.f32.xlu1 %v11573_v48 }
 0xaf2   :  { %4562 = vmax.xlane.f32.xlu0 %v11576_v6 }
 0xaf5   :  { %4584 = vmax.xlane.f32.xlu1 %v11582_v29 }
 0xaf6   :  { %4568 = vmax.xlane.f32.xlu0 %v11585_v16 }
 0xafa   :  { %4564 = vmax.xlane.f32.xlu0 %v11591_v46 }
 0xafe   :  { %4574 = vmax.xlane.f32.xlu0 %v11596_v49 }
 0xb02   :  { %4570 = vmax.xlane.f32.xlu0 %v11601_v38 }
 0xb06   :  { %4576 = vmax.xlane.f32.xlu0 %v11605_v56 }
 0xb0a   :  { %4582 = vmax.xlane.f32.xlu0 %v11609_v8 }
 0xb0e   :  { %4578 = vmax.xlane.f32.xlu0 %v11613_v32 }
 0xb12   :  { %4580 = vmax.xlane.f32.xlu0 %v11617_v58  ;;  %v3284_v30 = vpop.xlane.xlu0 %3283 }
 0xb13   :  { %v3313_v23 = vsub.f32 %v13463_v1, %v3284_v30 }
 0xb15   :  { %v3331_v53 = vmul.f32 1.442695, %v3313_v23  ;;  %v13468_v23 = vld [vmem:[#allocation62_spill] sm:$0xff] }
 0xb16   :  { %v3280_v15 = vpop.xlane.xlu0 %3279  ;;  %v3282_v17 = vpop.xlane.xlu1 %3281 }
 0xb17   :  { %9177 = vpow2.f32 %v3331_v53  ;;  %v3311_v47 = vsub.f32 %v13464_v2, %v3280_v15  ;;  %v3312_v61 = vsub.f32 %v13465_v27, %v3282_v17  ;;  %v13470_v17 = vld [vmem:[#allocation63_spill] sm:$0xff] }
 0xb19   :  { %v3327_v28 = vmul.f32 1.442695, %v3311_v47  ;;  %v3329_v1 = vmul.f32 1.442695, %v3312_v61 }
 0xb1a   :  { %v3286_v39 = vpop.xlane.xlu0 %3285  ;;  %v3292_v7 = vpop.xlane.xlu1 %3291 }
 0xb1b   :  { %9179 = vpow2.f32 %v3327_v28  ;;  %v3314_v44 = vsub.f32 %v13466_v18, %v3286_v39  ;;  %v3317_v41 = vsub.f32 %v13467_v0, %v3292_v7  ;;  %v13471_v7 = vld [vmem:[#allocation64_spill] sm:$0xff] }
 0xb1d   :  { %v3333_v22 = vmul.f32 1.442695, %v3314_v44  ;;  %v3339_v40 = vmul.f32 1.442695, %v3317_v41 }
 0xb1e   :  { %v3294_v19 = vpop.xlane.xlu0 %3293  ;;  %v3288_v30 = vpop.xlane.xlu1 %3287 }
 0xb1f   :  { %9181 = vpow2.f32 %v3333_v22  ;;  %v3318_v53 = vsub.f32 %v13468_v23, %v3294_v19  ;;  %v3315_v15 = vsub.f32 %v13469_v37, %v3288_v30 }
 0xb20   :  { %9183 = vpow2.f32 %v3339_v40  ;;  %v13472_v40 = vld [vmem:[#allocation66_spill] sm:$0xff] }
 0xb21   :  { %v11627_v2 = vpop.eup %9177  ;;  %v3335_v47 = vmul.f32 1.442695, %v3315_v15  ;;  %9185 = vpow2.f32 %v3329_v1  ;;  %v3341_v0 = vmul.f32 1.442695, %v3318_v53 }
 0xb22   :  { %v3290_v28 = vpop.xlane.xlu0 %3289  ;;  %3363 = vadd.xlane.f32.xlu1 %v11627_v2  ;;  %v3300_v18 = vpop.xlane.xlu1 %3299 }
 0xb23   :  { %v3316_v41 = vsub.f32 %v13470_v17, %v3290_v28  ;;  %9187 = vpow2.f32 %v3335_v47  ;;  %v3321_v19 = vsub.f32 %v13471_v7, %v3300_v18  ;;  %v13473_v47 = vld [vmem:[#allocation65_spill] sm:$0xff]  ;;  %v13474_v18 = vld [vmem:[#allocation67_spill] sm:$0xff] }
 0xb24   :  { %9189 = vpow2.f32 %v3341_v0 }
 0xb25   :  { %v11631_v39 = vpop.eup %9179  ;;  %v3337_v22 = vmul.f32 1.442695, %v3316_v41  ;;  %v3347_v23 = vmul.f32 1.442695, %v3321_v19 }
 0xb26   :  { %v3302_v27 = vpop.xlane.xlu0 %3301  ;;  %3359 = vadd.xlane.f32.xlu1 %v11631_v39  ;;  %v3296_v37 = vpop.xlane.xlu1 %3295 }
 0xb27   :  { %v3322_v61 = vsub.f32 %v13472_v40, %v3302_v27  ;;  %9191 = vpow2.f32 %v3337_v22  ;;  %v3319_v28 = vsub.f32 %v13473_v47, %v3296_v37  ;;  %v13475_v40 = vld [vmem:[#allocation68_spill] sm:$0xff] }
 0xb29   :  { %v11636_v44 = vpop.eup %9181  ;;  %v3349_v30 = vmul.f32 1.442695, %v3322_v61  ;;  %v3343_v19 = vmul.f32 1.442695, %v3319_v28 }
 0xb2a   :  { %v11638_v1 = vpop.eup %9183  ;;  %v3298_v53 = vpop.xlane.xlu0 %3297  ;;  %3365 = vadd.xlane.f32.xlu0 %v11636_v44 }
 0xb2b   :  { %v3308_v15 = vpop.xlane.xlu1 %3307  ;;  %9193 = vpow2.f32 %v3349_v30  ;;  %v3320_v17 = vsub.f32 %v13474_v18, %v3298_v53  ;;  %3371 = vadd.xlane.f32.xlu1 %v11638_v1  ;;  %v11644_v0 = vpop.eup %9185  ;;  %v13476_v18 = vld [vmem:[#allocation69_spill] sm:$0xff] }
 0xb2c   :  { %9195 = vpow2.f32 %v3347_v23  ;;  %v3325_v61 = vsub.f32 %v13475_v40, %v3308_v15 }
 0xb2d   :  { %v3345_v41 = vmul.f32 1.442695, %v3320_v17  ;;  %v11646_v7 = vpop.eup %9187 }
 0xb2e   :  { %v3310_v27 = vpop.xlane.xlu0 %3309  ;;  %3361 = vadd.xlane.f32.xlu0 %v11644_v0  ;;  %v11651_v37 = vpop.eup %9189  ;;  %v3355_v47 = vmul.f32 1.442695, %v3325_v61  ;;  %v13480_v61 = vld [vmem:[#allocation71_spill] sm:$0xff] }
 0xb2f   :  { %v3304_v22 = vpop.xlane.xlu1 %3303  ;;  %9197 = vpow2.f32 %v3345_v41  ;;  %3367 = vadd.xlane.f32.xlu1 %v11646_v7  ;;  %v13478_v41 = vld [vmem:[#allocation70_spill] sm:$0xff] }
 0xb30   :  { %9199 = vpow2.f32 %v3343_v19  ;;  %v3323_v23 = vsub.f32 %v13476_v18, %v3304_v22  ;;  %v3326_v40 = vsub.f32 %v13478_v41, %v3310_v27 }
 0xb31   :  { %v11655_v17 = vpop.eup %9191  ;;  %9201 = vpow2.f32 %v3355_v47 }
 0xb32   :  { %v3306_v30 = vpop.xlane.xlu0 %3305  ;;  %3373 = vadd.xlane.f32.xlu0 %v11651_v37  ;;  %v3351_v20 = vmul.f32 1.442695, %v3323_v23  ;;  %v3357_v60 = vmul.f32 1.442695, %v3326_v40 }
 0xb33   :  { %v3709_v53 = vpop.xlane.xlu1 %3708  ;;  %v3324_v22 = vsub.f32 %v13480_v61, %v3306_v30 }
 0xb34   :  { %9203 = vpow2.f32 %v3351_v20  ;;  %v3738_v27 = vsub.f32 %v13481_v4, %v3709_v53 }
 0xb35   :  { %v11657_v43 = vpop.eup %9193  ;;  %v3353_v47 = vmul.f32 1.442695, %v3324_v22  ;;  %9205 = vpow2.f32 %v3357_v60 }
 0xb36   :  { %13477 = vst [vmem:[#allocation42_spill] sm:$0xff] %v11657_v43  ;;  %v3711_v28 = vpop.xlane.xlu0 %3710  ;;  %3369 = vadd.xlane.f32.xlu0 %v11655_v17  ;;  %3381 = vadd.xlane.f32.xlu1 %v11657_v43  ;;  %v11662_v59 = vpop.eup %9195  ;;  %v3756_v14 = vmul.f32 1.442695, %v3738_v27  ;;  %v13482_v43 = vld [vmem:[#allocation73_spill] sm:$0xff] }
 0xb37   :  { %v3705_v15 = vpop.xlane.xlu1 %3704  ;;  %9207 = vpow2.f32 %v3353_v47 }
 0xb38   :  { %v3736_v40 = vsub.f32 %v13482_v43, %v3705_v15 }
 0xb39   :  { %v11664_v19 = vpop.eup %9197 }
 0xb3a   :  { %13479 = vst [vmem:[#allocation40_spill] sm:$0xff] %v11664_v19  ;;  %v3707_v18 = vpop.xlane.xlu0 %3706  ;;  %3377 = vadd.xlane.f32.xlu1 %v11664_v19  ;;  %3379 = vadd.xlane.f32.xlu0 %v11662_v59  ;;  %v11669_v9 = vpop.eup %9199 }
 0xb3b   :  { %v3717_v25 = vpop.xlane.xlu1 %3716  ;;  %v11674_v61 = vpop.eup %9201 }
 0xb3e   :  { %v3719_v23 = vpop.xlane.xlu0 %3718  ;;  %3375 = vadd.xlane.f32.xlu0 %v11669_v9  ;;  %v11680_v19 = vpop.eup %9203 }
 0xb3f   :  { %v3713_v41 = vpop.xlane.xlu1 %3712  ;;  %v3743_v30 = vsub.f32 %v11279_v57, %v3719_v23  ;;  %v13483_v57 = vld [vmem:[#allocation74_spill] sm:$0xff] }
 0xb40   :  { %v3739_v23 = vsub.f32 %v13483_v57, %v3711_v28 }
 0xb41   :  { %v3766_v21 = vmul.f32 1.442695, %v3743_v30  ;;  %v3752_v30 = vmul.f32 1.442695, %v3736_v40 }
 0xb42   :  { %v3715_v20 = vpop.xlane.xlu0 %3714  ;;  %3387 = vadd.xlane.f32.xlu0 %v11674_v61 }
 0xb43   :  { %v3725_v22 = vpop.xlane.xlu1 %3724  ;;  %9209 = vpow2.f32 %v3766_v21  ;;  %v3741_v4 = vsub.f32 %v11296_v51, %v3715_v20  ;;  %v11685_v21 = vpop.eup %9205  ;;  %v3758_v51 = vmul.f32 1.442695, %v3739_v23 }
 0xb44   :  { %v3746_v53 = vsub.f32 %v11301_v35, %v3725_v22  ;;  %9211 = vpow2.f32 %v3756_v14  ;;  %v13484_v35 = vld [vmem:[#allocation76_spill] sm:$0xff] }
 0xb45   :  { %v3762_v60 = vmul.f32 1.442695, %v3741_v4  ;;  %v3737_v20 = vsub.f32 %v13484_v35, %v3707_v18  ;;  %v11690_v4 = vpop.eup %9207 }
 0xb46   :  { %3383 = vadd.xlane.f32.xlu0 %v11680_v19  ;;  %v3772_v43 = vmul.f32 1.442695, %v3746_v53 }
 0xb47   :  { %v3721_v47 = vpop.xlane.xlu1 %3720  ;;  %9213 = vpow2.f32 %v3762_v60  ;;  %v3727_v15 = vpop.xlane.xlu0 %3726  ;;  %v13486_v60 = vld [vmem:[#allocation77_spill] sm:$0xff] }
 0xb48   :  { %v3744_v27 = vsub.f32 %v11319_v31, %v3721_v47  ;;  %9215 = vpow2.f32 %v3752_v30  ;;  %v3747_v28 = vsub.f32 %v11326_v33, %v3727_v15  ;;  %v3754_v31 = vmul.f32 1.442695, %v3737_v20 }
 0xb49   :  { %9217 = vpow2.f32 %v3772_v43  ;;  %v3742_v57 = vsub.f32 %v13486_v60, %v3717_v25 }
 0xb4a   :  { %3389 = vadd.xlane.f32.xlu0 %v11685_v21  ;;  %v3768_v40 = vmul.f32 1.442695, %v3744_v27  ;;  %9219 = vpow2.f32 %v3758_v51  ;;  %v3774_v23 = vmul.f32 1.442695, %v3747_v28  ;;  %v13487_v27 = vld [vmem:[#allocation34_spill] sm:$0xff] }
 0xb4b   :  { %v3733_v14 = vpop.xlane.xlu1 %3732  ;;  %v3723_v22 = vpop.xlane.xlu0 %3722  ;;  %v3764_v15 = vmul.f32 1.442695, %v3742_v57  ;;  %v3740_v51 = vsub.f32 %v13487_v27, %v3713_v41 }
 0xb4c   :  { %9221 = vpow2.f32 %v3768_v40  ;;  %v3745_v30 = vsub.f32 %v11359_v12, %v3723_v22 }
 0xb4d   :  { %v11692_v53 = vpop.eup %9209  ;;  %9223 = vpow2.f32 %v3754_v31  ;;  %v3760_v22 = vmul.f32 1.442695, %v3740_v51  ;;  %v3750_v31 = vsub.f32 %v11354_v54, %v3733_v14  ;;  %v13491_v51 = vld [vmem:[#allocation33_spill] sm:$0xff] }
 0xb4e   :  { %13485 = vst [vmem:[#allocation75_spill] sm:$0xff] %v11692_v53  ;;  %3798 = vadd.xlane.f32.xlu1 %v11692_v53  ;;  %3385 = vadd.xlane.f32.xlu0 %v11690_v4  ;;  %v11698_v47 = vpop.eup %9211  ;;  %9225 = vpow2.f32 %v3774_v23  ;;  %v3770_v35 = vmul.f32 1.442695, %v3745_v30 }
 0xb4f   :  { %v3729_v18 = vpop.xlane.xlu1 %3728  ;;  %v3735_v33 = vpop.xlane.xlu0 %3734  ;;  %9227 = vpow2.f32 %v3764_v15  ;;  %v3780_v30 = vmul.f32 1.442695, %v3750_v31 }
 0xb50   :  { %v3748_v20 = vsub.f32 %v11367_v10, %v3729_v18  ;;  %9229 = vpow2.f32 %v3770_v35  ;;  %v3751_v60 = vsub.f32 %v11376_v50, %v3735_v33 }
 0xb51   :  { %v11700_v43 = vpop.eup %9213  ;;  %9231 = vpow2.f32 %v3760_v22 }
 0xb52   :  { %3794 = vadd.xlane.f32.xlu1 %v11700_v43  ;;  %3788 = vadd.xlane.f32.xlu0 %v11698_v47  ;;  %v11706_v12 = vpop.eup %9215  ;;  %v3776_v57 = vmul.f32 1.442695, %v3748_v20  ;;  %v3782_v14 = vmul.f32 1.442695, %v3751_v60 }
 0xb53   :  { %v4134_v25 = vpop.xlane.xlu1 %4133  ;;  %v3731_v28 = vpop.xlane.xlu0 %3730 }
 0xb54   :  { %v11708_v40 = vpop.eup %9217  ;;  %9233 = vpow2.f32 %v3776_v57  ;;  %v3749_v15 = vsub.f32 %v11396_v55, %v3731_v28  ;;  %v4163_v35 = vsub.f32 %v13491_v51, %v4134_v25 }
 0xb55   :  { %13488 = vst [vmem:[#allocation46_spill] sm:$0xff] %v11708_v40  ;;  %v11714_v10 = vpop.eup %9219  ;;  %9235 = vpow2.f32 %v3780_v30 }
 0xb56   :  { %3784 = vadd.xlane.f32.xlu0 %v11706_v12  ;;  %3804 = vadd.xlane.f32.xlu1 %v11708_v40  ;;  %v11716_v18 = vpop.eup %9221  ;;  %9237 = vpow2.f32 %v3782_v14  ;;  %v3778_v22 = vmul.f32 1.442695, %v3749_v15  ;;  %v4181_v57 = vmul.f32 1.442695, %v4163_v35  ;;  %v13492_v40 = vld [vmem:[#allocation31_spill] sm:$0xff]  ;;  %v13493_v14 = vld [vmem:[#allocation41_spill] sm:$0xff] }
 0xb57   :  { %v4130_v41 = vpop.xlane.xlu1 %4129  ;;  %v4136_v23 = vpop.xlane.xlu0 %4135  ;;  %13489 = vst [vmem:[#allocation44_spill] sm:$0xff] %v11716_v18 }
 0xb58   :  { %v11723_v50 = vpop.eup %9223  ;;  %v4161_v30 = vsub.f32 %v13492_v40, %v4130_v41  ;;  %9239 = vpow2.f32 %v3778_v22  ;;  %v13495_v41 = vld [vmem:[#allocation38_spill] sm:$0xff] }
 0xb59   :  { %v11725_v33 = vpop.eup %9225 }
 0xb5a   :  { %3790 = vadd.xlane.f32.xlu0 %v11714_v10  ;;  %3800 = vadd.xlane.f32.xlu1 %v11716_v18  ;;  %13490 = vst [vmem:[#allocation78_spill] sm:$0xff] %v11725_v33  ;;  %v11732_v60 = vpop.eup %9227  ;;  %v4177_v35 = vmul.f32 1.442695, %v4161_v30  ;;  %v13496_v30 = vld [vmem:[#allocation36_spill] sm:$0xff] }
 0xb5b   :  { %v11720_v54 = vpop.xlane.xlu1 %4141  ;;  %v4132_v27 = vpop.xlane.xlu0 %4131 }
 0xb5c   :  { %v11735_v28 = vpop.eup %9229 }
 0xb5e   :  { %3786 = vadd.xlane.f32.xlu0 %v11723_v50  ;;  %3806 = vadd.xlane.f32.xlu1 %v11725_v33  ;;  %v11743_v33 = vpop.eup %9231 }
 0xb5f   :  { %v11730_v20 = vpop.xlane.xlu1 %4137  ;;  %v4144_v31 = vpop.xlane.xlu0 %4143 }
 0xb60   :  { %v4168_v55 = vsub.f32 %v11454_v24, %v4144_v31  ;;  %v11745_v24 = vpop.eup %9233 }
 0xb61   :  { %13494 = vst [vmem:[#allocation45_spill] sm:$0xff] %v11745_v24 }
 0xb62   :  { %v4191_v18 = vmul.f32 1.442695, %v4168_v55  ;;  %3796 = vadd.xlane.f32.xlu0 %v11732_v60  ;;  %3802 = vadd.xlane.f32.xlu1 %v11735_v28  ;;  %v4164_v55 = vsub.f32 %v13495_v41, %v4136_v23 }
 0xb63   :  { %v4150_v25 = vpop.xlane.xlu1 %4149  ;;  %v11740_v51 = vpop.xlane.xlu0 %4139 }
 0xb64   :  { %v4171_v15 = vsub.f32 %v13493_v14, %v4150_v25  ;;  %9241 = vpow2.f32 %v4191_v18  ;;  %v11751_v25 = vpop.eup %9235 }
 0xb65   :  { %9243 = vpow2.f32 %v4181_v57  ;;  %v11754_v14 = vpop.eup %9237  ;;  %v4183_v57 = vmul.f32 1.442695, %v4164_v55 }
 0xb66   :  { %v4197_v31 = vmul.f32 1.442695, %v4171_v15  ;;  %3792 = vadd.xlane.f32.xlu0 %v11743_v33  ;;  %3808 = vadd.xlane.f32.xlu1 %v11745_v24  ;;  %v4162_v24 = vsub.f32 %v13496_v30, %v4132_v27 }
 0xb67   :  { %v4146_v40 = vpop.xlane.xlu1 %4145  ;;  %v4152_v22 = vpop.xlane.xlu0 %4151 }
 0xb68   :  { %9245 = vpow2.f32 %v4197_v31  ;;  %v4169_v53 = vsub.f32 %v11500_v26, %v4146_v40  ;;  %v4172_v18 = vsub.f32 %v11504_v36, %v4152_v22  ;;  %v11760_v40 = vpop.eup %9239 }
 0xb69   :  { %9247 = vpow2.f32 %v4177_v35  ;;  %v13497_v35 = vld [vmem:[#allocation37_spill] sm:$0xff] }
 0xb6a   :  { %v4193_v15 = vmul.f32 1.442695, %v4169_v53  ;;  %3812 = vadd.xlane.f32.xlu0 %v11751_v25  ;;  %3814 = vadd.xlane.f32.xlu1 %v11754_v14  ;;  %v4199_v31 = vmul.f32 1.442695, %v4172_v18  ;;  %v4179_v53 = vmul.f32 1.442695, %v4162_v24  ;;  %v4167_v22 = vsub.f32 %v13497_v35, %v11720_v54 }
 0xb6b   :  { %v4148_v23 = vpop.xlane.xlu0 %4147  ;;  %v4158_v41 = vpop.xlane.xlu1 %4157  ;;  %v13499_v24 = vld [vmem:[#allocation35_spill] sm:$0xff] }
 0xb6c   :  { %9249 = vpow2.f32 %v4193_v15  ;;  %v4170_v26 = vsub.f32 %v11526_v34, %v4148_v23  ;;  %v4189_v30 = vmul.f32 1.442695, %v4167_v22  ;;  %v13501_v22 = vld [vmem:[#allocation39_spill] sm:$0xff] }
 0xb6d   :  { %9251 = vpow2.f32 %v4183_v57  ;;  %v4165_v57 = vsub.f32 %v13499_v24, %v11730_v20  ;;  %v4166_v20 = vsub.f32 %v13501_v22, %v11740_v51 }
 0xb6e   :  { %v11762_v36 = vpop.eup %9241  ;;  %3810 = vadd.xlane.f32.xlu1 %v11760_v40  ;;  %9253 = vpow2.f32 %v4199_v31  ;;  %v4195_v18 = vmul.f32 1.442695, %v4170_v26  ;;  %v4175_v31 = vsub.f32 %v11520_v5, %v4158_v41 }
 0xb6f   :  { %v4154_v55 = vpop.xlane.xlu0 %4153  ;;  %4223 = vadd.xlane.f32.xlu0 %v11762_v36  ;;  %v11768_v27 = vpop.eup %9243  ;;  %9255 = vpow2.f32 %v4179_v53  ;;  %v4185_v53 = vmul.f32 1.442695, %v4165_v57 }
 0xb70   :  { %v4173_v34 = vsub.f32 %v11538_v11, %v4154_v55  ;;  %v11776_v23 = vpop.xlane.xlu1 %4155  ;;  %9257 = vpow2.f32 %v4195_v18  ;;  %v4205_v24 = vmul.f32 1.442695, %v4175_v31 }
 0xb71   :  { %9259 = vpow2.f32 %v4189_v30 }
 0xb72   :  { %v11771_v15 = vpop.eup %9245  ;;  %4213 = vadd.xlane.f32.xlu1 %v11768_v27  ;;  %v4201_v11 = vmul.f32 1.442695, %v4173_v34  ;;  %v4187_v34 = vmul.f32 1.442695, %v4166_v20 }
 0xb73   :  { %13498 = vst [vmem:[#allocation43_spill] sm:$0xff] %v11771_v15  ;;  %v4160_v54 = vpop.xlane.xlu0 %4159  ;;  %4229 = vadd.xlane.f32.xlu0 %v11771_v15  ;;  %v11779_v35 = vpop.eup %9247 }
 0xb74   :  { %9261 = vpow2.f32 %v4201_v11  ;;  %v4176_v15 = vsub.f32 %v11548_v62, %v4160_v54  ;;  %v4559_v5 = vpop.xlane.xlu1 %4558 }
 0xb75   :  { %9263 = vpow2.f32 %v4185_v53  ;;  %v4588_v30 = vsub.f32 %v11544_v3, %v4559_v5 }
 0xb76   :  { %v11782_v26 = vpop.eup %9249  ;;  %4209 = vadd.xlane.f32.xlu1 %v11779_v35  ;;  %9265 = vpow2.f32 %v4205_v24  ;;  %v4207_v51 = vmul.f32 1.442695, %v4176_v15 }
 0xb77   :  { %13500 = vst [vmem:[#allocation50_spill] sm:$0xff] %v11782_v26  ;;  %v4555_v55 = vpop.xlane.xlu0 %4554  ;;  %4225 = vadd.xlane.f32.xlu0 %v11782_v26  ;;  %v11789_v18 = vpop.eup %9251  ;;  %9267 = vpow2.f32 %v4187_v34  ;;  %v4606_v62 = vmul.f32 1.442695, %v4588_v30 }
 0xb78   :  { %v11791_v41 = vpop.eup %9253  ;;  %9269 = vpow2.f32 %v4207_v51  ;;  %v4586_v54 = vsub.f32 %v11558_v63, %v4555_v55  ;;  %v4557_v3 = vpop.xlane.xlu1 %4556 }
 0xb79   :  { %13502 = vst [vmem:[#allocation48_spill] sm:$0xff] %v11791_v41  ;;  %v11796_v57 = vpop.eup %9255  ;;  %9271 = vpow2.f32 %v4606_v62  ;;  %v4587_v63 = vsub.f32 %v11554_v42, %v4557_v3 }
 0xb7a   :  { %4215 = vadd.xlane.f32.xlu1 %v11789_v18  ;;  %v11798_v11 = vpop.eup %9257  ;;  %v4602_v20 = vmul.f32 1.442695, %v4586_v54 }
 0xb7b   :  { %4231 = vadd.xlane.f32.xlu0 %v11791_v41  ;;  %v4561_v31 = vpop.xlane.xlu0 %4560  ;;  %v11803_v53 = vpop.eup %9259 }
 0xb7c   :  { %v4589_v24 = vsub.f32 %v11567_v13, %v4561_v31  ;;  %9273 = vpow2.f32 %v4602_v20  ;;  %v4567_v30 = vpop.xlane.xlu1 %4566  ;;  %v4604_v13 = vmul.f32 1.442695, %v4587_v63 }
 0xb7d   :  { %v4592_v31 = vsub.f32 %v11564_v52, %v4567_v30  ;;  %v504_v30 = vld [vmem:[%s13187_s6 + $0x70] sm:$0xff] }
 0xb7e   :  { %4211 = vadd.xlane.f32.xlu1 %v11796_v57  ;;  %v11805_v22 = vpop.eup %9261  ;;  %v4608_v55 = vmul.f32 1.442695, %v4589_v24 }
 0xb7f   :  { %4227 = vadd.xlane.f32.xlu0 %v11798_v11  ;;  %13503 = vst [vmem:[#allocation30_spill] sm:$0xff] %v11805_v22  ;;  %v4563_v15 = vpop.xlane.xlu0 %4562  ;;  %v11810_v5 = vpop.eup %9263  ;;  %v4614_v42 = vmul.f32 1.442695, %v4592_v31 }
 0xb80   :  { %v11812_v34 = vpop.eup %9265  ;;  %9275 = vpow2.f32 %v4608_v55  ;;  %v4590_v3 = vsub.f32 %v11576_v6, %v4563_v15 }
 0xb81   :  { %13504 = vst [vmem:[#allocation49_spill] sm:$0xff] %v11812_v34  ;;  %v11817_v51 = vpop.eup %9267  ;;  %9277 = vpow2.f32 %v4604_v13 }
 0xb82   :  { %4221 = vadd.xlane.f32.xlu1 %v11803_v53  ;;  %v11819_v62 = vpop.eup %9269  ;;  %9279 = vpow2.f32 %v4614_v42 }
 0xb83   :  { %4233 = vadd.xlane.f32.xlu0 %v11805_v22  ;;  %v4569_v22 = vpop.xlane.xlu0 %4568  ;;  %13505 = vst [vmem:[#allocation47_spill] sm:$0xff] %v11819_v62  ;;  %v11824_v54 = vpop.eup %9271 }
 0xb84   :  { %13506 = vst [vmem:[#allocation62_spill] sm:$0xff] %v11824_v54 }
 0xb86   :  { %4217 = vadd.xlane.f32.xlu1 %v11810_v5  ;;  %v11828_v24 = vpop.eup %9273 }
 0xb87   :  { %4237 = vadd.xlane.f32.xlu0 %v11812_v34  ;;  %v4565_v20 = vpop.xlane.xlu0 %4564  ;;  %13507 = vst [vmem:[#allocation61_spill] sm:$0xff] %v11828_v24  ;;  %v4610_v34 = vmul.f32 1.442695, %v4590_v3 }
 0xb88   :  { %v4591_v63 = vsub.f32 %v11591_v46, %v4565_v20 }
 0xb89   :  { %9281 = vpow2.f32 %v4610_v34  ;;  %v4573_v34 = vpop.xlane.xlu1 %4572 }
 0xb8a   :  { %4219 = vadd.xlane.f32.xlu1 %v11817_v51  ;;  %v4612_v52 = vmul.f32 1.442695, %v4591_v63  ;;  %v4174_v63 = vsub.f32 %v11533_v45, %v11776_v23 }
 0xb8b   :  { %4239 = vadd.xlane.f32.xlu0 %v11819_v62  ;;  %v4575_v55 = vpop.xlane.xlu0 %4574  ;;  %v11832_v62 = vpop.eup %9275 }
 0xb8c   :  { %13508 = vst [vmem:[#allocation63_spill] sm:$0xff] %v11832_v62  ;;  %v11838_v6 = vpop.eup %9277  ;;  %9283 = vpow2.f32 %v4612_v52 }
 0xb8d   :  { %13509 = vst [vmem:[#allocation64_spill] sm:$0xff] %v11838_v6  ;;  %v11841_v13 = vpop.eup %9279  ;;  %v11852_v3 = vpop.xlane.xlu1 %4584 }
 0xb8e   :  { %13510 = vst [vmem:[#allocation66_spill] sm:$0xff] %v11841_v13 }
 0xb8f   :  { %4638 = vadd.xlane.f32.xlu0 %v11824_v54  ;;  %v4571_v15 = vpop.xlane.xlu0 %4570  ;;  %v4203_v54 = vmul.f32 1.442695, %v4174_v63 }
 0xb91   :  { %9285 = vpow2.f32 %v4203_v54 }
 0xb93   :  { %4634 = vadd.xlane.f32.xlu0 %v11828_v24  ;;  %v4577_v46 = vpop.xlane.xlu0 %4576  ;;  %v11844_v31 = vpop.eup %9281 }
 0xb94   :  { %13511 = vst [vmem:[#allocation65_spill] sm:$0xff] %v11844_v31  ;;  %v4597_v45 = vsub.f32 %v11605_v56, %v4577_v46 }
 0xb96   :  { %v11847_v20 = vpop.eup %9283 }
 0xb97   :  { %4640 = vadd.xlane.f32.xlu0 %v11832_v62  ;;  %13512 = vst [vmem:[#allocation67_spill] sm:$0xff] %v11847_v20  ;;  %v11849_v42 = vpop.xlane.xlu0 %4582  ;;  %v4596_v62 = vsub.f32 %v11596_v49, %v4575_v55  ;;  %v4624_v55 = vmul.f32 1.442695, %v4597_v45 }
 0xb99   :  { %v4622_v41 = vmul.f32 1.442695, %v4596_v62 }
 0xb9b   :  { %4636 = vadd.xlane.f32.xlu0 %v11838_v6  ;;  %586 = vperm.xlu1 %8508, %v504_v30   ;;  %v4579_v52 = vpop.xlane.xlu0 %4578  ;;  %v4593_v30 = vsub.f32 %v11585_v16, %v4569_v22  ;;  %v505_v16 = vld [vmem:[%s13187_s6 + $0x78] sm:$0xff]  ;;  %v11865_v62 = vpop.eup %9285 }
 0xb9f   :  { %4646 = vadd.xlane.f32.xlu0 %v11841_v13  ;;  %v11858_v24 = vpop.xlane.xlu0 %4580 }
 0xba3   :  { %4642 = vadd.xlane.f32.xlu0 %v11844_v31  ;;  %v4616_v31 = vmul.f32 1.442695, %v4593_v30 }
 0xba5   :  { %9287 = vpow2.f32 %v4616_v31 }
 0xba6   :  { %9289 = vpow2.f32 %v4622_v41 }
 0xba7   :  { %4644 = vadd.xlane.f32.xlu0 %v11847_v20  ;;  %v4594_v20 = vsub.f32 %v11601_v38, %v4571_v15  ;;  %v4595_v38 = vsub.f32 %v11573_v48, %v4573_v34 }
 0xba9   :  { %v4618_v49 = vmul.f32 1.442695, %v4594_v20 }
 0xbaf   :  { %v3364_v13 = vpop.xlane.xlu1 %3363  ;;  %v11870_v54 = vpop.eup %9287 }
 0xbb3   :  { %v3360_v6 = vpop.xlane.xlu1 %3359 }
 0xbb7   :  { %v3366_v26 = vpop.xlane.xlu0 %3365 }
 0xbb8   :  { %9291 = vrcp.f32 %v3366_v26  ;;  %v3372_v23 = vpop.xlane.xlu1 %3371  ;;  %v4598_v26 = vsub.f32 %v11613_v32, %v4579_v52 }
 0xbb9   :  { %9293 = vrcp.f32 %v3360_v6  ;;  %v11872_v6 = vpop.eup %9289 }
 0xbba   :  { %9295 = vrcp.f32 %v3364_v13  ;;  %v4620_v13 = vmul.f32 1.442695, %v4595_v38  ;;  %v4626_v34 = vmul.f32 1.442695, %v4598_v26 }
 0xbbb   :  { %v3362_v22 = vpop.xlane.xlu0 %3361 }
 0xbbc   :  { %9297 = vrcp.f32 %v3362_v22  ;;  %v3368_v41 = vpop.xlane.xlu1 %3367 }
 0xbbd   :  { %591 = vperm.xlu0 %8507, %v505_v16   ;;  %9299 = vpow2.f32 %v4618_v49  ;;  %v4599_v16 = vsub.f32 %v11617_v58, %v11858_v24 }
 0xbbe   :  { %9301 = vpow2.f32 %v4624_v55 }
 0xbbf   :  { %v3374_v56 = vpop.xlane.xlu0 %3373  ;;  %4235 = vadd.xlane.f32.xlu1 %v11865_v62  ;;  %v4628_v24 = vmul.f32 1.442695, %v4599_v16 }
 0xbc0   :  { %9303 = vrcp.f32 %v3374_v56  ;;  %v13513_v56 = vld [vmem:[#allocation32_spill] sm:$0xff] }
 0xbc1   :  { %9305 = vrcp.f32 %v3368_v41 }
 0xbc2   :  { %v9292_v15 = vpop.eup %9291  ;;  %9307 = vrcp.f32 %v3372_v23 }
 0xbc3   :  { %v3370_v46 = vpop.xlane.xlu0 %3369  ;;  %4648 = vadd.xlane.f32.xlu1 %v11870_v54  ;;  %v3382_v48 = vpop.xlane.xlu1 %3381  ;;  %v3410_v32 = vmul.f32 %v9292_v15, %v11636_v44  ;;  %v4600_v44 = vsub.f32 %v11609_v8, %v11849_v42 }
 0xbc4   :  { %v9294_v31 = vpop.eup %9293  ;;  %9309 = vrcp.f32 %v3370_v46 }
 0xbc5   :  { %v9296_v20 = vpop.eup %9295  ;;  %9311 = vpow2.f32 %v4620_v13  ;;  %v3407_v45 = vmul.f32 %v9294_v31, %v11631_v39  ;;  %v4630_v42 = vmul.f32 1.442695, %v4600_v44 }
 0xbc6   :  { %v9298_v63 = vpop.eup %9297  ;;  %9313 = vpow2.f32 %v4626_v34  ;;  %v3409_v49 = vmul.f32 %v9296_v20, %v11627_v2  ;;  %v4601_v2 = vsub.f32 %v11582_v29, %v11852_v3 }
 0xbc7   :  { %v3380_v52 = vpop.xlane.xlu0 %3379  ;;  %4654 = vadd.xlane.f32.xlu1 %v11872_v6  ;;  %v3378_v30 = vpop.xlane.xlu1 %3377  ;;  %v3408_v23 = vmul.f32 %v9298_v63, %v11644_v0 }
 0xbc8   :  { %v11882_v22 = vpop.eup %9299  ;;  %9315 = vrcp.f32 %v3380_v52  ;;  %v3424_v41 = vpack.c.bf16 %v3410_v32, %v3409_v49  ;;  %v4632_v31 = vmul.f32 1.442695, %v4601_v2  ;;  %v13515_v49 = vld [vmem:[#allocation42_spill] sm:$0xff] }
 0xbc9   :  { %v3423_v55 = vpack.c.bf16 %v3408_v23, %v3407_v45  ;;  %v11886_v38 = vpop.eup %9301  ;;  %9317 = vrcp.f32 %v3378_v30  ;;  %v13514_v23 = vld [vmem:[#allocation40_spill] sm:$0xff] }
 0xbca   :  { %v9304_v39 = vpop.eup %9303  ;;  %9319 = vrcp.f32 %v3382_v48 }
 0xbcb   :  { %v3376_v0 = vpop.xlane.xlu0 %3375  ;;  %4650 = vadd.xlane.f32.xlu1 %v11882_v22  ;;  %8079 = vmatprep.mubr.bf16.mxu0 %v3423_v55  ;;  %v9306_v58 = vpop.eup %9305  ;;  %v3414_v15 = vmul.f32 %v9304_v39, %v11651_v37 }
 0xbcc   :  { %9321 = vrcp.f32 %v3376_v0  ;;  %8080 = vmatmul.mubr.bf16.vlgmr.msra.gmra.mrb[100].mxu0 %v3424_v41  ;;  %v9308_v8 = vpop.eup %9307  ;;  %v3411_v46 = vmul.f32 %v9306_v58, %v11646_v7 }
 0xbcd   :  { %8114 = vmatpush3.bf16.xpose.msra.mxu0 %v13513_v56  ;;  %9323 = vpow2.f32 %v4628_v24  ;;  %v3413_v29 = vmul.f32 %v9308_v8, %v11638_v1 }
 0xbce   :  { %v9310_v26 = vpop.eup %9309  ;;  %9325 = vpow2.f32 %v4630_v42 }
 0xbcf   :  { %v3388_v13 = vpop.xlane.xlu0 %3387  ;;  %4656 = vadd.xlane.f32.xlu1 %v11886_v38  ;;  %v3412_v48 = vmul.f32 %v9310_v26, %v11655_v17  ;;  %v11897_v3 = vpop.eup %9311  ;;  %v3426_v63 = vpack.c.bf16 %v3414_v15, %v3413_v29  ;;  %9327 = vpow2.f32 %v4632_v31 }
 0xbd0   :  { %v11899_v20 = vpop.eup %9313 }
 0xbd1   :  { %v3425_v34 = vpack.c.bf16 %v3412_v48, %v3411_v46 }
 0xbd2   :  { %v9316_v32 = vpop.eup %9315 }
 0xbd3   :  { %v3384_v37 = vpop.xlane.xlu0 %3383  ;;  %4652 = vadd.xlane.f32.xlu1 %v11897_v3  ;;  %8083 = vmatprep.mubr.bf16.mxu0 %v3425_v34  ;;  %v9318_v52 = vpop.eup %9317  ;;  %v3417_v30 = vmul.f32 %v9316_v32, %v11662_v59 }
 0xbd4   :  { %8084 = vmatmul.mubr.bf16.gmra.mrb[104].mxu0 %v3426_v63  ;;  %v9320_v7 = vpop.eup %9319  ;;  %v3416_v16 = vmul.f32 %v9318_v52, %v13514_v23  ;;  %v13517_v23 = vld [vmem:[#allocation7_spill] sm:$0xff] }
 0xbd5   :  { %v3418_v44 = vmul.f32 %v9320_v7, %v13515_v49 }
 0xbd6   :  { %v9322_v17 = vpop.eup %9321 }
 0xbd7   :  { %v3390_v1 = vpop.xlane.xlu0 %3389  ;;  %4658 = vadd.xlane.f32.xlu1 %v11899_v20  ;;  %v3415_v45 = vmul.f32 %v9322_v17, %v11669_v9  ;;  %v11907_v41 = vpop.eup %9323  ;;  %v3428_v39 = vpack.c.bf16 %v3418_v44, %v3417_v30 }
 0xbd8   :  { %9329 = vrcp.f32 %v3390_v1  ;;  %v11909_v0 = vpop.eup %9325 }
 0xbd9   :  { %v3427_v55 = vpack.c.bf16 %v3416_v16, %v3415_v45  ;;  %9331 = vrcp.f32 %v3384_v37  ;;  %v11913_v9 = vpop.eup %9327 }
 0xbda   :  { %9333 = vrcp.f32 %v3388_v13 }
 0xbdb   :  { %v3386_v58 = vpop.xlane.xlu0 %3385  ;;  %4660 = vadd.xlane.f32.xlu1 %v11907_v41  ;;  %v3799_v59 = vpop.xlane.xlu1 %3798  ;;  %8087 = vmatprep.mubr.bf16.mxu0 %v3427_v55  ;;  %v13518_v55 = vld [vmem:[#allocation10_spill] sm:$0xff] }
 0xbdc   :  { %9335 = vrcp.f32 %v3386_v58  ;;  %4662 = vadd.xlane.f32.xlu0 %v11909_v0  ;;  %8088 = vmatmul.mubr.bf16.gmra.mrb[108].mxu0 %v3428_v39 }
 0xbdf   :  { %v3789_v2 = vpop.xlane.xlu0 %3788  ;;  %4664 = vadd.xlane.f32.xlu1 %v11913_v9  ;;  %v3795_v24 = vpop.xlane.xlu1 %3794 }
 0xbe2   :  { %v9330_v8 = vpop.eup %9329 }
 0xbe3   :  { %v3785_v42 = vpop.xlane.xlu0 %3784  ;;  %v3805_v56 = vpop.xlane.xlu1 %3804  ;;  %v3422_v46 = vmul.f32 %v9330_v8, %v11685_v21  ;;  %v506_v21 = vld [vmem:[%s13187_s6 + $0x80] sm:$0xff] }
 0xbe4   :  { %v9332_v26 = vpop.eup %9331  ;;  %v13519_v8 = vld [vmem:[#allocation6_spill] sm:$0xff] }
 0xbe5   :  { %v9334_v15 = vpop.eup %9333  ;;  %v3419_v29 = vmul.f32 %v9332_v26, %v11680_v19 }
 0xbe6   :  { %v9336_v13 = vpop.eup %9335  ;;  %v3421_v63 = vmul.f32 %v9334_v15, %v11674_v61  ;;  %v13516_v61 = vld [vmem:[#allocation8_spill] sm:$0xff] }
 0xbe7   :  { %v3791_v48 = vpop.xlane.xlu0 %3790  ;;  %v3801_v31 = vpop.xlane.xlu1 %3800  ;;  %v3420_v34 = vmul.f32 %v9336_v13, %v11690_v4 }
 0xbe8   :  { %9337 = vrcp.f32 %v3791_v48  ;;  %v3430_v37 = vpack.c.bf16 %v3422_v46, %v3421_v63 }
 0xbe9   :  { %v3429_v32 = vpack.c.bf16 %v3420_v34, %v3419_v29  ;;  %9339 = vrcp.f32 %v3785_v42 }
 0xbea   :  { %9341 = vrcp.f32 %v3789_v2 }
 0xbeb   :  { %v3787_v52 = vpop.xlane.xlu0 %3786  ;;  %v3807_v7 = vpop.xlane.xlu1 %3806  ;;  %8091 = vmatprep.mubr.bf16.mxu0 %v3429_v32 }
 0xbec   :  { %9343 = vrcp.f32 %v3787_v52  ;;  %8092 = vmatmul.mubr.bf16.gmra.mrb[112].mxu0 %v3430_v37  ;;  %v13521_v52 = vld [vmem:[#allocation11_spill] sm:$0xff] }
 0xbed   :  { %9345 = vrcp.f32 %v3799_v59 }
 0xbee   :  { %9347 = vrcp.f32 %v3795_v24 }
 0xbef   :  { %v3797_v19 = vpop.xlane.xlu0 %3796  ;;  %v3803_v17 = vpop.xlane.xlu1 %3802 }
 0xbf0   :  { %596 = vperm.xlu1 %8508, %v506_v21   ;;  %9349 = vrcp.f32 %v3797_v19 }
 0xbf1   :  { %9351 = vrcp.f32 %v3803_v17  ;;  %v13523_v17 = vld [vmem:[#allocation44_spill] sm:$0xff] }
 0xbf2   :  { %5247 = vrot.lane.b32.xlu0 %v13516_v61, %s9725_s21  ;;  %v9338_v4 = vpop.eup %9337  ;;  %9353 = vrcp.f32 %v3801_v31 }
 0xbf3   :  { %v3793_v30 = vpop.xlane.xlu0 %3792  ;;  %v3809_v1 = vpop.xlane.xlu1 %3808  ;;  %v3835_v44 = vmul.f32 %v9338_v4, %v11714_v10 }
 0xbf4   :  { %v9340_v45 = vpop.eup %9339  ;;  %9355 = vrcp.f32 %v3793_v30  ;;  %5241 = vrot.lane.b32.xlu1 %v13517_v23, %s9725_s21 }
 0xbf5   :  { %v9342_v16 = vpop.eup %9341  ;;  %v3832_v59 = vmul.f32 %v9340_v45, %v11706_v12  ;;  %9357 = vrcp.f32 %v3807_v7  ;;  %v13520_v12 = vld [vmem:[#allocation9_spill] sm:$0xff]  ;;  %v13522_v7 = vld [vmem:[#allocation75_spill] sm:$0xff] }
 0xbf6   :  { %v9344_v49 = vpop.eup %9343  ;;  %5251 = vrot.lane.b32.xlu0 %v13518_v55, %s9725_s21  ;;  %v3834_v24 = vmul.f32 %v9342_v16, %v11698_v47  ;;  %9359 = vrcp.f32 %v3805_v56 }
 0xbf7   :  { %v3813_v39 = vpop.xlane.xlu0 %3812  ;;  %v3815_v58 = vpop.xlane.xlu1 %3814  ;;  %v3833_v2 = vmul.f32 %v9344_v49, %v11723_v50  ;;  %9361 = vrcp.f32 %v3809_v1  ;;  %v13524_v49 = vld [vmem:[#allocation78_spill] sm:$0xff] }
 0xbf8   :  { %5243 = vrot.lane.b32.xlu1 %v13519_v8, %s9725_s21  ;;  %v9346_v42 = vpop.eup %9345  ;;  %v3849_v10 = vpack.c.bf16 %v3835_v44, %v3834_v24 }
 0xbf9   :  { %v3848_v26 = vpack.c.bf16 %v3833_v2, %v3832_v59  ;;  %v9348_v15 = vpop.eup %9347  ;;  %v3839_v21 = vmul.f32 %v9346_v42, %v13522_v7  ;;  %v13525_v2 = vld [vmem:[#allocation46_spill] sm:$0xff]  ;;  %v13526_v42 = vld [vmem:[#allocation45_spill] sm:$0xff] }
 0xbfa   :  { %v9350_v13 = vpop.eup %9349  ;;  %v3837_v63 = vmul.f32 %v9348_v15, %v11700_v43 }
 0xbfb   :  { %v3811_v46 = vpop.xlane.xlu1 %3810  ;;  %8115 = vmatprep.mubr.bf16.mxu0 %v3848_v26  ;;  %v9352_v48 = vpop.eup %9351  ;;  %v3838_v29 = vmul.f32 %v9350_v13, %v11732_v60 }
 0xbfc   :  { %v11935_v31 = vpop.xlane.xlu0 %4223  ;;  %9363 = vrcp.f32 %v3811_v46  ;;  %5245 = vrot.lane.b32.xlu1 %v13520_v12, %s9725_s21  ;;  %8116 = vmatmul.mubr.bf16.vlgmr.msra.gmra.mrb[116].mxu0 %v3849_v10  ;;  %v9354_v47 = vpop.eup %9353  ;;  %v3841_v32 = vmul.f32 %v9352_v48, %v11735_v28 }
 0xbfd   :  { %9365 = vrcp.f32 %v3813_v39  ;;  %v3840_v4 = vmul.f32 %v9354_v47, %v13523_v17  ;;  %v3851_v60 = vpack.c.bf16 %v3839_v21, %v3838_v29 }
 0xbfe   :  { %v9356_v50 = vpop.eup %9355  ;;  %9367 = vrcp.f32 %v3815_v58 }
 0xbff   :  { %v4214_v34 = vpop.xlane.xlu1 %4213  ;;  %v3836_v56 = vmul.f32 %v9356_v50, %v11743_v33  ;;  %v9358_v30 = vpop.eup %9357  ;;  %v3852_v33 = vpack.c.bf16 %v3841_v32, %v3840_v4 }
 0xc00   :  { %v11943_v37 = vpop.xlane.xlu0 %4229  ;;  %5249 = vrot.lane.b32.xlu1 %v13521_v52, %s9725_s21  ;;  %v9360_v43 = vpop.eup %9359  ;;  %v3843_v44 = vmul.f32 %v9358_v30, %v13524_v49 }
 0xc01   :  { %v3850_v19 = vpack.c.bf16 %v3837_v63, %v3836_v56  ;;  %v9362_v28 = vpop.eup %9361  ;;  %v3842_v24 = vmul.f32 %v9360_v43, %v13525_v2 }
 0xc02   :  { %v3844_v26 = vmul.f32 %v9362_v28, %v13526_v42 }
 0xc03   :  { %v4210_v1 = vpop.xlane.xlu1 %4209  ;;  %8119 = vmatprep.mubr.bf16.mxu0 %v3850_v19  ;;  %v3853_v10 = vpack.c.bf16 %v3843_v44, %v3842_v24 }
 0xc04   :  { %v4226_v45 = vpop.xlane.xlu0 %4225  ;;  %8120 = vmatmul.mubr.bf16.gmra.mrb[120].mxu0 %v3851_v60  ;;  %9369 = vrcp.f32 %v4210_v1 }
 0xc05   :  { %8123 = vmatprep.mubr.bf16.mxu0 %v3852_v33  ;;  %v13527_v33 = vld [vmem:[#allocation51_spill] sm:$0xff] }
 0xc06   :  { %v9364_v16 = vpop.eup %9363 }
 0xc07   :  { %v4216_v39 = vpop.xlane.xlu1 %4215  ;;  %v3845_v59 = vmul.f32 %v9364_v16, %v11760_v40  ;;  %v9366_v15 = vpop.eup %9365 }
 0xc08   :  { %v4232_v58 = vpop.xlane.xlu0 %4231  ;;  %v9368_v13 = vpop.eup %9367  ;;  %v3846_v50 = vmul.f32 %v9366_v15, %v11751_v25 }
 0xc09   :  { %v3854_v48 = vpack.c.bf16 %v3845_v59, %v3844_v26  ;;  %v3847_v29 = vmul.f32 %v9368_v13, %v11754_v14 }
 0xc0b   :  { %v4212_v46 = vpop.xlane.xlu1 %4211  ;;  %v3855_v63 = vpack.c.bf16 %v3847_v29, %v3846_v50 }
 0xc0c   :  { %v4228_v47 = vpop.xlane.xlu0 %4227  ;;  %9371 = vrcp.f32 %v4212_v46  ;;  %8124 = vmatmul.mubr.bf16.gmra.mrb[124].mxu0 %v3853_v10  ;;  %v13528_v46 = vld [vmem:[#allocation50_spill] sm:$0xff] }
 0xc0d   :  { %8127 = vmatprep.mubr.bf16.mxu0 %v3854_v48  ;;  %9373 = vrcp.f32 %v4216_v39 }
 0xc0e   :  { %v9370_v7 = vpop.eup %9369  ;;  %9375 = vrcp.f32 %v4214_v34 }
 0xc0f   :  { %v4222_v40 = vpop.xlane.xlu1 %4221  ;;  %v4257_v4 = vmul.f32 %v9370_v7, %v11779_v35 }
 0xc10   :  { %v11955_v56 = vpop.xlane.xlu0 %4233 }
 0xc13   :  { %v4218_v32 = vpop.xlane.xlu1 %4217 }
 0xc14   :  { %v11957_v21 = vpop.xlane.xlu0 %4237  ;;  %8128 = vmatmul.mubr.bf16.gmra.mrb[128].mxu0 %v3855_v63  ;;  %9377 = vrcp.f32 %v4218_v32  ;;  %v13530_v32 = vld [vmem:[#allocation43_spill] sm:$0xff] }
 0xc16   :  { %v9372_v19 = vpop.eup %9371 }
 0xc17   :  { %v4220_v17 = vpop.xlane.xlu1 %4219  ;;  %v4258_v25 = vmul.f32 %v9372_v19, %v11796_v57  ;;  %v9374_v16 = vpop.eup %9373 }
 0xc18   :  { %v4240_v60 = vpop.xlane.xlu0 %4239  ;;  %9379 = vrcp.f32 %v4220_v17  ;;  %v9376_v34 = vpop.eup %9375  ;;  %v4260_v44 = vmul.f32 %v9374_v16, %v11789_v18  ;;  %v13531_v17 = vld [vmem:[#allocation52_spill] sm:$0xff] }
 0xc19   :  { %v4273_v14 = vpack.c.bf16 %v4258_v25, %v4257_v4  ;;  %9381 = vrcp.f32 %v4222_v40  ;;  %v4259_v59 = vmul.f32 %v9376_v34, %v11768_v27  ;;  %v13529_v40 = vld [vmem:[#allocation48_spill] sm:$0xff] }
 0xc1a   :  { %9383 = vrcp.f32 %v4228_v47 }
 0xc1b   :  { %v587_v30 = vpop.permute.xlu1 %586  ;;  %8151 = vmatprep.mubr.bf16.mxu0 %v4273_v14  ;;  %9385 = vrcp.f32 %v11935_v31  ;;  %v4274_v42 = vpack.c.bf16 %v4260_v44, %v4259_v59 }
 0xc1c   :  { %v11961_v1 = vpop.xlane.xlu0 %4638  ;;  %v821_v43 = vadd.f32 %v13527_v33, %v587_v30  ;;  %9387 = vrcp.f32 %v4226_v45 }
 0xc1d   :  { %9389 = vrcp.f32 %v4232_v58 }
 0xc1e   :  { %v3956_v28 = vpack.c.bf16 %v821_v43, %v821_v43  ;;  %v9378_v57 = vpop.eup %9377  ;;  %9391 = vrcp.f32 %v11943_v37 }
 0xc1f   :  { %v4261_v24 = vmul.f32 %v9378_v57, %v11810_v5  ;;  %9393 = vrcp.f32 %v11955_v56  ;;  %v13532_v57 = vld [vmem:[#allocation47_spill] sm:$0xff] }
 0xc20   :  { %v4635_v35 = vpop.xlane.xlu0 %4634  ;;  %8149 = vmatprep.subr.bf16.mxu0 %v3956_v28  ;;  %9395 = vrcp.f32 %v11957_v21 }
 0xc21   :  { %8150 = vmatpush3.bf16.xpose.msra.mxu0 %v3956_v28  ;;  %9397 = vrcp.f32 %v4240_v60 }
 0xc22   :  { %v9380_v49 = vpop.eup %9379 }
 0xc23   :  { %v4262_v39 = vmul.f32 %v9380_v49, %v11817_v51  ;;  %v9382_v26 = vpop.eup %9381  ;;  %v13533_v49 = vld [vmem:[#allocation30_spill] sm:$0xff] }
 0xc24   :  { %v4641_v2 = vpop.xlane.xlu0 %4640  ;;  %v9384_v45 = vpop.eup %9383  ;;  %v4263_v18 = vmul.f32 %v9382_v26, %v11803_v53  ;;  %v13536_v26 = vld [vmem:[#allocation61_spill] sm:$0xff] }
 0xc25   :  { %v4275_v31 = vpack.c.bf16 %v4262_v39, %v4261_v24  ;;  %v9386_v10 = vpop.eup %9385  ;;  %v4266_v51 = vmul.f32 %v9384_v45, %v11798_v11  ;;  %v13534_v39 = vld [vmem:[#allocation64_spill] sm:$0xff] }
 0xc26   :  { %v9388_v13 = vpop.eup %9387  ;;  %v4264_v58 = vmul.f32 %v9386_v10, %v11762_v36 }
 0xc27   :  { %v4265_v5 = vmul.f32 %v9388_v13, %v13528_v46  ;;  %v9390_v47 = vpop.eup %9389 }
 0xc28   :  { %v4637_v15 = vpop.xlane.xlu0 %4636  ;;  %8152 = vmatmul.mubr.bf16.vlgmr.msra.gmra.mrb[132].mxu0 %v4274_v42  ;;  %v4276_v48 = vpack.c.bf16 %v4264_v58, %v4263_v18  ;;  %v9392_v37 = vpop.eup %9391  ;;  %v4268_v63 = vmul.f32 %v9390_v47, %v13529_v40  ;;  %v13539_v47 = vld [vmem:[#allocation62_spill] sm:$0xff] }
 0xc29   :  { %8155 = vmatprep.mubr.bf16.mxu0 %v4275_v31  ;;  %v4277_v50 = vpack.c.bf16 %v4266_v51, %v4265_v5  ;;  %v4267_v7 = vmul.f32 %v9392_v37, %v13530_v32  ;;  %9399 = vrcp.f32 %v4637_v15  ;;  %v9394_v30 = vpop.eup %9393  ;;  %v13538_v5 = vld [vmem:[#allocation67_spill] sm:$0xff]  ;;  %v13540_v37 = vld [vmem:[#allocation65_spill] sm:$0xff] }
 0xc2a   :  { %9401 = vrcp.f32 %v4635_v35  ;;  %v9396_v33 = vpop.eup %9395  ;;  %v4269_v35 = vmul.f32 %v9394_v30, %v13533_v49 }
 0xc2b   :  { %v4278_v19 = vpack.c.bf16 %v4268_v63, %v4267_v7  ;;  %v9398_v43 = vpop.eup %9397 }
 0xc2c   :  { %v4647_v27 = vpop.xlane.xlu0 %4646  ;;  %v4272_v21 = vmul.f32 %v9398_v43, %v13532_v57 }
 0xc30   :  { %8156 = vmatmul.mubr.bf16.gmra.mrb[136].mxu0 %v4276_v48  ;;  %v4643_v29 = vpop.xlane.xlu0 %4642 }
 0xc31   :  { %8159 = vmatprep.mubr.bf16.mxu0 %v4277_v50 }
 0xc33   :  { %v9400_v16 = vpop.eup %9399 }
 0xc34   :  { %v4645_v53 = vpop.xlane.xlu0 %4644  ;;  %v9402_v34 = vpop.eup %9401  ;;  %v4683_v59 = vmul.f32 %v9400_v16, %v13534_v39 }
 0xc38   :  { %8160 = vmatmul.mubr.bf16.gmra.mrb[140].mxu0 %v4278_v19 }
 0xc3c   :  { %v592_v11 = vpop.permute.xlu0 %591 }
 0xc3d   :  { %v824_v4 = vadd.f32 %v13531_v17, %v592_v11 }
 0xc3f   :  { %v4381_v36 = vpack.c.bf16 %v824_v4, %v824_v4  ;;  %v13541_v4 = vld [vmem:[#allocation66_spill] sm:$0xff] }
 0xc41   :  { %8185 = vmatprep.subr.bf16.mxu0 %v4381_v36 }
 0xc42   :  { %8186 = vmatpush3.bf16.xpose.msra.mxu0 %v4381_v36 }
 0xc4c   :  { %v4236_v25 = vpop.xlane.xlu1 %4235 }
 0xc4d   :  { %9403 = vrcp.f32 %v4236_v25 }
 0xc4e   :  { %9405 = vrcp.f32 %v4641_v2  ;;  %v13535_v2 = vld [vmem:[#allocation49_spill] sm:$0xff] }
 0xc4f   :  { %9407 = vrcp.f32 %v4645_v53  ;;  %v4271_v24 = vmul.f32 %v9396_v33, %v13535_v2 }
 0xc50   :  { %v4649_v14 = vpop.xlane.xlu1 %4648  ;;  %9409 = vrcp.f32 %v11961_v1  ;;  %v4682_v1 = vmul.f32 %v9402_v34, %v13536_v26 }
 0xc51   :  { %9411 = vrcp.f32 %v4643_v29  ;;  %v4280_v31 = vpack.c.bf16 %v4272_v21, %v4271_v24  ;;  %v13542_v21 = vld [vmem:[#allocation54_spill] sm:$0xff] }
 0xc52   :  { %9413 = vrcp.f32 %v4649_v14  ;;  %v4698_v10 = vpack.c.bf16 %v4683_v59, %v4682_v1 }
 0xc53   :  { %9415 = vrcp.f32 %v4647_v27 }
 0xc54   :  { %v4655_v28 = vpop.xlane.xlu1 %4654 }
 0xc57   :  { %v9404_v56 = vpop.eup %9403 }
 0xc58   :  { %v4651_v60 = vpop.xlane.xlu1 %4650  ;;  %v4270_v44 = vmul.f32 %v9404_v56, %v11865_v62  ;;  %v9406_v45 = vpop.eup %9405  ;;  %v13537_v62 = vld [vmem:[#allocation63_spill] sm:$0xff] }
 0xc59   :  { %v9408_v13 = vpop.eup %9407  ;;  %v4685_v58 = vmul.f32 %v9406_v45, %v13537_v62  ;;  %9417 = vrcp.f32 %v4651_v60 }
 0xc5a   :  { %v4279_v42 = vpack.c.bf16 %v4270_v44, %v4269_v35  ;;  %v9410_v18 = vpop.eup %9409  ;;  %v4687_v48 = vmul.f32 %v9408_v13, %v13538_v5 }
 0xc5b   :  { %v9412_v51 = vpop.eup %9411  ;;  %v4684_v50 = vmul.f32 %v9410_v18, %v13539_v47 }
 0xc5c   :  { %v4657_v15 = vpop.xlane.xlu1 %4656  ;;  %8163 = vmatprep.mubr.bf16.mxu0 %v4279_v42  ;;  %v4686_v27 = vmul.f32 %v9412_v51, %v13540_v37  ;;  %v9414_v40 = vpop.eup %9413 }
 0xc5d   :  { %8164 = vmatmul.mubr.bf16.gmra.mrb[144].mxu0 %v4280_v31  ;;  %v4699_v29 = vpack.c.bf16 %v4685_v58, %v4684_v50  ;;  %v9416_v7 = vpop.eup %9415  ;;  %v4689_v19 = vmul.f32 %v9414_v40, %v11870_v54 }
 0xc5e   :  { %8187 = vmatprep.mubr.bf16.mxu0 %v4698_v10  ;;  %v4700_v32 = vpack.c.bf16 %v4687_v48, %v4686_v27  ;;  %v4688_v36 = vmul.f32 %v9416_v7, %v13541_v4 }
 0xc60   :  { %v4653_v46 = vpop.xlane.xlu1 %4652  ;;  %v4701_v14 = vpack.c.bf16 %v4689_v19, %v4688_v36 }
 0xc61   :  { %9419 = vrcp.f32 %v4653_v46 }
 0xc62   :  { %9421 = vrcp.f32 %v4657_v15 }
 0xc63   :  { %9423 = vrcp.f32 %v4655_v28  ;;  %v9418_v11 = vpop.eup %9417 }
 0xc64   :  { %v4659_v63 = vpop.xlane.xlu1 %4658  ;;  %v4690_v43 = vmul.f32 %v9418_v11, %v11882_v22 }
 0xc65   :  { %8188 = vmatmul.mubr.bf16.vlgmr.msra.gmra.mrb[148].mxu0 %v4699_v29  ;;  %9425 = vrcp.f32 %v4659_v63 }
 0xc66   :  { %8191 = vmatprep.mubr.bf16.mxu0 %v4700_v32 }
 0xc68   :  { %v4661_v53 = vpop.xlane.xlu1 %4660 }
 0xc69   :  { %v4663_v17 = vpop.xlane.xlu0 %4662  ;;  %9427 = vrcp.f32 %v4661_v53 }
 0xc6a   :  { %9429 = vrcp.f32 %v4663_v17 }
 0xc6b   :  { %v9420_v25 = vpop.eup %9419 }
 0xc6c   :  { %v9422_v30 = vpop.eup %9421  ;;  %v4665_v33 = vpop.xlane.xlu1 %4664  ;;  %v4691_v28 = vmul.f32 %v9420_v25, %v11897_v3 }
 0xc6d   :  { %9431 = vrcp.f32 %v4665_v33  ;;  %8192 = vmatmul.mubr.bf16.gmra.mrb[152].mxu0 %v4701_v14  ;;  %v9424_v16 = vpop.eup %9423  ;;  %v4693_v54 = vmul.f32 %v9422_v30, %v11886_v38  ;;  %v5248_v31 = vpop.permute.xlu0 %5247 }
 0xc6e   :  { %v4702_v34 = vpack.c.bf16 %v4691_v28, %v4690_v43  ;;  %v4692_v49 = vmul.f32 %v9424_v16, %v11872_v6 }
 0xc6f   :  { %v9426_v57 = vpop.eup %9425 }
 0xc70   :  { %v597_v56 = vpop.permute.xlu1 %596  ;;  %8195 = vmatprep.mubr.bf16.mxu0 %v4702_v34  ;;  %v4703_v39 = vpack.c.bf16 %v4693_v54, %v4692_v49  ;;  %v4694_v22 = vmul.f32 %v9426_v57, %v11899_v20 }
 0xc71   :  { %v829_v60 = vadd.f32 %v13542_v21, %v597_v56  ;;  %v5252_v15 = vpop.permute.xlu0 %5251 }
 0xc73   :  { %v9428_v35 = vpop.eup %9427  ;;  %v5238_v44 = vpack.c.bf16 %v829_v60, %v829_v60 }
 0xc74   :  { %v5242_v59 = vpop.permute.xlu1 %5241  ;;  %v4695_v3 = vmul.f32 %v9428_v35, %v11907_v41  ;;  %v9430_v2 = vpop.eup %9429 }
 0xc75   :  { %8196 = vmatmul.mubr.bf16.gmra.mrb[156].mxu0 %v4703_v39  ;;  %8485 = vmatprep.subr.msk.bf16.mxu1 %vm1003_vm2, %v5238_v44  ;;  %v5282_v38 = vsel %vm1003_vm2, %v5238_v44, 0  ;;  %v4696_v26 = vmul.f32 %v9430_v2, %v11909_v0 }
 0xc76   :  { %8225 = vmatprep.mubr.msk.bf16.mxu1 %vm978_vm1, %v5242_v59  ;;  %8224 = vmatpush3.bf16.msra.mxu1 %v5282_v38  ;;  %v4704_v24 = vpack.c.bf16 %v4695_v3, %v4694_v22 }
 0xc77   :  { %v9432_v42 = vpop.eup %9431 }
 0xc78   :  { %v5244_v6 = vpop.permute.xlu1 %5243  ;;  %8199 = vmatprep.mubr.bf16.mxu0 %v4704_v24  ;;  %v4697_v1 = vmul.f32 %v9432_v42, %v11913_v9 }
 0xc79   :  { %8226 = vmatmul.mubr.msk.bf16.vlgmr.msra.gmra.mrb[148].mxu1 %vm978_vm1, %v5244_v6 }
 0xc7a   :  { %v4705_v20 = vpack.c.bf16 %v4697_v1, %v4696_v26 }
 0xc7c   :  { %v5246_v41 = vpop.permute.xlu1 %5245 }
 0xc7d   :  { %8200 = vmatmul.mubr.bf16.gmra.mrb[160].mxu0 %v4705_v20  ;;  %8229 = vmatprep.mubr.msk.bf16.mxu1 %vm978_vm1, %v5246_v41 }
 0xc80   :  { %v5250_v45 = vpop.permute.xlu1 %5249 }
 0xc81   :  { %8230 = vmatmul.mubr.msk.bf16.gmra.mrb[152].mxu1 %vm978_vm1, %v5248_v31 }
 0xc82   :  { %8233 = vmatprep.mubr.msk.bf16.mxu1 %vm978_vm1, %v5250_v45 }
 0xc89   :  { %8234 = vmatmul.mubr.msk.bf16.gmra.mrb[156].mxu1 %vm978_vm1, %v5252_v15 }
 0xc9f   :  { %v12009_v10 = vpop.f32.mrb[100].mxu0 }
 0xca0   :  { %v12011_v0 = vpop.f32.mrb[101].mxu0 }
 0xca1   :  { %v12013_v9 = vpop.f32.mrb[102].mxu0 }
 0xca2   :  { %v12015_v13 = vpop.f32.mrb[103].mxu0 }
 0xca7   :  { %v12017_v18 = vpop.f32.mrb[104].mxu0 }
 0xca8   :  { %v12019_v51 = vpop.f32.mrb[105].mxu0 }
 0xca9   :  { %v12021_v62 = vpop.f32.mrb[106].mxu0 }
 0xcaa   :  { %v12023_v58 = vpop.f32.mrb[107].mxu0 }
 0xcaf   :  { %v12025_v46 = vpop.f32.mrb[108].mxu0 }
 0xcb0   :  { %v12027_v5 = vpop.f32.mrb[109].mxu0 }
 0xcb1   :  { %v12029_v48 = vpop.f32.mrb[110].mxu0 }
 0xcb2   :  { %v12031_v47 = vpop.f32.mrb[111].mxu0 }
 0xcbf   :  { %v12033_v50 = vpop.f32.mrb[112].mxu0 }
 0xcc0   :  { %v12035_v37 = vpop.f32.mrb[113].mxu0 }
 0xcc1   :  { %v12037_v27 = vpop.f32.mrb[114].mxu0 }
 0xcc2   :  { %v12039_v29 = vpop.f32.mrb[115].mxu0 }
 0xccf   :  { %v8117_v40 = vpop.f32.mrb[116].mxu0 }
 0xcd0   :  { %v3890_v63 = vpop.f32.mrb[117].mxu0 }
 0xcd1   :  { %v8118_v32 = vpop.f32.mrb[118].mxu0 }
 0xcd2   :  { %v8629_v7 = vpack.i.bf16 %v8118_v32, %v8117_v40  ;;  %v3893_v19 = vpop.f32.mrb[119].mxu0 }
 0xcd3   :  { %v8634_v53 = vpack.i.bf16 %v3893_v19, %v3890_v63 }
 0xcd4   :  { %8630 = vrot.lane.b32.xlu1 %v8629_v7, %s9722_s28  ;;  %v8885_v7 = vld [vmem:[%s13188_s7 + $0x10] sm:$0xff]  }
 0xcd5   :  { %8203 = vmatprep.subr.bf16.mxu0 %v8885_v7 }
 0xcd6   :  { %8204 = vmatpush3.bf16.msra.mxu0 %v8885_v7 }
 0xcd7   :  { %v8121_v11 = vpop.f32.mrb[120].mxu0 }
 0xcd8   :  { %8635 = vrot.lane.b32.xlu1 %v8634_v53, %s9722_s28  ;;  %v3906_v17 = vpop.f32.mrb[121].mxu0 }
 0xcd9   :  { %v8122_v4 = vpop.f32.mrb[122].mxu0 }
 0xcda   :  { %v8639_v36 = vpack.i.bf16 %v8122_v4, %v8121_v11  ;;  %v3909_v25 = vpop.f32.mrb[123].mxu0 }
 0xcdb   :  { %v8644_v14 = vpack.i.bf16 %v3909_v25, %v3906_v17  ;;  %v8886_v17 = vld [vmem:[%s13188_s7 + $0x18] sm:$0xff]  }
 0xcdc   :  { %8640 = vrot.lane.b32.xlu0 %v8639_v36, %s9722_s28  ;;  %8205 = vmatprep.subr.bf16.mxu0 %v8886_v17 }
 0xcdd   :  { %8645 = vrot.lane.b32.xlu1 %v8644_v14, %s9722_s28  ;;  %8206 = vmatpush3.bf16.msra.mxu0 %v8886_v17 }
 0xcdf   :  { %v8125_v30 = vpop.f32.mrb[124].mxu0 }
 0xce0   :  { %v3922_v33 = vpop.f32.mrb[125].mxu0 }
 0xce1   :  { %v8126_v43 = vpop.f32.mrb[126].mxu0 }
 0xce2   :  { %v8649_v28 = vpack.i.bf16 %v8126_v43, %v8125_v30  ;;  %v3925_v16 = vpop.f32.mrb[127].mxu0 }
 0xce3   :  { %v8654_v34 = vpack.i.bf16 %v3925_v16, %v3922_v33 }
 0xce4   :  { %8650 = vrot.lane.b32.xlu0 %v8649_v28, %s9722_s28 }
 0xce5   :  { %8655 = vrot.lane.b32.xlu1 %v8654_v34, %s9722_s28  ;;  %v507_v34 = vld [vmem:[%s13187_s6 + $0x88] sm:$0xff] }
 0xce7   :  { %v12047_v54 = vpop.f32.mrb[128].mxu0 }
 0xce8   :  { %v3938_v56 = vpop.f32.mrb[129].mxu0 }
 0xce9   :  { %v12049_v57 = vpop.f32.mrb[130].mxu0 }
 0xcea   :  { %v8714_v21 = vpack.i.bf16 %v12049_v57, %v12047_v54  ;;  %v3941_v60 = vpop.f32.mrb[131].mxu0 }
 0xceb   :  { %v8704_v49 = vpack.i.bf16 %v3941_v60, %v3938_v56 }
 0xcfb   :  { %v8153_v35 = vpop.f32.mrb[132].mxu0 }
 0xcfc   :  { %v4315_v44 = vpop.f32.mrb[133].mxu0 }
 0xcfd   :  { %v8154_v39 = vpop.f32.mrb[134].mxu0 }
 0xcfe   :  { %v8659_v59 = vpack.i.bf16 %v8154_v39, %v8153_v35  ;;  %v4318_v22 = vpop.f32.mrb[135].mxu0 }
 0xcff   :  { %v8664_v3 = vpack.i.bf16 %v4318_v22, %v4315_v44 }
 0xd00   :  { %8660 = vrot.lane.b32.xlu1 %v8659_v59, %s9723_s15 }
 0xd01   :  { %8665 = vrot.lane.b32.xlu0 %v8664_v3, %s9723_s15 }
 0xd03   :  { %v8157_v2 = vpop.f32.mrb[136].mxu0 }
 0xd04   :  { %v4331_v38 = vpop.f32.mrb[137].mxu0 }
 0xd05   :  { %v8158_v24 = vpop.f32.mrb[138].mxu0 }
 0xd06   :  { %v8669_v42 = vpack.i.bf16 %v8158_v24, %v8157_v2  ;;  %v4334_v6 = vpop.f32.mrb[139].mxu0 }
 0xd07   :  { %v8674_v26 = vpack.i.bf16 %v4334_v6, %v4331_v38 }
 0xd08   :  { %8670 = vrot.lane.b32.xlu0 %v8669_v42, %s9723_s15 }
 0xd09   :  { %8675 = vrot.lane.b32.xlu1 %v8674_v26, %s9723_s15 }
 0xd0b   :  { %v8161_v1 = vpop.f32.mrb[140].mxu0 }
 0xd0c   :  { %v4347_v20 = vpop.f32.mrb[141].mxu0 }
 0xd0d   :  { %v8162_v41 = vpop.f32.mrb[142].mxu0 }
 0xd0e   :  { %v8679_v31 = vpack.i.bf16 %v8162_v41, %v8161_v1  ;;  %v4350_v45 = vpop.f32.mrb[143].mxu0 }
 0xd0f   :  { %v8684_v15 = vpack.i.bf16 %v4350_v45, %v4347_v20 }
 0xd10   :  { %8680 = vrot.lane.b32.xlu0 %v8679_v31, %s9723_s15 }
 0xd11   :  { %8685 = vrot.lane.b32.xlu1 %v8684_v15, %s9723_s15  ;;  %v13543_v15 = vld [vmem:[#allocation13_spill] sm:$0xff] }
 0xd30   :  { %v8165_v40 = vpop.f32.mrb[144].mxu0 }
 0xd31   :  { %v4363_v63 = vpop.f32.mrb[145].mxu0 }
 0xd32   :  { %v8166_v32 = vpop.f32.mrb[146].mxu0 }
 0xd33   :  { %v8734_v19 = vpack.i.bf16 %v8166_v32, %v8165_v40  ;;  %v4366_v53 = vpop.f32.mrb[147].mxu0  ;;  %v13544_v32 = vld [vmem:[#allocation12_spill] sm:$0xff] }
 0xd34   :  { %v8724_v11 = vpack.i.bf16 %v4366_v53, %v4363_v63  ;;  %v508_v53 = vld [vmem:[%s13187_s6 + $0x90] sm:$0xff] }
 0xd38   :  { %v8189_v4 = vpop.f32.mrb[148].mxu0 }
 0xd39   :  { %v4740_v36 = vpop.f32.mrb[149].mxu0 }
 0xd3a   :  { %v8190_v25 = vpop.f32.mrb[150].mxu0 }
 0xd3b   :  { %v8689_v14 = vpack.i.bf16 %v8190_v25, %v8189_v4  ;;  %v4743_v30 = vpop.f32.mrb[151].mxu0 }
 0xd3c   :  { %v8694_v33 = vpack.i.bf16 %v4743_v30, %v4740_v36 }
 0xd3d   :  { %8690 = vrot.lane.b32.xlu1 %v8689_v14, %s9724_s16 }
 0xd40   :  { %v8193_v43 = vpop.f32.mrb[152].mxu0 }
 0xd41   :  { %8695 = vrot.lane.b32.xlu1 %v8694_v33, %s9724_s16  ;;  %v4756_v28 = vpop.f32.mrb[153].mxu0  ;;  %v13545_v33 = vld [vmem:[#allocation15_spill] sm:$0xff] }
 0xd42   :  { %v8194_v16 = vpop.f32.mrb[154].mxu0 }
 0xd43   :  { %v8699_v56 = vpack.i.bf16 %v8194_v16, %v8193_v43  ;;  %v4759_v60 = vpop.f32.mrb[155].mxu0 }
 0xd44   :  { %v8709_v35 = vpack.i.bf16 %v4759_v60, %v4756_v28 }
 0xd45   :  { %601 = vperm.xlu1 %8508, %v507_v34   ;;  %8700 = vrot.lane.b32.xlu0 %v8699_v56, %s9724_s16 }
 0xd46   :  { %v8631_v17 = vpop.permute.xlu1 %8630 }
 0xd47   :  { %v8632_v30 = vunpack.i.l.bf16 %v8631_v17 }
 0xd48   :  { %v8197_v44 = vpop.f32.mrb[156].mxu0 }
 0xd49   :  { %8705 = vrot.lane.b32.xlu0 %v8704_v49, %s9722_s28  ;;  %8710 = vrot.lane.b32.xlu1 %v8709_v35, %s9724_s16  ;;  %v4772_v39 = vpop.f32.mrb[157].mxu0 }
 0xd4a   :  { %v8198_v59 = vpop.f32.mrb[158].mxu0  ;;  %v8636_v4 = vpop.permute.xlu1 %8635 }
 0xd4b   :  { %v8719_v22 = vpack.i.bf16 %v8198_v59, %v8197_v44  ;;  %v4775_v3 = vpop.f32.mrb[159].mxu0  ;;  %v8638_v34 = vunpack.i.h.bf16 %v8636_v4  ;;  %v4997_v44 = vsel %vm978_vm1, %v12009_v10, %v8632_v30 }
 0xd4c   :  { %v8729_v2 = vpack.i.bf16 %v4775_v3, %v4772_v39  ;;  %v12073_v38 = vpop.f32.mrb[148].mxu1  ;;  %v13546_v39 = vld [vmem:[#allocation14_spill] sm:$0xff] }
 0xd4d   :  { %v5318_v24 = vpop.f32.mrb[149].mxu1  ;;  %8715 = vrot.lane.b32.xlu1 %v8714_v21, %s9722_s28  ;;  %8720 = vrot.lane.b32.xlu0 %v8719_v22, %s9724_s16 }
 0xd4e   :  { %v12080_v42 = vpop.f32.mrb[150].mxu1  ;;  %v5381_v14 = vmul.f32 0.35355338, %v5318_v24  ;;  %v4996_v24 = vsel %vm978_vm1, %v12015_v13, %v8638_v34  ;;  %v13548_v13 = vld [vmem:[#allocation17_spill] sm:$0xff] }
 0xd4f   :  { %v12082_v49 = vpop.f32.mrb[151].mxu1  ;;  %v12139_v36 = vpop.permute.xlu1 %8645  ;;  %v5384_v22 = vmul.f32 0.35355338, %v12080_v42 }
 0xd50   :  { %v8201_v6 = vpop.f32.mrb[160].mxu0  ;;  %v12149_v43 = vadd.f32 %v5381_v14, %v13545_v33  ;;  %v5382_v3 = vmul.f32 0.35355338, %v12082_v49 }
 0xd51   :  { %8725 = vrot.lane.b32.xlu0 %v8724_v11, %s9723_s15  ;;  %8730 = vrot.lane.b32.xlu1 %v8729_v2, %s9724_s16  ;;  %v4788_v26 = vpop.f32.mrb[161].mxu0  ;;  %v509_v11 = vld [vmem:[%s13187_s6 + $0x98] sm:$0xff] }
 0xd52   :  { %v8202_v1 = vpop.f32.mrb[162].mxu0 }
 0xd53   :  { %v8739_v20 = vpack.i.bf16 %v8202_v1, %v8201_v6  ;;  %v4791_v41 = vpop.f32.mrb[163].mxu0  ;;  %v8637_v6 = vunpack.i.l.bf16 %v8636_v4 }
 0xd54   :  { %v8744_v31 = vpack.i.bf16 %v4791_v41, %v4788_v26  ;;  %v12086_v45 = vpop.f32.mrb[152].mxu1 }
 0xd55   :  { %v12088_v54 = vpop.f32.mrb[153].mxu1  ;;  %8735 = vrot.lane.b32.xlu1 %v8734_v19, %s9723_s15 }
 0xd56   :  { %v12091_v57 = vpop.f32.mrb[154].mxu1  ;;  %8745 = vrot.lane.b32.xlu0 %v8744_v31, %s9724_s16 }
 0xd57   :  { %v12094_v21 = vpop.f32.mrb[155].mxu1  ;;  %v12141_v25 = vpop.permute.xlu1 %8655 }
 0xd59   :  { %8740 = vrot.lane.b32.xlu1 %v8739_v20, %s9724_s16 }
 0xd5a   :  { %5253 = vrot.lane.b32.xlu0 %v13543_v15, %s9725_s21 }
 0xd5c   :  { %v12099_v40 = vpop.f32.mrb[156].mxu1 }
 0xd5d   :  { %v12101_v63 = vpop.f32.mrb[157].mxu1  ;;  %5255 = vrot.lane.b32.xlu1 %v13544_v32, %s9725_s21 }
 0xd5e   :  { %v12105_v7 = vpop.f32.mrb[158].mxu1  ;;  %5666 = vrot.lane.b32.xlu0 %v13517_v23, %s9726_s27 }
 0xd5f   :  { %v12108_v19 = vpop.f32.mrb[159].mxu1 }
 0xd61   :  { %5668 = vrot.lane.b32.xlu1 %v13519_v8, %s9726_s27 }
 0xd62   :  { %5670 = vrot.lane.b32.xlu0 %v13520_v12, %s9726_s27 }
 0xd65   :  { %5672 = vrot.lane.b32.xlu1 %v13516_v61, %s9726_s27 }
 0xd66   :  { %5674 = vrot.lane.b32.xlu0 %v13521_v52, %s9726_s27 }
 0xd69   :  { %5676 = vrot.lane.b32.xlu1 %v13518_v55, %s9726_s27 }
 0xd6a   :  { %606 = vperm.xlu0 %8507, %v508_v53  }
 0xd6d   :  { %5678 = vrot.lane.b32.xlu1 %v13543_v15, %s9726_s27 }
 0xd6e   :  { %5680 = vrot.lane.b32.xlu0 %v13544_v32, %s9726_s27 }
 0xd71   :  { %6091 = vrot.lane.b32.xlu1 %v13517_v23, %s9727_s29 }
 0xd72   :  { %6093 = vrot.lane.b32.xlu0 %v13519_v8, %s9727_s29 }
 0xd75   :  { %6095 = vrot.lane.b32.xlu1 %v13520_v12, %s9727_s29 }
 0xd76   :  { %6097 = vrot.lane.b32.xlu0 %v13516_v61, %s9727_s29 }
 0xd79   :  { %6099 = vrot.lane.b32.xlu1 %v13521_v52, %s9727_s29 }
 0xd7a   :  { %6101 = vrot.lane.b32.xlu0 %v13518_v55, %s9727_s29 }
 0xd7d   :  { %611 = vperm.xlu1 %8508, %v509_v11   ;;  %v12174_v11 = vadd.f32 %v5382_v3, %v13548_v13 }
 0xd7e   :  { %6103 = vrot.lane.b32.xlu0 %v13543_v15, %s9727_s29 }
 0xd81   :  { %6105 = vrot.lane.b32.xlu1 %v13544_v32, %s9727_s29 }
 0xd82   :  { %6516 = vrot.lane.b32.xlu0 %v13517_v23, %s9728_s4  ;;  %v8641_v23 = vpop.permute.xlu0 %8640 }
 0xd83   :  { %v8643_v31 = vunpack.i.h.bf16 %v8641_v23  ;;  %v8642_v42 = vunpack.i.l.bf16 %v8641_v23  ;;  %v5386_v23 = vmul.f32 0.35355338, %v12094_v21 }
 0xd85   :  { %6518 = vrot.lane.b32.xlu1 %v13519_v8, %s9728_s4  ;;  %v8661_v8 = vpop.permute.xlu1 %8660  ;;  %v5002_v21 = vsel %vm978_vm1, %v12021_v62, %v8643_v31 }
 0xd86   :  { %6520 = vrot.lane.b32.xlu0 %v13520_v12, %s9728_s4  ;;  %v12143_v12 = vpop.permute.xlu0 %8650  ;;  %v8663_v56 = vunpack.i.h.bf16 %v8661_v8  ;;  %v8662_v60 = vunpack.i.l.bf16 %v8661_v8 }
 0xd87   :  { %v8652_v31 = vunpack.i.l.bf16 %v12143_v12 }
 0xd88   :  { %v5013_v20 = vsel %vm2876_vm6, %v4997_v44, %v8662_v60  ;;  %v5001_v44 = vsel %vm978_vm1, %v12017_v18, %v8642_v42  ;;  %v13551_v18 = vld [vmem:[#allocation18_spill] sm:$0xff]  ;;  %v5389_v42 = vmul.f32 0.35355338, %v12101_v63 }
 0xd89   :  { %6522 = vrot.lane.b32.xlu1 %v13516_v61, %s9728_s4  ;;  %v12145_v61 = vpop.permute.xlu1 %8675  ;;  %v5005_v63 = vsel %vm978_vm1, %v12025_v46, %v8652_v31  ;;  %v13557_v31 = vld [vmem:[#allocation56_spill] sm:$0xff] }
 0xd8a   :  { %6524 = vrot.lane.b32.xlu0 %v13521_v52, %s9728_s4  ;;  %v8633_v52 = vunpack.i.h.bf16 %v8631_v17  ;;  %v8666_v28 = vpop.permute.xlu0 %8665  ;;  %v5385_v17 = vmul.f32 0.35355338, %v12088_v54  ;;  %v5387_v54 = vmul.f32 0.35355338, %v12086_v45 }
 0xd8b   :  { %v8668_v10 = vunpack.i.h.bf16 %v8666_v28  ;;  %v8667_v41 = vunpack.i.l.bf16 %v8666_v28 }
 0xd8c   :  { %v4998_v35 = vsel %vm978_vm1, %v12013_v9, %v8633_v52  ;;  %v4995_v52 = vsel %vm978_vm1, %v12011_v0, %v8637_v6  ;;  %v13550_v6 = vld [vmem:[#allocation22_spill] sm:$0xff]  ;;  %v12203_v62 = vadd.f32 %v5387_v54, %v13551_v18 }
 0xd8d   :  { %6526 = vrot.lane.b32.xlu1 %v13518_v55, %s9728_s4  ;;  %v5383_v55 = vmul.f32 0.35355338, %v12073_v38  ;;  %v12151_v16 = vpop.permute.xlu1 %8685  ;;  %v5014_v9 = vsel %vm2876_vm6, %v4998_v35, %v8663_v56  ;;  %v5012_v28 = vsel %vm2876_vm6, %v4996_v24, %v8668_v10  ;;  %v5011_v34 = vsel %vm2876_vm6, %v4995_v52, %v8667_v41 }
 0xd8e   :  { %6528 = vrot.lane.b32.xlu0 %v13543_v15, %s9728_s4  ;;  %v8671_v2 = vpop.permute.xlu0 %8670  ;;  %v5388_v24 = vmul.f32 0.35355338, %v12091_v57  ;;  %v8653_v41 = vunpack.i.h.bf16 %v12143_v12  ;;  %v5390_v52 = vmul.f32 0.35355338, %v12108_v19  ;;  %v5392_v19 = vmul.f32 0.35355338, %v12105_v7 }
 0xd8f   :  { %v12159_v59 = vadd.f32 %v5383_v55, %v13546_v39  ;;  %v8673_v56 = vunpack.i.h.bf16 %v8671_v2  ;;  %v8672_v60 = vunpack.i.l.bf16 %v8671_v2  ;;  %v8648_v7 = vunpack.i.h.bf16 %v12139_v36 }
 0xd90   :  { %v5006_v12 = vsel %vm978_vm1, %v12029_v48, %v8653_v41 }
 0xd91   :  { %6530 = vrot.lane.b32.xlu1 %v13544_v32, %s9728_s4  ;;  %v13547_v32 = vld [vmem:[#allocation16_spill] sm:$0xff] }
 0xd92   :  { %v12171_v53 = vadd.f32 %v5384_v22, %v13547_v32  ;;  %v8681_v4 = vpop.permute.xlu0 %8680  ;;  %v13549_v22 = vld [vmem:[#allocation20_spill] sm:$0xff] }
 0xd93   :  { %v12192_v3 = vadd.f32 %v5385_v17, %v13549_v22  ;;  %v13552_v17 = vld [vmem:[#allocation21_spill] sm:$0xff] }
 0xdad   :  { %5413 = vmax.xlane.f32.xlu0 %v12149_v43 }
 0xdaf   :  { %v8691_v38 = vpop.permute.xlu1 %8690 }
 0xdb0   :  { %v8693_v26 = vunpack.i.h.bf16 %v8691_v38  ;;  %v8692_v1 = vunpack.i.l.bf16 %v8691_v38 }
 0xdb1   :  { %5417 = vmax.xlane.f32.xlu0 %v12159_v59 }
 0xdb2   :  { %v5030_v49 = vsel %vm2893_vm7, %v5014_v9, %v8693_v26  ;;  %v5029_v15 = vsel %vm2893_vm7, %v5013_v20, %v8692_v1  ;;  %v12196_v26 = vadd.f32 %v5386_v23, %v13550_v6  ;;  %v5018_v9 = vsel %vm2876_vm6, %v5002_v21, %v8673_v56  ;;  %v13554_v56 = vld [vmem:[#allocation25_spill] sm:$0xff]  ;;  %v13555_v21 = vld [vmem:[#allocation23_spill] sm:$0xff] }
 0xdb3   :  { %v5044_v8 = vpack.c.bf16 %v5030_v49, %v5029_v15  ;;  %v8696_v14 = vpop.permute.xlu1 %8695  ;;  %v5017_v20 = vsel %vm2876_vm6, %v5001_v44, %v8672_v60  ;;  %v8683_v23 = vunpack.i.h.bf16 %v8681_v4 }
 0xdb4   :  { %v8698_v30 = vunpack.i.h.bf16 %v8696_v14  ;;  %v8697_v55 = vunpack.i.l.bf16 %v8696_v14  ;;  %v12219_v14 = vadd.f32 %v5388_v24, %v13552_v17  ;;  %v13556_v24 = vld [vmem:[#allocation19_spill] sm:$0xff] }
 0xdb5   :  { %5415 = vmax.xlane.f32.xlu1 %v12174_v11  ;;  %5419 = vmax.xlane.f32.xlu0 %v12171_v53 }
 0xdb6   :  { %v5028_v35 = vsel %vm2893_vm7, %v5012_v28, %v8698_v30  ;;  %v5027_v0 = vsel %vm2893_vm7, %v5011_v34, %v8697_v55  ;;  %v8682_v30 = vunpack.i.l.bf16 %v8681_v4  ;;  %v13553_v55 = vld [vmem:[#allocation24_spill] sm:$0xff]  ;;  %v12234_v4 = vadd.f32 %v5390_v52, %v13554_v56 }
 0xdb7   :  { %v8701_v2 = vpop.permute.xlu0 %8700  ;;  %v5043_v38 = vpack.c.bf16 %v5028_v35, %v5027_v0  ;;  %v12230_v28 = vadd.f32 %v5389_v42, %v13553_v55  ;;  %v5022_v35 = vsel %vm2876_vm6, %v5006_v12, %v8683_v23  ;;  %v8647_v0 = vunpack.i.l.bf16 %v12139_v36 }
 0xdb8   :  { %v8703_v45 = vunpack.i.h.bf16 %v8701_v2  ;;  %v8702_v1 = vunpack.i.l.bf16 %v8701_v2  ;;  %v5021_v48 = vsel %vm2876_vm6, %v5005_v63, %v8682_v30  ;;  %v8677_v36 = vunpack.i.l.bf16 %v12145_v61 }
 0xdb9   :  { %8207 = vmatprep.mubr.msk.bf16.mxu0 %vm50_vm0, %v5043_v38  ;;  %5421 = vmax.xlane.f32.xlu1 %v12192_v3  ;;  %v5000_v30 = vsel %vm978_vm1, %v12023_v58, %v8648_v7  ;;  %v4999_v63 = vsel %vm978_vm1, %v12019_v51, %v8647_v0 }
 0xdba   :  { %v12206_v10 = vsel %vm2893_vm7, %v5018_v9, %v8703_v45  ;;  %v12209_v57 = vsel %vm2893_vm7, %v5017_v20, %v8702_v1  ;;  %5423 = vmax.xlane.f32.xlu0 %v12196_v26  ;;  %8208 = vmatmul.mubr.msk.bf16.vlgmr.msra.gmra.mrb[84].mxu0 %vm50_vm0, %v5044_v8  ;;  %v5391_v8 = vmul.f32 0.35355338, %v12099_v40  ;;  %v12254_v45 = vadd.f32 %v5392_v19, %v13556_v24 }
 0xdbb   :  { %v8706_v49 = vpop.permute.xlu0 %8705  ;;  %v5046_v15 = vpack.c.bf16 %v12206_v10, %v12209_v57  ;;  %v8678_v1 = vunpack.i.h.bf16 %v12145_v61  ;;  %v5015_v58 = vsel %vm2876_vm6, %v4999_v63, %v8677_v36  ;;  %v8687_v36 = vunpack.i.l.bf16 %v12151_v16 }
 0xdbc   :  { %v12249_v44 = vadd.f32 %v5391_v8, %v13555_v21  ;;  %v8708_v9 = vunpack.i.h.bf16 %v8706_v49  ;;  %v8707_v20 = vunpack.i.l.bf16 %v8706_v49 }
 0xdbd   :  { %5425 = vmax.xlane.f32.xlu1 %v12203_v62  ;;  %v5016_v49 = vsel %vm2876_vm6, %v5000_v30, %v8678_v1 }
 0xdbe   :  { %5427 = vmax.xlane.f32.xlu0 %v12219_v14  ;;  %v5008_v8 = vsel %vm978_vm1, %v12039_v29, %v8708_v9 }
 0xdbf   :  { %v8721_v34 = vpop.permute.xlu0 %8720 }
 0xdc0   :  { %v8723_v60 = vunpack.i.h.bf16 %v8721_v34  ;;  %v8722_v54 = vunpack.i.l.bf16 %v8721_v34  ;;  %v5007_v34 = vsel %vm978_vm1, %v12035_v37, %v8707_v20 }
 0xdc1   :  { %5429 = vmax.xlane.f32.xlu1 %v12230_v28 }
 0xdc2   :  { %v12240_v46 = vsel %vm2893_vm7, %v5022_v35, %v8723_v60  ;;  %v12243_v40 = vsel %vm2893_vm7, %v5021_v48, %v8722_v54  ;;  %5431 = vmax.xlane.f32.xlu0 %v12234_v4 }
 0xdc3   :  { %v8726_v2 = vpop.permute.xlu0 %8725  ;;  %v5048_v38 = vpack.c.bf16 %v12240_v46, %v12243_v40 }
 0xdc4   :  { %v602_v41 = vpop.permute.xlu1 %601  ;;  %v8728_v52 = vunpack.i.h.bf16 %v8726_v2  ;;  %v8727_v23 = vunpack.i.l.bf16 %v8726_v2 }
 0xdc5   :  { %v832_v42 = vadd.f32 %v13557_v31, %v602_v41  ;;  %5433 = vmax.xlane.f32.xlu1 %v12249_v44  ;;  %v8658_v41 = vunpack.i.h.bf16 %v12141_v25  ;;  %v8657_v31 = vunpack.i.l.bf16 %v12141_v25 }
 0xdc6   :  { %5435 = vmax.xlane.f32.xlu0 %v12254_v45  ;;  %v5024_v51 = vsel %vm2876_vm6, %v5008_v8, %v8728_v52  ;;  %v5023_v46 = vsel %vm2876_vm6, %v5007_v34, %v8727_v23 }
 0xdc7   :  { %v5663_v12 = vpack.c.bf16 %v832_v42, %v832_v42  ;;  %v8688_v42 = vunpack.i.h.bf16 %v12151_v16  ;;  %v5004_v23 = vsel %vm978_vm1, %v12031_v47, %v8658_v41  ;;  %v5003_v25 = vsel %vm978_vm1, %v12027_v5, %v8657_v31 }
 0xdc8   :  { %v8711_v61 = vpop.permute.xlu1 %8710  ;;  %v8746_v19 = vpop.permute.xlu0 %8745  ;;  %v5019_v16 = vsel %vm2876_vm6, %v5003_v25, %v8687_v36  ;;  %v13559_v25 = vld [vmem:[#allocation55_spill] sm:$0xff] }
 0xdc9   :  { %v8713_v60 = vunpack.i.h.bf16 %v8711_v61  ;;  %v8712_v54 = vunpack.i.l.bf16 %v8711_v61  ;;  %v8748_v35 = vunpack.i.h.bf16 %v8746_v19  ;;  %v8747_v48 = vunpack.i.l.bf16 %v8746_v19  ;;  %8486 = vmatprep.subr.msk.bf16.mxu0 %vm1003_vm2, %v5663_v12 }
 0xdca   :  { %v5707_v40 = vsel %vm1003_vm2, %v5663_v12, 0  ;;  %v5020_v63 = vsel %vm2876_vm6, %v5004_v23, %v8688_v42 }
 0xdcb   :  { %v5032_v29 = vsel %vm2893_vm7, %v5016_v49, %v8713_v60  ;;  %v5031_v37 = vsel %vm2893_vm7, %v5015_v58, %v8712_v54  ;;  %v5040_v7 = vsel %vm2893_vm7, %v5024_v51, %v8748_v35  ;;  %v5039_v0 = vsel %vm2893_vm7, %v5023_v46, %v8747_v48  ;;  %8260 = vmatpush3.bf16.msra.mxu0 %v5707_v40 }
 0xdcc   :  { %v8716_v2 = vpop.permute.xlu1 %8715  ;;  %v5254_v1 = vpop.permute.xlu0 %5253  ;;  %v5045_v9 = vpack.c.bf16 %v5032_v29, %v5031_v37  ;;  %v5049_v20 = vpack.c.bf16 %v5040_v7, %v5039_v0 }
 0xdcd   :  { %8237 = vmatprep.mubr.msk.bf16.mxu1 %vm978_vm1, %v5254_v1  ;;  %v8717_v34 = vunpack.i.l.bf16 %v8716_v2  ;;  %v13558_v1 = vld [vmem:[#allocation53_spill] sm:$0xff] }
 0xdce   :  { %8211 = vmatprep.mubr.msk.bf16.mxu0 %vm50_vm0, %v5045_v9 }
 0xdcf   :  { %8212 = vmatmul.mubr.msk.bf16.gmra.mrb[88].mxu0 %vm50_vm0, %v5046_v15  ;;  %v8718_v15 = vunpack.i.h.bf16 %v8716_v2  ;;  %v5009_v60 = vsel %vm978_vm1, %v12033_v50, %v8717_v34 }
 0xdd0   :  { %v8731_v52 = vpop.permute.xlu1 %8730  ;;  %v5667_v54 = vpop.permute.xlu0 %5666 }
 0xdd1   :  { %v8733_v30 = vunpack.i.h.bf16 %v8731_v52  ;;  %v8732_v12 = vunpack.i.l.bf16 %v8731_v52  ;;  %v5010_v47 = vsel %vm978_vm1, %v12037_v27, %v8718_v15 }
 0xdd3   :  { %v5036_v49 = vsel %vm2893_vm7, %v5020_v63, %v8733_v30  ;;  %v5035_v8 = vsel %vm2893_vm7, %v5019_v16, %v8732_v12 }
 0xdd4   :  { %v8736_v10 = vpop.permute.xlu1 %8735  ;;  %v5047_v57 = vpack.c.bf16 %v5036_v49, %v5035_v8  ;;  %v5671_v37 = vpop.permute.xlu0 %5670 }
 0xdd5   :  { %v8738_v61 = vunpack.i.h.bf16 %v8736_v10  ;;  %v8737_v19 = vunpack.i.l.bf16 %v8736_v10 }
 0xdd6   :  { %8215 = vmatprep.mubr.msk.bf16.mxu0 %vm50_vm0, %v5047_v57 }
 0xdd7   :  { %8216 = vmatmul.mubr.msk.bf16.gmra.mrb[92].mxu0 %vm50_vm0, %v5048_v38  ;;  %v5026_v58 = vsel %vm2876_vm6, %v5010_v47, %v8738_v61  ;;  %v5025_v51 = vsel %vm2876_vm6, %v5009_v60, %v8737_v19 }
 0xdd8   :  { %v8741_v5 = vpop.permute.xlu1 %8740  ;;  %8219 = vmatprep.mubr.msk.bf16.mxu0 %vm50_vm0, %v5049_v20  ;;  %v5675_v7 = vpop.permute.xlu0 %5674 }
 0xdd9   :  { %v8743_v35 = vunpack.i.h.bf16 %v8741_v5  ;;  %v8742_v48 = vunpack.i.l.bf16 %v8741_v5 }
 0xddb   :  { %v5042_v46 = vsel %vm2893_vm7, %v5026_v58, %v8743_v35  ;;  %v5041_v38 = vsel %vm2893_vm7, %v5025_v51, %v8742_v48 }
 0xddc   :  { %v5256_v40 = vpop.permute.xlu1 %5255  ;;  %v5050_v29 = vpack.c.bf16 %v5042_v46, %v5041_v38 }
 0xddd   :  { %8238 = vmatmul.mubr.msk.bf16.gmra.mrb[160].mxu1 %vm978_vm1, %v5256_v40 }
 0xddf   :  { %8220 = vmatmul.mubr.msk.bf16.gmra.mrb[96].mxu0 %vm50_vm0, %v5050_v29 }
 0xde0   :  { %v5669_v27 = vpop.permute.xlu1 %5668  ;;  %8261 = vmatprep.mubr.msk.bf16.mxu0 %vm978_vm1, %v5667_v54 }
 0xde4   :  { %v5673_v50 = vpop.permute.xlu1 %5672 }
 0xde7   :  { %8262 = vmatmul.mubr.msk.bf16.vlgmr.msra.gmra.mrb[164].mxu0 %vm978_vm1, %v5669_v27 }
 0xde8   :  { %v5677_v0 = vpop.permute.xlu1 %5676  ;;  %8265 = vmatprep.mubr.msk.bf16.mxu0 %vm978_vm1, %v5671_v37 }
 0xde9   :  { %v607_v2 = vpop.permute.xlu0 %606 }
 0xdea   :  { %v837_v9 = vadd.f32 %v13558_v1, %v607_v2 }
 0xdec   :  { %v6088_v20 = vpack.c.bf16 %v837_v9, %v837_v9  ;;  %v5679_v41 = vpop.permute.xlu1 %5678 }
 0xded   :  { %v5681_v12 = vpop.permute.xlu0 %5680 }
 0xdee   :  { %8487 = vmatprep.subr.msk.bf16.mxu0 %vm1003_vm2, %v6088_v20  ;;  %v6132_v31 = vsel %vm1003_vm2, %v6088_v20, 0 }
 0xdef   :  { %8266 = vmatmul.mubr.msk.bf16.gmra.mrb[168].mxu0 %vm978_vm1, %v5673_v50 }
 0xdf0   :  { %8296 = vmatpush3.bf16.msra.mxu0 %v6132_v31  ;;  %v6092_v42 = vpop.permute.xlu1 %6091  ;;  %8269 = vmatprep.mubr.msk.bf16.mxu0 %vm978_vm1, %v5675_v7 }
 0xdf1   :  { %v6094_v16 = vpop.permute.xlu0 %6093 }
 0xdf4   :  { %v6096_v36 = vpop.permute.xlu1 %6095 }
 0xdf5   :  { %v6098_v8 = vpop.permute.xlu0 %6097 }
 0xdf7   :  { %8270 = vmatmul.mubr.msk.bf16.gmra.mrb[172].mxu0 %vm978_vm1, %v5677_v0 }
 0xdf8   :  { %v6100_v52 = vpop.permute.xlu1 %6099  ;;  %8273 = vmatprep.mubr.msk.bf16.mxu0 %vm978_vm1, %v5679_v41 }
 0xdf9   :  { %v6102_v10 = vpop.permute.xlu0 %6101 }
 0xdfc   :  { %v612_v23 = vpop.permute.xlu1 %611 }
 0xdfd   :  { %v840_v30 = vadd.f32 %v13559_v25, %v612_v23  ;;  %v6104_v57 = vpop.permute.xlu0 %6103 }
 0xdff   :  { %v6513_v63 = vpack.c.bf16 %v840_v30, %v840_v30  ;;  %8274 = vmatmul.mubr.msk.bf16.gmra.mrb[176].mxu0 %vm978_vm1, %v5681_v12  ;;  %v13561_v12 = vld [vmem:[#allocation29_spill] sm:$0xff] }
 0xe00   :  { %8297 = vmatprep.mubr.msk.bf16.mxu0 %vm978_vm1, %v6092_v42  ;;  %v6106_v15 = vpop.permute.xlu1 %6105 }
 0xe01   :  { %8488 = vmatprep.subr.msk.bf16.mxu0 %vm1003_vm2, %v6513_v63  ;;  %v6557_v49 = vsel %vm1003_vm2, %v6513_v63, 0  ;;  %v6517_v34 = vpop.permute.xlu0 %6516 }
 0xe04   :  { %v6519_v61 = vpop.permute.xlu1 %6518 }
 0xe05   :  { %v6521_v19 = vpop.permute.xlu0 %6520 }
 0xe07   :  { %8298 = vmatmul.mubr.msk.bf16.vlgmr.msra.gmra.mrb[180].mxu0 %vm978_vm1, %v6094_v16 }
 0xe08   :  { %8332 = vmatpush3.bf16.msra.mxu0 %v6557_v49  ;;  %8301 = vmatprep.mubr.msk.bf16.mxu0 %vm978_vm1, %v6096_v36  ;;  %v6523_v5 = vpop.permute.xlu1 %6522  ;;  %v13562_v49 = vld [vmem:[#allocation26_spill] sm:$0xff] }
 0xe09   :  { %v6525_v47 = vpop.permute.xlu0 %6524 }
 0xe0c   :  { %v6527_v60 = vpop.permute.xlu1 %6526 }
 0xe0d   :  { %v6529_v54 = vpop.permute.xlu0 %6528 }
 0xe0f   :  { %8302 = vmatmul.mubr.msk.bf16.gmra.mrb[184].mxu0 %vm978_vm1, %v6098_v8 }
 0xe10   :  { %8305 = vmatprep.mubr.msk.bf16.mxu0 %vm978_vm1, %v6100_v52  ;;  %v6531_v35 = vpop.permute.xlu1 %6530 }
 0xe17   :  { %8306 = vmatmul.mubr.msk.bf16.gmra.mrb[188].mxu0 %vm978_vm1, %v6102_v10 }
 0xe18   :  { %8309 = vmatprep.mubr.msk.bf16.mxu0 %vm978_vm1, %v6104_v57 }
 0xe1f   :  { %8310 = vmatmul.mubr.msk.bf16.gmra.mrb[192].mxu0 %vm978_vm1, %v6106_v15  ;;  %v13563_v15 = vld [vmem:[#allocation28_spill] sm:$0xff] }
 0xe20   :  { %8333 = vmatprep.mubr.msk.bf16.mxu0 %vm978_vm1, %v6517_v34 }
 0xe27   :  { %8334 = vmatmul.mubr.msk.bf16.vlgmr.msra.gmra.mrb[196].mxu0 %vm978_vm1, %v6519_v61 }
 0xe28   :  { %8337 = vmatprep.mubr.msk.bf16.mxu0 %vm978_vm1, %v6521_v19 }
 0xe2f   :  { %8338 = vmatmul.mubr.msk.bf16.gmra.mrb[200].mxu0 %vm978_vm1, %v6523_v5 }
 0xe30   :  { %8341 = vmatprep.mubr.msk.bf16.mxu0 %vm978_vm1, %v6525_v47 }
 0xe37   :  { %8342 = vmatmul.mubr.msk.bf16.gmra.mrb[204].mxu0 %vm978_vm1, %v6527_v60 }
 0xe38   :  { %8345 = vmatprep.mubr.msk.bf16.mxu0 %vm978_vm1, %v6529_v54 }
 0xe3a   :  { %v5414_v48 = vpop.xlane.xlu0 %5413 }
 0xe3b   :  { %v5445_v38 = vsub.f32 %v12149_v43, %v5414_v48 }
 0xe3d   :  { %v5461_v37 = vmul.f32 1.442695, %v5445_v38 }
 0xe3e   :  { %v5418_v58 = vpop.xlane.xlu0 %5417 }
 0xe3f   :  { %8346 = vmatmul.mubr.msk.bf16.gmra.mrb[208].mxu0 %vm978_vm1, %v6531_v35  ;;  %v5447_v27 = vsub.f32 %v12159_v59, %v5418_v58  ;;  %9433 = vpow2.f32 %v5461_v37 }
 0xe41   :  { %v5465_v41 = vmul.f32 1.442695, %v5447_v27 }
 0xe42   :  { %v5416_v51 = vpop.xlane.xlu1 %5415  ;;  %v5420_v46 = vpop.xlane.xlu0 %5419 }
 0xe43   :  { %v5446_v40 = vsub.f32 %v12174_v11, %v5416_v51  ;;  %v5448_v2 = vsub.f32 %v12171_v53, %v5420_v46  ;;  %v13560_v11 = vld [vmem:[#allocation27_spill] sm:$0xff] }
 0xe45   :  { %v5463_v0 = vmul.f32 1.442695, %v5446_v40  ;;  %v5467_v59 = vmul.f32 1.442695, %v5448_v2 }
 0xe46   :  { %v5422_v29 = vpop.xlane.xlu1 %5421 }
 0xe47   :  { %v5424_v50 = vpop.xlane.xlu0 %5423  ;;  %v5449_v31 = vsub.f32 %v12192_v3, %v5422_v29  ;;  %9435 = vpow2.f32 %v5463_v0 }
 0xe48   :  { %v5450_v25 = vsub.f32 %v12196_v26, %v5424_v50  ;;  %9437 = vpow2.f32 %v5465_v41 }
 0xe49   :  { %v5469_v3 = vmul.f32 1.442695, %v5449_v31  ;;  %9439 = vpow2.f32 %v5467_v59  ;;  %v12370_v47 = vpop.eup %9433 }
 0xe4a   :  { %v5426_v43 = vpop.xlane.xlu1 %5425  ;;  %v5471_v10 = vmul.f32 1.442695, %v5450_v25 }
 0xe4b   :  { %v5428_v30 = vpop.xlane.xlu0 %5427  ;;  %v5451_v16 = vsub.f32 %v12203_v62, %v5426_v43  ;;  %9441 = vpow2.f32 %v5469_v3 }
 0xe4c   :  { %v5452_v26 = vsub.f32 %v12219_v14, %v5428_v30  ;;  %9443 = vpow2.f32 %v5471_v10 }
 0xe4d   :  { %v5473_v19 = vmul.f32 1.442695, %v5451_v16  ;;  %v510_v16 = vld [vmem:[%s13187_s6 + $0xa0] sm:$0xff] }
 0xe4e   :  { %v5430_v57 = vpop.xlane.xlu1 %5429  ;;  %v5475_v14 = vmul.f32 1.442695, %v5452_v26 }
 0xe4f   :  { %v5453_v60 = vsub.f32 %v12230_v28, %v5430_v57  ;;  %v5432_v35 = vpop.xlane.xlu0 %5431  ;;  %9445 = vpow2.f32 %v5473_v19 }
 0xe50   :  { %9447 = vpow2.f32 %v5475_v14  ;;  %v5454_v46 = vsub.f32 %v12234_v4, %v5432_v35 }
 0xe51   :  { %v12376_v48 = vpop.eup %9435  ;;  %v5477_v51 = vmul.f32 1.442695, %v5453_v60 }
 0xe52   :  { %v12379_v58 = vpop.eup %9437  ;;  %v5434_v38 = vpop.xlane.xlu1 %5433  ;;  %v5479_v50 = vmul.f32 1.442695, %v5454_v46 }
 0xe53   :  { %v12385_v40 = vpop.eup %9439  ;;  %9449 = vpow2.f32 %v5477_v51  ;;  %v5436_v0 = vpop.xlane.xlu0 %5435 }
 0xe54   :  { %9451 = vpow2.f32 %v5479_v50 }
 0xe55   :  { %v12392_v27 = vpop.eup %9441 }
 0xe56   :  { %v12398_v2 = vpop.eup %9443 }
 0xeb0   :  { %v8239_v7 = vpop.f32.mrb[160].mxu1 }
 0xeb1   :  { %v5366_v1 = vpop.f32.mrb[161].mxu1  ;;  %v5395_v36 = vmul.f32 0.35355338, %v8239_v7  ;;  %v5455_v7 = vsub.f32 %v12249_v44, %v5434_v38 }
 0xeb2   :  { %v5393_v9 = vmul.f32 0.35355338, %v5366_v1  ;;  %v8240_v20 = vpop.f32.mrb[162].mxu1  ;;  %v12401_v1 = vpop.eup %9445 }
 0xeb3   :  { %v5369_v42 = vpop.f32.mrb[163].mxu1  ;;  %v5396_v53 = vmul.f32 0.35355338, %v8240_v20  ;;  %v12355_v8 = vadd.f32 %v5395_v36, %v13562_v49  ;;  %v5456_v20 = vsub.f32 %v12254_v45, %v5436_v0  ;;  %v12405_v31 = vpop.eup %9447 }
 0xeb4   :  { %v12346_v52 = vadd.f32 %v5393_v9, %v13560_v11  ;;  %v5394_v23 = vmul.f32 0.35355338, %v5369_v42  ;;  %v5481_v9 = vmul.f32 1.442695, %v5455_v7 }
 0xeb5   :  { %v12360_v34 = vadd.f32 %v5396_v53, %v13563_v15  ;;  %v5483_v43 = vmul.f32 1.442695, %v5456_v20 }
 0xeb6   :  { %v12350_v63 = vadd.f32 %v5394_v23, %v13561_v12  ;;  %5437 = vmax.xlane.f32.xlu1 %v12346_v52  ;;  %9453 = vpow2.f32 %v5481_v9  ;;  %v12412_v23 = vpop.eup %9449 }
 0xeb7   :  { %9455 = vpow2.f32 %v5483_v43  ;;  %v12415_v59 = vpop.eup %9451 }
 0xeb8   :  { %5439 = vmax.xlane.f32.xlu0 %v12350_v63 }
 0xeba   :  { %5441 = vmax.xlane.f32.xlu1 %v12355_v8  ;;  %v12363_v61 = vpop.f32.mrb[164].mxu0 }
 0xebb   :  { %v12365_v62 = vpop.f32.mrb[165].mxu0 }
 0xebc   :  { %5443 = vmax.xlane.f32.xlu0 %v12360_v34  ;;  %v12368_v5 = vpop.f32.mrb[166].mxu0 }
 0xebd   :  { %v12373_v54 = vpop.f32.mrb[167].mxu0 }
 0xebe   :  { %5493 = vadd.xlane.f32.xlu1 %v12370_v47 }
 0xec0   :  { %5495 = vadd.xlane.f32.xlu0 %v12376_v48  ;;  %v12422_v3 = vpop.eup %9453 }
 0xec1   :  { %v12428_v26 = vpop.eup %9455 }
 0xec2   :  { %5497 = vadd.xlane.f32.xlu1 %v12379_v58  ;;  %v12383_v28 = vpop.f32.mrb[168].mxu0 }
 0xec3   :  { %v12387_v29 = vpop.f32.mrb[169].mxu0 }
 0xec4   :  { %5499 = vadd.xlane.f32.xlu0 %v12385_v40  ;;  %v12390_v37 = vpop.f32.mrb[170].mxu0 }
 0xec5   :  { %v12395_v4 = vpop.f32.mrb[171].mxu0 }
 0xec6   :  { %5501 = vadd.xlane.f32.xlu1 %v12392_v27 }
 0xec8   :  { %5503 = vadd.xlane.f32.xlu0 %v12398_v2 }
 0xeca   :  { %5505 = vadd.xlane.f32.xlu1 %v12401_v1  ;;  %v8271_v41 = vpop.f32.mrb[172].mxu0 }
 0xecb   :  { %v5775_v44 = vpop.f32.mrb[173].mxu0 }
 0xecc   :  { %5507 = vadd.xlane.f32.xlu0 %v12405_v31  ;;  %v12408_v42 = vpop.f32.mrb[174].mxu0 }
 0xecd   :  { %v12410_v36 = vpop.f32.mrb[175].mxu0 }
 0xed0   :  { %5509 = vadd.xlane.f32.xlu0 %v12412_v23 }
 0xed2   :  { %v8275_v45 = vpop.f32.mrb[176].mxu0 }
 0xed3   :  { %v5791_v25 = vpop.f32.mrb[177].mxu0 }
 0xed4   :  { %5511 = vadd.xlane.f32.xlu0 %v12415_v59  ;;  %v12418_v30 = vpop.f32.mrb[178].mxu0 }
 0xed5   :  { %13564 = vst [vmem:[#allocation68_spill] sm:$0xff] %v12418_v30  ;;  %v12420_v53 = vpop.f32.mrb[179].mxu0 }
 0xed6   :  { %13565 = vst [vmem:[#allocation69_spill] sm:$0xff] %v12420_v53 }
 0xed8   :  { %5513 = vadd.xlane.f32.xlu0 %v12422_v3 }
 0xeda   :  { %v8299_v10 = vpop.f32.mrb[180].mxu0 }
 0xedb   :  { %616 = vperm.xlu1 %8508, %v510_v16   ;;  %v6168_v57 = vpop.f32.mrb[181].mxu0 }
 0xedc   :  { %5515 = vadd.xlane.f32.xlu0 %v12428_v26  ;;  %v12431_v19 = vpop.f32.mrb[182].mxu0 }
 0xedd   :  { %13566 = vst [vmem:[#allocation70_spill] sm:$0xff] %v12431_v19  ;;  %v12433_v14 = vpop.f32.mrb[183].mxu0 }
 0xede   :  { %13567 = vst [vmem:[#allocation71_spill] sm:$0xff] %v12433_v14  ;;  %v5808_v14 = vmul.f32 0.35355338, %v12363_v61 }
 0xee2   :  { %v8303_v60 = vpop.f32.mrb[184].mxu0 }
 0xee3   :  { %v6184_v35 = vpop.f32.mrb[185].mxu0 }
 0xee4   :  { %v12435_v51 = vpop.f32.mrb[186].mxu0 }
 0xee5   :  { %13568 = vst [vmem:[#allocation72_spill] sm:$0xff] %v12435_v51  ;;  %v12437_v46 = vpop.f32.mrb[187].mxu0 }
 0xee6   :  { %13569 = vst [vmem:[#allocation73_spill] sm:$0xff] %v12437_v46  ;;  %v12455_v46 = vadd.f32 %v5808_v14, %v13546_v39 }
 0xee8   :  { %13575 = vst [vmem:[#allocation31_spill] sm:$0xff] %v12455_v46 }
 0xeea   :  { %v8307_v38 = vpop.f32.mrb[188].mxu0 }
 0xeeb   :  { %v6200_v50 = vpop.f32.mrb[189].mxu0 }
 0xeec   :  { %v12439_v7 = vpop.f32.mrb[190].mxu0 }
 0xeed   :  { %13570 = vst [vmem:[#allocation74_spill] sm:$0xff] %v12439_v7  ;;  %v12441_v0 = vpop.f32.mrb[191].mxu0  ;;  %v5806_v7 = vmul.f32 0.35355338, %v12365_v62  ;;  %v5810_v62 = vmul.f32 0.35355338, %v12387_v29 }
 0xeee   :  { %13571 = vst [vmem:[#allocation76_spill] sm:$0xff] %v12441_v0 }
 0xef2   :  { %v8311_v9 = vpop.f32.mrb[192].mxu0 }
 0xef3   :  { %v12443_v20 = vpop.f32.mrb[193].mxu0 }
 0xef4   :  { %v12445_v43 = vpop.f32.mrb[194].mxu0 }
 0xef5   :  { %13572 = vst [vmem:[#allocation77_spill] sm:$0xff] %v12445_v43  ;;  %v12447_v16 = vpop.f32.mrb[195].mxu0  ;;  %v12462_v43 = vadd.f32 %v5806_v7, %v13545_v33  ;;  %v12478_v7 = vadd.f32 %v5810_v62, %v13549_v22  ;;  %v5820_v62 = vmul.f32 0.35355338, %v8275_v45 }
 0xef6   :  { %13573 = vst [vmem:[#allocation34_spill] sm:$0xff] %v12447_v16  ;;  %v5812_v16 = vmul.f32 0.35355338, %v12383_v28  ;;  %v5816_v28 = vmul.f32 0.35355338, %v8271_v41 }
 0xef7   :  { %13577 = vst [vmem:[#allocation38_spill] sm:$0xff] %v12462_v43  ;;  %13582 = vst [vmem:[#allocation32_spill] sm:$0xff] %v12478_v7 }
 0xef8   :  { %v12473_v14 = vadd.f32 %v5812_v16, %v13551_v18  ;;  %v5814_v16 = vmul.f32 0.35355338, %v5775_v44 }
 0xefa   :  { %v8335_v19 = vpop.f32.mrb[196].mxu0  ;;  %13581 = vst [vmem:[#allocation39_spill] sm:$0xff] %v12473_v14  ;;  %v12492_v29 = vadd.f32 %v5814_v16, %v13553_v55  ;;  %v6233_v16 = vmul.f32 0.35355338, %v8299_v10 }
 0xefb   :  { %v12450_v53 = vpop.f32.mrb[197].mxu0 }
 0xefc   :  { %v12452_v51 = vpop.f32.mrb[198].mxu0  ;;  %13585 = vst [vmem:[#allocation8_spill] sm:$0xff] %v12492_v29  ;;  %v12508_v45 = vadd.f32 %v6233_v16, %v13546_v39  ;;  %v6241_v16 = vmul.f32 0.35355338, %v8307_v38 }
 0xefd   :  { %13574 = vst [vmem:[#allocation33_spill] sm:$0xff] %v12452_v51  ;;  %v12458_v0 = vpop.f32.mrb[199].mxu0 }
 0xefe   :  { %13576 = vst [vmem:[#allocation41_spill] sm:$0xff] %v12458_v0 }
 0xeff   :  { %5842 = vmax.xlane.f32.xlu1 %v12455_v46 }
 0xf02   :  { %v12465_v61 = vpop.f32.mrb[200].mxu0 }
 0xf03   :  { %13578 = vst [vmem:[#allocation36_spill] sm:$0xff] %v12465_v61  ;;  %5838 = vmax.xlane.f32.xlu1 %v12462_v43  ;;  %v12468_v30 = vpop.f32.mrb[201].mxu0 }
 0xf04   :  { %13579 = vst [vmem:[#allocation37_spill] sm:$0xff] %v12468_v30  ;;  %v12470_v51 = vpop.f32.mrb[202].mxu0 }
 0xf05   :  { %13580 = vst [vmem:[#allocation35_spill] sm:$0xff] %v12470_v51  ;;  %v6612_v0 = vpop.f32.mrb[203].mxu0  ;;  %v12486_v51 = vadd.f32 %v5816_v28, %v13555_v21  ;;  %v5818_v28 = vmul.f32 0.35355338, %v5791_v25 }
 0xf07   :  { %5850 = vmax.xlane.f32.xlu1 %v12473_v14  ;;  %13584 = vst [vmem:[#allocation42_spill] sm:$0xff] %v12486_v51 }
 0xf0a   :  { %v12480_v46 = vpop.f32.mrb[204].mxu0 }
 0xf0b   :  { %5846 = vmax.xlane.f32.xlu1 %v12478_v7  ;;  %v12483_v43 = vpop.f32.mrb[205].mxu0 }
 0xf0c   :  { %13583 = vst [vmem:[#allocation40_spill] sm:$0xff] %v12483_v43  ;;  %v8344_v30 = vpop.f32.mrb[206].mxu0  ;;  %v12500_v43 = vadd.f32 %v5820_v62, %v13562_v49  ;;  %v6237_v62 = vmul.f32 0.35355338, %v8303_v60 }
 0xf0d   :  { %v12488_v61 = vpop.f32.mrb[207].mxu0 }
 0xf0e   :  { %v12516_v25 = vadd.f32 %v6237_v62, %v13551_v18  ;;  %v6245_v62 = vmul.f32 0.35355338, %v8311_v9  ;;  %v6656_v9 = vmul.f32 0.35355338, %v12450_v53 }
 0xf0f   :  { %5858 = vmax.xlane.f32.xlu1 %v12486_v51  ;;  %v12504_v51 = vadd.f32 %v5818_v28, %v13560_v11  ;;  %v6235_v28 = vmul.f32 0.35355338, %v6184_v35 }
 0xf10   :  { %v12532_v35 = vadd.f32 %v6245_v62, %v13562_v49  ;;  %v6661_v62 = vmul.f32 0.35355338, %v6612_v0 }
 0xf11   :  { %v12520_v10 = vadd.f32 %v6235_v28, %v13549_v22  ;;  %v6243_v28 = vmul.f32 0.35355338, %v12443_v20 }
 0xf12   :  { %v12494_v41 = vpop.f32.mrb[208].mxu0  ;;  %13588 = vst [vmem:[#allocation6_spill] sm:$0xff] %v12532_v35 }
 0xf13   :  { %5854 = vmax.xlane.f32.xlu1 %v12492_v29  ;;  %v12497_v7 = vpop.f32.mrb[209].mxu0  ;;  %v6231_v29 = vmul.f32 0.35355338, %v6168_v57  ;;  %13587 = vst [vmem:[#allocation10_spill] sm:$0xff] %v12520_v10  ;;  %v12524_v57 = vadd.f32 %v6241_v16, %v13555_v21  ;;  %v12537_v38 = vadd.f32 %v6243_v28, %v13560_v11  ;;  %v6658_v16 = vmul.f32 0.35355338, %v8335_v19 }
 0xf14   :  { %13586 = vst [vmem:[#allocation7_spill] sm:$0xff] %v12497_v7  ;;  %v8348_v14 = vpop.f32.mrb[210].mxu0  ;;  %v12551_v19 = vadd.f32 %v6661_v62, %v13550_v6 }
 0xf15   :  { %v6644_v44 = vpop.f32.mrb[211].mxu0  ;;  %v12512_v7 = vadd.f32 %v6231_v29, %v13545_v33  ;;  %v6239_v29 = vmul.f32 0.35355338, %v6200_v50  ;;  %v12541_v50 = vadd.f32 %v6658_v16, %v13546_v39 }
 0xf17   :  { %5866 = vmax.xlane.f32.xlu1 %v12500_v43  ;;  %v12528_v60 = vadd.f32 %v6239_v29, %v13553_v55  ;;  %v12546_v29 = vadd.f32 %v6656_v9, %v13545_v33 }
 0xf19   :  { %13589 = vst [vmem:[#allocation9_spill] sm:$0xff] %v12546_v29 }
 0xf1b   :  { %5862 = vmax.xlane.f32.xlu1 %v12504_v51 }
 0xf1f   :  { %6267 = vmax.xlane.f32.xlu1 %v12508_v45 }
 0xf23   :  { %6263 = vmax.xlane.f32.xlu1 %v12512_v7 }
 0xf27   :  { %6275 = vmax.xlane.f32.xlu1 %v12516_v25 }
 0xf2b   :  { %6271 = vmax.xlane.f32.xlu1 %v12520_v10 }
 0xf2f   :  { %6283 = vmax.xlane.f32.xlu1 %v12524_v57 }
 0xf33   :  { %6279 = vmax.xlane.f32.xlu1 %v12528_v60 }
 0xf37   :  { %6291 = vmax.xlane.f32.xlu1 %v12532_v35  ;;  %v6667_v35 = vmul.f32 0.35355338, %v8344_v30 }
 0xf39   :  { %v12557_v9 = vadd.f32 %v6667_v35, %v13556_v24 }
 0xf3b   :  { %6287 = vmax.xlane.f32.xlu1 %v12537_v38 }
 0xf3f   :  { %6692 = vmax.xlane.f32.xlu1 %v12541_v50 }
 0xf43   :  { %v5438_v20 = vpop.xlane.xlu1 %5437  ;;  %6688 = vmax.xlane.f32.xlu1 %v12546_v29  ;;  %v6671_v29 = vmul.f32 0.35355338, %v8348_v14 }
 0xf44   :  { %v5457_v28 = vsub.f32 %v12346_v52, %v5438_v20 }
 0xf45   :  { %v5440_v10 = vpop.xlane.xlu0 %5439 }
 0xf46   :  { %v5485_v39 = vmul.f32 1.442695, %v5457_v28  ;;  %v5458_v16 = vsub.f32 %v12350_v63, %v5440_v10  ;;  %v12562_v63 = vadd.f32 %v6671_v29, %v13563_v15  ;;  %v6669_v10 = vmul.f32 0.35355338, %v6644_v44 }
 0xf47   :  { %v5442_v53 = vpop.xlane.xlu1 %5441  ;;  %6698 = vmax.xlane.f32.xlu1 %v12551_v19 }
 0xf48   :  { %9457 = vpow2.f32 %v5485_v39  ;;  %v5487_v33 = vmul.f32 1.442695, %v5458_v16  ;;  %v5459_v0 = vsub.f32 %v12355_v8, %v5442_v53  ;;  %13590 = vst [vmem:[#allocation11_spill] sm:$0xff] %v12562_v63  ;;  %v12566_v35 = vadd.f32 %v6669_v10, %v13561_v12 }
 0xf49   :  { %v5444_v52 = vpop.xlane.xlu0 %5443 }
 0xf4a   :  { %9459 = vpow2.f32 %v5487_v33  ;;  %v5489_v30 = vmul.f32 1.442695, %v5459_v0  ;;  %v5460_v62 = vsub.f32 %v12360_v34, %v5444_v52  ;;  %13591 = vst [vmem:[#allocation75_spill] sm:$0xff] %v12566_v35 }
 0xf4b   :  { %v5494_v20 = vpop.xlane.xlu1 %5493  ;;  %6710 = vmax.xlane.f32.xlu1 %v12557_v9 }
 0xf4c   :  { %9461 = vrcp.f32 %v5494_v20  ;;  %v5491_v14 = vmul.f32 1.442695, %v5460_v62 }
 0xf4d   :  { %v5496_v28 = vpop.xlane.xlu0 %5495 }
 0xf4e   :  { %9463 = vrcp.f32 %v5496_v28  ;;  %v13592_v28 = vld [vmem:[#allocation58_spill] sm:$0xff] }
 0xf4f   :  { %v5498_v8 = vpop.xlane.xlu1 %5497  ;;  %6718 = vmax.xlane.f32.xlu1 %v12562_v63  ;;  %9465 = vpow2.f32 %v5489_v30 }
 0xf50   :  { %9467 = vpow2.f32 %v5491_v14 }
 0xf51   :  { %v5500_v39 = vpop.xlane.xlu0 %5499 }
 0xf52   :  { %v12568_v16 = vpop.eup %9457  ;;  %9469 = vrcp.f32 %v5500_v39 }
 0xf53   :  { %v5502_v53 = vpop.xlane.xlu1 %5501  ;;  %5517 = vadd.xlane.f32.xlu0 %v12568_v16  ;;  %6714 = vmax.xlane.f32.xlu1 %v12566_v35 }
 0xf54   :  { %v12572_v44 = vpop.eup %9459 }
 0xf55   :  { %v5504_v34 = vpop.xlane.xlu0 %5503 }
 0xf56   :  { %9471 = vrcp.f32 %v5504_v34  ;;  %v9462_v29 = vpop.eup %9461 }
 0xf57   :  { %9473 = vrcp.f32 %v5498_v8  ;;  %v5506_v33 = vpop.xlane.xlu1 %5505  ;;  %5519 = vadd.xlane.f32.xlu0 %v12572_v44  ;;  %v5541_v30 = vmul.f32 %v9462_v29, %v12370_v47 }
 0xf58   :  { %9475 = vrcp.f32 %v5502_v53  ;;  %v9464_v0 = vpop.eup %9463 }
 0xf59   :  { %v5508_v52 = vpop.xlane.xlu0 %5507  ;;  %v12575_v20 = vpop.eup %9465  ;;  %v5542_v62 = vmul.f32 %v9464_v0, %v12376_v48 }
 0xf5a   :  { %9477 = vrcp.f32 %v5508_v52  ;;  %v12581_v34 = vpop.eup %9467 }
 0xf5b   :  { %v617_v10 = vpop.permute.xlu1 %616  ;;  %5521 = vadd.xlane.f32.xlu0 %v12575_v20  ;;  %v5557_v39 = vpack.c.bf16 %v5542_v62, %v5541_v30  ;;  %9479 = vrcp.f32 %v5506_v33 }
 0xf5c   :  { %v845_v14 = vadd.f32 %v13592_v28, %v617_v10  ;;  %v9470_v53 = vpop.eup %9469 }
 0xf5d   :  { %v5510_v8 = vpop.xlane.xlu0 %5509  ;;  %8243 = vmatprep.mubr.bf16.mxu1 %v5557_v39  ;;  %v5544_v0 = vmul.f32 %v9470_v53, %v12385_v40 }
 0xf5e   :  { %v5240_v63 = vpack.c.bf16 %v845_v14, %v845_v14  ;;  %9481 = vrcp.f32 %v5510_v8 }
 0xf5f   :  { %5523 = vadd.xlane.f32.xlu0 %v12581_v34 }
 0xf60   :  { %v9472_v35 = vpop.eup %9471  ;;  %8241 = vmatprep.subr.bf16.mxu1 %v5240_v63 }
 0xf61   :  { %v9474_v47 = vpop.eup %9473  ;;  %8242 = vmatpush3.bf16.xpose.msra.mxu1 %v5240_v63  ;;  %v5512_v48 = vpop.xlane.xlu0 %5511  ;;  %v5546_v52 = vmul.f32 %v9472_v35, %v12398_v2 }
 0xf62   :  { %v9476_v29 = vpop.eup %9475  ;;  %9483 = vrcp.f32 %v5512_v48  ;;  %v5543_v30 = vmul.f32 %v9474_v47, %v12379_v58 }
 0xf63   :  { %v5545_v10 = vmul.f32 %v9476_v29, %v12392_v27  ;;  %v511_v29 = vld [vmem:[%s13187_s6 + $0xa8] sm:$0xff] }
 0xf64   :  { %v5558_v33 = vpack.c.bf16 %v5544_v0, %v5543_v30  ;;  %v9478_v28 = vpop.eup %9477  ;;  %v5807_v30 = vmul.f32 0.35355338, %v12373_v54  ;;  %v5817_v54 = vmul.f32 0.35355338, %v12408_v42  ;;  %v13594_v42 = vld [vmem:[#allocation69_spill] sm:$0xff] }
 0xf65   :  { %v5514_v62 = vpop.xlane.xlu0 %5513  ;;  %v5559_v14 = vpack.c.bf16 %v5546_v52, %v5545_v10  ;;  %v9480_v39 = vpop.eup %9479  ;;  %v5548_v40 = vmul.f32 %v9478_v28, %v12405_v31  ;;  %v5813_v10 = vmul.f32 0.35355338, %v12390_v37  ;;  %v5815_v37 = vmul.f32 0.35355338, %v12410_v36  ;;  %v13595_v36 = vld [vmem:[#allocation70_spill] sm:$0xff] }
 0xf66   :  { %9485 = vrcp.f32 %v5514_v62  ;;  %v5547_v2 = vmul.f32 %v9480_v39, %v12401_v1  ;;  %v12604_v62 = vadd.f32 %v5807_v30, %v13548_v13  ;;  %v13600_v30 = vld [vmem:[#allocation76_spill] sm:$0xff] }
 0xf67   :  { %v12624_v28 = vadd.f32 %v5815_v37, %v13554_v56 }
 0xf68   :  { %8244 = vmatmul.mubr.bf16.vlgmr.msra.gmra.mrb[164].mxu1 %v5558_v33  ;;  %v9482_v8 = vpop.eup %9481  ;;  %v5560_v27 = vpack.c.bf16 %v5548_v40, %v5547_v2  ;;  %v12619_v33 = vadd.f32 %v5817_v54, %v13556_v24  ;;  %v6234_v40 = vmul.f32 0.35355338, %v13595_v36  ;;  %v13596_v2 = vld [vmem:[#allocation71_spill] sm:$0xff]  ;;  %v13601_v54 = vld [vmem:[#allocation77_spill] sm:$0xff] }
 0xf69   :  { %8247 = vmatprep.mubr.bf16.mxu1 %v5559_v14  ;;  %v5516_v63 = vpop.xlane.xlu0 %5515  ;;  %v5549_v58 = vmul.f32 %v9482_v8, %v12412_v23  ;;  %v5809_v23 = vmul.f32 0.35355338, %v12368_v5  ;;  %v6246_v37 = vmul.f32 0.35355338, %v13601_v54 }
 0xf6a   :  { %9487 = vrcp.f32 %v5516_v63  ;;  %v5819_v63 = vmul.f32 0.35355338, %v13594_v42  ;;  %v13603_v42 = vld [vmem:[#allocation33_spill] sm:$0xff] }
 0xf6c   :  { %v9484_v53 = vpop.eup %9483  ;;  %v12634_v8 = vadd.f32 %v5819_v63, %v13561_v12  ;;  %v6659_v63 = vmul.f32 0.35355338, %v13603_v42 }
 0xf6d   :  { %v5550_v35 = vmul.f32 %v9484_v53, %v12415_v59  ;;  %v12599_v59 = vadd.f32 %v5809_v23, %v13547_v32  ;;  %v12639_v53 = vadd.f32 %v6234_v40, %v13547_v32  ;;  %v13604_v40 = vld [vmem:[#allocation41_spill] sm:$0xff] }
 0xf6e   :  { %v12679_v36 = vadd.f32 %v6659_v63, %v13547_v32  ;;  %v13609_v63 = vld [vmem:[#allocation31_spill] sm:$0xff] }
 0xf6f   :  { %v5561_v47 = vpack.c.bf16 %v5550_v35, %v5549_v58  ;;  %v6232_v58 = vmul.f32 0.35355338, %v13596_v2  ;;  %v6657_v2 = vmul.f32 0.35355338, %v13604_v40 }
 0xf70   :  { %8248 = vmatmul.mubr.bf16.gmra.mrb[168].mxu1 %v5560_v27  ;;  %v9486_v48 = vpop.eup %9485  ;;  %v13597_v27 = vld [vmem:[#allocation72_spill] sm:$0xff] }
 0xf71   :  { %8251 = vmatprep.mubr.bf16.mxu1 %v5561_v47  ;;  %v5551_v31 = vmul.f32 %v9486_v48, %v12422_v3  ;;  %v12609_v3 = vadd.f32 %v5813_v10, %v13552_v17  ;;  %v12644_v35 = vadd.f32 %v6232_v58, %v13548_v13  ;;  %v6238_v47 = vmul.f32 0.35355338, %v13597_v27  ;;  %v13605_v27 = vld [vmem:[#allocation36_spill] sm:$0xff] }
 0xf72   :  { %v6240_v10 = vmul.f32 0.35355338, %v13600_v30 }
 0xf73   :  { %v12649_v48 = vadd.f32 %v6238_v47, %v13552_v17  ;;  %v6662_v47 = vmul.f32 0.35355338, %v13605_v27 }
 0xf74   :  { %v9488_v0 = vpop.eup %9487 }
 0xf75   :  { %621 = vperm.xlu0 %8507, %v511_v29   ;;  %v5552_v52 = vmul.f32 %v9488_v0, %v12428_v26  ;;  %v5811_v26 = vmul.f32 0.35355338, %v12395_v4  ;;  %v13593_v4 = vld [vmem:[#allocation68_spill] sm:$0xff]  ;;  %v13598_v29 = vld [vmem:[#allocation73_spill] sm:$0xff] }
 0xf76   :  { %v5821_v14 = vmul.f32 0.35355338, %v13593_v4  ;;  %v6236_v0 = vmul.f32 0.35355338, %v13598_v29  ;;  %v13602_v4 = vld [vmem:[#allocation34_spill] sm:$0xff] }
 0xf77   :  { %v5562_v1 = vpack.c.bf16 %v5552_v52, %v5551_v31  ;;  %v12614_v5 = vadd.f32 %v5811_v26, %v13550_v6  ;;  %v13599_v52 = vld [vmem:[#allocation74_spill] sm:$0xff]  ;;  %v12664_v26 = vadd.f32 %v6240_v10, %v13554_v56 }
 0xf78   :  { %v12629_v39 = vadd.f32 %v5821_v14, %v13563_v15  ;;  %v12654_v31 = vadd.f32 %v6236_v0, %v13550_v6  ;;  %v12669_v6 = vadd.f32 %v6246_v37, %v13563_v15  ;;  %v6244_v14 = vmul.f32 0.35355338, %v13602_v4  ;;  %v13606_v0 = vld [vmem:[#allocation37_spill] sm:$0xff] }
 0xf79   :  { %8252 = vmatmul.mubr.bf16.gmra.mrb[172].mxu1 %v5562_v1  ;;  %v6242_v1 = vmul.f32 0.35355338, %v13599_v52  ;;  %v12684_v15 = vadd.f32 %v6657_v2, %v13548_v13  ;;  %v6660_v52 = vmul.f32 0.35355338, %v13606_v0  ;;  %v6666_v37 = vmul.f32 0.35355338, %v12480_v46 }
 0xf7a   :  { %v6665_v46 = vmul.f32 0.35355338, %v12488_v61 }
 0xf7b   :  { %v12659_v23 = vadd.f32 %v6242_v1, %v13556_v24  ;;  %v12674_v24 = vadd.f32 %v6244_v14, %v13561_v12  ;;  %v12689_v12 = vadd.f32 %v6662_v47, %v13551_v18  ;;  %v12694_v32 = vadd.f32 %v6660_v52, %v13549_v22  ;;  %v13607_v1 = vld [vmem:[#allocation35_spill] sm:$0xff]  ;;  %v13608_v22 = vld [vmem:[#allocation40_spill] sm:$0xff] }
 0xf7c   :  { %v6663_v30 = vmul.f32 0.35355338, %v13607_v1  ;;  %v12704_v14 = vadd.f32 %v6666_v37, %v13555_v21  ;;  %v6664_v42 = vmul.f32 0.35355338, %v13608_v22  ;;  %v13610_v21 = vld [vmem:[#allocation38_spill] sm:$0xff]  ;;  %v13611_v37 = vld [vmem:[#allocation39_spill] sm:$0xff] }
 0xf7e   :  { %v12699_v54 = vadd.f32 %v6663_v30, %v13552_v17  ;;  %v12710_v17 = vadd.f32 %v6664_v42, %v13553_v55  ;;  %v6670_v30 = vmul.f32 0.35355338, %v12494_v41 }
 0xf80   :  { %v12728_v42 = vadd.f32 %v6670_v30, %v13562_v49 }
 0xf8c   :  { %v5843_v58 = vpop.xlane.xlu1 %5842 }
 0xf8d   :  { %v5872_v40 = vsub.f32 %v13609_v63, %v5843_v58  ;;  %v12718_v58 = vadd.f32 %v6665_v46, %v13554_v56  ;;  %v13612_v56 = vld [vmem:[#allocation7_spill] sm:$0xff] }
 0xf8e   :  { %v6668_v63 = vmul.f32 0.35355338, %v13612_v56 }
 0xf8f   :  { %v5890_v47 = vmul.f32 1.442695, %v5872_v40 }
 0xf90   :  { %v5839_v29 = vpop.xlane.xlu1 %5838 }
 0xf91   :  { %v5870_v52 = vsub.f32 %v13610_v21, %v5839_v29 }
 0xf93   :  { %v5886_v61 = vmul.f32 1.442695, %v5870_v52 }
 0xf94   :  { %5844 = vmax.xlane.f32.xlu0 %v12599_v59  ;;  %v5851_v10 = vpop.xlane.xlu1 %5850 }
 0xf98   :  { %5840 = vmax.xlane.f32.xlu0 %v12604_v62  ;;  %v5847_v18 = vpop.xlane.xlu1 %5846 }
 0xf9c   :  { %5852 = vmax.xlane.f32.xlu0 %v12609_v3  ;;  %v12713_v27 = vpop.xlane.xlu1 %5858 }
 0xfa0   :  { %5848 = vmax.xlane.f32.xlu0 %v12614_v5 }
 0xfa4   :  { %5860 = vmax.xlane.f32.xlu0 %v12619_v33 }
 0xfa8   :  { %5856 = vmax.xlane.f32.xlu0 %v12624_v28 }
 0xfac   :  { %5868 = vmax.xlane.f32.xlu0 %v12629_v39 }
 0xfb0   :  { %5864 = vmax.xlane.f32.xlu0 %v12634_v8 }
 0xfb4   :  { %6269 = vmax.xlane.f32.xlu0 %v12639_v53 }
 0xfb8   :  { %6265 = vmax.xlane.f32.xlu0 %v12644_v35 }
 0xfbc   :  { %6277 = vmax.xlane.f32.xlu0 %v12649_v48 }
 0xfc0   :  { %6273 = vmax.xlane.f32.xlu0 %v12654_v31 }
 0xfc4   :  { %6285 = vmax.xlane.f32.xlu0 %v12659_v23 }
 0xfc8   :  { %6281 = vmax.xlane.f32.xlu0 %v12664_v26 }
 0xfcc   :  { %6293 = vmax.xlane.f32.xlu0 %v12669_v6 }
 0xfd0   :  { %6289 = vmax.xlane.f32.xlu0 %v12674_v24 }
 0xfd4   :  { %6694 = vmax.xlane.f32.xlu0 %v12679_v36 }
 0xfd8   :  { %6690 = vmax.xlane.f32.xlu0 %v12684_v15 }
 0xfdc   :  { %6700 = vmax.xlane.f32.xlu0 %v12689_v12 }
 0xfe0   :  { %v5518_v13 = vpop.xlane.xlu0 %5517  ;;  %6696 = vmax.xlane.f32.xlu0 %v12694_v32 }
 0xfe1   :  { %9489 = vrcp.f32 %v5518_v13  ;;  %v12721_v13 = vpop.xlane.xlu1 %5854 }
 0xfe4   :  { %v5520_v4 = vpop.xlane.xlu0 %5519  ;;  %6702 = vmax.xlane.f32.xlu0 %v12699_v54 }
 0xfe5   :  { %9491 = vrcp.f32 %v5520_v4  ;;  %v5876_v4 = vsub.f32 %v13611_v37, %v5851_v10  ;;  %v13614_v10 = vld [vmem:[#allocation60_spill] sm:$0xff] }
 0xfe7   :  { %v5898_v46 = vmul.f32 1.442695, %v5876_v4 }
 0xfe8   :  { %v5522_v2 = vpop.xlane.xlu0 %5521  ;;  %6708 = vmax.xlane.f32.xlu0 %v12704_v14 }
 0xfe9   :  { %9493 = vrcp.f32 %v5522_v2 }
 0xfeb   :  { %v9490_v1 = vpop.eup %9489 }
 0xfec   :  { %v5524_v0 = vpop.xlane.xlu0 %5523  ;;  %6704 = vmax.xlane.f32.xlu0 %v12710_v17  ;;  %v5553_v22 = vmul.f32 %v9490_v1, %v12568_v16  ;;  %v12735_v16 = vadd.f32 %v6668_v63, %v13560_v11 }
 0xfed   :  { %9495 = vrcp.f32 %v5524_v0 }
 0xfee   :  { %9497 = vpow2.f32 %v5890_v47  ;;  %v13613_v47 = vld [vmem:[#allocation32_spill] sm:$0xff] }
 0xfef   :  { %v9492_v55 = vpop.eup %9491  ;;  %9499 = vpow2.f32 %v5886_v61  ;;  %v5874_v0 = vsub.f32 %v13613_v47, %v5847_v18 }
 0xff0   :  { %6706 = vmax.xlane.f32.xlu0 %v12718_v58  ;;  %v5554_v29 = vmul.f32 %v9492_v55, %v12572_v44  ;;  %v5867_v44 = vpop.xlane.xlu1 %5866  ;;  %9501 = vpow2.f32 %v5898_v46 }
 0xff1   :  { %v5894_v55 = vmul.f32 1.442695, %v5874_v0  ;;  %v5884_v61 = vsub.f32 %v12500_v43, %v5867_v44  ;;  %v13615_v44 = vld [vmem:[#allocation42_spill] sm:$0xff] }
 0xff2   :  { %v5563_v40 = vpack.c.bf16 %v5554_v29, %v5553_v22 }
 0xff3   :  { %v9494_v2 = vpop.eup %9493  ;;  %9503 = vpow2.f32 %v5894_v55  ;;  %v5914_v11 = vmul.f32 1.442695, %v5884_v61  ;;  %v13616_v55 = vld [vmem:[#allocation8_spill] sm:$0xff] }
 0xff4   :  { %v622_v41 = vpop.permute.xlu0 %621  ;;  %6716 = vmax.xlane.f32.xlu0 %v12728_v42  ;;  %8255 = vmatprep.mubr.bf16.mxu1 %v5563_v40  ;;  %v5555_v1 = vmul.f32 %v9494_v2, %v12575_v20  ;;  %v5863_v40 = vpop.xlane.xlu1 %5862 }
 0xff5   :  { %v848_v21 = vadd.f32 %v13614_v10, %v622_v41  ;;  %9505 = vpow2.f32 %v5914_v11 }
 0xff7   :  { %v9496_v49 = vpop.eup %9495  ;;  %v5665_v52 = vpack.c.bf16 %v848_v21, %v848_v21 }
 0xff8   :  { %6712 = vmax.xlane.f32.xlu0 %v12735_v16  ;;  %v5556_v30 = vmul.f32 %v9496_v49, %v12581_v34  ;;  %v12741_v18 = vpop.eup %9497  ;;  %v12759_v0 = vpop.xlane.xlu1 %6267  ;;  %v5880_v49 = vsub.f32 %v13615_v44, %v12713_v27 }
 0xff9   :  { %8277 = vmatprep.subr.bf16.mxu1 %v5665_v52  ;;  %v12744_v4 = vpop.eup %9499 }
 0xffa   :  { %8278 = vmatpush3.bf16.xpose.msra.mxu1 %v5665_v52  ;;  %v5564_v37 = vpack.c.bf16 %v5556_v30, %v5555_v1  ;;  %v12747_v20 = vpop.eup %9501 }
 0xffc   :  { %8256 = vmatmul.mubr.bf16.gmra.mrb[176].mxu1 %v5564_v37  ;;  %5922 = vadd.xlane.f32.xlu0 %v12741_v18  ;;  %v12769_v61 = vpop.xlane.xlu1 %6263 }
 0xffd   :  { %v12750_v43 = vpop.eup %9503 }
 0xfff   :  { %v12753_v34 = vpop.eup %9505 }
0x1000   :  { %5918 = vadd.xlane.f32.xlu0 %v12744_v4 }
0x1004   :  { %5930 = vadd.xlane.f32.xlu0 %v12747_v20 }
0x1008   :  { %5926 = vadd.xlane.f32.xlu0 %v12750_v43 }
0x100c   :  { %5946 = vadd.xlane.f32.xlu0 %v12753_v34 }
0x1021   :  { %v5845_v22 = vpop.xlane.xlu0 %5844 }
0x1022   :  { %v5873_v29 = vsub.f32 %v12599_v59, %v5845_v22 }
0x1024   :  { %v5892_v56 = vmul.f32 1.442695, %v5873_v29  ;;  %v12777_v29 = vpop.xlane.xlu1 %6275 }
0x1025   :  { %v5841_v63 = vpop.xlane.xlu0 %5840 }
0x1026   :  { %9507 = vpow2.f32 %v5892_v56  ;;  %v5871_v41 = vsub.f32 %v12604_v62, %v5841_v63  ;;  %v5906_v62 = vmul.f32 1.442695, %v5880_v49 }
0x1028   :  { %v5888_v2 = vmul.f32 1.442695, %v5871_v41 }
0x1029   :  { %v5853_v46 = vpop.xlane.xlu0 %5852 }
0x102a   :  { %9509 = vpow2.f32 %v5888_v2  ;;  %v5877_v47 = vsub.f32 %v12609_v3, %v5853_v46  ;;  %v5878_v3 = vsub.f32 %v13616_v55, %v12721_v13 }
0x102c   :  { %v5900_v10 = vmul.f32 1.442695, %v5877_v47 }
0x102d   :  { %v5849_v21 = vpop.xlane.xlu0 %5848 }
0x102e   :  { %9511 = vpow2.f32 %v5900_v10  ;;  %v5875_v59 = vsub.f32 %v12614_v5, %v5849_v21  ;;  %v5902_v5 = vmul.f32 1.442695, %v5878_v3  ;;  %v5882_v10 = vsub.f32 %v12504_v51, %v5863_v40  ;;  %v12791_v21 = vpop.xlane.xlu1 %6271 }
0x1030   :  { %v12764_v52 = vpop.eup %9507  ;;  %v5896_v1 = vmul.f32 1.442695, %v5875_v59 }
0x1031   :  { %v5861_v30 = vpop.xlane.xlu0 %5860  ;;  %5924 = vadd.xlane.f32.xlu1 %v12764_v52 }
0x1032   :  { %9513 = vpow2.f32 %v5896_v1  ;;  %v5881_v27 = vsub.f32 %v12619_v33, %v5861_v30  ;;  %v5910_v1 = vmul.f32 1.442695, %v5882_v10  ;;  %v6284_v51 = vpop.xlane.xlu1 %6283 }
0x1033   :  { %9515 = vpow2.f32 %v5906_v62 }
0x1034   :  { %v12771_v37 = vpop.eup %9509  ;;  %9517 = vpow2.f32 %v5902_v5  ;;  %v5908_v13 = vmul.f32 1.442695, %v5881_v27 }
0x1035   :  { %v5857_v11 = vpop.xlane.xlu0 %5856  ;;  %5920 = vadd.xlane.f32.xlu1 %v12771_v37 }
0x1036   :  { %v5879_v63 = vsub.f32 %v12624_v28, %v5857_v11  ;;  %9519 = vpow2.f32 %v5908_v13 }
0x1038   :  { %v12775_v22 = vpop.eup %9511  ;;  %v5904_v44 = vmul.f32 1.442695, %v5879_v63 }
0x1039   :  { %v5869_v56 = vpop.xlane.xlu0 %5868  ;;  %5932 = vadd.xlane.f32.xlu1 %v12775_v22 }
0x103a   :  { %9521 = vpow2.f32 %v5904_v44  ;;  %v5885_v30 = vsub.f32 %v12629_v39, %v5869_v56  ;;  %v6297_v39 = vsub.f32 %v12508_v45, %v12759_v0  ;;  %v6280_v44 = vpop.xlane.xlu1 %6279 }
0x103b   :  { %v12781_v41 = vpop.f32.mrb[164].mxu1  ;;  %9523 = vpow2.f32 %v5910_v1 }
0x103c   :  { %13617 = vst [vmem:[#allocation44_spill] sm:$0xff] %v12781_v41  ;;  %v12783_v2 = vpop.eup %9513  ;;  %v12785_v46 = vpop.f32.mrb[165].mxu1  ;;  %v5916_v27 = vmul.f32 1.442695, %v5885_v30 }
0x103d   :  { %13618 = vst [vmem:[#allocation78_spill] sm:$0xff] %v12785_v46  ;;  %v12787_v47 = vpop.f32.mrb[166].mxu1  ;;  %5928 = vadd.xlane.f32.xlu1 %v12783_v2  ;;  %v5865_v33 = vpop.xlane.xlu0 %5864 }
0x103e   :  { %13619 = vst [vmem:[#allocation46_spill] sm:$0xff] %v12787_v47  ;;  %v12793_v49 = vpop.f32.mrb[167].mxu1  ;;  %v12795_v28 = vpop.eup %9515  ;;  %v5883_v3 = vsub.f32 %v12634_v8, %v5865_v33  ;;  %v6305_v8 = vsub.f32 %v12524_v57, %v6284_v51  ;;  %9525 = vpow2.f32 %v5916_v27  ;;  %v6303_v51 = vsub.f32 %v12528_v60, %v6280_v44 }
0x103f   :  { %13620 = vst [vmem:[#allocation45_spill] sm:$0xff] %v12793_v49  ;;  %v12801_v55 = vpop.eup %9517 }
0x1040   :  { %v12811_v63 = vpop.eup %9519  ;;  %v5912_v56 = vmul.f32 1.442695, %v5883_v3  ;;  %v6331_v57 = vmul.f32 1.442695, %v6305_v8 }
0x1041   :  { %5938 = vadd.xlane.f32.xlu1 %v12795_v28  ;;  %v6270_v59 = vpop.xlane.xlu0 %6269 }
0x1042   :  { %9527 = vpow2.f32 %v5912_v56  ;;  %v6327_v56 = vmul.f32 1.442695, %v6303_v51 }
0x1043   :  { %v12799_v62 = vpop.f32.mrb[168].mxu1 }
0x1044   :  { %13621 = vst [vmem:[#allocation51_spill] sm:$0xff] %v12799_v62  ;;  %v12803_v40 = vpop.f32.mrb[169].mxu1  ;;  %v12818_v62 = vpop.eup %9521 }
0x1045   :  { %13622 = vst [vmem:[#allocation50_spill] sm:$0xff] %v12803_v40  ;;  %v12806_v11 = vpop.f32.mrb[170].mxu1  ;;  %5934 = vadd.xlane.f32.xlu1 %v12801_v55  ;;  %v6266_v5 = vpop.xlane.xlu0 %6265  ;;  %v6295_v40 = vsub.f32 %v12512_v7, %v12769_v61  ;;  %v6298_v7 = vsub.f32 %v12639_v53, %v6270_v59 }
0x1046   :  { %13623 = vst [vmem:[#allocation48_spill] sm:$0xff] %v12806_v11  ;;  %v12809_v13 = vpop.f32.mrb[171].mxu1  ;;  %v6315_v11 = vmul.f32 1.442695, %v6297_v39  ;;  %v12832_v27 = vpop.eup %9523  ;;  %v6296_v44 = vsub.f32 %v12644_v35, %v6266_v5 }
0x1047   :  { %13624 = vst [vmem:[#allocation43_spill] sm:$0xff] %v12809_v13  ;;  %v6311_v39 = vmul.f32 1.442695, %v6295_v40  ;;  %v513_v13 = vld [vmem:[%s13187_s6 + $0xb8] sm:$0xff] }
0x1048   :  { %v12837_v60 = vpop.eup %9525  ;;  %v6313_v51 = vmul.f32 1.442695, %v6296_v44 }
0x1049   :  { %5940 = vadd.xlane.f32.xlu1 %v12811_v63  ;;  %v6278_v10 = vpop.xlane.xlu0 %6277 }
0x104a   :  { %v6302_v33 = vsub.f32 %v12649_v48, %v6278_v10  ;;  %v6292_v10 = vpop.xlane.xlu1 %6291 }
0x104c   :  { %v6325_v1 = vmul.f32 1.442695, %v6302_v33  ;;  %v12820_v30 = vpop.f32.mrb[172].mxu1  ;;  %v6317_v33 = vmul.f32 1.442695, %v6298_v7  ;;  %v12842_v59 = vpop.eup %9527 }
0x104d   :  { %13625 = vst [vmem:[#allocation52_spill] sm:$0xff] %v12820_v30  ;;  %v12824_v45 = vpop.f32.mrb[173].mxu1  ;;  %5936 = vadd.xlane.f32.xlu1 %v12818_v62  ;;  %v6274_v0 = vpop.xlane.xlu0 %6273 }
0x104e   :  { %13626 = vst [vmem:[#allocation47_spill] sm:$0xff] %v12824_v45  ;;  %9529 = vpow2.f32 %v6325_v1  ;;  %v12828_v48 = vpop.f32.mrb[174].mxu1  ;;  %v6288_v1 = vpop.xlane.xlu1 %6287 }
0x104f   :  { %13627 = vst [vmem:[#allocation30_spill] sm:$0xff] %v12828_v48  ;;  %v12830_v3 = vpop.f32.mrb[175].mxu1  ;;  %9531 = vpow2.f32 %v6315_v11  ;;  %v6307_v5 = vsub.f32 %v12537_v38, %v6288_v1 }
0x1050   :  { %13628 = vst [vmem:[#allocation64_spill] sm:$0xff] %v12830_v3  ;;  %9533 = vpow2.f32 %v6331_v57 }
0x1051   :  { %5942 = vadd.xlane.f32.xlu1 %v12832_v27  ;;  %v6286_v61 = vpop.xlane.xlu0 %6285  ;;  %9535 = vpow2.f32 %v6311_v39 }
0x1052   :  { %v6306_v8 = vsub.f32 %v12659_v23, %v6286_v61  ;;  %9537 = vpow2.f32 %v6327_v56  ;;  %v6301_v23 = vsub.f32 %v12516_v25, %v12777_v29  ;;  %v13629_v56 = vld [vmem:[#allocation10_spill] sm:$0xff] }
0x1053   :  { %9539 = vpow2.f32 %v6317_v33  ;;  %v13630_v25 = vld [vmem:[#allocation6_spill] sm:$0xff]  ;;  %v6335_v33 = vmul.f32 1.442695, %v6307_v5 }
0x1054   :  { %v6333_v40 = vmul.f32 1.442695, %v6306_v8  ;;  %v6323_v61 = vmul.f32 1.442695, %v6301_v23  ;;  %v6299_v8 = vsub.f32 %v13629_v56, %v12791_v21  ;;  %v6309_v29 = vsub.f32 %v13630_v25, %v6292_v10 }
0x1055   :  { %5948 = vadd.xlane.f32.xlu1 %v12837_v60  ;;  %v6282_v11 = vpop.xlane.xlu0 %6281  ;;  %v6300_v21 = vsub.f32 %v12654_v31, %v6274_v0 }
0x1056   :  { %v6304_v53 = vsub.f32 %v12664_v26, %v6282_v11  ;;  %9541 = vpow2.f32 %v6333_v40  ;;  %v6319_v40 = vmul.f32 1.442695, %v6299_v8  ;;  %v6339_v1 = vmul.f32 1.442695, %v6309_v29 }
0x1057   :  { %9543 = vpow2.f32 %v6313_v51  ;;  %v6321_v5 = vmul.f32 1.442695, %v6300_v21 }
0x1058   :  { %v12844_v57 = vpop.eup %9529  ;;  %v6329_v39 = vmul.f32 1.442695, %v6304_v53  ;;  %v6693_v53 = vpop.xlane.xlu1 %6692 }
0x1059   :  { %5944 = vadd.xlane.f32.xlu1 %v12842_v59  ;;  %6357 = vadd.xlane.f32.xlu0 %v12844_v57  ;;  %v6294_v35 = vpop.xlane.xlu0 %6293  ;;  %v12851_v26 = vpop.eup %9531  ;;  %v6722_v31 = vsub.f32 %v12541_v50, %v6693_v53 }
0x105a   :  { %v12853_v7 = vpop.eup %9533  ;;  %9545 = vpow2.f32 %v6329_v39  ;;  %v6310_v10 = vsub.f32 %v12669_v6, %v6294_v35  ;;  %v13631_v35 = vld [vmem:[#allocation9_spill] sm:$0xff] }
0x105b   :  { %v12860_v38 = vpop.eup %9535  ;;  %9547 = vpow2.f32 %v6323_v61  ;;  %v6740_v6 = vmul.f32 1.442695, %v6722_v31 }
0x105c   :  { %v12864_v11 = vpop.eup %9537  ;;  %9549 = vpow2.f32 %v6335_v33  ;;  %v6341_v0 = vmul.f32 1.442695, %v6310_v10  ;;  %v6689_v56 = vpop.xlane.xlu1 %6688 }
0x105d   :  { %6347 = vadd.xlane.f32.xlu1 %v12851_v26  ;;  %6363 = vadd.xlane.f32.xlu0 %v12853_v7  ;;  %v12862_v44 = vpop.xlane.xlu0 %6289  ;;  %v12870_v23 = vpop.eup %9539  ;;  %9551 = vpow2.f32 %v6319_v40  ;;  %v6720_v25 = vsub.f32 %v13631_v35, %v6689_v56 }
0x105e   :  { %9553 = vpow2.f32 %v6339_v1 }
0x105f   :  { %9555 = vpow2.f32 %v6321_v5  ;;  %v6736_v50 = vmul.f32 1.442695, %v6720_v25 }
0x1060   :  { %v12872_v51 = vpop.eup %9541  ;;  %9557 = vpow2.f32 %v6341_v0 }
0x1061   :  { %6343 = vadd.xlane.f32.xlu1 %v12860_v38  ;;  %6359 = vadd.xlane.f32.xlu0 %v12864_v11  ;;  %v6695_v39 = vpop.xlane.xlu0 %6694  ;;  %v12877_v61 = vpop.eup %9543  ;;  %9559 = vpow2.f32 %v6740_v6 }
0x1062   :  { %v6723_v53 = vsub.f32 %v12679_v36, %v6695_v39  ;;  %9561 = vpow2.f32 %v6736_v50 }
0x1064   :  { %v12879_v8 = vpop.eup %9545  ;;  %v6742_v5 = vmul.f32 1.442695, %v6723_v53 }
0x1065   :  { %6349 = vadd.xlane.f32.xlu1 %v12870_v23  ;;  %6365 = vadd.xlane.f32.xlu0 %v12872_v51  ;;  %v12884_v29 = vpop.eup %9547  ;;  %v6691_v33 = vpop.xlane.xlu0 %6690 }
0x1066   :  { %v12886_v40 = vpop.eup %9549  ;;  %v6721_v31 = vsub.f32 %v12684_v15, %v6691_v33  ;;  %9563 = vpow2.f32 %v6742_v5  ;;  %v6699_v33 = vpop.xlane.xlu1 %6698 }
0x1067   :  { %v12891_v21 = vpop.eup %9551  ;;  %v6725_v53 = vsub.f32 %v12551_v19, %v6699_v33 }
0x1068   :  { %v12893_v1 = vpop.eup %9553  ;;  %v6738_v36 = vmul.f32 1.442695, %v6721_v31 }
0x1069   :  { %6345 = vadd.xlane.f32.xlu1 %v12877_v61  ;;  %6361 = vadd.xlane.f32.xlu0 %v12879_v8  ;;  %v6701_v10 = vpop.xlane.xlu0 %6700  ;;  %v12898_v0 = vpop.eup %9555 }
0x106a   :  { %v12900_v56 = vpop.eup %9557  ;;  %v6726_v39 = vsub.f32 %v12689_v12, %v6701_v10  ;;  %9565 = vpow2.f32 %v6738_v36  ;;  %v6746_v12 = vmul.f32 1.442695, %v6725_v53  ;;  %v512_v10 = vld [vmem:[%s13187_s6 + $0xb0] sm:$0xff]  ;;  %v6711_v48 = vpop.xlane.xlu1 %6710 }
0x106b   :  { %v12905_v35 = vpop.eup %9559 }
0x106c   :  { %v6748_v25 = vmul.f32 1.442695, %v6726_v39  ;;  %v12909_v50 = vpop.eup %9561 }
0x106d   :  { %6355 = vadd.xlane.f32.xlu1 %v12884_v29  ;;  %6367 = vadd.xlane.f32.xlu0 %v12886_v40  ;;  %v6697_v6 = vpop.xlane.xlu0 %6696 }
0x106e   :  { %v6724_v15 = vsub.f32 %v12694_v32, %v6697_v6  ;;  %9567 = vpow2.f32 %v6748_v25 }
0x1070   :  { %v6744_v5 = vmul.f32 1.442695, %v6724_v15  ;;  %v12913_v31 = vpop.eup %9563  ;;  %v6308_v15 = vsub.f32 %v12674_v24, %v12862_v44  ;;  %v6731_v24 = vsub.f32 %v12557_v9, %v6711_v48  ;;  %v13632_v48 = vld [vmem:[#allocation75_spill] sm:$0xff] }
0x1071   :  { %6351 = vadd.xlane.f32.xlu1 %v12891_v21  ;;  %6371 = vadd.xlane.f32.xlu0 %v12893_v1  ;;  %v6703_v39 = vpop.xlane.xlu0 %6702 }
0x1072   :  { %9569 = vpow2.f32 %v6744_v5  ;;  %v6337_v53 = vmul.f32 1.442695, %v6308_v15  ;;  %v6727_v5 = vsub.f32 %v12699_v54, %v6703_v39  ;;  %v6719_v39 = vpop.xlane.xlu1 %6718 }
0x1073   :  { %9571 = vpow2.f32 %v6746_v12 }
0x1074   :  { %v12919_v32 = vpop.eup %9565  ;;  %9573 = vpow2.f32 %v6337_v53  ;;  %v6750_v12 = vmul.f32 1.442695, %v6727_v5 }
0x1075   :  { %6353 = vadd.xlane.f32.xlu1 %v12898_v0  ;;  %6373 = vadd.xlane.f32.xlu0 %v12900_v56  ;;  %v6709_v25 = vpop.xlane.xlu0 %6708 }
0x1076   :  { %9575 = vpow2.f32 %v6750_v12 }
0x1078   :  { %v12922_v36 = vpop.eup %9567 }
0x1079   :  { %6772 = vadd.xlane.f32.xlu0 %v12905_v35  ;;  %v6705_v33 = vpop.xlane.xlu0 %6704 }
0x107a   :  { %v6728_v3 = vsub.f32 %v12710_v17, %v6705_v33  ;;  %v6715_v33 = vpop.xlane.xlu1 %6714 }
0x107c   :  { %v12925_v19 = vpop.eup %9569  ;;  %v6752_v44 = vmul.f32 1.442695, %v6728_v3  ;;  %v6733_v3 = vsub.f32 %v13632_v48, %v6715_v33 }
0x107d   :  { %6768 = vadd.xlane.f32.xlu0 %v12909_v50  ;;  %v12928_v6 = vpop.eup %9571  ;;  %v6707_v30 = vpop.xlane.xlu0 %6706 }
0x107e   :  { %v12940_v54 = vpop.eup %9573  ;;  %v6762_v12 = vmul.f32 1.442695, %v6733_v3 }
0x1080   :  { %v12944_v15 = vpop.eup %9575 }
0x1081   :  { %6774 = vadd.xlane.f32.xlu0 %v12913_v31  ;;  %v6717_v46 = vpop.xlane.xlu0 %6716 }
0x1082   :  { %v6734_v53 = vsub.f32 %v12728_v42, %v6717_v46 }
0x1085   :  { %6770 = vadd.xlane.f32.xlu0 %v12919_v32  ;;  %v6713_v17 = vpop.xlane.xlu0 %6712 }
0x1086   :  { %626 = vperm.xlu1 %8508, %v512_v10   ;;  %v6730_v10 = vsub.f32 %v12704_v14, %v6709_v25  ;;  %v6758_v14 = vmul.f32 1.442695, %v6731_v24  ;;  %v6729_v25 = vsub.f32 %v12718_v58, %v6707_v30 }
0x1088   :  { %v6756_v45 = vmul.f32 1.442695, %v6730_v10  ;;  %v6754_v9 = vmul.f32 1.442695, %v6729_v25  ;;  %v13633_v10 = vld [vmem:[#allocation11_spill] sm:$0xff] }
0x1089   :  { %6780 = vadd.xlane.f32.xlu0 %v12922_v36  ;;  %v5923_v30 = vpop.xlane.xlu0 %5922  ;;  %v6735_v24 = vsub.f32 %v13633_v10, %v6719_v39 }
0x108a   :  { %9577 = vpow2.f32 %v6756_v45  ;;  %v6732_v45 = vsub.f32 %v12735_v16, %v6713_v17 }
0x108b   :  { %9579 = vpow2.f32 %v6752_v44  ;;  %v6764_v44 = vmul.f32 1.442695, %v6734_v53  ;;  %v6766_v25 = vmul.f32 1.442695, %v6735_v24 }
0x108c   :  { %9581 = vpow2.f32 %v6758_v14  ;;  %v6760_v58 = vmul.f32 1.442695, %v6732_v45 }
0x108d   :  { %6776 = vadd.xlane.f32.xlu0 %v12925_v19  ;;  %9583 = vpow2.f32 %v6754_v9  ;;  %v5919_v14 = vpop.xlane.xlu0 %5918 }
0x108e   :  { %9585 = vpow2.f32 %v6760_v58 }
0x108f   :  { %9587 = vpow2.f32 %v6762_v12 }
0x1090   :  { %9589 = vpow2.f32 %v6764_v44 }
0x1091   :  { %6778 = vadd.xlane.f32.xlu0 %v12928_v6  ;;  %9591 = vpow2.f32 %v6766_v25  ;;  %v5931_v17 = vpop.xlane.xlu0 %5930 }
0x1095   :  { %v5927_v48 = vpop.xlane.xlu0 %5926 }
0x10a7   :  { %631 = vperm.xlu0 %8507, %v513_v13   ;;  %v12948_v13 = vpop.eup %9577 }
0x10a8   :  { %v12953_v5 = vpop.eup %9579 }
0x10a9   :  { %v12957_v16 = vpop.eup %9581 }
0x10aa   :  { %6369 = vadd.xlane.f32.xlu1 %v12940_v54  ;;  %v12960_v42 = vpop.eup %9583 }
0x10ab   :  { %v12963_v33 = vpop.eup %9585 }
0x10ac   :  { %v12966_v9 = vpop.eup %9587 }
0x10ad   :  { %v12968_v45 = vpop.eup %9589 }
0x10ae   :  { %6782 = vadd.xlane.f32.xlu1 %v12944_v15  ;;  %v12972_v53 = vpop.eup %9591 }
0x10af   :  { %13634 = vst [vmem:[#allocation49_spill] sm:$0xff] %v12972_v53 }
0x10b2   :  { %6788 = vadd.xlane.f32.xlu1 %v12948_v13 }
0x10b6   :  { %6784 = vadd.xlane.f32.xlu1 %v12953_v5 }
0x10ba   :  { %6790 = vadd.xlane.f32.xlu1 %v12957_v16 }
0x10be   :  { %v5925_v46 = vpop.xlane.xlu1 %5924  ;;  %6786 = vadd.xlane.f32.xlu1 %v12960_v42 }
0x10bf   :  { %9593 = vrcp.f32 %v5925_v46 }
0x10c0   :  { %9595 = vrcp.f32 %v5919_v14 }
0x10c1   :  { %9597 = vrcp.f32 %v5923_v30 }
0x10c2   :  { %v5921_v39 = vpop.xlane.xlu1 %5920  ;;  %6792 = vadd.xlane.f32.xlu1 %v12963_v33 }
0x10c3   :  { %9599 = vrcp.f32 %v5921_v39 }
0x10c6   :  { %v5933_v3 = vpop.xlane.xlu1 %5932  ;;  %6796 = vadd.xlane.f32.xlu0 %v12968_v45  ;;  %6794 = vadd.xlane.f32.xlu1 %v12966_v9 }
0x10c7   :  { %9601 = vrcp.f32 %v5933_v3 }
0x10c8   :  { %9603 = vrcp.f32 %v5927_v48 }
0x10c9   :  { %v9594_v58 = vpop.eup %9593  ;;  %9605 = vrcp.f32 %v5931_v17 }
0x10ca   :  { %v5929_v30 = vpop.xlane.xlu1 %5928  ;;  %6798 = vadd.xlane.f32.xlu1 %v12972_v53  ;;  %v9596_v12 = vpop.eup %9595  ;;  %v5969_v44 = vmul.f32 %v9594_v58, %v12764_v52 }
0x10cb   :  { %9607 = vrcp.f32 %v5929_v30  ;;  %v9598_v10 = vpop.eup %9597  ;;  %v5966_v25 = vmul.f32 %v9596_v12, %v12744_v4 }
0x10cc   :  { %v5968_v39 = vmul.f32 %v9598_v10, %v12741_v18 }
0x10cd   :  { %v9600_v24 = vpop.eup %9599 }
0x10ce   :  { %v5939_v14 = vpop.xlane.xlu1 %5938  ;;  %v5967_v46 = vmul.f32 %v9600_v24, %v12771_v37  ;;  %v5983_v41 = vpack.c.bf16 %v5969_v44, %v5968_v39 }
0x10cf   :  { %v12979_v3 = vpop.f32.mrb[176].mxu1 }
0x10d0   :  { %13635 = vst [vmem:[#allocation61_spill] sm:$0xff] %v12979_v3  ;;  %v12981_v48 = vpop.f32.mrb[177].mxu1  ;;  %v5982_v17 = vpack.c.bf16 %v5967_v46, %v5966_v25 }
0x10d1   :  { %v12983_v49 = vpop.f32.mrb[178].mxu1  ;;  %v9602_v30 = vpop.eup %9601 }
0x10d2   :  { %v12985_v47 = vpop.f32.mrb[179].mxu1  ;;  %v5935_v53 = vpop.xlane.xlu1 %5934  ;;  %8279 = vmatprep.mubr.bf16.mxu1 %v5982_v17  ;;  %v5973_v37 = vmul.f32 %v9602_v30, %v12775_v22 }
0x10d3   :  { %v9604_v52 = vpop.eup %9603  ;;  %8280 = vmatmul.mubr.bf16.vlgmr.msra.gmra.mrb[180].mxu1 %v5983_v41  ;;  %v5947_v17 = vpop.xlane.xlu0 %5946 }
0x10d4   :  { %v9606_v4 = vpop.eup %9605  ;;  %v5970_v12 = vmul.f32 %v9604_v52, %v12750_v43 }
0x10d5   :  { %v9608_v58 = vpop.eup %9607  ;;  %v5972_v24 = vmul.f32 %v9606_v4, %v12747_v20 }
0x10d6   :  { %v5941_v18 = vpop.xlane.xlu1 %5940  ;;  %v5971_v10 = vmul.f32 %v9608_v58, %v12783_v2 }
0x10d7   :  { %9609 = vrcp.f32 %v5941_v18  ;;  %v5985_v25 = vpack.c.bf16 %v5973_v37, %v5972_v24 }
0x10d8   :  { %v5984_v44 = vpack.c.bf16 %v5971_v10, %v5970_v12  ;;  %9611 = vrcp.f32 %v5935_v53 }
0x10d9   :  { %9613 = vrcp.f32 %v5939_v14 }
0x10da   :  { %v5937_v46 = vpop.xlane.xlu1 %5936  ;;  %8283 = vmatprep.mubr.bf16.mxu1 %v5984_v44 }
0x10db   :  { %9615 = vrcp.f32 %v5937_v46  ;;  %8284 = vmatmul.mubr.bf16.gmra.mrb[184].mxu1 %v5985_v25 }
0x10de   :  { %v5943_v41 = vpop.xlane.xlu1 %5942 }
0x10e1   :  { %v9610_v39 = vpop.eup %9609 }
0x10e2   :  { %v5949_v22 = vpop.xlane.xlu1 %5948  ;;  %v9612_v30 = vpop.eup %9611  ;;  %v5977_v20 = vmul.f32 %v9610_v39, %v12811_v63 }
0x10e3   :  { %v9614_v3 = vpop.eup %9613  ;;  %9617 = vrcp.f32 %v5949_v22  ;;  %v5974_v14 = vmul.f32 %v9612_v30, %v12801_v55 }
0x10e4   :  { %9619 = vrcp.f32 %v5943_v41  ;;  %v5976_v4 = vmul.f32 %v9614_v3, %v12795_v28 }
0x10e5   :  { %v9616_v43 = vpop.eup %9615  ;;  %9621 = vrcp.f32 %v5947_v17 }
0x10e6   :  { %v5945_v2 = vpop.xlane.xlu1 %5944  ;;  %v6358_v53 = vpop.xlane.xlu0 %6357  ;;  %v5975_v52 = vmul.f32 %v9616_v43, %v12818_v62  ;;  %v5987_v37 = vpack.c.bf16 %v5977_v20, %v5976_v4 }
0x10e7   :  { %9623 = vrcp.f32 %v5945_v2 }
0x10e8   :  { %v5986_v58 = vpack.c.bf16 %v5975_v52, %v5974_v14 }
0x10ea   :  { %v6348_v18 = vpop.xlane.xlu1 %6347  ;;  %8287 = vmatprep.mubr.bf16.mxu1 %v5986_v58  ;;  %v6364_v12 = vpop.xlane.xlu0 %6363 }
0x10eb   :  { %8288 = vmatmul.mubr.bf16.gmra.mrb[188].mxu1 %v5987_v37 }
0x10ed   :  { %v9618_v10 = vpop.eup %9617 }
0x10ee   :  { %v6344_v24 = vpop.xlane.xlu1 %6343  ;;  %v6360_v44 = vpop.xlane.xlu0 %6359  ;;  %v5981_v41 = vmul.f32 %v9618_v10, %v12837_v60 }
0x10ef   :  { %v9620_v63 = vpop.eup %9619  ;;  %9625 = vrcp.f32 %v6344_v24 }
0x10f0   :  { %v9622_v25 = vpop.eup %9621  ;;  %v5978_v62 = vmul.f32 %v9620_v63, %v12832_v27  ;;  %v13636_v63 = vld [vmem:[#allocation57_spill] sm:$0xff] }
0x10f1   :  { %v9624_v46 = vpop.eup %9623  ;;  %v5980_v3 = vmul.f32 %v9622_v25, %v12753_v34 }
0x10f2   :  { %v6350_v55 = vpop.xlane.xlu1 %6349  ;;  %v6366_v39 = vpop.xlane.xlu0 %6365  ;;  %v5979_v28 = vmul.f32 %v9624_v46, %v12842_v59 }
0x10f3   :  { %v5989_v22 = vpack.c.bf16 %v5981_v41, %v5980_v3 }
0x10f4   :  { %v5988_v17 = vpack.c.bf16 %v5979_v28, %v5978_v62 }
0x10f6   :  { %v6346_v30 = vpop.xlane.xlu1 %6345  ;;  %8291 = vmatprep.mubr.bf16.mxu1 %v5988_v17  ;;  %v6362_v43 = vpop.xlane.xlu0 %6361 }
0x10f7   :  { %9627 = vrcp.f32 %v6346_v30  ;;  %8292 = vmatmul.mubr.bf16.gmra.mrb[192].mxu1 %v5989_v22 }
0x10f8   :  { %9629 = vrcp.f32 %v6350_v55 }
0x10f9   :  { %v9626_v52 = vpop.eup %9625  ;;  %9631 = vrcp.f32 %v6348_v18 }
0x10fa   :  { %v6356_v20 = vpop.xlane.xlu1 %6355  ;;  %v12999_v2 = vpop.xlane.xlu0 %6367  ;;  %v6391_v4 = vmul.f32 %v9626_v52, %v12860_v38 }
0x10fe   :  { %v6352_v60 = vpop.xlane.xlu1 %6351  ;;  %v13001_v14 = vpop.xlane.xlu0 %6371 }
0x10ff   :  { %9633 = vrcp.f32 %v6352_v60 }
0x1101   :  { %v9628_v27 = vpop.eup %9627 }
0x1102   :  { %v6354_v34 = vpop.xlane.xlu1 %6353  ;;  %v6374_v59 = vpop.xlane.xlu0 %6373  ;;  %v6392_v58 = vmul.f32 %v9628_v27, %v12877_v61 }
0x1103   :  { %9635 = vrcp.f32 %v6354_v34  ;;  %v9630_v41 = vpop.eup %9629 }
0x1104   :  { %v6407_v37 = vpack.c.bf16 %v6392_v58, %v6391_v4  ;;  %9637 = vrcp.f32 %v6356_v20  ;;  %v9632_v55 = vpop.eup %9631  ;;  %v6394_v62 = vmul.f32 %v9630_v41, %v12870_v23 }
0x1105   :  { %9639 = vrcp.f32 %v6362_v43  ;;  %v6393_v17 = vmul.f32 %v9632_v55, %v12851_v26 }
0x1106   :  { %v627_v10 = vpop.permute.xlu1 %626  ;;  %8315 = vmatprep.mubr.bf16.mxu1 %v6407_v37  ;;  %v13005_v24 = vpop.xlane.xlu0 %6772  ;;  %9641 = vrcp.f32 %v6358_v53 }
0x1107   :  { %v853_v25 = vadd.f32 %v13636_v63, %v627_v10  ;;  %9643 = vrcp.f32 %v6360_v44  ;;  %v6408_v30 = vpack.c.bf16 %v6394_v62, %v6393_v17 }
0x1108   :  { %9645 = vrcp.f32 %v6366_v39 }
0x1109   :  { %v6090_v46 = vpack.c.bf16 %v853_v25, %v853_v25  ;;  %v9634_v38 = vpop.eup %9633  ;;  %9647 = vrcp.f32 %v6364_v12 }
0x110a   :  { %v6769_v18 = vpop.xlane.xlu0 %6768  ;;  %v6395_v22 = vmul.f32 %v9634_v38, %v12891_v21  ;;  %9649 = vrcp.f32 %v12999_v2 }
0x110b   :  { %8313 = vmatprep.subr.bf16.mxu1 %v6090_v46  ;;  %9651 = vrcp.f32 %v13001_v14 }
0x110c   :  { %8314 = vmatpush3.bf16.xpose.msra.mxu1 %v6090_v46  ;;  %9653 = vrcp.f32 %v6374_v59 }
0x110d   :  { %v9636_v61 = vpop.eup %9635 }
0x110e   :  { %v6775_v28 = vpop.xlane.xlu0 %6774  ;;  %v6396_v3 = vmul.f32 %v9636_v61, %v12898_v0  ;;  %v9638_v43 = vpop.eup %9637 }
0x110f   :  { %v9640_v44 = vpop.eup %9639  ;;  %v6397_v23 = vmul.f32 %v9638_v43, %v12884_v29 }
0x1110   :  { %v6409_v20 = vpack.c.bf16 %v6396_v3, %v6395_v22  ;;  %v9642_v60 = vpop.eup %9641  ;;  %v6400_v0 = vmul.f32 %v9640_v44, %v12879_v8  ;;  %v13637_v8 = vld [vmem:[#allocation59_spill] sm:$0xff] }
0x1111   :  { %v9644_v52 = vpop.eup %9643  ;;  %v6398_v26 = vmul.f32 %v9642_v60, %v12844_v57 }
0x1112   :  { %v6771_v53 = vpop.xlane.xlu0 %6770  ;;  %v6399_v39 = vmul.f32 %v9644_v52, %v12864_v11  ;;  %v9646_v34 = vpop.eup %9645 }
0x1113   :  { %8316 = vmatmul.mubr.bf16.vlgmr.msra.gmra.mrb[196].mxu1 %v6408_v30  ;;  %v6410_v21 = vpack.c.bf16 %v6398_v26, %v6397_v23  ;;  %v9648_v12 = vpop.eup %9647  ;;  %v6402_v37 = vmul.f32 %v9646_v34, %v12872_v51  ;;  %9655 = vrcp.f32 %v6771_v53 }
0x1114   :  { %8319 = vmatprep.mubr.bf16.mxu1 %v6409_v20  ;;  %v6411_v4 = vpack.c.bf16 %v6400_v0, %v6399_v39  ;;  %v6401_v10 = vmul.f32 %v9648_v12, %v12853_v7  ;;  %9657 = vrcp.f32 %v6769_v18  ;;  %v9650_v7 = vpop.eup %9649 }
0x1115   :  { %v9652_v41 = vpop.eup %9651  ;;  %v6403_v18 = vmul.f32 %v9650_v7, %v12886_v40  ;;  %v13638_v7 = vld [vmem:[#allocation49_spill] sm:$0xff] }
0x1116   :  { %v6781_v27 = vpop.xlane.xlu0 %6780  ;;  %v6412_v63 = vpack.c.bf16 %v6402_v37, %v6401_v10  ;;  %v9654_v55 = vpop.eup %9653 }
0x1117   :  { %v6406_v14 = vmul.f32 %v9654_v55, %v12900_v56 }
0x111a   :  { %v6777_v58 = vpop.xlane.xlu0 %6776 }
0x111b   :  { %8320 = vmatmul.mubr.bf16.gmra.mrb[200].mxu1 %v6410_v21 }
0x111c   :  { %8323 = vmatprep.mubr.bf16.mxu1 %v6411_v4 }
0x111d   :  { %v9656_v61 = vpop.eup %9655 }
0x111e   :  { %v6779_v29 = vpop.xlane.xlu0 %6778  ;;  %v9658_v62 = vpop.eup %9657  ;;  %v6817_v17 = vmul.f32 %v9656_v61, %v12919_v32 }
0x1123   :  { %8324 = vmatmul.mubr.bf16.gmra.mrb[204].mxu1 %v6412_v63 }
0x1126   :  { %v632_v25 = vpop.permute.xlu0 %631 }
0x1127   :  { %v856_v46 = vadd.f32 %v13637_v8, %v632_v25 }
0x1129   :  { %v6515_v57 = vpack.c.bf16 %v856_v46, %v856_v46 }
0x112b   :  { %8349 = vmatprep.subr.bf16.mxu1 %v6515_v57 }
0x112c   :  { %8350 = vmatpush3.bf16.xpose.msra.mxu1 %v6515_v57 }
0x1137   :  { %v6370_v11 = vpop.xlane.xlu1 %6369 }
0x1138   :  { %9659 = vrcp.f32 %v6370_v11 }
0x1139   :  { %9661 = vrcp.f32 %v6775_v28  ;;  %v6405_v28 = vmul.f32 %v9652_v41, %v12893_v1 }
0x113a   :  { %9663 = vrcp.f32 %v6779_v29 }
0x113b   :  { %v6783_v51 = vpop.xlane.xlu1 %6782  ;;  %9665 = vrcp.f32 %v13005_v24  ;;  %v6816_v24 = vmul.f32 %v9658_v62, %v12909_v50  ;;  %v6414_v30 = vpack.c.bf16 %v6406_v14, %v6405_v28 }
0x113c   :  { %9667 = vrcp.f32 %v6777_v58 }
0x113d   :  { %9669 = vrcp.f32 %v6783_v51  ;;  %v6832_v20 = vpack.c.bf16 %v6817_v17, %v6816_v24 }
0x113e   :  { %9671 = vrcp.f32 %v6781_v27 }
0x113f   :  { %v6789_v38 = vpop.xlane.xlu1 %6788 }
0x1142   :  { %v9660_v2 = vpop.eup %9659 }
0x1143   :  { %v6785_v59 = vpop.xlane.xlu1 %6784  ;;  %v6404_v3 = vmul.f32 %v9660_v2, %v12940_v54  ;;  %v9662_v43 = vpop.eup %9661 }
0x1144   :  { %v9664_v56 = vpop.eup %9663  ;;  %v6819_v54 = vmul.f32 %v9662_v43, %v12913_v31  ;;  %9673 = vrcp.f32 %v6785_v59 }
0x1145   :  { %v6413_v22 = vpack.c.bf16 %v6404_v3, %v6403_v18  ;;  %v9666_v44 = vpop.eup %9665  ;;  %v6821_v1 = vmul.f32 %v9664_v56, %v12928_v6 }
0x1146   :  { %v9668_v40 = vpop.eup %9667  ;;  %v6818_v60 = vmul.f32 %v9666_v44, %v12905_v35 }
0x1147   :  { %v6791_v53 = vpop.xlane.xlu1 %6790  ;;  %8327 = vmatprep.mubr.bf16.mxu1 %v6413_v22  ;;  %v6820_v50 = vmul.f32 %v9668_v40, %v12925_v19  ;;  %v9670_v23 = vpop.eup %9669 }
0x1148   :  { %8328 = vmatmul.mubr.bf16.gmra.mrb[208].mxu1 %v6414_v30  ;;  %v6833_v52 = vpack.c.bf16 %v6819_v54, %v6818_v60  ;;  %v9672_v26 = vpop.eup %9671  ;;  %v6823_v31 = vmul.f32 %v9670_v23, %v12944_v15 }
0x1149   :  { %8351 = vmatprep.mubr.bf16.mxu1 %v6832_v20  ;;  %v6834_v0 = vpack.c.bf16 %v6821_v1, %v6820_v50  ;;  %v6822_v35 = vmul.f32 %v9672_v26, %v12922_v36 }
0x114b   :  { %v6787_v32 = vpop.xlane.xlu1 %6786  ;;  %v6835_v19 = vpack.c.bf16 %v6823_v31, %v6822_v35 }
0x114c   :  { %9675 = vrcp.f32 %v6787_v32 }
0x114d   :  { %9677 = vrcp.f32 %v6791_v53 }
0x114e   :  { %9679 = vrcp.f32 %v6789_v38  ;;  %v9674_v6 = vpop.eup %9673 }
0x114f   :  { %v6793_v27 = vpop.xlane.xlu1 %6792  ;;  %v6824_v58 = vmul.f32 %v9674_v6, %v12953_v5 }
0x1150   :  { %8352 = vmatmul.mubr.bf16.vlgmr.msra.gmra.mrb[212].mxu1 %v6833_v52  ;;  %9681 = vrcp.f32 %v6793_v27 }
0x1151   :  { %8355 = vmatprep.mubr.bf16.mxu1 %v6834_v0 }
0x1153   :  { %v6795_v39 = vpop.xlane.xlu1 %6794  ;;  %v6797_v21 = vpop.xlane.xlu0 %6796 }
0x1154   :  { %9683 = vrcp.f32 %v6795_v39  ;;  %v8887_v39 = vld [vmem:[%s13188_s7 + $0x20] sm:$0xff]  }
0x1155   :  { %9685 = vrcp.f32 %v6797_v21  ;;  %v8888_v21 = vld [vmem:[%s13188_s7 + $0x28] sm:$0xff]   ;;  %8367 = vmatprep.subr.bf16.mxu0 %v8887_v39 }
0x1156   :  { %v9676_v34 = vpop.eup %9675  ;;  %8368 = vmatpush3.bf16.msra.mxu0 %v8887_v39 }
0x1157   :  { %v9678_v4 = vpop.eup %9677  ;;  %v6799_v12 = vpop.xlane.xlu1 %6798  ;;  %v6825_v37 = vmul.f32 %v9676_v34, %v12960_v42  ;;  %8369 = vmatprep.subr.bf16.mxu0 %v8888_v21 }
0x1158   :  { %9687 = vrcp.f32 %v6799_v12  ;;  %8356 = vmatmul.mubr.bf16.gmra.mrb[216].mxu1 %v6835_v19  ;;  %v9680_v10 = vpop.eup %9679  ;;  %v6827_v15 = vmul.f32 %v9678_v4, %v12957_v16 }
0x1159   :  { %v6836_v63 = vpack.c.bf16 %v6825_v37, %v6824_v58  ;;  %v6826_v25 = vmul.f32 %v9680_v10, %v12948_v13 }
0x115a   :  { %v9682_v29 = vpop.eup %9681  ;;  %8370 = vmatpush3.bf16.msra.mxu0 %v8888_v21 }
0x115b   :  { %8359 = vmatprep.mubr.bf16.mxu1 %v6836_v63  ;;  %v6837_v8 = vpack.c.bf16 %v6827_v15, %v6826_v25  ;;  %v6828_v46 = vmul.f32 %v9682_v29, %v12963_v33 }
0x115e   :  { %v9684_v36 = vpop.eup %9683 }
0x115f   :  { %v6829_v57 = vmul.f32 %v9684_v36, %v12966_v9  ;;  %v9686_v11 = vpop.eup %9685 }
0x1160   :  { %8360 = vmatmul.mubr.bf16.gmra.mrb[220].mxu1 %v6837_v8  ;;  %v6830_v51 = vmul.f32 %v9686_v11, %v12968_v45 }
0x1161   :  { %v6838_v5 = vpack.c.bf16 %v6829_v57, %v6828_v46 }
0x1162   :  { %v9688_v42 = vpop.eup %9687 }
0x1163   :  { %8363 = vmatprep.mubr.bf16.mxu1 %v6838_v5  ;;  %v6831_v41 = vmul.f32 %v9688_v42, %v13638_v7 }
0x1165   :  { %v6839_v16 = vpack.c.bf16 %v6831_v41, %v6830_v51 }
0x1168   :  { %8364 = vmatmul.mubr.bf16.gmra.mrb[224].mxu1 %v6839_v16 }
0x11a6   :  { %v8281_v55 = vpop.f32.mrb[180].mxu1 }
0x11a7   :  { %v6024_v38 = vpop.f32.mrb[181].mxu1 }
0x11a8   :  { %v8282_v13 = vpop.f32.mrb[182].mxu1 }
0x11a9   :  { %v8749_v61 = vpack.i.bf16 %v8282_v13, %v8281_v55  ;;  %v6027_v62 = vpop.f32.mrb[183].mxu1 }
0x11aa   :  { %v8754_v2 = vpack.i.bf16 %v6027_v62, %v6024_v38 }
0x11ab   :  { %8750 = vrot.lane.b32.xlu1 %v8749_v61, %s9722_s28 }
0x11ae   :  { %v8285_v33 = vpop.f32.mrb[184].mxu1 }
0x11af   :  { %8755 = vrot.lane.b32.xlu1 %v8754_v2, %s9722_s28  ;;  %v6040_v9 = vpop.f32.mrb[185].mxu1 }
0x11b0   :  { %v8286_v14 = vpop.f32.mrb[186].mxu1 }
0x11b1   :  { %v8759_v59 = vpack.i.bf16 %v8286_v14, %v8285_v33  ;;  %v6043_v18 = vpop.f32.mrb[187].mxu1 }
0x11b2   :  { %v8764_v45 = vpack.i.bf16 %v6043_v18, %v6040_v9 }
0x11b3   :  { %8760 = vrot.lane.b32.xlu1 %v8759_v59, %s9722_s28 }
0x11b7   :  { %8765 = vrot.lane.b32.xlu1 %v8764_v45, %s9722_s28 }
0x11be   :  { %v8289_v3 = vpop.f32.mrb[188].mxu1 }
0x11bf   :  { %v6056_v17 = vpop.f32.mrb[189].mxu1 }
0x11c0   :  { %v8290_v28 = vpop.f32.mrb[190].mxu1 }
0x11c1   :  { %v8804_v22 = vpack.i.bf16 %v8290_v28, %v8289_v3  ;;  %v6059_v24 = vpop.f32.mrb[191].mxu1 }
0x11c2   :  { %v8769_v30 = vpack.i.bf16 %v6059_v24, %v6056_v17 }
0x11c4   :  { %8770 = vrot.lane.b32.xlu0 %v8769_v30, %s9722_s28 }
0x11ca   :  { %v13047_v43 = vpop.f32.mrb[192].mxu1 }
0x11cb   :  { %v6072_v53 = vpop.f32.mrb[193].mxu1 }
0x11cc   :  { %v13049_v20 = vpop.f32.mrb[194].mxu1 }
0x11cd   :  { %v8834_v56 = vpack.i.bf16 %v13049_v20, %v13047_v43  ;;  %v6075_v44 = vpop.f32.mrb[195].mxu1 }
0x11ce   :  { %v8829_v40 = vpack.i.bf16 %v6075_v44, %v6072_v53 }
0x11e6   :  { %v8317_v54 = vpop.f32.mrb[196].mxu1 }
0x11e7   :  { %v6449_v32 = vpop.f32.mrb[197].mxu1 }
0x11e8   :  { %v8318_v1 = vpop.f32.mrb[198].mxu1 }
0x11e9   :  { %v8774_v60 = vpack.i.bf16 %v8318_v1, %v8317_v54  ;;  %v6452_v50 = vpop.f32.mrb[199].mxu1  ;;  %v13639_v1 = vld [vmem:[#allocation46_spill] sm:$0xff] }
0x11ea   :  { %v8779_v52 = vpack.i.bf16 %v6452_v50, %v6449_v32  ;;  %v13640_v50 = vld [vmem:[#allocation44_spill] sm:$0xff] }
0x11eb   :  { %8775 = vrot.lane.b32.xlu0 %v8774_v60, %s9723_s15 }
0x11ec   :  { %8780 = vrot.lane.b32.xlu1 %v8779_v52, %s9723_s15 }
0x11ee   :  { %v8321_v23 = vpop.f32.mrb[200].mxu1 }
0x11ef   :  { %v6465_v27 = vpop.f32.mrb[201].mxu1 }
0x11f0   :  { %v8322_v0 = vpop.f32.mrb[202].mxu1 }
0x11f1   :  { %v8784_v26 = vpack.i.bf16 %v8322_v0, %v8321_v23  ;;  %v6468_v31 = vpop.f32.mrb[203].mxu1 }
0x11f2   :  { %v8789_v6 = vpack.i.bf16 %v6468_v31, %v6465_v27 }
0x11f3   :  { %8785 = vrot.lane.b32.xlu1 %v8784_v26, %s9723_s15 }
0x11f6   :  { %v8325_v35 = vpop.f32.mrb[204].mxu1 }
0x11f7   :  { %8790 = vrot.lane.b32.xlu1 %v8789_v6, %s9723_s15  ;;  %v6481_v34 = vpop.f32.mrb[205].mxu1 }
0x11f8   :  { %v8326_v19 = vpop.f32.mrb[206].mxu1 }
0x11f9   :  { %v8814_v4 = vpack.i.bf16 %v8326_v19, %v8325_v35  ;;  %v6484_v12 = vpop.f32.mrb[207].mxu1 }
0x11fa   :  { %v8809_v58 = vpack.i.bf16 %v6484_v12, %v6481_v34 }
0x11fc   :  { %8810 = vrot.lane.b32.xlu0 %v8809_v58, %s9723_s15  ;;  %v13641_v58 = vld [vmem:[#allocation45_spill] sm:$0xff] }
0x121b   :  { %v8329_v37 = vpop.f32.mrb[208].mxu1 }
0x121c   :  { %v6497_v10 = vpop.f32.mrb[209].mxu1 }
0x121d   :  { %v8330_v63 = vpop.f32.mrb[210].mxu1  ;;  %v8751_v17 = vpop.permute.xlu1 %8750 }
0x121e   :  { %v8854_v15 = vpack.i.bf16 %v8330_v63, %v8329_v37  ;;  %v6500_v29 = vpop.f32.mrb[211].mxu1  ;;  %v8752_v44 = vunpack.i.l.bf16 %v8751_v17 }
0x121f   :  { %v8849_v25 = vpack.i.bf16 %v6500_v29, %v6497_v10  ;;  %v13642_v10 = vld [vmem:[#allocation78_spill] sm:$0xff] }
0x1220   :  { %v7131_v52 = vsel %vm978_vm1, %v13640_v50, %v8752_v44 }
0x1221   :  { %v8756_v28 = vpop.permute.xlu1 %8755 }
0x1222   :  { %v8758_v27 = vunpack.i.h.bf16 %v8756_v28  ;;  %v8757_v0 = vunpack.i.l.bf16 %v8756_v28 }
0x1223   :  { %v8353_v36 = vpop.f32.mrb[212].mxu1 }
0x1224   :  { %v6874_v8 = vpop.f32.mrb[213].mxu1  ;;  %v7130_v37 = vsel %vm978_vm1, %v13641_v58, %v8758_v27  ;;  %v7129_v63 = vsel %vm978_vm1, %v13642_v10, %v8757_v0 }
0x1225   :  { %v8354_v46 = vpop.f32.mrb[214].mxu1 }
0x1226   :  { %v8794_v57 = vpack.i.bf16 %v8354_v46, %v8353_v36  ;;  %v6877_v11 = vpop.f32.mrb[215].mxu1 }
0x1227   :  { %v8799_v5 = vpack.i.bf16 %v6877_v11, %v6874_v8 }
0x1228   :  { %8795 = vrot.lane.b32.xlu1 %v8794_v57, %s9724_s16 }
0x122b   :  { %v8357_v42 = vpop.f32.mrb[216].mxu1 }
0x122c   :  { %8800 = vrot.lane.b32.xlu1 %v8799_v5, %s9724_s16  ;;  %v6890_v51 = vpop.f32.mrb[217].mxu1 }
0x122d   :  { %v8358_v7 = vpop.f32.mrb[218].mxu1 }
0x122e   :  { %v8819_v41 = vpack.i.bf16 %v8358_v7, %v8357_v42  ;;  %v6893_v16 = vpop.f32.mrb[219].mxu1 }
0x122f   :  { %v8824_v55 = vpack.i.bf16 %v6893_v16, %v6890_v51 }
0x1230   :  { %8805 = vrot.lane.b32.xlu1 %v8804_v22, %s9722_s28  ;;  %v13081_v22 = vpop.permute.xlu1 %8760 }
0x1231   :  { %8825 = vrot.lane.b32.xlu0 %v8824_v55, %s9724_s16  ;;  %v13643_v55 = vld [vmem:[#allocation43_spill] sm:$0xff] }
0x1233   :  { %v8361_v38 = vpop.f32.mrb[220].mxu1 }
0x1234   :  { %8815 = vrot.lane.b32.xlu1 %v8814_v4, %s9723_s15  ;;  %v6906_v13 = vpop.f32.mrb[221].mxu1  ;;  %v8766_v24 = vpop.permute.xlu1 %8765 }
0x1235   :  { %8830 = vrot.lane.b32.xlu0 %v8829_v40, %s9722_s28  ;;  %v8362_v61 = vpop.f32.mrb[222].mxu1  ;;  %v8768_v36 = vunpack.i.h.bf16 %v8766_v24  ;;  %v8767_v8 = vunpack.i.l.bf16 %v8766_v24 }
0x1236   :  { %v8839_v62 = vpack.i.bf16 %v8362_v61, %v8361_v38  ;;  %v6909_v2 = vpop.f32.mrb[223].mxu1  ;;  %v13085_v53 = vpop.permute.xlu0 %8770 }
0x1237   :  { %v8844_v33 = vpack.i.bf16 %v6909_v2, %v6906_v13  ;;  %v7134_v38 = vsel %vm978_vm1, %v13643_v55, %v8768_v36  ;;  %v13644_v13 = vld [vmem:[#allocation50_spill] sm:$0xff]  ;;  %v8772_v28 = vunpack.i.l.bf16 %v13085_v53 }
0x1238   :  { %8820 = vrot.lane.b32.xlu1 %v8819_v41, %s9724_s16  ;;  %v7133_v61 = vsel %vm978_vm1, %v13644_v13, %v8767_v8 }
0x1239   :  { %8845 = vrot.lane.b32.xlu0 %v8844_v33, %s9724_s16  ;;  %v8763_v33 = vunpack.i.h.bf16 %v13081_v22 }
0x123b   :  { %v8365_v9 = vpop.f32.mrb[224].mxu1 }
0x123c   :  { %8835 = vrot.lane.b32.xlu1 %v8834_v56, %s9722_s28  ;;  %v6922_v14 = vpop.f32.mrb[225].mxu1  ;;  %v8753_v56 = vunpack.i.h.bf16 %v8751_v17 }
0x123d   :  { %8850 = vrot.lane.b32.xlu0 %v8849_v25, %s9723_s15  ;;  %v8366_v59 = vpop.f32.mrb[226].mxu1 }
0x123e   :  { %v8864_v18 = vpack.i.bf16 %v8366_v59, %v8365_v9  ;;  %v6925_v45 = vpop.f32.mrb[227].mxu1  ;;  %v7132_v60 = vsel %vm978_vm1, %v13639_v1, %v8753_v56  ;;  %v8762_v59 = vunpack.i.l.bf16 %v13081_v22  ;;  %v13645_v22 = vld [vmem:[#allocation48_spill] sm:$0xff] }
0x123f   :  { %v8859_v3 = vpack.i.bf16 %v6925_v45, %v6922_v14 }
0x1240   :  { %8840 = vrot.lane.b32.xlu1 %v8839_v62, %s9724_s16 }
0x1241   :  { %8860 = vrot.lane.b32.xlu0 %v8859_v3, %s9724_s16 }
0x1244   :  { %8855 = vrot.lane.b32.xlu1 %v8854_v15, %s9723_s15 }
0x1248   :  { %8865 = vrot.lane.b32.xlu1 %v8864_v18, %s9724_s16  ;;  %v8773_v18 = vunpack.i.h.bf16 %v13085_v53 }
0x125d   :  { %v8776_v20 = vpop.permute.xlu0 %8775 }
0x125e   :  { %v8781_v30 = vpop.permute.xlu1 %8780  ;;  %v8778_v54 = vunpack.i.h.bf16 %v8776_v20  ;;  %v8777_v32 = vunpack.i.l.bf16 %v8776_v20 }
0x125f   :  { %v8783_v6 = vunpack.i.h.bf16 %v8781_v30  ;;  %v8782_v35 = vunpack.i.l.bf16 %v8781_v30 }
0x1260   :  { %v7148_v39 = vsel %vm2876_vm6, %v7132_v60, %v8778_v54  ;;  %v7147_v21 = vsel %vm2876_vm6, %v7131_v52, %v8777_v32  ;;  %v7136_v54 = vsel %vm978_vm1, %v13645_v22, %v8763_v33  ;;  %v13646_v32 = vld [vmem:[#allocation51_spill] sm:$0xff]  ;;  %v13647_v60 = vld [vmem:[#allocation64_spill] sm:$0xff]  ;;  %v13651_v22 = vld [vmem:[#allocation61_spill] sm:$0xff] }
0x1261   :  { %v7146_v46 = vsel %vm2876_vm6, %v7130_v37, %v8783_v6  ;;  %v7145_v57 = vsel %vm2876_vm6, %v7129_v63, %v8782_v35  ;;  %v7135_v1 = vsel %vm978_vm1, %v13646_v32, %v8762_v59  ;;  %v7138_v50 = vsel %vm978_vm1, %v13647_v60, %v8773_v18  ;;  %v13648_v52 = vld [vmem:[#allocation47_spill] sm:$0xff] }
0x1265   :  { %v13083_v43 = vpop.permute.xlu1 %8785 }
0x1266   :  { %v8788_v24 = vunpack.i.h.bf16 %v13083_v43  ;;  %v8787_v56 = vunpack.i.l.bf16 %v13083_v43 }
0x1268   :  { %v7152_v27 = vsel %vm2876_vm6, %v7136_v54, %v8788_v24 }
0x1269   :  { %v8791_v40 = vpop.permute.xlu1 %8790 }
0x126a   :  { %v8793_v11 = vunpack.i.h.bf16 %v8791_v40  ;;  %v8792_v5 = vunpack.i.l.bf16 %v8791_v40 }
0x126c   :  { %v7150_v9 = vsel %vm2876_vm6, %v7134_v38, %v8793_v11  ;;  %v7149_v14 = vsel %vm2876_vm6, %v7133_v61, %v8792_v5  ;;  %v13649_v5 = vld [vmem:[#allocation30_spill] sm:$0xff] }
0x126e   :  { %v8811_v15 = vpop.permute.xlu0 %8810 }
0x126f   :  { %v8812_v44 = vunpack.i.l.bf16 %v8811_v15  ;;  %v8813_v40 = vunpack.i.h.bf16 %v8811_v15 }
0x1271   :  { %v7154_v35 = vsel %vm2876_vm6, %v7138_v50, %v8813_v40 }
0x129a   :  { %v8796_v23 = vpop.permute.xlu1 %8795 }
0x129b   :  { %v8798_v26 = vunpack.i.h.bf16 %v8796_v23  ;;  %v8797_v31 = vunpack.i.l.bf16 %v8796_v23  ;;  %v7137_v23 = vsel %vm978_vm1, %v13648_v52, %v8772_v28 }
0x129d   :  { %v7163_v34 = vsel %vm2893_vm7, %v7147_v21, %v8797_v31  ;;  %v7164_v19 = vsel %vm2893_vm7, %v7148_v39, %v8798_v26  ;;  %v7151_v31 = vsel %vm2876_vm6, %v7135_v1, %v8787_v56  ;;  %v7153_v39 = vsel %vm2876_vm6, %v7137_v23, %v8812_v44 }
0x129e   :  { %v7178_v4 = vpack.c.bf16 %v7164_v19, %v7163_v34  ;;  %v8801_v12 = vpop.permute.xlu1 %8800 }
0x129f   :  { %v8803_v29 = vunpack.i.h.bf16 %v8801_v12  ;;  %v8802_v25 = vunpack.i.l.bf16 %v8801_v12 }
0x12a1   :  { %v7162_v42 = vsel %vm2893_vm7, %v7146_v46, %v8803_v29  ;;  %v7161_v51 = vsel %vm2893_vm7, %v7145_v57, %v8802_v25 }
0x12a2   :  { %v7177_v7 = vpack.c.bf16 %v7162_v42, %v7161_v51  ;;  %v8806_v41 = vpop.permute.xlu1 %8805  ;;  %v13650_v51 = vld [vmem:[#allocation52_spill] sm:$0xff] }
0x12a3   :  { %v8826_v16 = vpop.permute.xlu0 %8825  ;;  %v8808_v34 = vunpack.i.h.bf16 %v8806_v41  ;;  %v8807_v12 = vunpack.i.l.bf16 %v8806_v41 }
0x12a4   :  { %v8828_v62 = vunpack.i.h.bf16 %v8826_v16  ;;  %v8827_v2 = vunpack.i.l.bf16 %v8826_v16  ;;  %8371 = vmatprep.mubr.msk.bf16.mxu0 %vm50_vm0, %v7177_v7 }
0x12a5   :  { %8372 = vmatmul.mubr.msk.bf16.vlgmr.msra.gmra.mrb[84].mxu0 %vm50_vm0, %v7178_v4  ;;  %v7140_v42 = vsel %vm978_vm1, %v13649_v5, %v8808_v34  ;;  %v7139_v7 = vsel %vm978_vm1, %v13650_v51, %v8807_v12 }
0x12a6   :  { %v7166_v45 = vsel %vm2893_vm7, %v7150_v9, %v8828_v62  ;;  %v7165_v3 = vsel %vm2893_vm7, %v7149_v14, %v8827_v2  ;;  %v8816_v17 = vpop.permute.xlu1 %8815 }
0x12a7   :  { %v7179_v30 = vpack.c.bf16 %v7166_v45, %v7165_v3  ;;  %v8831_v20 = vpop.permute.xlu0 %8830  ;;  %v8818_v15 = vunpack.i.h.bf16 %v8816_v17  ;;  %v8817_v29 = vunpack.i.l.bf16 %v8816_v17 }
0x12a8   :  { %v8833_v8 = vunpack.i.h.bf16 %v8831_v20  ;;  %v8832_v46 = vunpack.i.l.bf16 %v8831_v20 }
0x12a9   :  { %8375 = vmatprep.mubr.msk.bf16.mxu0 %vm50_vm0, %v7179_v30  ;;  %v7155_v16 = vsel %vm2876_vm6, %v7139_v7, %v8817_v29  ;;  %v7156_v55 = vsel %vm2876_vm6, %v7140_v42, %v8818_v15 }
0x12aa   :  { %v8821_v53 = vpop.permute.xlu1 %8820  ;;  %v7142_v62 = vsel %vm978_vm1, %v12985_v47, %v8833_v8  ;;  %v7141_v2 = vsel %vm978_vm1, %v12981_v48, %v8832_v46 }
0x12ab   :  { %v8823_v43 = vunpack.i.h.bf16 %v8821_v53  ;;  %v8822_v0 = vunpack.i.l.bf16 %v8821_v53  ;;  %v8846_v26 = vpop.permute.xlu0 %8845 }
0x12ac   :  { %v8848_v21 = vunpack.i.h.bf16 %v8846_v26  ;;  %v8847_v6 = vunpack.i.l.bf16 %v8846_v26 }
0x12ad   :  { %v7168_v19 = vsel %vm2893_vm7, %v7152_v27, %v8823_v43  ;;  %v7167_v4 = vsel %vm2893_vm7, %v7151_v31, %v8822_v0 }
0x12ae   :  { %v7180_v58 = vpack.c.bf16 %v7168_v19, %v7167_v4  ;;  %v7169_v37 = vsel %vm2893_vm7, %v7153_v39, %v8847_v6  ;;  %v7170_v10 = vsel %vm2893_vm7, %v7154_v35, %v8848_v21  ;;  %v8836_v63 = vpop.permute.xlu1 %8835 }
0x12af   :  { %v7181_v25 = vpack.c.bf16 %v7170_v10, %v7169_v37  ;;  %v8851_v36 = vpop.permute.xlu0 %8850  ;;  %v8838_v47 = vunpack.i.h.bf16 %v8836_v63  ;;  %v8837_v30 = vunpack.i.l.bf16 %v8836_v63 }
0x12b0   :  { %8376 = vmatmul.mubr.msk.bf16.gmra.mrb[88].mxu0 %vm50_vm0, %v7180_v58  ;;  %v8853_v57 = vunpack.i.h.bf16 %v8851_v36  ;;  %v8852_v11 = vunpack.i.l.bf16 %v8851_v36 }
0x12b1   :  { %8379 = vmatprep.mubr.msk.bf16.mxu0 %vm50_vm0, %v7181_v25  ;;  %v7144_v40 = vsel %vm978_vm1, %v12983_v49, %v8838_v47  ;;  %v7143_v54 = vsel %vm978_vm1, %v13651_v22, %v8837_v30  ;;  %v7424_v49 = vld [vmem:[%s13189_s8] ss:$0 sm:$0xff]  ;;  %s9729_s8 = smov [#allocation3]  }
0x12b2   :  { %v8841_v41 = vpop.permute.xlu1 %8840  ;;  %v7157_v14 = vsel %vm2876_vm6, %v7141_v2, %v8852_v11  ;;  %v7158_v59 = vsel %vm2876_vm6, %v7142_v62, %v8853_v57  ;;  %s7376_s16 = sshll.u32 %s9729_s8, 4  ;;  %s7377_s16 = int_to_ptr.vmem [resolvable:$true] %s7376_s16 }
0x12b3   :  { %v8843_v38 = vunpack.i.h.bf16 %v8841_v41  ;;  %v8842_v13 = vunpack.i.l.bf16 %v8841_v41  ;;  %v8861_v61 = vpop.permute.xlu0 %8860  ;;  %s9689_s22 = scalar_lea.vmem %s7377_s16, 2048  ;;  %p9694_p1 = scmp.lt.s32.totalorder %s7377_s16, %s7377_s16 }
0x12b4   :  { %v8863_v33 = vunpack.i.h.bf16 %v8861_v61  ;;  %v8862_v9 = vunpack.i.l.bf16 %v8861_v61  ;;  %p9690_p0 = scmp.ne.s32.totalorder %s7377_s16, %s9689_s22  ;;  %p9695_p2 = scmp.lt.s32.totalorder %s9689_s22, %s9689_s22 }
0x12b5   :  { %v7172_v18 = vsel %vm2893_vm7, %v7156_v55, %v8843_v38  ;;  %v7171_v45 = vsel %vm2893_vm7, %v7155_v16, %v8842_v13 }
0x12b6   :  { %v7182_v3 = vpack.c.bf16 %v7172_v18, %v7171_v45  ;;  %v7173_v17 = vsel %vm2893_vm7, %v7157_v14, %v8862_v9  ;;  %v7174_v28 = vsel %vm2893_vm7, %v7158_v59, %v8863_v33  ;;  %v8856_v24 = vpop.permute.xlu1 %8855  ;;  %p9696_p3 = por %p9695_p2, %p9694_p1 }
0x12b7   :  { %v7183_v20 = vpack.c.bf16 %v7174_v28, %v7173_v17  ;;  %v8858_v48 = vunpack.i.h.bf16 %v8856_v24  ;;  %v8857_v56 = vunpack.i.l.bf16 %v8856_v24 }
0x12b8   :  { %8380 = vmatmul.mubr.msk.bf16.gmra.mrb[92].mxu0 %vm50_vm0, %v7182_v3  ;;  %p9697_p4 = pnand %p9696_p3, %p9690_p0 }
0x12b9   :  { %8383 = vmatprep.mubr.msk.bf16.mxu0 %vm50_vm0, %v7183_v20  ;;  %v7160_v60 = vsel %vm2876_vm6, %v7144_v40, %v8858_v48  ;;  %v7159_v50 = vsel %vm2876_vm6, %v7143_v54, %v8857_v56 }
0x12ba   :  { %v8866_v44 = vpop.permute.xlu1 %8865 }
0x12bb   :  { %v8868_v32 = vunpack.i.h.bf16 %v8866_v44  ;;  %v8867_v1 = vunpack.i.l.bf16 %v8866_v44 }
0x12bd   :  { %v7176_v53 = vsel %vm2893_vm7, %v7160_v60, %v8868_v32  ;;  %v7175_v52 = vsel %vm2893_vm7, %v7159_v50, %v8867_v1 }
0x12be   :  { %v7184_v23 = vpack.c.bf16 %v7176_v53, %v7175_v52 }
0x12c0   :  { %8384 = vmatmul.mubr.msk.bf16.gmra.mrb[96].mxu0 %vm50_vm0, %v7184_v23 }
0x1378   :  { %v8373_v27 = vpop.f32.mrb[84].mxu0 }
0x1379   :  { %v8391_v43 = vadd.f32 %v8373_v27, %v7424_v49  ;;  %v7276_v0 = vpop.f32.mrb[85].mxu0 }
0x137a   :  { %v8394_v26 = vadd.f32 %v7424_v49, %v7276_v0  ;;  %v8374_v31 = vpop.f32.mrb[86].mxu0 }
0x137b   :  { %7357 = vst [vmem:[#allocation3 + $0x10] sm:$0xff] %v8391_v43  ;;  %v8397_v39 = vadd.f32 %v8374_v31, %v7424_v49  ;;  %v7279_v21 = vpop.f32.mrb[87].mxu0 }
0x137c   :  { %7355 = vst [vmem:[#allocation3] sm:$0xff] %v8394_v26  ;;  %v8400_v6 = vadd.f32 %v7424_v49, %v7279_v21 }
0x137d   :  { %7358 = vst [vmem:[#allocation3 + $0x18] sm:$0xff] %v8397_v39 }
0x137e   :  { %7356 = vst [vmem:[#allocation3 + $0x8] sm:$0xff] %v8400_v6 }
0x1383   :  { %v8377_v35 = vpop.f32.mrb[88].mxu0 }
0x1384   :  { %v8403_v34 = vadd.f32 %v8377_v35, %v7424_v49  ;;  %v7292_v19 = vpop.f32.mrb[89].mxu0 }
0x1385   :  { %v8406_v4 = vadd.f32 %v7424_v49, %v7292_v19  ;;  %v8378_v12 = vpop.f32.mrb[90].mxu0 }
0x1386   :  { %7361 = vst [vmem:[#allocation3 + $0x30] sm:$0xff] %v8403_v34  ;;  %v8409_v58 = vadd.f32 %v8378_v12, %v7424_v49  ;;  %v7295_v37 = vpop.f32.mrb[91].mxu0 }
0x1387   :  { %7359 = vst [vmem:[#allocation3 + $0x20] sm:$0xff] %v8406_v4  ;;  %v8412_v10 = vadd.f32 %v7424_v49, %v7295_v37 }
0x1388   :  { %7362 = vst [vmem:[#allocation3 + $0x38] sm:$0xff] %v8409_v58 }
0x1389   :  { %7360 = vst [vmem:[#allocation3 + $0x28] sm:$0xff] %v8412_v10 }
0x138b   :  { %v8381_v63 = vpop.f32.mrb[92].mxu0 }
0x138c   :  { %v8415_v15 = vadd.f32 %v8381_v63, %v7424_v49  ;;  %v7308_v29 = vpop.f32.mrb[93].mxu0 }
0x138d   :  { %v8418_v25 = vadd.f32 %v7424_v49, %v7308_v29  ;;  %v8382_v36 = vpop.f32.mrb[94].mxu0 }
0x138e   :  { %7365 = vst [vmem:[#allocation3 + $0x50] sm:$0xff] %v8415_v15  ;;  %v8421_v8 = vadd.f32 %v8382_v36, %v7424_v49  ;;  %v7311_v46 = vpop.f32.mrb[95].mxu0 }
0x138f   :  { %7363 = vst [vmem:[#allocation3 + $0x40] sm:$0xff] %v8418_v25  ;;  %v8424_v57 = vadd.f32 %v7424_v49, %v7311_v46 }
0x1390   :  { %7366 = vst [vmem:[#allocation3 + $0x58] sm:$0xff] %v8421_v8 }
0x1391   :  { %7364 = vst [vmem:[#allocation3 + $0x48] sm:$0xff] %v8424_v57 }
0x1393   :  { %v8385_v11 = vpop.f32.mrb[96].mxu0 }
0x1394   :  { %v8427_v5 = vadd.f32 %v8385_v11, %v7424_v49  ;;  %v7324_v42 = vpop.f32.mrb[97].mxu0 }
0x1395   :  { %v8430_v51 = vadd.f32 %v7424_v49, %v7324_v42  ;;  %v8386_v7 = vpop.f32.mrb[98].mxu0 }
0x1396   :  { %7369 = vst [vmem:[#allocation3 + $0x70] sm:$0xff] %v8427_v5  ;;  %v8433_v41 = vadd.f32 %v8386_v7, %v7424_v49  ;;  %v7327_v16 = vpop.f32.mrb[99].mxu0 }
0x1397   :  { %7367 = vst [vmem:[#allocation3 + $0x60] sm:$0xff] %v8430_v51  ;;  %v8436_v55 = vadd.f32 %v7424_v49, %v7327_v16 }
0x1398   :  { %7370 = vst [vmem:[#allocation3 + $0x78] sm:$0xff] %v8433_v41 }
0x1399   :  { %7368 = vst [vmem:[#allocation3 + $0x68] sm:$0xff] %v8436_v55 }
0x139a   :  { %9700 = shalt.err (!%p9697_p4)
}
0x139b   :  { %s9701_s3 = scalar_lea.hbm %s13190_s9, 2048 }
0x139c   :  { %p9702_p5 = scmp.ne.s32.totalorder %s13190_s9, %s9701_s3  ;;  %p9705_p6 = scmp.lt.u32.totalorder %s9701_s3, %s13190_s9 }
0x139e   :  { %p9707_p7 = pnand %p9705_p6, %p9702_p5 }
0x13a0   :  { %9710 = shalt.err (!%p9707_p7)
}
0x13a1   :  { %s9730_s2 = smov 128  }
0x13a2   :  { %7382 = dma.vmem_to_hbm [thread:$0]  %s7377_s16, 2048, %s13190_s9, [#allocation4], %s9730_s2, %s9730_s2, %s9722_s28  }
0x13a3   :  { %9711 = dma.done.wait [#allocation4], 2048  }
0x13a4   :  { %9712 = vsyncadd [#allocation4], 4294965248 }
0x13a5   :  { %7386 = vsyncpa [#allocation4], 1 }

</bundles_post_ra>
